<compile_context>
chip_gen: v7x
topology: tpu7x:2x2x1
jax: 0.10.0
libtpu: 0.0.40
codegen_flags: <defaults>
</compile_context>

<pallas_src>
import functools

import jax
import jax.numpy as jnp
from jax import lax
from jax.experimental import pallas as pl
from jax.experimental.pallas import tpu as pltpu


# ----------------------------------------------------------------------------
# Fused kernel: layer-1 bi-LSTM  ->  layer-2 bi-LSTM  ->  fc head
# ----------------------------------------------------------------------------
def _lstm_cell(gates, c, H):
    """PyTorch gate order (i, f, g, o); gates is (B, 4H) f32."""
    i = jax.nn.sigmoid(gates[:, 0:H])
    f = jax.nn.sigmoid(gates[:, H:2 * H])
    g = jnp.tanh(gates[:, 2 * H:3 * H])
    o = jax.nn.sigmoid(gates[:, 3 * H:4 * H])
    c_new = f * c + i * g
    h_new = o * jnp.tanh(c_new)
    return h_new, c_new


def _fused_encoder_kernel(x_ref, w_ih1_ref, w_hh1_ref, b1_ref,
                          w_ih2f_ref, b2f_ref, w_ih2b_ref, b2b_ref, w_hh2f_ref,
                          w_fc_ref, b_fc_ref,
                          out_ref,
                          gx1f_sc, gx1b_sc, gx2_sc, h1f_sc, h1b_sc,
                          *, hidden, seq_len, unroll):
    """
    x_ref:      (T, B, D)        w_ih1_ref: (D, 8H)   [fwd 4H | bwd 4H]
    w_hh1_ref:  (2H, 8H)         block-diagonal: [0:H,0:4H]=W_hh_f^T, [H:2H,4H:8H]=W_hh_b^T
    b1_ref:     (1, 8H)          b_ih + b_hh, both directions concatenated
    w_ih2f_ref: (2H, 4H), b2f_ref: (1, 4H)     layer-2 forward input proj
    w_ih2b_ref: (2H, 4H), b2b_ref: (1, 4H)     layer-2 backward input proj (1 step only)
    w_hh2f_ref: (H, 4H)                        layer-2 forward recurrent weights
    w_fc_ref:   (2H, C), b_fc_ref: (1, C)
    out_ref:    (B, C)
    scratches:  gx1f/gx1b/gx2 (T, B, 4H) f32, h1f/h1b (T, B, H) compute dtype
    """
    H = hidden
    T = seq_len
    B = x_ref.shape[1]
    D = x_ref.shape[2]

    # ===================== layer 1: hoisted input projection =====================
    # One (T*B, D) @ (D, 8H) MXU issue + one bias broadcast covers BOTH directions.
    x2d = x_ref[...].reshape(T * B, D)
    gx1 = (jnp.dot(x2d, w_ih1_ref[...], preferred_element_type=jnp.float32)
           + b1_ref[...]).reshape(T, B, 8 * H)
    gx1f_sc[...] = gx1[:, :, 0:4 * H]
    gx1b_sc[...] = gx1[:, :, 4 * H:8 * H]

    w_hh1 = w_hh1_ref[...]                      # (2H, 8H) block-diagonal

    # ---- layer-1 recurrence: both directions interleaved in one loop body ----
    def step1(s, carry):
        h_f, c_f, h_b, c_b = carry
        tb = T - 1 - s                          # backward direction's time index
        h_cat = jnp.concatenate([h_f, h_b], axis=-1).astype(w_hh1.dtype)   # (B, 2H)
        rec = jnp.dot(h_cat, w_hh1, preferred_element_type=jnp.float32)    # (B, 8H), K=2H
        h_f, c_f = _lstm_cell(gx1f_sc[s] + rec[:, 0:4 * H], c_f, H)
        h_b, c_b = _lstm_cell(gx1b_sc[tb] + rec[:, 4 * H:8 * H], c_b, H)
        h1f_sc[s] = h_f.astype(h1f_sc.dtype)
        h1b_sc[tb] = h_b.astype(h1b_sc.dtype)
        return h_f, c_f, h_b, c_b

    z = jnp.zeros((B, H), jnp.float32)
    lax.fori_loop(0, T, step1, (z, z, z, z), unroll=unroll)

    # ===================== layer 2 =====================
    # Input is [h1_fwd | h1_bwd] (T, B, 2H), read straight from VMEM scratch.
    # Only out[:, -1, :] feeds fc, so: forward = full recurrence, backward = ONE step.
    h1cat2d = jnp.concatenate([h1f_sc[...], h1b_sc[...]], axis=-1).reshape(T * B, 2 * H)
    gx2_sc[...] = (jnp.dot(h1cat2d, w_ih2f_ref[...],
                           preferred_element_type=jnp.float32)
                   + b2f_ref[...]).reshape(T, B, 4 * H)

    w_hh2f = w_hh2f_ref[...]

    def step2(s, carry):
        h, c = carry
        rec = jnp.dot(h.astype(w_hh2f.dtype), w_hh2f, preferred_element_type=jnp.float32)
        return _lstm_cell(gx2_sc[s] + rec, c, H)

    h_f2, _ = lax.fori_loop(0, T, step2, (z, z), unroll=unroll)

    # Backward direction at original t = T-1 from zero state:
    # h0 = 0 -> h @ W_hh vanishes; c0 = 0 -> forget-gate term vanishes.
    x_last = jnp.concatenate([h1f_sc[T - 1], h1b_sc[T - 1]], axis=-1)       # (B, 2H)
    gb = (jnp.dot(x_last, w_ih2b_ref[...], preferred_element_type=jnp.float32)
          + b2b_ref[...])
    i_b = jax.nn.sigmoid(gb[:, 0:H])
    g_b = jnp.tanh(gb[:, 2 * H:3 * H])
    o_b = jax.nn.sigmoid(gb[:, 3 * H:4 * H])
    h_b2 = o_b * jnp.tanh(i_b * g_b)

    # ===================== fused fc head =====================
    h2 = jnp.concatenate([h_f2, h_b2], axis=-1).astype(w_fc_ref.dtype)      # (B, 2H)
    logits = (jnp.dot(h2, w_fc_ref[...], preferred_element_type=jnp.float32)
              + b_fc_ref[...])
    out_ref[...] = logits.astype(out_ref.dtype)


# ----------------------------------------------------------------------------
# Wrapper: one pallas_call for the whole LSTM_Encoder forward
# ----------------------------------------------------------------------------
def lstm_encoder_forward(x_btd, params, *, compute_dtype=jnp.float32):
    """Matches LSTM_Encoder.forward: x (B, T, input_size) -> (B, num_classes).

    Use compute_dtype=jnp.bfloat16 on v6e/v7x (accumulation stays f32); keep f32 on v5e.
    """
    B, T, D = x_btd.shape
    assert B % 8 == 0, "pad batch to a multiple of 8 to keep reshapes layout-free"
    H = params["hidden"]
    C = params["b_fc"].shape[1]

    # Single tiny wrapper-side op: batch-first -> time-major (+ optional cast).
    x_tbd = jnp.transpose(x_btd, (1, 0, 2)).astype(compute_dtype)
    unroll = True if T <= 16 else 4

    kernel = functools.partial(_fused_encoder_kernel, hidden=H, seq_len=T, unroll=unroll)
    return pl.pallas_call(
        kernel,
        grid=(1,),
        in_specs=[
            pl.BlockSpec((T, B, D), lambda i: (0, 0, 0)),          # x
            pl.BlockSpec((D, 8 * H), lambda i: (0, 0)),            # w_ih1  [fwd|bwd]
            pl.BlockSpec((2 * H, 8 * H), lambda i: (0, 0)),        # w_hh1  block-diag
            pl.BlockSpec((1, 8 * H), lambda i: (0, 0)),            # b1
            pl.BlockSpec((2 * H, 4 * H), lambda i: (0, 0)),        # w_ih2 fwd
            pl.BlockSpec((1, 4 * H), lambda i: (0, 0)),            # b2 fwd
            pl.BlockSpec((2 * H, 4 * H), lambda i: (0, 0)),        # w_ih2 bwd
            pl.BlockSpec((1, 4 * H), lambda i: (0, 0)),            # b2 bwd
            pl.BlockSpec((H, 4 * H), lambda i: (0, 0)),            # w_hh2 fwd
            pl.BlockSpec((2 * H, C), lambda i: (0, 0)),            # w_fc
            pl.BlockSpec((1, C), lambda i: (0, 0)),                # b_fc
        ],
        out_specs=pl.BlockSpec((B, C), lambda i: (0, 0)),
        out_shape=jax.ShapeDtypeStruct((B, C), jnp.float32),
        scratch_shapes=[
            pltpu.VMEM((T, B, 4 * H), jnp.float32),    # layer-1 fwd hoisted gates
            pltpu.VMEM((T, B, 4 * H), jnp.float32),    # layer-1 bwd hoisted gates
            pltpu.VMEM((T, B, 4 * H), jnp.float32),    # layer-2 fwd hoisted gates
            pltpu.VMEM((T, B, H), compute_dtype),      # layer-1 fwd hidden states
            pltpu.VMEM((T, B, H), compute_dtype),      # layer-1 bwd hidden states
        ],
        compiler_params=pltpu.CompilerParams(dimension_semantics=("arbitrary",)),
    )(x_tbd, params["w_ih1"], params["w_hh1"], params["b1"],
      params["w_ih2f"], params["b2f"], params["w_ih2b"], params["b2b"],
      params["w_hh2f"], params["w_fc"], params["b_fc"])


# ----------------------------------------------------------------------------
# Parameter init (PyTorch default U(-1/sqrt(H), 1/sqrt(H))) and one-time packing
# ----------------------------------------------------------------------------
def init_raw_params(key, input_size, hidden_size, num_layers, num_classes):
    """Raw PyTorch-layout weights: per layer/direction (W_ih, W_hh, b_ih, b_hh) + fc."""
    H = hidden_size
    bound = 1.0 / float(H) ** 0.5
    layers = []
    for layer in range(num_layers):
        d_in = input_size if layer == 0 else 2 * H
        dirs = []
        for _direction in range(2):
            key, k1, k2, k3, k4 = jax.random.split(key, 5)
            dirs.append({
                "w_ih": jax.random.uniform(k1, (4 * H, d_in), jnp.float32, -bound, bound),
                "w_hh": jax.random.uniform(k2, (4 * H, H), jnp.float32, -bound, bound),
                "b_ih": jax.random.uniform(k3, (4 * H,), jnp.float32, -bound, bound),
                "b_hh": jax.random.uniform(k4, (4 * H,), jnp.float32, -bound, bound),
            })
        layers.append(dirs)
    fc_bound = 1.0 / float(2 * H) ** 0.5
    key, k1, k2 = jax.random.split(key, 3)
    fc_w = jax.random.uniform(k1, (num_classes, 2 * H), jnp.float32, -fc_bound, fc_bound)
    fc_b = jax.random.uniform(k2, (num_classes,), jnp.float32, -fc_bound, fc_bound)
    return {"layers": layers, "fc_w": fc_w, "fc_b": fc_b}


def pack_params(raw, hidden_size, *, compute_dtype=jnp.float32):
    """Build the fused-kernel layout ONCE (weights cast to compute_dtype here, not per call).

    TODO(synk): packing is specialized to num_layers == 2 (the module's configuration);
                extra middle layers would chain more layer-1-style blocks.
    """
    H = hidden_size
    (l1f, l1b), (l2f, l2b) = raw["layers"]

    w_ih1 = jnp.concatenate([l1f["w_ih"].T, l1b["w_ih"].T], axis=1)          # (D, 8H)
    b1 = jnp.concatenate([l1f["b_ih"] + l1f["b_hh"],
                          l1b["b_ih"] + l1b["b_hh"]]).reshape(1, 8 * H)

    w_hh1 = jnp.zeros((2 * H, 8 * H), jnp.float32)                           # block-diagonal
    w_hh1 = w_hh1.at[0:H, 0:4 * H].set(l1f["w_hh"].T)
    w_hh1 = w_hh1.at[H:2 * H, 4 * H:8 * H].set(l1b["w_hh"].T)

    return {
        "hidden": H,
        "w_ih1": w_ih1.astype(compute_dtype),
        "w_hh1": w_hh1.astype(compute_dtype),
        "b1": b1,                                                             # bias stays f32
        "w_ih2f": l2f["w_ih"].T.astype(compute_dtype),
        "b2f": (l2f["b_ih"] + l2f["b_hh"]).reshape(1, 4 * H),
        "w_ih2b": l2b["w_ih"].T.astype(compute_dtype),
        "b2b": (l2b["b_ih"] + l2b["b_hh"]).reshape(1, 4 * H),
        "w_hh2f": l2f["w_hh"].T.astype(compute_dtype),
        "w_fc": raw["fc_w"].T.astype(compute_dtype),
        "b_fc": raw["fc_b"].reshape(1, -1),
    }


# ----------------------------------------------------------------------------
# Pure-JAX reference for validation
# ----------------------------------------------------------------------------
def _ref_lstm_dir(x_tbd, w_ih, w_hh, b_ih, b_hh, H):
    T, B, _ = x_tbd.shape
    h = jnp.zeros((B, H), jnp.float32)
    c = jnp.zeros((B, H), jnp.float32)
    outs = []
    for t in range(T):
        gates = x_tbd[t] @ w_ih.T + h @ w_hh.T + b_ih + b_hh
        i = jax.nn.sigmoid(gates[:, 0:H])
        f = jax.nn.sigmoid(gates[:, H:2 * H])
        g = jnp.tanh(gates[:, 2 * H:3 * H])
        o = jax.nn.sigmoid(gates[:, 3 * H:4 * H])
        c = f * c + i * g
        h = o * jnp.tanh(c)
        outs.append(h)
    return jnp.stack(outs, axis=0)


def ref_forward(x_btd, raw, H):
    x = jnp.transpose(x_btd, (1, 0, 2)).astype(jnp.float32)
    layer_in = x
    for (df, db) in raw["layers"]:
        out_f = _ref_lstm_dir(layer_in, df["w_ih"], df["w_hh"], df["b_ih"], df["b_hh"], H)
        out_b = _ref_lstm_dir(layer_in[::-1], db["w_ih"], db["w_hh"],
                              db["b_ih"], db["b_hh"], H)[::-1]
        layer_in = jnp.concatenate([out_f, out_b], axis=-1)
    return layer_in[-1] @ raw["fc_w"].T + raw["fc_b"]


# ----------------------------------------------------------------------------
if __name__ == "__main__":
    # B=8 fills the sublanes, H=128 (module default) keeps gate slices lane-aligned.
    B, T, INPUT_SIZE = 8, 8, 16
    HIDDEN_SIZE, NUM_LAYERS, NUM_CLASSES = 128, 2, 10

    key = jax.random.PRNGKey(0)
    key, kx, kp = jax.random.split(key, 3)
    x = jax.random.normal(kx, (B, T, INPUT_SIZE), jnp.float32)

    raw = init_raw_params(kp, INPUT_SIZE, HIDDEN_SIZE, NUM_LAYERS, NUM_CLASSES)
    params = pack_params(raw, HIDDEN_SIZE, compute_dtype=jnp.float32)  # f32 for tight check

    out = lstm_encoder_forward(x, params)
    out = jax.block_until_ready(out)
    assert out.shape == (B, NUM_CLASSES), out.shape

    ref = jax.block_until_ready(ref_forward(x, raw, HIDDEN_SIZE))
    assert jnp.allclose(out, ref, atol=2e-3, rtol=2e-3), float(jnp.max(jnp.abs(out - ref)))

    print("KERNEL_OK")
</pallas_src>

<mosaic_0001>
module attributes {stable_mosaic.version = 11 : i64} {
  func.func @_fused_encoder_kernel(%arg0: i32, %arg1: memref<8x8x16xf32, #tpu.memory_space<vmem>>, %arg2: memref<16x1024xf32, #tpu.memory_space<vmem>>, %arg3: memref<256x1024xf32, #tpu.memory_space<vmem>>, %arg4: memref<1x1024xf32, #tpu.memory_space<vmem>>, %arg5: memref<256x512xf32, #tpu.memory_space<vmem>>, %arg6: memref<1x512xf32, #tpu.memory_space<vmem>>, %arg7: memref<256x512xf32, #tpu.memory_space<vmem>>, %arg8: memref<1x512xf32, #tpu.memory_space<vmem>>, %arg9: memref<128x512xf32, #tpu.memory_space<vmem>>, %arg10: memref<256x10xf32, #tpu.memory_space<vmem>>, %arg11: memref<1x10xf32, #tpu.memory_space<vmem>>, %arg12: memref<8x10xf32, #tpu.memory_space<vmem>>, %arg13: memref<8x8x512xf32, #tpu.memory_space<vmem>>, %arg14: memref<8x8x512xf32, #tpu.memory_space<vmem>>, %arg15: memref<8x8x512xf32, #tpu.memory_space<vmem>>, %arg16: memref<8x8x128xf32, #tpu.memory_space<vmem>>, %arg17: memref<8x8x128xf32, #tpu.memory_space<vmem>>) attributes {dimension_semantics = [#tpu.dimension_semantics<arbitrary>], iteration_bounds = array<i64: 1>, scalar_prefetch = 0 : i64, scratch_operands = 5 : i64, tpu.core_type = #tpu.core_type<tc>, window_params = [{pipeline_mode = #tpu.pipeline_mode<synchronous>, transform_indices = @transform_0, window_bounds = array<i64: 8, 8, 16>}, {pipeline_mode = #tpu.pipeline_mode<synchronous>, transform_indices = @transform_1, window_bounds = array<i64: 16, 1024>}, {pipeline_mode = #tpu.pipeline_mode<synchronous>, transform_indices = @transform_2, window_bounds = array<i64: 256, 1024>}, {pipeline_mode = #tpu.pipeline_mode<synchronous>, transform_indices = @transform_3, window_bounds = array<i64: 1, 1024>}, {pipeline_mode = #tpu.pipeline_mode<synchronous>, transform_indices = @transform_4, window_bounds = array<i64: 256, 512>}, {pipeline_mode = #tpu.pipeline_mode<synchronous>, transform_indices = @transform_5, window_bounds = array<i64: 1, 512>}, {pipeline_mode = #tpu.pipeline_mode<synchronous>, transform_indices = @transform_6, window_bounds = array<i64: 256, 512>}, {pipeline_mode = #tpu.pipeline_mode<synchronous>, transform_indices = @transform_7, window_bounds = array<i64: 1, 512>}, {pipeline_mode = #tpu.pipeline_mode<synchronous>, transform_indices = @transform_8, window_bounds = array<i64: 128, 512>}, {pipeline_mode = #tpu.pipeline_mode<synchronous>, transform_indices = @transform_9, window_bounds = array<i64: 256, 10>}, {pipeline_mode = #tpu.pipeline_mode<synchronous>, transform_indices = @transform_10, window_bounds = array<i64: 1, 10>}, {pipeline_mode = #tpu.pipeline_mode<synchronous>, transform_indices = @transform_11, window_bounds = array<i64: 8, 10>}]} {
    %c0 = arith.constant 0 : index
    %c0_0 = arith.constant 0 : index
    %c0_1 = arith.constant 0 : index
    %0 = vector.load %arg1[%c0, %c0_0, %c0_1] : memref<8x8x16xf32, #tpu.memory_space<vmem>>, vector<8x8x16xf32>
    %1 = vector.shape_cast %0 : vector<8x8x16xf32> to vector<64x16xf32>
    %c0_2 = arith.constant 0 : index
    %c0_3 = arith.constant 0 : index
    %2 = vector.load %arg2[%c0_2, %c0_3] : memref<16x1024xf32, #tpu.memory_space<vmem>>, vector<16x1024xf32>
    %cst = arith.constant dense<0.000000e+00> : vector<64x1024xf32>
    %3 = tpu.matmul %1, %2, %cst {dimension_numbers = #tpu.dot_dimension_numbers<[1], [0], [0], [1], [0, 0, 1, 1], [], []>} : vector<64x16xf32>, vector<16x1024xf32>, vector<64x1024xf32> -> vector<64x1024xf32>
    %c0_4 = arith.constant 0 : index
    %c0_5 = arith.constant 0 : index
    %4 = vector.load %arg4[%c0_4, %c0_5] : memref<1x1024xf32, #tpu.memory_space<vmem>>, vector<1x1024xf32>
    %5 = vector.broadcast %4 : vector<1x1024xf32> to vector<64x1024xf32>
    %6 = arith.addf %3, %5 : vector<64x1024xf32>
    %7 = vector.shape_cast %6 : vector<64x1024xf32> to vector<8x8x1024xf32>
    %8 = vector.extract_strided_slice %7 {offsets = [0, 0, 0], sizes = [8, 8, 512], strides = [1, 1, 1]} : vector<8x8x1024xf32> to vector<8x8x512xf32>
    %c0_6 = arith.constant 0 : index
    %c0_7 = arith.constant 0 : index
    %c0_8 = arith.constant 0 : index
    %9 = vector.load %arg13[%c0_6, %c0_7, %c0_8] : memref<8x8x512xf32, #tpu.memory_space<vmem>>, vector<8x8x512xf32>
    tpu.vector_store %arg13[%c0_6, %c0_7, %c0_8], %8 {strides = array<i32>} : memref<8x8x512xf32, #tpu.memory_space<vmem>>, vector<8x8x512xf32>,
    %10 = vector.extract_strided_slice %7 {offsets = [0, 0, 512], sizes = [8, 8, 512], strides = [1, 1, 1]} : vector<8x8x1024xf32> to vector<8x8x512xf32>
    %c0_9 = arith.constant 0 : index
    %c0_10 = arith.constant 0 : index
    %c0_11 = arith.constant 0 : index
    %11 = vector.load %arg14[%c0_9, %c0_10, %c0_11] : memref<8x8x512xf32, #tpu.memory_space<vmem>>, vector<8x8x512xf32>
    tpu.vector_store %arg14[%c0_9, %c0_10, %c0_11], %10 {strides = array<i32>} : memref<8x8x512xf32, #tpu.memory_space<vmem>>, vector<8x8x512xf32>,
    %c0_12 = arith.constant 0 : index
    %c0_13 = arith.constant 0 : index
    %12 = vector.load %arg3[%c0_12, %c0_13] : memref<256x1024xf32, #tpu.memory_space<vmem>>, vector<256x1024xf32>
    %cst_14 = arith.constant 0.000000e+00 : f32
    %13 = vector.broadcast %cst_14 : f32 to vector<8x128xf32>
    %c0_i32 = arith.constant 0 : i32
    %c7_i32 = arith.constant 7 : i32
    %14 = arith.subi %c7_i32, %c0_i32 : i32
    %15 = tpu.concatenate %13, %13 in 1 : vector<8x128xf32>, vector<8x128xf32> -> vector<8x256xf32>
    %cst_15 = arith.constant dense<0.000000e+00> : vector<8x1024xf32>
    %16 = tpu.matmul %15, %12, %cst_15 {dimension_numbers = #tpu.dot_dimension_numbers<[1], [0], [0], [1], [0, 0, 1, 1], [], []>} : vector<8x256xf32>, vector<256x1024xf32>, vector<8x1024xf32> -> vector<8x1024xf32>
    %17 = arith.index_cast %c0_i32 : i32 to index
    %c0_16 = arith.constant 0 : index
    %c0_17 = arith.constant 0 : index
    %18 = vector.load %arg13[%17, %c0_16, %c0_17] : memref<8x8x512xf32, #tpu.memory_space<vmem>>, vector<1x8x512xf32>
    %19 = vector.shape_cast %18 : vector<1x8x512xf32> to vector<8x512xf32>
    %20 = vector.extract_strided_slice %16 {offsets = [0, 0], sizes = [8, 512], strides = [1, 1]} : vector<8x1024xf32> to vector<8x512xf32>
    %21 = arith.addf %19, %20 : vector<8x512xf32>
    %22 = vector.extract_strided_slice %21 {offsets = [0, 0], sizes = [8, 128], strides = [1, 1]} : vector<8x512xf32> to vector<8x128xf32>
    %23 = arith.negf %22 : vector<8x128xf32>
    %24 = math.exp %23 : vector<8x128xf32>
    %cst_18 = arith.constant 1.000000e+00 : f32
    %25 = vector.broadcast %cst_18 : f32 to vector<8x128xf32>
    %26 = arith.addf %25, %24 : vector<8x128xf32>
    %27 = arith.divf %25, %26 : vector<8x128xf32>
    %28 = vector.extract_strided_slice %21 {offsets = [0, 128], sizes = [8, 128], strides = [1, 1]} : vector<8x512xf32> to vector<8x128xf32>
    %29 = arith.negf %28 : vector<8x128xf32>
    %30 = math.exp %29 : vector<8x128xf32>
    %cst_19 = arith.constant 1.000000e+00 : f32
    %31 = vector.broadcast %cst_19 : f32 to vector<8x128xf32>
    %32 = arith.addf %31, %30 : vector<8x128xf32>
    %33 = arith.divf %31, %32 : vector<8x128xf32>
    %34 = vector.extract_strided_slice %21 {offsets = [0, 256], sizes = [8, 128], strides = [1, 1]} : vector<8x512xf32> to vector<8x128xf32>
    %35 = math.tanh %34 : vector<8x128xf32>
    %36 = vector.extract_strided_slice %21 {offsets = [0, 384], sizes = [8, 128], strides = [1, 1]} : vector<8x512xf32> to vector<8x128xf32>
    %37 = arith.negf %36 : vector<8x128xf32>
    %38 = math.exp %37 : vector<8x128xf32>
    %cst_20 = arith.constant 1.000000e+00 : f32
    %39 = vector.broadcast %cst_20 : f32 to vector<8x128xf32>
    %40 = arith.addf %39, %38 : vector<8x128xf32>
    %41 = arith.divf %39, %40 : vector<8x128xf32>
    %42 = arith.mulf %33, %13 : vector<8x128xf32>
    %43 = arith.mulf %27, %35 : vector<8x128xf32>
    %44 = arith.addf %42, %43 : vector<8x128xf32>
    %45 = math.tanh %44 : vector<8x128xf32>
    %46 = arith.mulf %41, %45 : vector<8x128xf32>
    %47 = arith.index_cast %14 : i32 to index
    %c0_21 = arith.constant 0 : index
    %c0_22 = arith.constant 0 : index
    %48 = vector.load %arg14[%47, %c0_21, %c0_22] : memref<8x8x512xf32, #tpu.memory_space<vmem>>, vector<1x8x512xf32>
    %49 = vector.shape_cast %48 : vector<1x8x512xf32> to vector<8x512xf32>
    %50 = vector.extract_strided_slice %16 {offsets = [0, 512], sizes = [8, 512], strides = [1, 1]} : vector<8x1024xf32> to vector<8x512xf32>
    %51 = arith.addf %49, %50 : vector<8x512xf32>
    %52 = vector.extract_strided_slice %51 {offsets = [0, 0], sizes = [8, 128], strides = [1, 1]} : vector<8x512xf32> to vector<8x128xf32>
    %53 = arith.negf %52 : vector<8x128xf32>
    %54 = math.exp %53 : vector<8x128xf32>
    %cst_23 = arith.constant 1.000000e+00 : f32
    %55 = vector.broadcast %cst_23 : f32 to vector<8x128xf32>
    %56 = arith.addf %55, %54 : vector<8x128xf32>
    %57 = arith.divf %55, %56 : vector<8x128xf32>
    %58 = vector.extract_strided_slice %51 {offsets = [0, 128], sizes = [8, 128], strides = [1, 1]} : vector<8x512xf32> to vector<8x128xf32>
    %59 = arith.negf %58 : vector<8x128xf32>
    %60 = math.exp %59 : vector<8x128xf32>
    %cst_24 = arith.constant 1.000000e+00 : f32
    %61 = vector.broadcast %cst_24 : f32 to vector<8x128xf32>
    %62 = arith.addf %61, %60 : vector<8x128xf32>
    %63 = arith.divf %61, %62 : vector<8x128xf32>
    %64 = vector.extract_strided_slice %51 {offsets = [0, 256], sizes = [8, 128], strides = [1, 1]} : vector<8x512xf32> to vector<8x128xf32>
    %65 = math.tanh %64 : vector<8x128xf32>
    %66 = vector.extract_strided_slice %51 {offsets = [0, 384], sizes = [8, 128], strides = [1, 1]} : vector<8x512xf32> to vector<8x128xf32>
    %67 = arith.negf %66 : vector<8x128xf32>
    %68 = math.exp %67 : vector<8x128xf32>
    %cst_25 = arith.constant 1.000000e+00 : f32
    %69 = vector.broadcast %cst_25 : f32 to vector<8x128xf32>
    %70 = arith.addf %69, %68 : vector<8x128xf32>
    %71 = arith.divf %69, %70 : vector<8x128xf32>
    %72 = arith.mulf %63, %13 : vector<8x128xf32>
    %73 = arith.mulf %57, %65 : vector<8x128xf32>
    %74 = arith.addf %72, %73 : vector<8x128xf32>
    %75 = math.tanh %74 : vector<8x128xf32>
    %76 = arith.mulf %71, %75 : vector<8x128xf32>
    %77 = arith.index_cast %c0_i32 : i32 to index
    %c0_26 = arith.constant 0 : index
    %c0_27 = arith.constant 0 : index
    %78 = vector.load %arg16[%77, %c0_26, %c0_27] : memref<8x8x128xf32, #tpu.memory_space<vmem>>, vector<1x8x128xf32>
    %79 = vector.shape_cast %78 : vector<1x8x128xf32> to vector<8x128xf32>
    %80 = vector.shape_cast %46 : vector<8x128xf32> to vector<1x8x128xf32>
    tpu.vector_store %arg16[%77, %c0_26, %c0_27], %80 {strides = array<i32>} : memref<8x8x128xf32, #tpu.memory_space<vmem>>, vector<1x8x128xf32>,
    %81 = arith.index_cast %14 : i32 to index
    %c0_28 = arith.constant 0 : index
    %c0_29 = arith.constant 0 : index
    %82 = vector.load %arg17[%81, %c0_28, %c0_29] : memref<8x8x128xf32, #tpu.memory_space<vmem>>, vector<1x8x128xf32>
    %83 = vector.shape_cast %82 : vector<1x8x128xf32> to vector<8x128xf32>
    %84 = vector.shape_cast %76 : vector<8x128xf32> to vector<1x8x128xf32>
    tpu.vector_store %arg17[%81, %c0_28, %c0_29], %84 {strides = array<i32>} : memref<8x8x128xf32, #tpu.memory_space<vmem>>, vector<1x8x128xf32>,
    %c1_i32 = arith.constant 1 : i32
    %c7_i32_30 = arith.constant 7 : i32
    %85 = arith.subi %c7_i32_30, %c1_i32 : i32
    %86 = tpu.concatenate %46, %76 in 1 : vector<8x128xf32>, vector<8x128xf32> -> vector<8x256xf32>
    %cst_31 = arith.constant dense<0.000000e+00> : vector<8x1024xf32>
    %87 = tpu.matmul %86, %12, %cst_31 {dimension_numbers = #tpu.dot_dimension_numbers<[1], [0], [0], [1], [0, 0, 1, 1], [], []>} : vector<8x256xf32>, vector<256x1024xf32>, vector<8x1024xf32> -> vector<8x1024xf32>
    %88 = arith.index_cast %c1_i32 : i32 to index
    %c0_32 = arith.constant 0 : index
    %c0_33 = arith.constant 0 : index
    %89 = vector.load %arg13[%88, %c0_32, %c0_33] : memref<8x8x512xf32, #tpu.memory_space<vmem>>, vector<1x8x512xf32>
    %90 = vector.shape_cast %89 : vector<1x8x512xf32> to vector<8x512xf32>
    %91 = vector.extract_strided_slice %87 {offsets = [0, 0], sizes = [8, 512], strides = [1, 1]} : vector<8x1024xf32> to vector<8x512xf32>
    %92 = arith.addf %90, %91 : vector<8x512xf32>
    %93 = vector.extract_strided_slice %92 {offsets = [0, 0], sizes = [8, 128], strides = [1, 1]} : vector<8x512xf32> to vector<8x128xf32>
    %94 = arith.negf %93 : vector<8x128xf32>
    %95 = math.exp %94 : vector<8x128xf32>
    %cst_34 = arith.constant 1.000000e+00 : f32
    %96 = vector.broadcast %cst_34 : f32 to vector<8x128xf32>
    %97 = arith.addf %96, %95 : vector<8x128xf32>
    %98 = arith.divf %96, %97 : vector<8x128xf32>
    %99 = vector.extract_strided_slice %92 {offsets = [0, 128], sizes = [8, 128], strides = [1, 1]} : vector<8x512xf32> to vector<8x128xf32>
    %100 = arith.negf %99 : vector<8x128xf32>
    %101 = math.exp %100 : vector<8x128xf32>
    %cst_35 = arith.constant 1.000000e+00 : f32
    %102 = vector.broadcast %cst_35 : f32 to vector<8x128xf32>
    %103 = arith.addf %102, %101 : vector<8x128xf32>
    %104 = arith.divf %102, %103 : vector<8x128xf32>
    %105 = vector.extract_strided_slice %92 {offsets = [0, 256], sizes = [8, 128], strides = [1, 1]} : vector<8x512xf32> to vector<8x128xf32>
    %106 = math.tanh %105 : vector<8x128xf32>
    %107 = vector.extract_strided_slice %92 {offsets = [0, 384], sizes = [8, 128], strides = [1, 1]} : vector<8x512xf32> to vector<8x128xf32>
    %108 = arith.negf %107 : vector<8x128xf32>
    %109 = math.exp %108 : vector<8x128xf32>
    %cst_36 = arith.constant 1.000000e+00 : f32
    %110 = vector.broadcast %cst_36 : f32 to vector<8x128xf32>
    %111 = arith.addf %110, %109 : vector<8x128xf32>
    %112 = arith.divf %110, %111 : vector<8x128xf32>
    %113 = arith.mulf %104, %44 : vector<8x128xf32>
    %114 = arith.mulf %98, %106 : vector<8x128xf32>
    %115 = arith.addf %113, %114 : vector<8x128xf32>
    %116 = math.tanh %115 : vector<8x128xf32>
    %117 = arith.mulf %112, %116 : vector<8x128xf32>
    %118 = arith.index_cast %85 : i32 to index
    %c0_37 = arith.constant 0 : index
    %c0_38 = arith.constant 0 : index
    %119 = vector.load %arg14[%118, %c0_37, %c0_38] : memref<8x8x512xf32, #tpu.memory_space<vmem>>, vector<1x8x512xf32>
    %120 = vector.shape_cast %119 : vector<1x8x512xf32> to vector<8x512xf32>
    %121 = vector.extract_strided_slice %87 {offsets = [0, 512], sizes = [8, 512], strides = [1, 1]} : vector<8x1024xf32> to vector<8x512xf32>
    %122 = arith.addf %120, %121 : vector<8x512xf32>
    %123 = vector.extract_strided_slice %122 {offsets = [0, 0], sizes = [8, 128], strides = [1, 1]} : vector<8x512xf32> to vector<8x128xf32>
    %124 = arith.negf %123 : vector<8x128xf32>
    %125 = math.exp %124 : vector<8x128xf32>
    %cst_39 = arith.constant 1.000000e+00 : f32
    %126 = vector.broadcast %cst_39 : f32 to vector<8x128xf32>
    %127 = arith.addf %126, %125 : vector<8x128xf32>
    %128 = arith.divf %126, %127 : vector<8x128xf32>
    %129 = vector.extract_strided_slice %122 {offsets = [0, 128], sizes = [8, 128], strides = [1, 1]} : vector<8x512xf32> to vector<8x128xf32>
    %130 = arith.negf %129 : vector<8x128xf32>
    %131 = math.exp %130 : vector<8x128xf32>
    %cst_40 = arith.constant 1.000000e+00 : f32
    %132 = vector.broadcast %cst_40 : f32 to vector<8x128xf32>
    %133 = arith.addf %132, %131 : vector<8x128xf32>
    %134 = arith.divf %132, %133 : vector<8x128xf32>
    %135 = vector.extract_strided_slice %122 {offsets = [0, 256], sizes = [8, 128], strides = [1, 1]} : vector<8x512xf32> to vector<8x128xf32>
    %136 = math.tanh %135 : vector<8x128xf32>
    %137 = vector.extract_strided_slice %122 {offsets = [0, 384], sizes = [8, 128], strides = [1, 1]} : vector<8x512xf32> to vector<8x128xf32>
    %138 = arith.negf %137 : vector<8x128xf32>
    %139 = math.exp %138 : vector<8x128xf32>
    %cst_41 = arith.constant 1.000000e+00 : f32
    %140 = vector.broadcast %cst_41 : f32 to vector<8x128xf32>
    %141 = arith.addf %140, %139 : vector<8x128xf32>
    %142 = arith.divf %140, %141 : vector<8x128xf32>
    %143 = arith.mulf %134, %74 : vector<8x128xf32>
    %144 = arith.mulf %128, %136 : vector<8x128xf32>
    %145 = arith.addf %143, %144 : vector<8x128xf32>
    %146 = math.tanh %145 : vector<8x128xf32>
    %147 = arith.mulf %142, %146 : vector<8x128xf32>
    %148 = arith.index_cast %c1_i32 : i32 to index
    %c0_42 = arith.constant 0 : index
    %c0_43 = arith.constant 0 : index
    %149 = vector.load %arg16[%148, %c0_42, %c0_43] : memref<8x8x128xf32, #tpu.memory_space<vmem>>, vector<1x8x128xf32>
    %150 = vector.shape_cast %149 : vector<1x8x128xf32> to vector<8x128xf32>
    %151 = vector.shape_cast %117 : vector<8x128xf32> to vector<1x8x128xf32>
    tpu.vector_store %arg16[%148, %c0_42, %c0_43], %151 {strides = array<i32>} : memref<8x8x128xf32, #tpu.memory_space<vmem>>, vector<1x8x128xf32>,
    %152 = arith.index_cast %85 : i32 to index
    %c0_44 = arith.constant 0 : index
    %c0_45 = arith.constant 0 : index
    %153 = vector.load %arg17[%152, %c0_44, %c0_45] : memref<8x8x128xf32, #tpu.memory_space<vmem>>, vector<1x8x128xf32>
    %154 = vector.shape_cast %153 : vector<1x8x128xf32> to vector<8x128xf32>
    %155 = vector.shape_cast %147 : vector<8x128xf32> to vector<1x8x128xf32>
    tpu.vector_store %arg17[%152, %c0_44, %c0_45], %155 {strides = array<i32>} : memref<8x8x128xf32, #tpu.memory_space<vmem>>, vector<1x8x128xf32>,
    %c2_i32 = arith.constant 2 : i32
    %c7_i32_46 = arith.constant 7 : i32
    %156 = arith.subi %c7_i32_46, %c2_i32 : i32
    %157 = tpu.concatenate %117, %147 in 1 : vector<8x128xf32>, vector<8x128xf32> -> vector<8x256xf32>
    %cst_47 = arith.constant dense<0.000000e+00> : vector<8x1024xf32>
    %158 = tpu.matmul %157, %12, %cst_47 {dimension_numbers = #tpu.dot_dimension_numbers<[1], [0], [0], [1], [0, 0, 1, 1], [], []>} : vector<8x256xf32>, vector<256x1024xf32>, vector<8x1024xf32> -> vector<8x1024xf32>
    %159 = arith.index_cast %c2_i32 : i32 to index
    %c0_48 = arith.constant 0 : index
    %c0_49 = arith.constant 0 : index
    %160 = vector.load %arg13[%159, %c0_48, %c0_49] : memref<8x8x512xf32, #tpu.memory_space<vmem>>, vector<1x8x512xf32>
    %161 = vector.shape_cast %160 : vector<1x8x512xf32> to vector<8x512xf32>
    %162 = vector.extract_strided_slice %158 {offsets = [0, 0], sizes = [8, 512], strides = [1, 1]} : vector<8x1024xf32> to vector<8x512xf32>
    %163 = arith.addf %161, %162 : vector<8x512xf32>
    %164 = vector.extract_strided_slice %163 {offsets = [0, 0], sizes = [8, 128], strides = [1, 1]} : vector<8x512xf32> to vector<8x128xf32>
    %165 = arith.negf %164 : vector<8x128xf32>
    %166 = math.exp %165 : vector<8x128xf32>
    %cst_50 = arith.constant 1.000000e+00 : f32
    %167 = vector.broadcast %cst_50 : f32 to vector<8x128xf32>
    %168 = arith.addf %167, %166 : vector<8x128xf32>
    %169 = arith.divf %167, %168 : vector<8x128xf32>
    %170 = vector.extract_strided_slice %163 {offsets = [0, 128], sizes = [8, 128], strides = [1, 1]} : vector<8x512xf32> to vector<8x128xf32>
    %171 = arith.negf %170 : vector<8x128xf32>
    %172 = math.exp %171 : vector<8x128xf32>
    %cst_51 = arith.constant 1.000000e+00 : f32
    %173 = vector.broadcast %cst_51 : f32 to vector<8x128xf32>
    %174 = arith.addf %173, %172 : vector<8x128xf32>
    %175 = arith.divf %173, %174 : vector<8x128xf32>
    %176 = vector.extract_strided_slice %163 {offsets = [0, 256], sizes = [8, 128], strides = [1, 1]} : vector<8x512xf32> to vector<8x128xf32>
    %177 = math.tanh %176 : vector<8x128xf32>
    %178 = vector.extract_strided_slice %163 {offsets = [0, 384], sizes = [8, 128], strides = [1, 1]} : vector<8x512xf32> to vector<8x128xf32>
    %179 = arith.negf %178 : vector<8x128xf32>
    %180 = math.exp %179 : vector<8x128xf32>
    %cst_52 = arith.constant 1.000000e+00 : f32
    %181 = vector.broadcast %cst_52 : f32 to vector<8x128xf32>
    %182 = arith.addf %181, %180 : vector<8x128xf32>
    %183 = arith.divf %181, %182 : vector<8x128xf32>
    %184 = arith.mulf %175, %115 : vector<8x128xf32>
    %185 = arith.mulf %169, %177 : vector<8x128xf32>
    %186 = arith.addf %184, %185 : vector<8x128xf32>
    %187 = math.tanh %186 : vector<8x128xf32>
    %188 = arith.mulf %183, %187 : vector<8x128xf32>
    %189 = arith.index_cast %156 : i32 to index
    %c0_53 = arith.constant 0 : index
    %c0_54 = arith.constant 0 : index
    %190 = vector.load %arg14[%189, %c0_53, %c0_54] : memref<8x8x512xf32, #tpu.memory_space<vmem>>, vector<1x8x512xf32>
    %191 = vector.shape_cast %190 : vector<1x8x512xf32> to vector<8x512xf32>
    %192 = vector.extract_strided_slice %158 {offsets = [0, 512], sizes = [8, 512], strides = [1, 1]} : vector<8x1024xf32> to vector<8x512xf32>
    %193 = arith.addf %191, %192 : vector<8x512xf32>
    %194 = vector.extract_strided_slice %193 {offsets = [0, 0], sizes = [8, 128], strides = [1, 1]} : vector<8x512xf32> to vector<8x128xf32>
    %195 = arith.negf %194 : vector<8x128xf32>
    %196 = math.exp %195 : vector<8x128xf32>
    %cst_55 = arith.constant 1.000000e+00 : f32
    %197 = vector.broadcast %cst_55 : f32 to vector<8x128xf32>
    %198 = arith.addf %197, %196 : vector<8x128xf32>
    %199 = arith.divf %197, %198 : vector<8x128xf32>
    %200 = vector.extract_strided_slice %193 {offsets = [0, 128], sizes = [8, 128], strides = [1, 1]} : vector<8x512xf32> to vector<8x128xf32>
    %201 = arith.negf %200 : vector<8x128xf32>
    %202 = math.exp %201 : vector<8x128xf32>
    %cst_56 = arith.constant 1.000000e+00 : f32
    %203 = vector.broadcast %cst_56 : f32 to vector<8x128xf32>
    %204 = arith.addf %203, %202 : vector<8x128xf32>
    %205 = arith.divf %203, %204 : vector<8x128xf32>
    %206 = vector.extract_strided_slice %193 {offsets = [0, 256], sizes = [8, 128], strides = [1, 1]} : vector<8x512xf32> to vector<8x128xf32>
    %207 = math.tanh %206 : vector<8x128xf32>
    %208 = vector.extract_strided_slice %193 {offsets = [0, 384], sizes = [8, 128], strides = [1, 1]} : vector<8x512xf32> to vector<8x128xf32>
    %209 = arith.negf %208 : vector<8x128xf32>
    %210 = math.exp %209 : vector<8x128xf32>
    %cst_57 = arith.constant 1.000000e+00 : f32
    %211 = vector.broadcast %cst_57 : f32 to vector<8x128xf32>
    %212 = arith.addf %211, %210 : vector<8x128xf32>
    %213 = arith.divf %211, %212 : vector<8x128xf32>
    %214 = arith.mulf %205, %145 : vector<8x128xf32>
    %215 = arith.mulf %199, %207 : vector<8x128xf32>
    %216 = arith.addf %214, %215 : vector<8x128xf32>
    %217 = math.tanh %216 : vector<8x128xf32>
    %218 = arith.mulf %213, %217 : vector<8x128xf32>
    %219 = arith.index_cast %c2_i32 : i32 to index
    %c0_58 = arith.constant 0 : index
    %c0_59 = arith.constant 0 : index
    %220 = vector.load %arg16[%219, %c0_58, %c0_59] : memref<8x8x128xf32, #tpu.memory_space<vmem>>, vector<1x8x128xf32>
    %221 = vector.shape_cast %220 : vector<1x8x128xf32> to vector<8x128xf32>
    %222 = vector.shape_cast %188 : vector<8x128xf32> to vector<1x8x128xf32>
    tpu.vector_store %arg16[%219, %c0_58, %c0_59], %222 {strides = array<i32>} : memref<8x8x128xf32, #tpu.memory_space<vmem>>, vector<1x8x128xf32>,
    %223 = arith.index_cast %156 : i32 to index
    %c0_60 = arith.constant 0 : index
    %c0_61 = arith.constant 0 : index
    %224 = vector.load %arg17[%223, %c0_60, %c0_61] : memref<8x8x128xf32, #tpu.memory_space<vmem>>, vector<1x8x128xf32>
    %225 = vector.shape_cast %224 : vector<1x8x128xf32> to vector<8x128xf32>
    %226 = vector.shape_cast %218 : vector<8x128xf32> to vector<1x8x128xf32>
    tpu.vector_store %arg17[%223, %c0_60, %c0_61], %226 {strides = array<i32>} : memref<8x8x128xf32, #tpu.memory_space<vmem>>, vector<1x8x128xf32>,
    %c3_i32 = arith.constant 3 : i32
    %c7_i32_62 = arith.constant 7 : i32
    %227 = arith.subi %c7_i32_62, %c3_i32 : i32
    %228 = tpu.concatenate %188, %218 in 1 : vector<8x128xf32>, vector<8x128xf32> -> vector<8x256xf32>
    %cst_63 = arith.constant dense<0.000000e+00> : vector<8x1024xf32>
    %229 = tpu.matmul %228, %12, %cst_63 {dimension_numbers = #tpu.dot_dimension_numbers<[1], [0], [0], [1], [0, 0, 1, 1], [], []>} : vector<8x256xf32>, vector<256x1024xf32>, vector<8x1024xf32> -> vector<8x1024xf32>
    %230 = arith.index_cast %c3_i32 : i32 to index
    %c0_64 = arith.constant 0 : index
    %c0_65 = arith.constant 0 : index
    %231 = vector.load %arg13[%230, %c0_64, %c0_65] : memref<8x8x512xf32, #tpu.memory_space<vmem>>, vector<1x8x512xf32>
    %232 = vector.shape_cast %231 : vector<1x8x512xf32> to vector<8x512xf32>
    %233 = vector.extract_strided_slice %229 {offsets = [0, 0], sizes = [8, 512], strides = [1, 1]} : vector<8x1024xf32> to vector<8x512xf32>
    %234 = arith.addf %232, %233 : vector<8x512xf32>
    %235 = vector.extract_strided_slice %234 {offsets = [0, 0], sizes = [8, 128], strides = [1, 1]} : vector<8x512xf32> to vector<8x128xf32>
    %236 = arith.negf %235 : vector<8x128xf32>
    %237 = math.exp %236 : vector<8x128xf32>
    %cst_66 = arith.constant 1.000000e+00 : f32
    %238 = vector.broadcast %cst_66 : f32 to vector<8x128xf32>
    %239 = arith.addf %238, %237 : vector<8x128xf32>
    %240 = arith.divf %238, %239 : vector<8x128xf32>
    %241 = vector.extract_strided_slice %234 {offsets = [0, 128], sizes = [8, 128], strides = [1, 1]} : vector<8x512xf32> to vector<8x128xf32>
    %242 = arith.negf %241 : vector<8x128xf32>
    %243 = math.exp %242 : vector<8x128xf32>
    %cst_67 = arith.constant 1.000000e+00 : f32
    %244 = vector.broadcast %cst_67 : f32 to vector<8x128xf32>
    %245 = arith.addf %244, %243 : vector<8x128xf32>
    %246 = arith.divf %244, %245 : vector<8x128xf32>
    %247 = vector.extract_strided_slice %234 {offsets = [0, 256], sizes = [8, 128], strides = [1, 1]} : vector<8x512xf32> to vector<8x128xf32>
    %248 = math.tanh %247 : vector<8x128xf32>
    %249 = vector.extract_strided_slice %234 {offsets = [0, 384], sizes = [8, 128], strides = [1, 1]} : vector<8x512xf32> to vector<8x128xf32>
    %250 = arith.negf %249 : vector<8x128xf32>
    %251 = math.exp %250 : vector<8x128xf32>
    %cst_68 = arith.constant 1.000000e+00 : f32
    %252 = vector.broadcast %cst_68 : f32 to vector<8x128xf32>
    %253 = arith.addf %252, %251 : vector<8x128xf32>
    %254 = arith.divf %252, %253 : vector<8x128xf32>
    %255 = arith.mulf %246, %186 : vector<8x128xf32>
    %256 = arith.mulf %240, %248 : vector<8x128xf32>
    %257 = arith.addf %255, %256 : vector<8x128xf32>
    %258 = math.tanh %257 : vector<8x128xf32>
    %259 = arith.mulf %254, %258 : vector<8x128xf32>
    %260 = arith.index_cast %227 : i32 to index
    %c0_69 = arith.constant 0 : index
    %c0_70 = arith.constant 0 : index
    %261 = vector.load %arg14[%260, %c0_69, %c0_70] : memref<8x8x512xf32, #tpu.memory_space<vmem>>, vector<1x8x512xf32>
    %262 = vector.shape_cast %261 : vector<1x8x512xf32> to vector<8x512xf32>
    %263 = vector.extract_strided_slice %229 {offsets = [0, 512], sizes = [8, 512], strides = [1, 1]} : vector<8x1024xf32> to vector<8x512xf32>
    %264 = arith.addf %262, %263 : vector<8x512xf32>
    %265 = vector.extract_strided_slice %264 {offsets = [0, 0], sizes = [8, 128], strides = [1, 1]} : vector<8x512xf32> to vector<8x128xf32>
    %266 = arith.negf %265 : vector<8x128xf32>
    %267 = math.exp %266 : vector<8x128xf32>
    %cst_71 = arith.constant 1.000000e+00 : f32
    %268 = vector.broadcast %cst_71 : f32 to vector<8x128xf32>
    %269 = arith.addf %268, %267 : vector<8x128xf32>
    %270 = arith.divf %268, %269 : vector<8x128xf32>
    %271 = vector.extract_strided_slice %264 {offsets = [0, 128], sizes = [8, 128], strides = [1, 1]} : vector<8x512xf32> to vector<8x128xf32>
    %272 = arith.negf %271 : vector<8x128xf32>
    %273 = math.exp %272 : vector<8x128xf32>
    %cst_72 = arith.constant 1.000000e+00 : f32
    %274 = vector.broadcast %cst_72 : f32 to vector<8x128xf32>
    %275 = arith.addf %274, %273 : vector<8x128xf32>
    %276 = arith.divf %274, %275 : vector<8x128xf32>
    %277 = vector.extract_strided_slice %264 {offsets = [0, 256], sizes = [8, 128], strides = [1, 1]} : vector<8x512xf32> to vector<8x128xf32>
    %278 = math.tanh %277 : vector<8x128xf32>
    %279 = vector.extract_strided_slice %264 {offsets = [0, 384], sizes = [8, 128], strides = [1, 1]} : vector<8x512xf32> to vector<8x128xf32>
    %280 = arith.negf %279 : vector<8x128xf32>
    %281 = math.exp %280 : vector<8x128xf32>
    %cst_73 = arith.constant 1.000000e+00 : f32
    %282 = vector.broadcast %cst_73 : f32 to vector<8x128xf32>
    %283 = arith.addf %282, %281 : vector<8x128xf32>
    %284 = arith.divf %282, %283 : vector<8x128xf32>
    %285 = arith.mulf %276, %216 : vector<8x128xf32>
    %286 = arith.mulf %270, %278 : vector<8x128xf32>
    %287 = arith.addf %285, %286 : vector<8x128xf32>
    %288 = math.tanh %287 : vector<8x128xf32>
    %289 = arith.mulf %284, %288 : vector<8x128xf32>
    %290 = arith.index_cast %c3_i32 : i32 to index
    %c0_74 = arith.constant 0 : index
    %c0_75 = arith.constant 0 : index
    %291 = vector.load %arg16[%290, %c0_74, %c0_75] : memref<8x8x128xf32, #tpu.memory_space<vmem>>, vector<1x8x128xf32>
    %292 = vector.shape_cast %291 : vector<1x8x128xf32> to vector<8x128xf32>
    %293 = vector.shape_cast %259 : vector<8x128xf32> to vector<1x8x128xf32>
    tpu.vector_store %arg16[%290, %c0_74, %c0_75], %293 {strides = array<i32>} : memref<8x8x128xf32, #tpu.memory_space<vmem>>, vector<1x8x128xf32>,
    %294 = arith.index_cast %227 : i32 to index
    %c0_76 = arith.constant 0 : index
    %c0_77 = arith.constant 0 : index
    %295 = vector.load %arg17[%294, %c0_76, %c0_77] : memref<8x8x128xf32, #tpu.memory_space<vmem>>, vector<1x8x128xf32>
    %296 = vector.shape_cast %295 : vector<1x8x128xf32> to vector<8x128xf32>
    %297 = vector.shape_cast %289 : vector<8x128xf32> to vector<1x8x128xf32>
    tpu.vector_store %arg17[%294, %c0_76, %c0_77], %297 {strides = array<i32>} : memref<8x8x128xf32, #tpu.memory_space<vmem>>, vector<1x8x128xf32>,
    %c4_i32 = arith.constant 4 : i32
    %c7_i32_78 = arith.constant 7 : i32
    %298 = arith.subi %c7_i32_78, %c4_i32 : i32
    %299 = tpu.concatenate %259, %289 in 1 : vector<8x128xf32>, vector<8x128xf32> -> vector<8x256xf32>
    %cst_79 = arith.constant dense<0.000000e+00> : vector<8x1024xf32>
    %300 = tpu.matmul %299, %12, %cst_79 {dimension_numbers = #tpu.dot_dimension_numbers<[1], [0], [0], [1], [0, 0, 1, 1], [], []>} : vector<8x256xf32>, vector<256x1024xf32>, vector<8x1024xf32> -> vector<8x1024xf32>
    %301 = arith.index_cast %c4_i32 : i32 to index
    %c0_80 = arith.constant 0 : index
    %c0_81 = arith.constant 0 : index
    %302 = vector.load %arg13[%301, %c0_80, %c0_81] : memref<8x8x512xf32, #tpu.memory_space<vmem>>, vector<1x8x512xf32>
    %303 = vector.shape_cast %302 : vector<1x8x512xf32> to vector<8x512xf32>
    %304 = vector.extract_strided_slice %300 {offsets = [0, 0], sizes = [8, 512], strides = [1, 1]} : vector<8x1024xf32> to vector<8x512xf32>
    %305 = arith.addf %303, %304 : vector<8x512xf32>
    %306 = vector.extract_strided_slice %305 {offsets = [0, 0], sizes = [8, 128], strides = [1, 1]} : vector<8x512xf32> to vector<8x128xf32>
    %307 = arith.negf %306 : vector<8x128xf32>
    %308 = math.exp %307 : vector<8x128xf32>
    %cst_82 = arith.constant 1.000000e+00 : f32
    %309 = vector.broadcast %cst_82 : f32 to vector<8x128xf32>
    %310 = arith.addf %309, %308 : vector<8x128xf32>
    %311 = arith.divf %309, %310 : vector<8x128xf32>
    %312 = vector.extract_strided_slice %305 {offsets = [0, 128], sizes = [8, 128], strides = [1, 1]} : vector<8x512xf32> to vector<8x128xf32>
    %313 = arith.negf %312 : vector<8x128xf32>
    %314 = math.exp %313 : vector<8x128xf32>
    %cst_83 = arith.constant 1.000000e+00 : f32
    %315 = vector.broadcast %cst_83 : f32 to vector<8x128xf32>
    %316 = arith.addf %315, %314 : vector<8x128xf32>
    %317 = arith.divf %315, %316 : vector<8x128xf32>
    %318 = vector.extract_strided_slice %305 {offsets = [0, 256], sizes = [8, 128], strides = [1, 1]} : vector<8x512xf32> to vector<8x128xf32>
    %319 = math.tanh %318 : vector<8x128xf32>
    %320 = vector.extract_strided_slice %305 {offsets = [0, 384], sizes = [8, 128], strides = [1, 1]} : vector<8x512xf32> to vector<8x128xf32>
    %321 = arith.negf %320 : vector<8x128xf32>
    %322 = math.exp %321 : vector<8x128xf32>
    %cst_84 = arith.constant 1.000000e+00 : f32
    %323 = vector.broadcast %cst_84 : f32 to vector<8x128xf32>
    %324 = arith.addf %323, %322 : vector<8x128xf32>
    %325 = arith.divf %323, %324 : vector<8x128xf32>
    %326 = arith.mulf %317, %257 : vector<8x128xf32>
    %327 = arith.mulf %311, %319 : vector<8x128xf32>
    %328 = arith.addf %326, %327 : vector<8x128xf32>
    %329 = math.tanh %328 : vector<8x128xf32>
    %330 = arith.mulf %325, %329 : vector<8x128xf32>
    %331 = arith.index_cast %298 : i32 to index
    %c0_85 = arith.constant 0 : index
    %c0_86 = arith.constant 0 : index
    %332 = vector.load %arg14[%331, %c0_85, %c0_86] : memref<8x8x512xf32, #tpu.memory_space<vmem>>, vector<1x8x512xf32>
    %333 = vector.shape_cast %332 : vector<1x8x512xf32> to vector<8x512xf32>
    %334 = vector.extract_strided_slice %300 {offsets = [0, 512], sizes = [8, 512], strides = [1, 1]} : vector<8x1024xf32> to vector<8x512xf32>
    %335 = arith.addf %333, %334 : vector<8x512xf32>
    %336 = vector.extract_strided_slice %335 {offsets = [0, 0], sizes = [8, 128], strides = [1, 1]} : vector<8x512xf32> to vector<8x128xf32>
    %337 = arith.negf %336 : vector<8x128xf32>
    %338 = math.exp %337 : vector<8x128xf32>
    %cst_87 = arith.constant 1.000000e+00 : f32
    %339 = vector.broadcast %cst_87 : f32 to vector<8x128xf32>
    %340 = arith.addf %339, %338 : vector<8x128xf32>
    %341 = arith.divf %339, %340 : vector<8x128xf32>
    %342 = vector.extract_strided_slice %335 {offsets = [0, 128], sizes = [8, 128], strides = [1, 1]} : vector<8x512xf32> to vector<8x128xf32>
    %343 = arith.negf %342 : vector<8x128xf32>
    %344 = math.exp %343 : vector<8x128xf32>
    %cst_88 = arith.constant 1.000000e+00 : f32
    %345 = vector.broadcast %cst_88 : f32 to vector<8x128xf32>
    %346 = arith.addf %345, %344 : vector<8x128xf32>
    %347 = arith.divf %345, %346 : vector<8x128xf32>
    %348 = vector.extract_strided_slice %335 {offsets = [0, 256], sizes = [8, 128], strides = [1, 1]} : vector<8x512xf32> to vector<8x128xf32>
    %349 = math.tanh %348 : vector<8x128xf32>
    %350 = vector.extract_strided_slice %335 {offsets = [0, 384], sizes = [8, 128], strides = [1, 1]} : vector<8x512xf32> to vector<8x128xf32>
    %351 = arith.negf %350 : vector<8x128xf32>
    %352 = math.exp %351 : vector<8x128xf32>
    %cst_89 = arith.constant 1.000000e+00 : f32
    %353 = vector.broadcast %cst_89 : f32 to vector<8x128xf32>
    %354 = arith.addf %353, %352 : vector<8x128xf32>
    %355 = arith.divf %353, %354 : vector<8x128xf32>
    %356 = arith.mulf %347, %287 : vector<8x128xf32>
    %357 = arith.mulf %341, %349 : vector<8x128xf32>
    %358 = arith.addf %356, %357 : vector<8x128xf32>
    %359 = math.tanh %358 : vector<8x128xf32>
    %360 = arith.mulf %355, %359 : vector<8x128xf32>
    %361 = arith.index_cast %c4_i32 : i32 to index
    %c0_90 = arith.constant 0 : index
    %c0_91 = arith.constant 0 : index
    %362 = vector.load %arg16[%361, %c0_90, %c0_91] : memref<8x8x128xf32, #tpu.memory_space<vmem>>, vector<1x8x128xf32>
    %363 = vector.shape_cast %362 : vector<1x8x128xf32> to vector<8x128xf32>
    %364 = vector.shape_cast %330 : vector<8x128xf32> to vector<1x8x128xf32>
    tpu.vector_store %arg16[%361, %c0_90, %c0_91], %364 {strides = array<i32>} : memref<8x8x128xf32, #tpu.memory_space<vmem>>, vector<1x8x128xf32>,
    %365 = arith.index_cast %298 : i32 to index
    %c0_92 = arith.constant 0 : index
    %c0_93 = arith.constant 0 : index
    %366 = vector.load %arg17[%365, %c0_92, %c0_93] : memref<8x8x128xf32, #tpu.memory_space<vmem>>, vector<1x8x128xf32>
    %367 = vector.shape_cast %366 : vector<1x8x128xf32> to vector<8x128xf32>
    %368 = vector.shape_cast %360 : vector<8x128xf32> to vector<1x8x128xf32>
    tpu.vector_store %arg17[%365, %c0_92, %c0_93], %368 {strides = array<i32>} : memref<8x8x128xf32, #tpu.memory_space<vmem>>, vector<1x8x128xf32>,
    %c5_i32 = arith.constant 5 : i32
    %c7_i32_94 = arith.constant 7 : i32
    %369 = arith.subi %c7_i32_94, %c5_i32 : i32
    %370 = tpu.concatenate %330, %360 in 1 : vector<8x128xf32>, vector<8x128xf32> -> vector<8x256xf32>
    %cst_95 = arith.constant dense<0.000000e+00> : vector<8x1024xf32>
    %371 = tpu.matmul %370, %12, %cst_95 {dimension_numbers = #tpu.dot_dimension_numbers<[1], [0], [0], [1], [0, 0, 1, 1], [], []>} : vector<8x256xf32>, vector<256x1024xf32>, vector<8x1024xf32> -> vector<8x1024xf32>
    %372 = arith.index_cast %c5_i32 : i32 to index
    %c0_96 = arith.constant 0 : index
    %c0_97 = arith.constant 0 : index
    %373 = vector.load %arg13[%372, %c0_96, %c0_97] : memref<8x8x512xf32, #tpu.memory_space<vmem>>, vector<1x8x512xf32>
    %374 = vector.shape_cast %373 : vector<1x8x512xf32> to vector<8x512xf32>
    %375 = vector.extract_strided_slice %371 {offsets = [0, 0], sizes = [8, 512], strides = [1, 1]} : vector<8x1024xf32> to vector<8x512xf32>
    %376 = arith.addf %374, %375 : vector<8x512xf32>
    %377 = vector.extract_strided_slice %376 {offsets = [0, 0], sizes = [8, 128], strides = [1, 1]} : vector<8x512xf32> to vector<8x128xf32>
    %378 = arith.negf %377 : vector<8x128xf32>
    %379 = math.exp %378 : vector<8x128xf32>
    %cst_98 = arith.constant 1.000000e+00 : f32
    %380 = vector.broadcast %cst_98 : f32 to vector<8x128xf32>
    %381 = arith.addf %380, %379 : vector<8x128xf32>
    %382 = arith.divf %380, %381 : vector<8x128xf32>
    %383 = vector.extract_strided_slice %376 {offsets = [0, 128], sizes = [8, 128], strides = [1, 1]} : vector<8x512xf32> to vector<8x128xf32>
    %384 = arith.negf %383 : vector<8x128xf32>
    %385 = math.exp %384 : vector<8x128xf32>
    %cst_99 = arith.constant 1.000000e+00 : f32
    %386 = vector.broadcast %cst_99 : f32 to vector<8x128xf32>
    %387 = arith.addf %386, %385 : vector<8x128xf32>
    %388 = arith.divf %386, %387 : vector<8x128xf32>
    %389 = vector.extract_strided_slice %376 {offsets = [0, 256], sizes = [8, 128], strides = [1, 1]} : vector<8x512xf32> to vector<8x128xf32>
    %390 = math.tanh %389 : vector<8x128xf32>
    %391 = vector.extract_strided_slice %376 {offsets = [0, 384], sizes = [8, 128], strides = [1, 1]} : vector<8x512xf32> to vector<8x128xf32>
    %392 = arith.negf %391 : vector<8x128xf32>
    %393 = math.exp %392 : vector<8x128xf32>
    %cst_100 = arith.constant 1.000000e+00 : f32
    %394 = vector.broadcast %cst_100 : f32 to vector<8x128xf32>
    %395 = arith.addf %394, %393 : vector<8x128xf32>
    %396 = arith.divf %394, %395 : vector<8x128xf32>
    %397 = arith.mulf %388, %328 : vector<8x128xf32>
    %398 = arith.mulf %382, %390 : vector<8x128xf32>
    %399 = arith.addf %397, %398 : vector<8x128xf32>
    %400 = math.tanh %399 : vector<8x128xf32>
    %401 = arith.mulf %396, %400 : vector<8x128xf32>
    %402 = arith.index_cast %369 : i32 to index
    %c0_101 = arith.constant 0 : index
    %c0_102 = arith.constant 0 : index
    %403 = vector.load %arg14[%402, %c0_101, %c0_102] : memref<8x8x512xf32, #tpu.memory_space<vmem>>, vector<1x8x512xf32>
    %404 = vector.shape_cast %403 : vector<1x8x512xf32> to vector<8x512xf32>
    %405 = vector.extract_strided_slice %371 {offsets = [0, 512], sizes = [8, 512], strides = [1, 1]} : vector<8x1024xf32> to vector<8x512xf32>
    %406 = arith.addf %404, %405 : vector<8x512xf32>
    %407 = vector.extract_strided_slice %406 {offsets = [0, 0], sizes = [8, 128], strides = [1, 1]} : vector<8x512xf32> to vector<8x128xf32>
    %408 = arith.negf %407 : vector<8x128xf32>
    %409 = math.exp %408 : vector<8x128xf32>
    %cst_103 = arith.constant 1.000000e+00 : f32
    %410 = vector.broadcast %cst_103 : f32 to vector<8x128xf32>
    %411 = arith.addf %410, %409 : vector<8x128xf32>
    %412 = arith.divf %410, %411 : vector<8x128xf32>
    %413 = vector.extract_strided_slice %406 {offsets = [0, 128], sizes = [8, 128], strides = [1, 1]} : vector<8x512xf32> to vector<8x128xf32>
    %414 = arith.negf %413 : vector<8x128xf32>
    %415 = math.exp %414 : vector<8x128xf32>
    %cst_104 = arith.constant 1.000000e+00 : f32
    %416 = vector.broadcast %cst_104 : f32 to vector<8x128xf32>
    %417 = arith.addf %416, %415 : vector<8x128xf32>
    %418 = arith.divf %416, %417 : vector<8x128xf32>
    %419 = vector.extract_strided_slice %406 {offsets = [0, 256], sizes = [8, 128], strides = [1, 1]} : vector<8x512xf32> to vector<8x128xf32>
    %420 = math.tanh %419 : vector<8x128xf32>
    %421 = vector.extract_strided_slice %406 {offsets = [0, 384], sizes = [8, 128], strides = [1, 1]} : vector<8x512xf32> to vector<8x128xf32>
    %422 = arith.negf %421 : vector<8x128xf32>
    %423 = math.exp %422 : vector<8x128xf32>
    %cst_105 = arith.constant 1.000000e+00 : f32
    %424 = vector.broadcast %cst_105 : f32 to vector<8x128xf32>
    %425 = arith.addf %424, %423 : vector<8x128xf32>
    %426 = arith.divf %424, %425 : vector<8x128xf32>
    %427 = arith.mulf %418, %358 : vector<8x128xf32>
    %428 = arith.mulf %412, %420 : vector<8x128xf32>
    %429 = arith.addf %427, %428 : vector<8x128xf32>
    %430 = math.tanh %429 : vector<8x128xf32>
    %431 = arith.mulf %426, %430 : vector<8x128xf32>
    %432 = arith.index_cast %c5_i32 : i32 to index
    %c0_106 = arith.constant 0 : index
    %c0_107 = arith.constant 0 : index
    %433 = vector.load %arg16[%432, %c0_106, %c0_107] : memref<8x8x128xf32, #tpu.memory_space<vmem>>, vector<1x8x128xf32>
    %434 = vector.shape_cast %433 : vector<1x8x128xf32> to vector<8x128xf32>
    %435 = vector.shape_cast %401 : vector<8x128xf32> to vector<1x8x128xf32>
    tpu.vector_store %arg16[%432, %c0_106, %c0_107], %435 {strides = array<i32>} : memref<8x8x128xf32, #tpu.memory_space<vmem>>, vector<1x8x128xf32>,
    %436 = arith.index_cast %369 : i32 to index
    %c0_108 = arith.constant 0 : index
    %c0_109 = arith.constant 0 : index
    %437 = vector.load %arg17[%436, %c0_108, %c0_109] : memref<8x8x128xf32, #tpu.memory_space<vmem>>, vector<1x8x128xf32>
    %438 = vector.shape_cast %437 : vector<1x8x128xf32> to vector<8x128xf32>
    %439 = vector.shape_cast %431 : vector<8x128xf32> to vector<1x8x128xf32>
    tpu.vector_store %arg17[%436, %c0_108, %c0_109], %439 {strides = array<i32>} : memref<8x8x128xf32, #tpu.memory_space<vmem>>, vector<1x8x128xf32>,
    %c6_i32 = arith.constant 6 : i32
    %c7_i32_110 = arith.constant 7 : i32
    %440 = arith.subi %c7_i32_110, %c6_i32 : i32
    %441 = tpu.concatenate %401, %431 in 1 : vector<8x128xf32>, vector<8x128xf32> -> vector<8x256xf32>
    %cst_111 = arith.constant dense<0.000000e+00> : vector<8x1024xf32>
    %442 = tpu.matmul %441, %12, %cst_111 {dimension_numbers = #tpu.dot_dimension_numbers<[1], [0], [0], [1], [0, 0, 1, 1], [], []>} : vector<8x256xf32>, vector<256x1024xf32>, vector<8x1024xf32> -> vector<8x1024xf32>
    %443 = arith.index_cast %c6_i32 : i32 to index
    %c0_112 = arith.constant 0 : index
    %c0_113 = arith.constant 0 : index
    %444 = vector.load %arg13[%443, %c0_112, %c0_113] : memref<8x8x512xf32, #tpu.memory_space<vmem>>, vector<1x8x512xf32>
    %445 = vector.shape_cast %444 : vector<1x8x512xf32> to vector<8x512xf32>
    %446 = vector.extract_strided_slice %442 {offsets = [0, 0], sizes = [8, 512], strides = [1, 1]} : vector<8x1024xf32> to vector<8x512xf32>
    %447 = arith.addf %445, %446 : vector<8x512xf32>
    %448 = vector.extract_strided_slice %447 {offsets = [0, 0], sizes = [8, 128], strides = [1, 1]} : vector<8x512xf32> to vector<8x128xf32>
    %449 = arith.negf %448 : vector<8x128xf32>
    %450 = math.exp %449 : vector<8x128xf32>
    %cst_114 = arith.constant 1.000000e+00 : f32
    %451 = vector.broadcast %cst_114 : f32 to vector<8x128xf32>
    %452 = arith.addf %451, %450 : vector<8x128xf32>
    %453 = arith.divf %451, %452 : vector<8x128xf32>
    %454 = vector.extract_strided_slice %447 {offsets = [0, 128], sizes = [8, 128], strides = [1, 1]} : vector<8x512xf32> to vector<8x128xf32>
    %455 = arith.negf %454 : vector<8x128xf32>
    %456 = math.exp %455 : vector<8x128xf32>
    %cst_115 = arith.constant 1.000000e+00 : f32
    %457 = vector.broadcast %cst_115 : f32 to vector<8x128xf32>
    %458 = arith.addf %457, %456 : vector<8x128xf32>
    %459 = arith.divf %457, %458 : vector<8x128xf32>
    %460 = vector.extract_strided_slice %447 {offsets = [0, 256], sizes = [8, 128], strides = [1, 1]} : vector<8x512xf32> to vector<8x128xf32>
    %461 = math.tanh %460 : vector<8x128xf32>
    %462 = vector.extract_strided_slice %447 {offsets = [0, 384], sizes = [8, 128], strides = [1, 1]} : vector<8x512xf32> to vector<8x128xf32>
    %463 = arith.negf %462 : vector<8x128xf32>
    %464 = math.exp %463 : vector<8x128xf32>
    %cst_116 = arith.constant 1.000000e+00 : f32
    %465 = vector.broadcast %cst_116 : f32 to vector<8x128xf32>
    %466 = arith.addf %465, %464 : vector<8x128xf32>
    %467 = arith.divf %465, %466 : vector<8x128xf32>
    %468 = arith.mulf %459, %399 : vector<8x128xf32>
    %469 = arith.mulf %453, %461 : vector<8x128xf32>
    %470 = arith.addf %468, %469 : vector<8x128xf32>
    %471 = math.tanh %470 : vector<8x128xf32>
    %472 = arith.mulf %467, %471 : vector<8x128xf32>
    %473 = arith.index_cast %440 : i32 to index
    %c0_117 = arith.constant 0 : index
    %c0_118 = arith.constant 0 : index
    %474 = vector.load %arg14[%473, %c0_117, %c0_118] : memref<8x8x512xf32, #tpu.memory_space<vmem>>, vector<1x8x512xf32>
    %475 = vector.shape_cast %474 : vector<1x8x512xf32> to vector<8x512xf32>
    %476 = vector.extract_strided_slice %442 {offsets = [0, 512], sizes = [8, 512], strides = [1, 1]} : vector<8x1024xf32> to vector<8x512xf32>
    %477 = arith.addf %475, %476 : vector<8x512xf32>
    %478 = vector.extract_strided_slice %477 {offsets = [0, 0], sizes = [8, 128], strides = [1, 1]} : vector<8x512xf32> to vector<8x128xf32>
    %479 = arith.negf %478 : vector<8x128xf32>
    %480 = math.exp %479 : vector<8x128xf32>
    %cst_119 = arith.constant 1.000000e+00 : f32
    %481 = vector.broadcast %cst_119 : f32 to vector<8x128xf32>
    %482 = arith.addf %481, %480 : vector<8x128xf32>
    %483 = arith.divf %481, %482 : vector<8x128xf32>
    %484 = vector.extract_strided_slice %477 {offsets = [0, 128], sizes = [8, 128], strides = [1, 1]} : vector<8x512xf32> to vector<8x128xf32>
    %485 = arith.negf %484 : vector<8x128xf32>
    %486 = math.exp %485 : vector<8x128xf32>
    %cst_120 = arith.constant 1.000000e+00 : f32
    %487 = vector.broadcast %cst_120 : f32 to vector<8x128xf32>
    %488 = arith.addf %487, %486 : vector<8x128xf32>
    %489 = arith.divf %487, %488 : vector<8x128xf32>
    %490 = vector.extract_strided_slice %477 {offsets = [0, 256], sizes = [8, 128], strides = [1, 1]} : vector<8x512xf32> to vector<8x128xf32>
    %491 = math.tanh %490 : vector<8x128xf32>
    %492 = vector.extract_strided_slice %477 {offsets = [0, 384], sizes = [8, 128], strides = [1, 1]} : vector<8x512xf32> to vector<8x128xf32>
    %493 = arith.negf %492 : vector<8x128xf32>
    %494 = math.exp %493 : vector<8x128xf32>
    %cst_121 = arith.constant 1.000000e+00 : f32
    %495 = vector.broadcast %cst_121 : f32 to vector<8x128xf32>
    %496 = arith.addf %495, %494 : vector<8x128xf32>
    %497 = arith.divf %495, %496 : vector<8x128xf32>
    %498 = arith.mulf %489, %429 : vector<8x128xf32>
    %499 = arith.mulf %483, %491 : vector<8x128xf32>
    %500 = arith.addf %498, %499 : vector<8x128xf32>
    %501 = math.tanh %500 : vector<8x128xf32>
    %502 = arith.mulf %497, %501 : vector<8x128xf32>
    %503 = arith.index_cast %c6_i32 : i32 to index
    %c0_122 = arith.constant 0 : index
    %c0_123 = arith.constant 0 : index
    %504 = vector.load %arg16[%503, %c0_122, %c0_123] : memref<8x8x128xf32, #tpu.memory_space<vmem>>, vector<1x8x128xf32>
    %505 = vector.shape_cast %504 : vector<1x8x128xf32> to vector<8x128xf32>
    %506 = vector.shape_cast %472 : vector<8x128xf32> to vector<1x8x128xf32>
    tpu.vector_store %arg16[%503, %c0_122, %c0_123], %506 {strides = array<i32>} : memref<8x8x128xf32, #tpu.memory_space<vmem>>, vector<1x8x128xf32>,
    %507 = arith.index_cast %440 : i32 to index
    %c0_124 = arith.constant 0 : index
    %c0_125 = arith.constant 0 : index
    %508 = vector.load %arg17[%507, %c0_124, %c0_125] : memref<8x8x128xf32, #tpu.memory_space<vmem>>, vector<1x8x128xf32>
    %509 = vector.shape_cast %508 : vector<1x8x128xf32> to vector<8x128xf32>
    %510 = vector.shape_cast %502 : vector<8x128xf32> to vector<1x8x128xf32>
    tpu.vector_store %arg17[%507, %c0_124, %c0_125], %510 {strides = array<i32>} : memref<8x8x128xf32, #tpu.memory_space<vmem>>, vector<1x8x128xf32>,
    %c7_i32_126 = arith.constant 7 : i32
    %c7_i32_127 = arith.constant 7 : i32
    %511 = arith.subi %c7_i32_127, %c7_i32_126 : i32
    %512 = tpu.concatenate %472, %502 in 1 : vector<8x128xf32>, vector<8x128xf32> -> vector<8x256xf32>
    %cst_128 = arith.constant dense<0.000000e+00> : vector<8x1024xf32>
    %513 = tpu.matmul %512, %12, %cst_128 {dimension_numbers = #tpu.dot_dimension_numbers<[1], [0], [0], [1], [0, 0, 1, 1], [], []>} : vector<8x256xf32>, vector<256x1024xf32>, vector<8x1024xf32> -> vector<8x1024xf32>
    %514 = arith.index_cast %c7_i32_126 : i32 to index
    %c0_129 = arith.constant 0 : index
    %c0_130 = arith.constant 0 : index
    %515 = vector.load %arg13[%514, %c0_129, %c0_130] : memref<8x8x512xf32, #tpu.memory_space<vmem>>, vector<1x8x512xf32>
    %516 = vector.shape_cast %515 : vector<1x8x512xf32> to vector<8x512xf32>
    %517 = vector.extract_strided_slice %513 {offsets = [0, 0], sizes = [8, 512], strides = [1, 1]} : vector<8x1024xf32> to vector<8x512xf32>
    %518 = arith.addf %516, %517 : vector<8x512xf32>
    %519 = vector.extract_strided_slice %518 {offsets = [0, 0], sizes = [8, 128], strides = [1, 1]} : vector<8x512xf32> to vector<8x128xf32>
    %520 = arith.negf %519 : vector<8x128xf32>
    %521 = math.exp %520 : vector<8x128xf32>
    %cst_131 = arith.constant 1.000000e+00 : f32
    %522 = vector.broadcast %cst_131 : f32 to vector<8x128xf32>
    %523 = arith.addf %522, %521 : vector<8x128xf32>
    %524 = arith.divf %522, %523 : vector<8x128xf32>
    %525 = vector.extract_strided_slice %518 {offsets = [0, 128], sizes = [8, 128], strides = [1, 1]} : vector<8x512xf32> to vector<8x128xf32>
    %526 = arith.negf %525 : vector<8x128xf32>
    %527 = math.exp %526 : vector<8x128xf32>
    %cst_132 = arith.constant 1.000000e+00 : f32
    %528 = vector.broadcast %cst_132 : f32 to vector<8x128xf32>
    %529 = arith.addf %528, %527 : vector<8x128xf32>
    %530 = arith.divf %528, %529 : vector<8x128xf32>
    %531 = vector.extract_strided_slice %518 {offsets = [0, 256], sizes = [8, 128], strides = [1, 1]} : vector<8x512xf32> to vector<8x128xf32>
    %532 = math.tanh %531 : vector<8x128xf32>
    %533 = vector.extract_strided_slice %518 {offsets = [0, 384], sizes = [8, 128], strides = [1, 1]} : vector<8x512xf32> to vector<8x128xf32>
    %534 = arith.negf %533 : vector<8x128xf32>
    %535 = math.exp %534 : vector<8x128xf32>
    %cst_133 = arith.constant 1.000000e+00 : f32
    %536 = vector.broadcast %cst_133 : f32 to vector<8x128xf32>
    %537 = arith.addf %536, %535 : vector<8x128xf32>
    %538 = arith.divf %536, %537 : vector<8x128xf32>
    %539 = arith.mulf %530, %470 : vector<8x128xf32>
    %540 = arith.mulf %524, %532 : vector<8x128xf32>
    %541 = arith.addf %539, %540 : vector<8x128xf32>
    %542 = math.tanh %541 : vector<8x128xf32>
    %543 = arith.mulf %538, %542 : vector<8x128xf32>
    %544 = arith.index_cast %511 : i32 to index
    %c0_134 = arith.constant 0 : index
    %c0_135 = arith.constant 0 : index
    %545 = vector.load %arg14[%544, %c0_134, %c0_135] : memref<8x8x512xf32, #tpu.memory_space<vmem>>, vector<1x8x512xf32>
    %546 = vector.shape_cast %545 : vector<1x8x512xf32> to vector<8x512xf32>
    %547 = vector.extract_strided_slice %513 {offsets = [0, 512], sizes = [8, 512], strides = [1, 1]} : vector<8x1024xf32> to vector<8x512xf32>
    %548 = arith.addf %546, %547 : vector<8x512xf32>
    %549 = vector.extract_strided_slice %548 {offsets = [0, 0], sizes = [8, 128], strides = [1, 1]} : vector<8x512xf32> to vector<8x128xf32>
    %550 = arith.negf %549 : vector<8x128xf32>
    %551 = math.exp %550 : vector<8x128xf32>
    %cst_136 = arith.constant 1.000000e+00 : f32
    %552 = vector.broadcast %cst_136 : f32 to vector<8x128xf32>
    %553 = arith.addf %552, %551 : vector<8x128xf32>
    %554 = arith.divf %552, %553 : vector<8x128xf32>
    %555 = vector.extract_strided_slice %548 {offsets = [0, 128], sizes = [8, 128], strides = [1, 1]} : vector<8x512xf32> to vector<8x128xf32>
    %556 = arith.negf %555 : vector<8x128xf32>
    %557 = math.exp %556 : vector<8x128xf32>
    %cst_137 = arith.constant 1.000000e+00 : f32
    %558 = vector.broadcast %cst_137 : f32 to vector<8x128xf32>
    %559 = arith.addf %558, %557 : vector<8x128xf32>
    %560 = arith.divf %558, %559 : vector<8x128xf32>
    %561 = vector.extract_strided_slice %548 {offsets = [0, 256], sizes = [8, 128], strides = [1, 1]} : vector<8x512xf32> to vector<8x128xf32>
    %562 = math.tanh %561 : vector<8x128xf32>
    %563 = vector.extract_strided_slice %548 {offsets = [0, 384], sizes = [8, 128], strides = [1, 1]} : vector<8x512xf32> to vector<8x128xf32>
    %564 = arith.negf %563 : vector<8x128xf32>
    %565 = math.exp %564 : vector<8x128xf32>
    %cst_138 = arith.constant 1.000000e+00 : f32
    %566 = vector.broadcast %cst_138 : f32 to vector<8x128xf32>
    %567 = arith.addf %566, %565 : vector<8x128xf32>
    %568 = arith.divf %566, %567 : vector<8x128xf32>
    %569 = arith.mulf %560, %500 : vector<8x128xf32>
    %570 = arith.mulf %554, %562 : vector<8x128xf32>
    %571 = arith.addf %569, %570 : vector<8x128xf32>
    %572 = math.tanh %571 : vector<8x128xf32>
    %573 = arith.mulf %568, %572 : vector<8x128xf32>
    %574 = arith.index_cast %c7_i32_126 : i32 to index
    %c0_139 = arith.constant 0 : index
    %c0_140 = arith.constant 0 : index
    %575 = vector.load %arg16[%574, %c0_139, %c0_140] : memref<8x8x128xf32, #tpu.memory_space<vmem>>, vector<1x8x128xf32>
    %576 = vector.shape_cast %575 : vector<1x8x128xf32> to vector<8x128xf32>
    %577 = vector.shape_cast %543 : vector<8x128xf32> to vector<1x8x128xf32>
    tpu.vector_store %arg16[%574, %c0_139, %c0_140], %577 {strides = array<i32>} : memref<8x8x128xf32, #tpu.memory_space<vmem>>, vector<1x8x128xf32>,
    %578 = arith.index_cast %511 : i32 to index
    %c0_141 = arith.constant 0 : index
    %c0_142 = arith.constant 0 : index
    %579 = vector.load %arg17[%578, %c0_141, %c0_142] : memref<8x8x128xf32, #tpu.memory_space<vmem>>, vector<1x8x128xf32>
    %580 = vector.shape_cast %579 : vector<1x8x128xf32> to vector<8x128xf32>
    %581 = vector.shape_cast %573 : vector<8x128xf32> to vector<1x8x128xf32>
    tpu.vector_store %arg17[%578, %c0_141, %c0_142], %581 {strides = array<i32>} : memref<8x8x128xf32, #tpu.memory_space<vmem>>, vector<1x8x128xf32>,
    %c8_i32 = arith.constant 8 : i32
    %c0_143 = arith.constant 0 : index
    %c0_144 = arith.constant 0 : index
    %c0_145 = arith.constant 0 : index
    %582 = vector.load %arg16[%c0_143, %c0_144, %c0_145] : memref<8x8x128xf32, #tpu.memory_space<vmem>>, vector<8x8x128xf32>
    %c0_146 = arith.constant 0 : index
    %c0_147 = arith.constant 0 : index
    %c0_148 = arith.constant 0 : index
    %583 = vector.load %arg17[%c0_146, %c0_147, %c0_148] : memref<8x8x128xf32, #tpu.memory_space<vmem>>, vector<8x8x128xf32>
    %584 = tpu.concatenate %582, %583 in 2 : vector<8x8x128xf32>, vector<8x8x128xf32> -> vector<8x8x256xf32>
    %585 = vector.shape_cast %584 : vector<8x8x256xf32> to vector<64x256xf32>
    %c0_149 = arith.constant 0 : index
    %c0_150 = arith.constant 0 : index
    %586 = vector.load %arg5[%c0_149, %c0_150] : memref<256x512xf32, #tpu.memory_space<vmem>>, vector<256x512xf32>
    %cst_151 = arith.constant dense<0.000000e+00> : vector<64x512xf32>
    %587 = tpu.matmul %585, %586, %cst_151 {dimension_numbers = #tpu.dot_dimension_numbers<[1], [0], [0], [1], [0, 0, 1, 1], [], []>} : vector<64x256xf32>, vector<256x512xf32>, vector<64x512xf32> -> vector<64x512xf32>
    %c0_152 = arith.constant 0 : index
    %c0_153 = arith.constant 0 : index
    %588 = vector.load %arg6[%c0_152, %c0_153] : memref<1x512xf32, #tpu.memory_space<vmem>>, vector<1x512xf32>
    %589 = vector.broadcast %588 : vector<1x512xf32> to vector<64x512xf32>
    %590 = arith.addf %587, %589 : vector<64x512xf32>
    %591 = vector.shape_cast %590 : vector<64x512xf32> to vector<8x8x512xf32>
    %c0_154 = arith.constant 0 : index
    %c0_155 = arith.constant 0 : index
    %c0_156 = arith.constant 0 : index
    %592 = vector.load %arg15[%c0_154, %c0_155, %c0_156] : memref<8x8x512xf32, #tpu.memory_space<vmem>>, vector<8x8x512xf32>
    tpu.vector_store %arg15[%c0_154, %c0_155, %c0_156], %591 {strides = array<i32>} : memref<8x8x512xf32, #tpu.memory_space<vmem>>, vector<8x8x512xf32>,
    %c0_157 = arith.constant 0 : index
    %c0_158 = arith.constant 0 : index
    %593 = vector.load %arg9[%c0_157, %c0_158] : memref<128x512xf32, #tpu.memory_space<vmem>>, vector<128x512xf32>
    %c0_i32_159 = arith.constant 0 : i32
    %cst_160 = arith.constant dense<0.000000e+00> : vector<8x512xf32>
    %594 = tpu.matmul %13, %593, %cst_160 {dimension_numbers = #tpu.dot_dimension_numbers<[1], [0], [0], [1], [0, 0, 1, 1], [], []>} : vector<8x128xf32>, vector<128x512xf32>, vector<8x512xf32> -> vector<8x512xf32>
    %595 = arith.index_cast %c0_i32_159 : i32 to index
    %c0_161 = arith.constant 0 : index
    %c0_162 = arith.constant 0 : index
    %596 = vector.load %arg15[%595, %c0_161, %c0_162] : memref<8x8x512xf32, #tpu.memory_space<vmem>>, vector<1x8x512xf32>
    %597 = vector.shape_cast %596 : vector<1x8x512xf32> to vector<8x512xf32>
    %598 = arith.addf %597, %594 : vector<8x512xf32>
    %599 = vector.extract_strided_slice %598 {offsets = [0, 0], sizes = [8, 128], strides = [1, 1]} : vector<8x512xf32> to vector<8x128xf32>
    %600 = arith.negf %599 : vector<8x128xf32>
    %601 = math.exp %600 : vector<8x128xf32>
    %cst_163 = arith.constant 1.000000e+00 : f32
    %602 = vector.broadcast %cst_163 : f32 to vector<8x128xf32>
    %603 = arith.addf %602, %601 : vector<8x128xf32>
    %604 = arith.divf %602, %603 : vector<8x128xf32>
    %605 = vector.extract_strided_slice %598 {offsets = [0, 128], sizes = [8, 128], strides = [1, 1]} : vector<8x512xf32> to vector<8x128xf32>
    %606 = arith.negf %605 : vector<8x128xf32>
    %607 = math.exp %606 : vector<8x128xf32>
    %cst_164 = arith.constant 1.000000e+00 : f32
    %608 = vector.broadcast %cst_164 : f32 to vector<8x128xf32>
    %609 = arith.addf %608, %607 : vector<8x128xf32>
    %610 = arith.divf %608, %609 : vector<8x128xf32>
    %611 = vector.extract_strided_slice %598 {offsets = [0, 256], sizes = [8, 128], strides = [1, 1]} : vector<8x512xf32> to vector<8x128xf32>
    %612 = math.tanh %611 : vector<8x128xf32>
    %613 = vector.extract_strided_slice %598 {offsets = [0, 384], sizes = [8, 128], strides = [1, 1]} : vector<8x512xf32> to vector<8x128xf32>
    %614 = arith.negf %613 : vector<8x128xf32>
    %615 = math.exp %614 : vector<8x128xf32>
    %cst_165 = arith.constant 1.000000e+00 : f32
    %616 = vector.broadcast %cst_165 : f32 to vector<8x128xf32>
    %617 = arith.addf %616, %615 : vector<8x128xf32>
    %618 = arith.divf %616, %617 : vector<8x128xf32>
    %619 = arith.mulf %610, %13 : vector<8x128xf32>
    %620 = arith.mulf %604, %612 : vector<8x128xf32>
    %621 = arith.addf %619, %620 : vector<8x128xf32>
    %622 = math.tanh %621 : vector<8x128xf32>
    %623 = arith.mulf %618, %622 : vector<8x128xf32>
    %c1_i32_166 = arith.constant 1 : i32
    %cst_167 = arith.constant dense<0.000000e+00> : vector<8x512xf32>
    %624 = tpu.matmul %623, %593, %cst_167 {dimension_numbers = #tpu.dot_dimension_numbers<[1], [0], [0], [1], [0, 0, 1, 1], [], []>} : vector<8x128xf32>, vector<128x512xf32>, vector<8x512xf32> -> vector<8x512xf32>
    %625 = arith.index_cast %c1_i32_166 : i32 to index
    %c0_168 = arith.constant 0 : index
    %c0_169 = arith.constant 0 : index
    %626 = vector.load %arg15[%625, %c0_168, %c0_169] : memref<8x8x512xf32, #tpu.memory_space<vmem>>, vector<1x8x512xf32>
    %627 = vector.shape_cast %626 : vector<1x8x512xf32> to vector<8x512xf32>
    %628 = arith.addf %627, %624 : vector<8x512xf32>
    %629 = vector.extract_strided_slice %628 {offsets = [0, 0], sizes = [8, 128], strides = [1, 1]} : vector<8x512xf32> to vector<8x128xf32>
    %630 = arith.negf %629 : vector<8x128xf32>
    %631 = math.exp %630 : vector<8x128xf32>
    %cst_170 = arith.constant 1.000000e+00 : f32
    %632 = vector.broadcast %cst_170 : f32 to vector<8x128xf32>
    %633 = arith.addf %632, %631 : vector<8x128xf32>
    %634 = arith.divf %632, %633 : vector<8x128xf32>
    %635 = vector.extract_strided_slice %628 {offsets = [0, 128], sizes = [8, 128], strides = [1, 1]} : vector<8x512xf32> to vector<8x128xf32>
    %636 = arith.negf %635 : vector<8x128xf32>
    %637 = math.exp %636 : vector<8x128xf32>
    %cst_171 = arith.constant 1.000000e+00 : f32
    %638 = vector.broadcast %cst_171 : f32 to vector<8x128xf32>
    %639 = arith.addf %638, %637 : vector<8x128xf32>
    %640 = arith.divf %638, %639 : vector<8x128xf32>
    %641 = vector.extract_strided_slice %628 {offsets = [0, 256], sizes = [8, 128], strides = [1, 1]} : vector<8x512xf32> to vector<8x128xf32>
    %642 = math.tanh %641 : vector<8x128xf32>
    %643 = vector.extract_strided_slice %628 {offsets = [0, 384], sizes = [8, 128], strides = [1, 1]} : vector<8x512xf32> to vector<8x128xf32>
    %644 = arith.negf %643 : vector<8x128xf32>
    %645 = math.exp %644 : vector<8x128xf32>
    %cst_172 = arith.constant 1.000000e+00 : f32
    %646 = vector.broadcast %cst_172 : f32 to vector<8x128xf32>
    %647 = arith.addf %646, %645 : vector<8x128xf32>
    %648 = arith.divf %646, %647 : vector<8x128xf32>
    %649 = arith.mulf %640, %621 : vector<8x128xf32>
    %650 = arith.mulf %634, %642 : vector<8x128xf32>
    %651 = arith.addf %649, %650 : vector<8x128xf32>
    %652 = math.tanh %651 : vector<8x128xf32>
    %653 = arith.mulf %648, %652 : vector<8x128xf32>
    %c2_i32_173 = arith.constant 2 : i32
    %cst_174 = arith.constant dense<0.000000e+00> : vector<8x512xf32>
    %654 = tpu.matmul %653, %593, %cst_174 {dimension_numbers = #tpu.dot_dimension_numbers<[1], [0], [0], [1], [0, 0, 1, 1], [], []>} : vector<8x128xf32>, vector<128x512xf32>, vector<8x512xf32> -> vector<8x512xf32>
    %655 = arith.index_cast %c2_i32_173 : i32 to index
    %c0_175 = arith.constant 0 : index
    %c0_176 = arith.constant 0 : index
    %656 = vector.load %arg15[%655, %c0_175, %c0_176] : memref<8x8x512xf32, #tpu.memory_space<vmem>>, vector<1x8x512xf32>
    %657 = vector.shape_cast %656 : vector<1x8x512xf32> to vector<8x512xf32>
    %658 = arith.addf %657, %654 : vector<8x512xf32>
    %659 = vector.extract_strided_slice %658 {offsets = [0, 0], sizes = [8, 128], strides = [1, 1]} : vector<8x512xf32> to vector<8x128xf32>
    %660 = arith.negf %659 : vector<8x128xf32>
    %661 = math.exp %660 : vector<8x128xf32>
    %cst_177 = arith.constant 1.000000e+00 : f32
    %662 = vector.broadcast %cst_177 : f32 to vector<8x128xf32>
    %663 = arith.addf %662, %661 : vector<8x128xf32>
    %664 = arith.divf %662, %663 : vector<8x128xf32>
    %665 = vector.extract_strided_slice %658 {offsets = [0, 128], sizes = [8, 128], strides = [1, 1]} : vector<8x512xf32> to vector<8x128xf32>
    %666 = arith.negf %665 : vector<8x128xf32>
    %667 = math.exp %666 : vector<8x128xf32>
    %cst_178 = arith.constant 1.000000e+00 : f32
    %668 = vector.broadcast %cst_178 : f32 to vector<8x128xf32>
    %669 = arith.addf %668, %667 : vector<8x128xf32>
    %670 = arith.divf %668, %669 : vector<8x128xf32>
    %671 = vector.extract_strided_slice %658 {offsets = [0, 256], sizes = [8, 128], strides = [1, 1]} : vector<8x512xf32> to vector<8x128xf32>
    %672 = math.tanh %671 : vector<8x128xf32>
    %673 = vector.extract_strided_slice %658 {offsets = [0, 384], sizes = [8, 128], strides = [1, 1]} : vector<8x512xf32> to vector<8x128xf32>
    %674 = arith.negf %673 : vector<8x128xf32>
    %675 = math.exp %674 : vector<8x128xf32>
    %cst_179 = arith.constant 1.000000e+00 : f32
    %676 = vector.broadcast %cst_179 : f32 to vector<8x128xf32>
    %677 = arith.addf %676, %675 : vector<8x128xf32>
    %678 = arith.divf %676, %677 : vector<8x128xf32>
    %679 = arith.mulf %670, %651 : vector<8x128xf32>
    %680 = arith.mulf %664, %672 : vector<8x128xf32>
    %681 = arith.addf %679, %680 : vector<8x128xf32>
    %682 = math.tanh %681 : vector<8x128xf32>
    %683 = arith.mulf %678, %682 : vector<8x128xf32>
    %c3_i32_180 = arith.constant 3 : i32
    %cst_181 = arith.constant dense<0.000000e+00> : vector<8x512xf32>
    %684 = tpu.matmul %683, %593, %cst_181 {dimension_numbers = #tpu.dot_dimension_numbers<[1], [0], [0], [1], [0, 0, 1, 1], [], []>} : vector<8x128xf32>, vector<128x512xf32>, vector<8x512xf32> -> vector<8x512xf32>
    %685 = arith.index_cast %c3_i32_180 : i32 to index
    %c0_182 = arith.constant 0 : index
    %c0_183 = arith.constant 0 : index
    %686 = vector.load %arg15[%685, %c0_182, %c0_183] : memref<8x8x512xf32, #tpu.memory_space<vmem>>, vector<1x8x512xf32>
    %687 = vector.shape_cast %686 : vector<1x8x512xf32> to vector<8x512xf32>
    %688 = arith.addf %687, %684 : vector<8x512xf32>
    %689 = vector.extract_strided_slice %688 {offsets = [0, 0], sizes = [8, 128], strides = [1, 1]} : vector<8x512xf32> to vector<8x128xf32>
    %690 = arith.negf %689 : vector<8x128xf32>
    %691 = math.exp %690 : vector<8x128xf32>
    %cst_184 = arith.constant 1.000000e+00 : f32
    %692 = vector.broadcast %cst_184 : f32 to vector<8x128xf32>
    %693 = arith.addf %692, %691 : vector<8x128xf32>
    %694 = arith.divf %692, %693 : vector<8x128xf32>
    %695 = vector.extract_strided_slice %688 {offsets = [0, 128], sizes = [8, 128], strides = [1, 1]} : vector<8x512xf32> to vector<8x128xf32>
    %696 = arith.negf %695 : vector<8x128xf32>
    %697 = math.exp %696 : vector<8x128xf32>
    %cst_185 = arith.constant 1.000000e+00 : f32
    %698 = vector.broadcast %cst_185 : f32 to vector<8x128xf32>
    %699 = arith.addf %698, %697 : vector<8x128xf32>
    %700 = arith.divf %698, %699 : vector<8x128xf32>
    %701 = vector.extract_strided_slice %688 {offsets = [0, 256], sizes = [8, 128], strides = [1, 1]} : vector<8x512xf32> to vector<8x128xf32>
    %702 = math.tanh %701 : vector<8x128xf32>
    %703 = vector.extract_strided_slice %688 {offsets = [0, 384], sizes = [8, 128], strides = [1, 1]} : vector<8x512xf32> to vector<8x128xf32>
    %704 = arith.negf %703 : vector<8x128xf32>
    %705 = math.exp %704 : vector<8x128xf32>
    %cst_186 = arith.constant 1.000000e+00 : f32
    %706 = vector.broadcast %cst_186 : f32 to vector<8x128xf32>
    %707 = arith.addf %706, %705 : vector<8x128xf32>
    %708 = arith.divf %706, %707 : vector<8x128xf32>
    %709 = arith.mulf %700, %681 : vector<8x128xf32>
    %710 = arith.mulf %694, %702 : vector<8x128xf32>
    %711 = arith.addf %709, %710 : vector<8x128xf32>
    %712 = math.tanh %711 : vector<8x128xf32>
    %713 = arith.mulf %708, %712 : vector<8x128xf32>
    %c4_i32_187 = arith.constant 4 : i32
    %cst_188 = arith.constant dense<0.000000e+00> : vector<8x512xf32>
    %714 = tpu.matmul %713, %593, %cst_188 {dimension_numbers = #tpu.dot_dimension_numbers<[1], [0], [0], [1], [0, 0, 1, 1], [], []>} : vector<8x128xf32>, vector<128x512xf32>, vector<8x512xf32> -> vector<8x512xf32>
    %715 = arith.index_cast %c4_i32_187 : i32 to index
    %c0_189 = arith.constant 0 : index
    %c0_190 = arith.constant 0 : index
    %716 = vector.load %arg15[%715, %c0_189, %c0_190] : memref<8x8x512xf32, #tpu.memory_space<vmem>>, vector<1x8x512xf32>
    %717 = vector.shape_cast %716 : vector<1x8x512xf32> to vector<8x512xf32>
    %718 = arith.addf %717, %714 : vector<8x512xf32>
    %719 = vector.extract_strided_slice %718 {offsets = [0, 0], sizes = [8, 128], strides = [1, 1]} : vector<8x512xf32> to vector<8x128xf32>
    %720 = arith.negf %719 : vector<8x128xf32>
    %721 = math.exp %720 : vector<8x128xf32>
    %cst_191 = arith.constant 1.000000e+00 : f32
    %722 = vector.broadcast %cst_191 : f32 to vector<8x128xf32>
    %723 = arith.addf %722, %721 : vector<8x128xf32>
    %724 = arith.divf %722, %723 : vector<8x128xf32>
    %725 = vector.extract_strided_slice %718 {offsets = [0, 128], sizes = [8, 128], strides = [1, 1]} : vector<8x512xf32> to vector<8x128xf32>
    %726 = arith.negf %725 : vector<8x128xf32>
    %727 = math.exp %726 : vector<8x128xf32>
    %cst_192 = arith.constant 1.000000e+00 : f32
    %728 = vector.broadcast %cst_192 : f32 to vector<8x128xf32>
    %729 = arith.addf %728, %727 : vector<8x128xf32>
    %730 = arith.divf %728, %729 : vector<8x128xf32>
    %731 = vector.extract_strided_slice %718 {offsets = [0, 256], sizes = [8, 128], strides = [1, 1]} : vector<8x512xf32> to vector<8x128xf32>
    %732 = math.tanh %731 : vector<8x128xf32>
    %733 = vector.extract_strided_slice %718 {offsets = [0, 384], sizes = [8, 128], strides = [1, 1]} : vector<8x512xf32> to vector<8x128xf32>
    %734 = arith.negf %733 : vector<8x128xf32>
    %735 = math.exp %734 : vector<8x128xf32>
    %cst_193 = arith.constant 1.000000e+00 : f32
    %736 = vector.broadcast %cst_193 : f32 to vector<8x128xf32>
    %737 = arith.addf %736, %735 : vector<8x128xf32>
    %738 = arith.divf %736, %737 : vector<8x128xf32>
    %739 = arith.mulf %730, %711 : vector<8x128xf32>
    %740 = arith.mulf %724, %732 : vector<8x128xf32>
    %741 = arith.addf %739, %740 : vector<8x128xf32>
    %742 = math.tanh %741 : vector<8x128xf32>
    %743 = arith.mulf %738, %742 : vector<8x128xf32>
    %c5_i32_194 = arith.constant 5 : i32
    %cst_195 = arith.constant dense<0.000000e+00> : vector<8x512xf32>
    %744 = tpu.matmul %743, %593, %cst_195 {dimension_numbers = #tpu.dot_dimension_numbers<[1], [0], [0], [1], [0, 0, 1, 1], [], []>} : vector<8x128xf32>, vector<128x512xf32>, vector<8x512xf32> -> vector<8x512xf32>
    %745 = arith.index_cast %c5_i32_194 : i32 to index
    %c0_196 = arith.constant 0 : index
    %c0_197 = arith.constant 0 : index
    %746 = vector.load %arg15[%745, %c0_196, %c0_197] : memref<8x8x512xf32, #tpu.memory_space<vmem>>, vector<1x8x512xf32>
    %747 = vector.shape_cast %746 : vector<1x8x512xf32> to vector<8x512xf32>
    %748 = arith.addf %747, %744 : vector<8x512xf32>
    %749 = vector.extract_strided_slice %748 {offsets = [0, 0], sizes = [8, 128], strides = [1, 1]} : vector<8x512xf32> to vector<8x128xf32>
    %750 = arith.negf %749 : vector<8x128xf32>
    %751 = math.exp %750 : vector<8x128xf32>
    %cst_198 = arith.constant 1.000000e+00 : f32
    %752 = vector.broadcast %cst_198 : f32 to vector<8x128xf32>
    %753 = arith.addf %752, %751 : vector<8x128xf32>
    %754 = arith.divf %752, %753 : vector<8x128xf32>
    %755 = vector.extract_strided_slice %748 {offsets = [0, 128], sizes = [8, 128], strides = [1, 1]} : vector<8x512xf32> to vector<8x128xf32>
    %756 = arith.negf %755 : vector<8x128xf32>
    %757 = math.exp %756 : vector<8x128xf32>
    %cst_199 = arith.constant 1.000000e+00 : f32
    %758 = vector.broadcast %cst_199 : f32 to vector<8x128xf32>
    %759 = arith.addf %758, %757 : vector<8x128xf32>
    %760 = arith.divf %758, %759 : vector<8x128xf32>
    %761 = vector.extract_strided_slice %748 {offsets = [0, 256], sizes = [8, 128], strides = [1, 1]} : vector<8x512xf32> to vector<8x128xf32>
    %762 = math.tanh %761 : vector<8x128xf32>
    %763 = vector.extract_strided_slice %748 {offsets = [0, 384], sizes = [8, 128], strides = [1, 1]} : vector<8x512xf32> to vector<8x128xf32>
    %764 = arith.negf %763 : vector<8x128xf32>
    %765 = math.exp %764 : vector<8x128xf32>
    %cst_200 = arith.constant 1.000000e+00 : f32
    %766 = vector.broadcast %cst_200 : f32 to vector<8x128xf32>
    %767 = arith.addf %766, %765 : vector<8x128xf32>
    %768 = arith.divf %766, %767 : vector<8x128xf32>
    %769 = arith.mulf %760, %741 : vector<8x128xf32>
    %770 = arith.mulf %754, %762 : vector<8x128xf32>
    %771 = arith.addf %769, %770 : vector<8x128xf32>
    %772 = math.tanh %771 : vector<8x128xf32>
    %773 = arith.mulf %768, %772 : vector<8x128xf32>
    %c6_i32_201 = arith.constant 6 : i32
    %cst_202 = arith.constant dense<0.000000e+00> : vector<8x512xf32>
    %774 = tpu.matmul %773, %593, %cst_202 {dimension_numbers = #tpu.dot_dimension_numbers<[1], [0], [0], [1], [0, 0, 1, 1], [], []>} : vector<8x128xf32>, vector<128x512xf32>, vector<8x512xf32> -> vector<8x512xf32>
    %775 = arith.index_cast %c6_i32_201 : i32 to index
    %c0_203 = arith.constant 0 : index
    %c0_204 = arith.constant 0 : index
    %776 = vector.load %arg15[%775, %c0_203, %c0_204] : memref<8x8x512xf32, #tpu.memory_space<vmem>>, vector<1x8x512xf32>
    %777 = vector.shape_cast %776 : vector<1x8x512xf32> to vector<8x512xf32>
    %778 = arith.addf %777, %774 : vector<8x512xf32>
    %779 = vector.extract_strided_slice %778 {offsets = [0, 0], sizes = [8, 128], strides = [1, 1]} : vector<8x512xf32> to vector<8x128xf32>
    %780 = arith.negf %779 : vector<8x128xf32>
    %781 = math.exp %780 : vector<8x128xf32>
    %cst_205 = arith.constant 1.000000e+00 : f32
    %782 = vector.broadcast %cst_205 : f32 to vector<8x128xf32>
    %783 = arith.addf %782, %781 : vector<8x128xf32>
    %784 = arith.divf %782, %783 : vector<8x128xf32>
    %785 = vector.extract_strided_slice %778 {offsets = [0, 128], sizes = [8, 128], strides = [1, 1]} : vector<8x512xf32> to vector<8x128xf32>
    %786 = arith.negf %785 : vector<8x128xf32>
    %787 = math.exp %786 : vector<8x128xf32>
    %cst_206 = arith.constant 1.000000e+00 : f32
    %788 = vector.broadcast %cst_206 : f32 to vector<8x128xf32>
    %789 = arith.addf %788, %787 : vector<8x128xf32>
    %790 = arith.divf %788, %789 : vector<8x128xf32>
    %791 = vector.extract_strided_slice %778 {offsets = [0, 256], sizes = [8, 128], strides = [1, 1]} : vector<8x512xf32> to vector<8x128xf32>
    %792 = math.tanh %791 : vector<8x128xf32>
    %793 = vector.extract_strided_slice %778 {offsets = [0, 384], sizes = [8, 128], strides = [1, 1]} : vector<8x512xf32> to vector<8x128xf32>
    %794 = arith.negf %793 : vector<8x128xf32>
    %795 = math.exp %794 : vector<8x128xf32>
    %cst_207 = arith.constant 1.000000e+00 : f32
    %796 = vector.broadcast %cst_207 : f32 to vector<8x128xf32>
    %797 = arith.addf %796, %795 : vector<8x128xf32>
    %798 = arith.divf %796, %797 : vector<8x128xf32>
    %799 = arith.mulf %790, %771 : vector<8x128xf32>
    %800 = arith.mulf %784, %792 : vector<8x128xf32>
    %801 = arith.addf %799, %800 : vector<8x128xf32>
    %802 = math.tanh %801 : vector<8x128xf32>
    %803 = arith.mulf %798, %802 : vector<8x128xf32>
    %c7_i32_208 = arith.constant 7 : i32
    %cst_209 = arith.constant dense<0.000000e+00> : vector<8x512xf32>
    %804 = tpu.matmul %803, %593, %cst_209 {dimension_numbers = #tpu.dot_dimension_numbers<[1], [0], [0], [1], [0, 0, 1, 1], [], []>} : vector<8x128xf32>, vector<128x512xf32>, vector<8x512xf32> -> vector<8x512xf32>
    %805 = arith.index_cast %c7_i32_208 : i32 to index
    %c0_210 = arith.constant 0 : index
    %c0_211 = arith.constant 0 : index
    %806 = vector.load %arg15[%805, %c0_210, %c0_211] : memref<8x8x512xf32, #tpu.memory_space<vmem>>, vector<1x8x512xf32>
    %807 = vector.shape_cast %806 : vector<1x8x512xf32> to vector<8x512xf32>
    %808 = arith.addf %807, %804 : vector<8x512xf32>
    %809 = vector.extract_strided_slice %808 {offsets = [0, 0], sizes = [8, 128], strides = [1, 1]} : vector<8x512xf32> to vector<8x128xf32>
    %810 = arith.negf %809 : vector<8x128xf32>
    %811 = math.exp %810 : vector<8x128xf32>
    %cst_212 = arith.constant 1.000000e+00 : f32
    %812 = vector.broadcast %cst_212 : f32 to vector<8x128xf32>
    %813 = arith.addf %812, %811 : vector<8x128xf32>
    %814 = arith.divf %812, %813 : vector<8x128xf32>
    %815 = vector.extract_strided_slice %808 {offsets = [0, 128], sizes = [8, 128], strides = [1, 1]} : vector<8x512xf32> to vector<8x128xf32>
    %816 = arith.negf %815 : vector<8x128xf32>
    %817 = math.exp %816 : vector<8x128xf32>
    %cst_213 = arith.constant 1.000000e+00 : f32
    %818 = vector.broadcast %cst_213 : f32 to vector<8x128xf32>
    %819 = arith.addf %818, %817 : vector<8x128xf32>
    %820 = arith.divf %818, %819 : vector<8x128xf32>
    %821 = vector.extract_strided_slice %808 {offsets = [0, 256], sizes = [8, 128], strides = [1, 1]} : vector<8x512xf32> to vector<8x128xf32>
    %822 = math.tanh %821 : vector<8x128xf32>
    %823 = vector.extract_strided_slice %808 {offsets = [0, 384], sizes = [8, 128], strides = [1, 1]} : vector<8x512xf32> to vector<8x128xf32>
    %824 = arith.negf %823 : vector<8x128xf32>
    %825 = math.exp %824 : vector<8x128xf32>
    %cst_214 = arith.constant 1.000000e+00 : f32
    %826 = vector.broadcast %cst_214 : f32 to vector<8x128xf32>
    %827 = arith.addf %826, %825 : vector<8x128xf32>
    %828 = arith.divf %826, %827 : vector<8x128xf32>
    %829 = arith.mulf %820, %801 : vector<8x128xf32>
    %830 = arith.mulf %814, %822 : vector<8x128xf32>
    %831 = arith.addf %829, %830 : vector<8x128xf32>
    %832 = math.tanh %831 : vector<8x128xf32>
    %833 = arith.mulf %828, %832 : vector<8x128xf32>
    %c8_i32_215 = arith.constant 8 : i32
    %c7 = arith.constant 7 : index
    %c0_216 = arith.constant 0 : index
    %c0_217 = arith.constant 0 : index
    %834 = vector.load %arg16[%c7, %c0_216, %c0_217] : memref<8x8x128xf32, #tpu.memory_space<vmem>>, vector<1x8x128xf32>
    %835 = vector.shape_cast %834 : vector<1x8x128xf32> to vector<8x128xf32>
    %c7_218 = arith.constant 7 : index
    %c0_219 = arith.constant 0 : index
    %c0_220 = arith.constant 0 : index
    %836 = vector.load %arg17[%c7_218, %c0_219, %c0_220] : memref<8x8x128xf32, #tpu.memory_space<vmem>>, vector<1x8x128xf32>
    %837 = vector.shape_cast %836 : vector<1x8x128xf32> to vector<8x128xf32>
    %838 = tpu.concatenate %835, %837 in 1 : vector<8x128xf32>, vector<8x128xf32> -> vector<8x256xf32>
    %c0_221 = arith.constant 0 : index
    %c0_222 = arith.constant 0 : index
    %839 = vector.load %arg7[%c0_221, %c0_222] : memref<256x512xf32, #tpu.memory_space<vmem>>, vector<256x512xf32>
    %cst_223 = arith.constant dense<0.000000e+00> : vector<8x512xf32>
    %840 = tpu.matmul %838, %839, %cst_223 {dimension_numbers = #tpu.dot_dimension_numbers<[1], [0], [0], [1], [0, 0, 1, 1], [], []>} : vector<8x256xf32>, vector<256x512xf32>, vector<8x512xf32> -> vector<8x512xf32>
    %c0_224 = arith.constant 0 : index
    %c0_225 = arith.constant 0 : index
    %841 = vector.load %arg8[%c0_224, %c0_225] : memref<1x512xf32, #tpu.memory_space<vmem>>, vector<1x512xf32>
    %842 = vector.broadcast %841 : vector<1x512xf32> to vector<8x512xf32>
    %843 = arith.addf %840, %842 : vector<8x512xf32>
    %844 = vector.extract_strided_slice %843 {offsets = [0, 0], sizes = [8, 128], strides = [1, 1]} : vector<8x512xf32> to vector<8x128xf32>
    %845 = arith.negf %844 : vector<8x128xf32>
    %846 = math.exp %845 : vector<8x128xf32>
    %cst_226 = arith.constant 1.000000e+00 : f32
    %847 = vector.broadcast %cst_226 : f32 to vector<8x128xf32>
    %848 = arith.addf %847, %846 : vector<8x128xf32>
    %849 = arith.divf %847, %848 : vector<8x128xf32>
    %850 = vector.extract_strided_slice %843 {offsets = [0, 256], sizes = [8, 128], strides = [1, 1]} : vector<8x512xf32> to vector<8x128xf32>
    %851 = math.tanh %850 : vector<8x128xf32>
    %852 = vector.extract_strided_slice %843 {offsets = [0, 384], sizes = [8, 128], strides = [1, 1]} : vector<8x512xf32> to vector<8x128xf32>
    %853 = arith.negf %852 : vector<8x128xf32>
    %854 = math.exp %853 : vector<8x128xf32>
    %cst_227 = arith.constant 1.000000e+00 : f32
    %855 = vector.broadcast %cst_227 : f32 to vector<8x128xf32>
    %856 = arith.addf %855, %854 : vector<8x128xf32>
    %857 = arith.divf %855, %856 : vector<8x128xf32>
    %858 = arith.mulf %849, %851 : vector<8x128xf32>
    %859 = math.tanh %858 : vector<8x128xf32>
    %860 = arith.mulf %857, %859 : vector<8x128xf32>
    %861 = tpu.concatenate %833, %860 in 1 : vector<8x128xf32>, vector<8x128xf32> -> vector<8x256xf32>
    %c0_228 = arith.constant 0 : index
    %c0_229 = arith.constant 0 : index
    %862 = vector.load %arg10[%c0_228, %c0_229] : memref<256x10xf32, #tpu.memory_space<vmem>>, vector<256x10xf32>
    %cst_230 = arith.constant dense<0.000000e+00> : vector<8x10xf32>
    %863 = tpu.matmul %861, %862, %cst_230 {dimension_numbers = #tpu.dot_dimension_numbers<[1], [0], [0], [1], [0, 0, 1, 1], [], []>} : vector<8x256xf32>, vector<256x10xf32>, vector<8x10xf32> -> vector<8x10xf32>
    %c0_231 = arith.constant 0 : index
    %c0_232 = arith.constant 0 : index
    %864 = vector.load %arg11[%c0_231, %c0_232] : memref<1x10xf32, #tpu.memory_space<vmem>>, vector<1x10xf32>
    %865 = vector.broadcast %864 : vector<1x10xf32> to vector<8x10xf32>
    %866 = arith.addf %863, %865 : vector<8x10xf32>
    %c0_233 = arith.constant 0 : index
    %c0_234 = arith.constant 0 : index
    %867 = vector.load %arg12[%c0_233, %c0_234] : memref<8x10xf32, #tpu.memory_space<vmem>>, vector<8x10xf32>
    tpu.vector_store %arg12[%c0_233, %c0_234], %866 {strides = array<i32>} : memref<8x10xf32, #tpu.memory_space<vmem>>, vector<8x10xf32>,
    return
  }
  func.func @transform_0(%arg0: i32) -> (i32, i32, i32) {
    %c0_i32 = arith.constant 0 : i32
    %c0_i32_0 = arith.constant 0 : i32
    %c0_i32_1 = arith.constant 0 : i32
    %c0_i32_2 = arith.constant 0 : i32
    return %c0_i32, %c0_i32_0, %c0_i32_1 : i32, i32, i32
  }
  func.func @transform_1(%arg0: i32) -> (i32, i32) {
    %c0_i32 = arith.constant 0 : i32
    %c0_i32_0 = arith.constant 0 : i32
    %c0_i32_1 = arith.constant 0 : i32
    return %c0_i32, %c0_i32_0 : i32, i32
  }
  func.func @transform_2(%arg0: i32) -> (i32, i32) {
    %c0_i32 = arith.constant 0 : i32
    %c0_i32_0 = arith.constant 0 : i32
    %c0_i32_1 = arith.constant 0 : i32
    return %c0_i32, %c0_i32_0 : i32, i32
  }
  func.func @transform_3(%arg0: i32) -> (i32, i32) {
    %c0_i32 = arith.constant 0 : i32
    %c0_i32_0 = arith.constant 0 : i32
    %c0_i32_1 = arith.constant 0 : i32
    return %c0_i32, %c0_i32_0 : i32, i32
  }
  func.func @transform_4(%arg0: i32) -> (i32, i32) {
    %c0_i32 = arith.constant 0 : i32
    %c0_i32_0 = arith.constant 0 : i32
    %c0_i32_1 = arith.constant 0 : i32
    return %c0_i32, %c0_i32_0 : i32, i32
  }
  func.func @transform_5(%arg0: i32) -> (i32, i32) {
    %c0_i32 = arith.constant 0 : i32
    %c0_i32_0 = arith.constant 0 : i32
    %c0_i32_1 = arith.constant 0 : i32
    return %c0_i32, %c0_i32_0 : i32, i32
  }
  func.func @transform_6(%arg0: i32) -> (i32, i32) {
    %c0_i32 = arith.constant 0 : i32
    %c0_i32_0 = arith.constant 0 : i32
    %c0_i32_1 = arith.constant 0 : i32
    return %c0_i32, %c0_i32_0 : i32, i32
  }
  func.func @transform_7(%arg0: i32) -> (i32, i32) {
    %c0_i32 = arith.constant 0 : i32
    %c0_i32_0 = arith.constant 0 : i32
    %c0_i32_1 = arith.constant 0 : i32
    return %c0_i32, %c0_i32_0 : i32, i32
  }
  func.func @transform_8(%arg0: i32) -> (i32, i32) {
    %c0_i32 = arith.constant 0 : i32
    %c0_i32_0 = arith.constant 0 : i32
    %c0_i32_1 = arith.constant 0 : i32
    return %c0_i32, %c0_i32_0 : i32, i32
  }
  func.func @transform_9(%arg0: i32) -> (i32, i32) {
    %c0_i32 = arith.constant 0 : i32
    %c0_i32_0 = arith.constant 0 : i32
    %c0_i32_1 = arith.constant 0 : i32
    return %c0_i32, %c0_i32_0 : i32, i32
  }
  func.func @transform_10(%arg0: i32) -> (i32, i32) {
    %c0_i32 = arith.constant 0 : i32
    %c0_i32_0 = arith.constant 0 : i32
    %c0_i32_1 = arith.constant 0 : i32
    return %c0_i32, %c0_i32_0 : i32, i32
  }
  func.func @transform_11(%arg0: i32) -> (i32, i32) {
    %c0_i32 = arith.constant 0 : i32
    %c0_i32_0 = arith.constant 0 : i32
    %c0_i32_1 = arith.constant 0 : i32
    return %c0_i32, %c0_i32_0 : i32, i32
  }
}

</mosaic_0001>

<bundles_post_ra>
// kernel: tpu_custom_call.1
= control target key start
LH: loop header
LB: loop body
LE: loop exit
PB: predicated region body
PF: predicated region fallthrough
CT: control target
= control target key end

     0   :  { %16 = vsyncpa [#allocation8], 0  ;;  %s12269_s0 = inlined_call_operand.vmem [shape: f32[8,8,16], index: 0, kind: input, shape index: {}]   ;;  %s12270_s1 = inlined_call_operand.vmem [shape: f32[16,1024], index: 1, kind: input, shape index: {}]   ;;  %s12271_s2 = inlined_call_operand.hbm [shape: f32[256,1024], index: 2, kind: input, shape index: {}]   ;;  %s12272_s3 = inlined_call_operand.vmem [shape: f32[1,1024], index: 3, kind: input, shape index: {}]   ;;  %s12273_s4 = inlined_call_operand.hbm [shape: f32[256,512], index: 4, kind: input, shape index: {}]   ;;  %s12274_s5 = inlined_call_operand.vmem [shape: f32[1,512], index: 5, kind: input, shape index: {}]   ;;  %s12275_s6 = inlined_call_operand.hbm [shape: f32[256,512], index: 6, kind: input, shape index: {}]   ;;  %s12276_s7 = inlined_call_operand.vmem [shape: f32[1,512], index: 7, kind: input, shape index: {}]   ;;  %s12277_s8 = inlined_call_operand.hbm [shape: f32[128,512], index: 8, kind: input, shape index: {}]   ;;  %s12278_s9 = inlined_call_operand.vmem [shape: f32[256,10], index: 9, kind: input, shape index: {}]   ;;  %s12279_s10 = inlined_call_operand.vmem [shape: f32[1,10], index: 10, kind: input, shape index: {}]   ;;  %s12280_s11 = inlined_call_operand.hbm [shape: f32[8,10], index: 11, kind: output, shape index: {}]  }
   0x1   :  { %17 = vsyncpa [#allocation11], 0 }
   0x2   :  { %18 = vsyncpa [#allocation14], 0 }
   0x3   :  { %19 = vsyncpa [#allocation9], 0  ;;  %s9828_s17 = smov [#allocation10]   ;;  %s9710_s21 = scalar_lea.hbm %s12273_s4, 16384 }
   0x4   :  { %s43_s18 = sshll.u32 %s9828_s17, 4  ;;  %p9711_p0 = scmp.ne.s32.totalorder %s12273_s4, %s9710_s21  ;;  %s44_s18 = int_to_ptr.vmem [resolvable:$true] %s43_s18 }
   0x5   :  { %p9714_p1 = scmp.lt.u32.totalorder %s9710_s21, %s12273_s4 }
   0x7   :  { %p9716_p2 = pnand %p9714_p1, %p9711_p0 }
   0x9   :  { %9719 = shalt.err (!%p9716_p2)
}
   0xa   :  { %s9720_s26 = scalar_lea.vmem %s44_s18, 16384  ;;  %p9725_p4 = scmp.lt.s32.totalorder %s44_s18, %s44_s18 }
   0xb   :  { %p9721_p3 = scmp.ne.s32.totalorder %s44_s18, %s9720_s26  ;;  %p9726_p5 = scmp.lt.s32.totalorder %s9720_s26, %s9720_s26 }
   0xd   :  { %p9727_p6 = por %p9726_p5, %p9725_p4 }
   0xf   :  { %p9728_p7 = pnand %p9727_p6, %p9721_p3 }
  0x11   :  { %9731 = shalt.err (!%p9728_p7)
}
  0x12   :  { %s9829_s27 = smov 512   ;;  %s9830_s28 = smov 32  }
  0x13   :  { %49 = dma.hbm_to_vmem [thread:$0]  %s12273_s4, 16384, %s44_s18, [#allocation11], %s9829_s27, %s9829_s27, %s9830_s28  }
  0x14   :  { %s9831_s12 = smov [#allocation7]   ;;  %s9732_s16 = scalar_lea.hbm %s12271_s2, 32768 }
  0x15   :  { %s29_s13 = sshll.u32 %s9831_s12, 4  ;;  %p9733_p8 = scmp.ne.s32.totalorder %s12271_s2, %s9732_s16  ;;  %s30_s13 = int_to_ptr.vmem [resolvable:$true] %s29_s13 }
  0x16   :  { %p9736_p9 = scmp.lt.u32.totalorder %s9732_s16, %s12271_s2 }
  0x18   :  { %p9738_p10 = pnand %p9736_p9, %p9733_p8 }
  0x1a   :  { %9741 = shalt.err (!%p9738_p10)
}
  0x1b   :  { %s9742_s22 = scalar_lea.vmem %s30_s13, 32768  ;;  %p9747_p12 = scmp.lt.s32.totalorder %s30_s13, %s30_s13 }
  0x1c   :  { %p9743_p11 = scmp.ne.s32.totalorder %s30_s13, %s9742_s22  ;;  %p9748_p13 = scmp.lt.s32.totalorder %s9742_s22, %s9742_s22 }
  0x1e   :  { %p9749_p0 = por %p9748_p13, %p9747_p12 }
  0x20   :  { %p9750_p1 = pnand %p9749_p0, %p9743_p11 }
  0x22   :  { %9753 = shalt.err (!%p9750_p1)
}
  0x23   :  { %s9832_s4 = smov 1024   ;;  %s9833_s18 = smov 64  }
  0x24   :  { %35 = dma.hbm_to_vmem [thread:$0]  %s12271_s2, 32768, %s30_s13, [#allocation8], %s9832_s4, %s9832_s4, %s9833_s18  }
  0x25   :  { %s9834_s25 = smov [#allocation12]   ;;  %s9835_s29 = smov [#allocation13]  }
  0x26   :  { %s57_s26 = sshll.u32 %s9834_s25, 4  ;;  %s71_s30 = sshll.u32 %s9835_s29, 4  ;;  %s58_s26 = int_to_ptr.vmem [resolvable:$true] %s57_s26  ;;  %s9925_s30 = int_to_ptr.vmem [resolvable:$true] %s71_s30 }
  0x27   :  { %s9754_s15 = scalar_lea.hbm %s12275_s6, 16384 }
  0x28   :  { %p9755_p2 = scmp.ne.s32.totalorder %s12275_s6, %s9754_s15  ;;  %p9758_p3 = scmp.lt.u32.totalorder %s9754_s15, %s12275_s6 }
  0x2a   :  { %p9760_p4 = pnand %p9758_p3, %p9755_p2 }
  0x2c   :  { %9763 = shalt.err (!%p9760_p4)
}
  0x2d   :  { %s9764_s2 = scalar_lea.vmem %s58_s26, 16384  ;;  %p9769_p6 = scmp.lt.s32.totalorder %s58_s26, %s58_s26 }
  0x2e   :  { %p9765_p5 = scmp.ne.s32.totalorder %s58_s26, %s9764_s2  ;;  %p9770_p7 = scmp.lt.s32.totalorder %s9764_s2, %s9764_s2 }
  0x30   :  { %p9771_p8 = por %p9770_p7, %p9769_p6 }
  0x32   :  { %p9772_p9 = pnand %p9771_p8, %p9765_p5 }
  0x34   :  { %9775 = shalt.err (!%p9772_p9)
}
  0x35   :  { %63 = dma.hbm_to_vmem [thread:$0]  %s12275_s6, 16384, %s58_s26, [#allocation11], %s9829_s27, %s9829_s27, %s9830_s28  }
  0x36   :  { %s9776_s18 = scalar_lea.hbm %s12277_s8, 8192 }
  0x37   :  { %p9777_p10 = scmp.ne.s32.totalorder %s12277_s8, %s9776_s18  ;;  %p9780_p11 = scmp.lt.u32.totalorder %s9776_s18, %s12277_s8 }
  0x39   :  { %p9782_p12 = pnand %p9780_p11, %p9777_p10 }
  0x3b   :  { %9785 = shalt.err (!%p9782_p12)
}
  0x3c   :  { %s9786_s12 = scalar_lea.vmem %s9925_s30, 8192  ;;  %p9791_p0 = scmp.lt.s32.totalorder %s9925_s30, %s9925_s30 }
  0x3d   :  { %p9787_p13 = scmp.ne.s32.totalorder %s9925_s30, %s9786_s12  ;;  %p9792_p1 = scmp.lt.s32.totalorder %s9786_s12, %s9786_s12 }
  0x3f   :  { %p9793_p2 = por %p9792_p1, %p9791_p0 }
  0x41   :  { %p9794_p3 = pnand %p9793_p2, %p9787_p13 }
  0x43   :  { %9797 = shalt.err (!%p9794_p3)
}
  0x44   :  { %77 = dma.hbm_to_vmem [thread:$0]  %s12277_s8, 8192, %s9925_s30, [#allocation14], %s9829_s27, %s9829_s27, %s9830_s28  }
  0x45   :  { %9820 = dma.done.wait [#allocation8], 32768  }
  0x46   :  { %9821 = vsyncadd [#allocation8], 4294934528 }
  0x47   :  { %9822 = dma.done.wait [#allocation11], 32768  }
  0x48   :  { %9823 = vsyncadd [#allocation11], 4294934528 }
  0x49   :  { %9824 = dma.done.wait [#allocation14], 8192  }
  0x4a   :  { %9825 = vsyncadd [#allocation14], 4294959104  ;;  %v12281_v0 = vmov 0.0   ;;  %v103_v1 = vld [vmem:[%s12270_s1 + $0x8] sm:$0xff]  ;;  %v102_v3 = vld [vmem:[%s12270_s1] sm:$0xff]  ;;  %vm160_vm0 = vcmask 130048  }
  0x4b   :  { %249 = vmatprep.mubr.f32.mxu0 %v12281_v0  ;;  %273 = vmatprep.mubr.f32.mxu1 %v12281_v0  ;;  %v111_v2 = vld [vmem:[%s12270_s1 + $0x48] sm:$0xff]  ;;  %v110_v5 = vld [vmem:[%s12270_s1 + $0x40] sm:$0xff]  ;;  %v105_v7 = vld [vmem:[%s12270_s1 + $0x18] sm:$0xff]  ;;  %s9837_s4 = smov [#allocation15]   ;;  %vm6085_vm1 = vcmask 80896  }
  0x4c   :  { %v6246_v4 = vpack.c.bf16 %v111_v2, %v103_v1  ;;  %v6248_v6 = vpack.c.bf16 %v110_v5, %v102_v3  ;;  %v113_v8 = vld [vmem:[%s12270_s1 + $0x58] sm:$0xff]  ;;  %v104_v9 = vld [vmem:[%s12270_s1 + $0x10] sm:$0xff]  ;;  %v9991_v12 = vld [vmem:[%s12269_s0] sm:$0xff]  ;;  %s6093_s18 = sshll.u32 %s9837_s4, 4  ;;  %s6094_s18 = int_to_ptr.vmem [resolvable:$true] %s6093_s18 }
  0x4d   :  { %v6250_v10 = vpack.c.bf16 %v113_v8, %v105_v7  ;;  %v112_v11 = vld [vmem:[%s12270_s1 + $0x50] sm:$0xff]  ;;  %v9996_v13 = vld [vmem:[%s12269_s0 + $0x20] sm:$0xff]  ;;  %v107_v15 = vld [vmem:[%s12270_s1 + $0x28] sm:$0xff]  ;;  %s9798_s23 = scalar_lea.vmem %s6094_s18, 128  ;;  %p9803_p5 = scmp.lt.s32.totalorder %s6094_s18, %s6094_s18 }
  0x4e   :  { %6247 = vmatprep.subr.bf16.mxu0 %v6246_v4  ;;  %9110 = vmatprep.subr.bf16.mxu1 %v6246_v4  ;;  %v6252_v14 = vpack.c.bf16 %v112_v11, %v104_v9  ;;  %v115_v16 = vld [vmem:[%s12270_s1 + $0x68] sm:$0xff]  ;;  %v106_v18 = vld [vmem:[%s12270_s1 + $0x20] sm:$0xff]  ;;  %v109_v23 = vld [vmem:[%s12270_s1 + $0x38] sm:$0xff]  ;;  %p9799_p4 = scmp.ne.s32.totalorder %s6094_s18, %s9798_s23  ;;  %p9804_p6 = scmp.lt.s32.totalorder %s9798_s23, %s9798_s23 }
  0x4f   :  { %6249 = vmatpush1.bf16.msra.mxu0 %v6248_v6  ;;  %9111 = vmatpush1.bf16.msra.mxu1 %v6248_v6  ;;  %v6254_v17 = vpack.c.bf16 %v115_v16, %v107_v15  ;;  %v114_v19 = vld [vmem:[%s12270_s1 + $0x60] sm:$0xff]  ;;  %v702_v20 = vld [vmem:[#allocation7 + $0x8] sm:$0xff]  ;;  %v117_v24 = vld [vmem:[%s12270_s1 + $0x78] sm:$0xff] }
  0x50   :  { %6251 = vmatprep.subr.bf16.mxu1 %v6250_v10  ;;  %v6256_v21 = vpack.c.bf16 %v114_v19, %v106_v18  ;;  %v710_v22 = vld [vmem:[#allocation7 + $0x48] sm:$0xff]  ;;  %v6258_v27 = vpack.c.bf16 %v117_v24, %v109_v23  ;;  %v10043_v29 = vld [vmem:[%s12269_s0 + $0x10] sm:$0xff]  ;;  %v10060_v31 = vld [vmem:[%s12269_s0 + $0x18] sm:$0xff]  ;;  %p9805_p7 = por %p9804_p6, %p9803_p5 }
  0x51   :  { %v10024_v25 = vld [vmem:[%s12269_s0 + $0x8] sm:$0xff]  ;;  %6255 = vmatprep.subr.bf16.mxu0 %v6254_v17  ;;  %v10032_v28 = vpack.c.bf16 %v710_v22, %v702_v20  ;;  %v10048_v30 = vld [vmem:[%s12269_s0 + $0x30] sm:$0xff]  ;;  %v10065_v32 = vld [vmem:[%s12269_s0 + $0x38] sm:$0xff] }
  0x52   :  { %6104 = vmatmul.mubr.msk.f32.vlgmr.msra.gmra.mrb[0].mxu0 %vm160_vm0, %v9991_v12  ;;  %6108 = vmatmul.mubr.msk.f32.vlgmr.msra.gmra.mrb[0].mxu1 %vm160_vm0, %v9996_v13  ;;  %v10029_v26 = vld [vmem:[%s12269_s0 + $0x28] sm:$0xff]  ;;  %v701_v33 = vld [vmem:[#allocation7] sm:$0xff]  ;;  %v108_v35 = vld [vmem:[%s12270_s1 + $0x30] sm:$0xff]  ;;  %p9806_p8 = pnand %p9805_p7, %p9799_p4 }
  0x53   :  { %6253 = vmatpush1.bf16.msra.mxu1 %v6252_v14  ;;  %255 = vmatprep.mubr.f32.mxu0 %v12281_v0  ;;  %12611 = vst [vmem:[#allocation20_spill] sm:$0xff] %v10032_v28  ;;  %v709_v34 = vld [vmem:[#allocation7 + $0x40] sm:$0xff]  ;;  %v116_v36 = vld [vmem:[%s12270_s1 + $0x70] sm:$0xff]  ;;  %v718_v37 = vld [vmem:[#allocation7 + $0x88] sm:$0xff] }
  0x54   :  { %279 = vmatprep.mubr.f32.mxu1 %v12281_v0  ;;  %6257 = vmatpush1.bf16.msra.mxu0 %v6256_v21  ;;  %v726_v38 = vld [vmem:[#allocation7 + $0xc8] sm:$0xff]  ;;  %v704_v39 = vld [vmem:[#allocation7 + $0x18] sm:$0xff]  ;;  %v10079_v41 = vpack.c.bf16 %v709_v34, %v701_v33  ;;  %v6260_v42 = vpack.c.bf16 %v116_v36, %v108_v35  ;;  %v717_v44 = vld [vmem:[#allocation7 + $0x80] sm:$0xff] }
  0x55   :  { %6259 = vmatprep.subr.bf16.mxu1 %v6258_v27  ;;  %6263 = vmatprep.subr.bf16.mxu0 %v10032_v28  ;;  %v712_v40 = vld [vmem:[#allocation7 + $0x58] sm:$0xff]  ;;  %v10081_v43 = vpack.c.bf16 %v726_v38, %v718_v37  ;;  %v725_v45 = vld [vmem:[#allocation7 + $0xc0] sm:$0xff]  ;;  %v734_v46 = vld [vmem:[#allocation7 + $0x108] sm:$0xff] }
  0x56   :  { %6105 = vmatmul.mubr.msk.f32.gmra.mrb[2].mxu0 %vm160_vm0, %v10024_v25  ;;  %6109 = vmatmul.mubr.msk.f32.gmra.mrb[2].mxu1 %vm160_vm0, %v10029_v26  ;;  %12612 = vst [vmem:[#allocation21_spill] sm:$0xff] %v10079_v41  ;;  %v742_v47 = vld [vmem:[#allocation7 + $0x148] sm:$0xff]  ;;  %v10083_v48 = vpack.c.bf16 %v712_v40, %v704_v39  ;;  %v10090_v49 = vpack.c.bf16 %v725_v45, %v717_v44  ;;  %v733_v51 = vld [vmem:[#allocation7 + $0x100] sm:$0xff]  ;;  %v703_v35 = vld [vmem:[#allocation7 + $0x10] sm:$0xff] }
  0x57   :  { %261 = vmatprep.mubr.f32.mxu0 %v12281_v0  ;;  %285 = vmatprep.mubr.f32.mxu1 %v12281_v0  ;;  %12613 = vst [vmem:[#allocation22_spill] sm:$0xff] %v10081_v43  ;;  %v10094_v50 = vpack.c.bf16 %v742_v47, %v734_v46  ;;  %v741_v52 = vld [vmem:[#allocation7 + $0x140] sm:$0xff]  ;;  %v750_v53 = vld [vmem:[#allocation7 + $0x188] sm:$0xff]  ;;  %v711_v36 = vld [vmem:[#allocation7 + $0x50] sm:$0xff] }
  0x58   :  { %12614 = vst [vmem:[#allocation23_spill] sm:$0xff] %v10083_v48  ;;  %12615 = vst [vmem:[#allocation24_spill] sm:$0xff] %v10090_v49  ;;  %v758_v54 = vld [vmem:[#allocation7 + $0x1c8] sm:$0xff]  ;;  %v10104_v55 = vpack.c.bf16 %v741_v52, %v733_v51  ;;  %v749_v57 = vld [vmem:[#allocation7 + $0x180] sm:$0xff]  ;;  %v10178_v44 = vpack.c.bf16 %v711_v36, %v703_v35 }
  0x59   :  { %12616 = vst [vmem:[#allocation25_spill] sm:$0xff] %v10094_v50  ;;  %v10107_v56 = vpack.c.bf16 %v758_v54, %v750_v53  ;;  %v757_v58 = vld [vmem:[#allocation7 + $0x1c0] sm:$0xff]  ;;  %v766_v59 = vld [vmem:[#allocation7 + $0x208] sm:$0xff]  ;;  %v720_v39 = vld [vmem:[#allocation7 + $0x98] sm:$0xff] }
  0x5a   :  { %6106 = vmatmul.mubr.msk.f32.gmra.mrb[4].mxu0 %vm160_vm0, %v10043_v29  ;;  %6110 = vmatmul.mubr.msk.f32.gmra.mrb[4].mxu1 %vm160_vm0, %v10048_v30  ;;  %12617 = vst [vmem:[#allocation26_spill] sm:$0xff] %v10104_v55  ;;  %v774_v60 = vld [vmem:[#allocation7 + $0x248] sm:$0xff]  ;;  %v10116_v61 = vpack.c.bf16 %v757_v58, %v749_v57  ;;  %v765_v63 = vld [vmem:[#allocation7 + $0x200] sm:$0xff]  ;;  %v728_v40 = vld [vmem:[#allocation7 + $0xd8] sm:$0xff] }
  0x5b   :  { %267 = vmatprep.mubr.f32.mxu0 %v12281_v0  ;;  %291 = vmatprep.mubr.f32.mxu1 %v12281_v0  ;;  %12618 = vst [vmem:[#allocation27_spill] sm:$0xff] %v10107_v56  ;;  %v10119_v62 = vpack.c.bf16 %v774_v60, %v766_v59  ;;  %v773_v1 = vld [vmem:[#allocation7 + $0x240] sm:$0xff]  ;;  %v782_v2 = vld [vmem:[#allocation7 + $0x288] sm:$0xff]  ;;  %12630 = vst [vmem:[#allocation39_spill] sm:$0xff] %v10178_v44  ;;  %v10183_v51 = vpack.c.bf16 %v728_v40, %v720_v39 }
  0x5c   :  { %12619 = vst [vmem:[#allocation28_spill] sm:$0xff] %v10116_v61  ;;  %v790_v3 = vld [vmem:[#allocation7 + $0x2c8] sm:$0xff]  ;;  %v10128_v4 = vpack.c.bf16 %v773_v1, %v765_v63  ;;  %v781_v6 = vld [vmem:[#allocation7 + $0x280] sm:$0xff]  ;;  %v719_v52 = vld [vmem:[#allocation7 + $0x90] sm:$0xff] }
  0x5d   :  { %12620 = vst [vmem:[#allocation29_spill] sm:$0xff] %v10119_v62  ;;  %v10131_v5 = vpack.c.bf16 %v790_v3, %v782_v2  ;;  %v789_v7 = vld [vmem:[#allocation7 + $0x2c0] sm:$0xff]  ;;  %v798_v8 = vld [vmem:[#allocation7 + $0x308] sm:$0xff]  ;;  %12632 = vst [vmem:[#allocation41_spill] sm:$0xff] %v10183_v51 }
  0x5e   :  { %6107 = vmatmul.mubr.msk.f32.gmra.mrb[6].mxu0 %vm160_vm0, %v10060_v31  ;;  %6111 = vmatmul.mubr.msk.f32.gmra.mrb[6].mxu1 %vm160_vm0, %v10065_v32  ;;  %12621 = vst [vmem:[#allocation30_spill] sm:$0xff] %v10128_v4  ;;  %v806_v9 = vld [vmem:[#allocation7 + $0x348] sm:$0xff]  ;;  %v10140_v10 = vpack.c.bf16 %v789_v7, %v781_v6  ;;  %v797_v14 = vld [vmem:[#allocation7 + $0x300] sm:$0xff]  ;;  %v727_v53 = vld [vmem:[#allocation7 + $0xd0] sm:$0xff] }
  0x5f   :  { %362 = vmatprep.mubr.f32.mxu1 %v12281_v0  ;;  %475 = vmatprep.mubr.f32.mxu0 %v12281_v0  ;;  %12622 = vst [vmem:[#allocation31_spill] sm:$0xff] %v10131_v5  ;;  %v10143_v11 = vpack.c.bf16 %v806_v9, %v798_v8  ;;  %v805_v15 = vld [vmem:[#allocation7 + $0x340] sm:$0xff]  ;;  %v814_v16 = vld [vmem:[#allocation7 + $0x388] sm:$0xff]  ;;  %v736_v58 = vld [vmem:[#allocation7 + $0x118] sm:$0xff]  ;;  %v10192_v63 = vpack.c.bf16 %v727_v53, %v719_v52 }
  0x60   :  { %12623 = vst [vmem:[#allocation32_spill] sm:$0xff] %v10140_v10  ;;  %v822_v17 = vld [vmem:[#allocation7 + $0x3c8] sm:$0xff]  ;;  %v10152_v18 = vpack.c.bf16 %v805_v15, %v797_v14  ;;  %v813_v20 = vld [vmem:[#allocation7 + $0x380] sm:$0xff]  ;;  %v744_v59 = vld [vmem:[#allocation7 + $0x158] sm:$0xff] }
  0x61   :  { %12624 = vst [vmem:[#allocation33_spill] sm:$0xff] %v10143_v11  ;;  %v10155_v19 = vpack.c.bf16 %v822_v17, %v814_v16  ;;  %v821_v21 = vld [vmem:[#allocation7 + $0x3c0] sm:$0xff]  ;;  %v830_v22 = vld [vmem:[#allocation7 + $0x408] sm:$0xff]  ;;  %12634 = vst [vmem:[#allocation43_spill] sm:$0xff] %v10192_v63  ;;  %v10198_v6 = vpack.c.bf16 %v744_v59, %v736_v58 }
  0x62   :  { %6112 = vmatmul.mubr.msk.f32.vlgmr.msra.gmra.mrb[8].mxu1 %vm160_vm0, %v9991_v12  ;;  %6120 = vmatmul.mubr.msk.f32.vlgmr.msra.gmra.mrb[8].mxu0 %vm160_vm0, %v9991_v12  ;;  %12625 = vst [vmem:[#allocation34_spill] sm:$0xff] %v10152_v18  ;;  %v838_v23 = vld [vmem:[#allocation7 + $0x448] sm:$0xff]  ;;  %v10164_v24 = vpack.c.bf16 %v821_v21, %v813_v20  ;;  %v829_v27 = vld [vmem:[#allocation7 + $0x400] sm:$0xff]  ;;  %v735_v7 = vld [vmem:[#allocation7 + $0x110] sm:$0xff] }
  0x63   :  { %6265 = vmatpush1.bf16.msra.mxu0 %v10079_v41  ;;  %6261 = vmatpush1.bf16.msra.mxu1 %v6260_v42  ;;  %12626 = vst [vmem:[#allocation35_spill] sm:$0xff] %v10155_v19  ;;  %v837_v33 = vld [vmem:[#allocation7 + $0x440] sm:$0xff]  ;;  %v10167_v34 = vpack.c.bf16 %v838_v23, %v830_v22  ;;  %v846_v37 = vld [vmem:[#allocation7 + $0x488] sm:$0xff]  ;;  %12636 = vst [vmem:[#allocation45_spill] sm:$0xff] %v10198_v6 }
  0x64   :  { %368 = vmatprep.mubr.f32.mxu1 %v12281_v0  ;;  %6267 = vmatprep.subr.bf16.mxu0 %v10081_v43  ;;  %12627 = vst [vmem:[#allocation36_spill] sm:$0xff] %v10164_v24  ;;  %v854_v38 = vld [vmem:[#allocation7 + $0x4c8] sm:$0xff]  ;;  %v10176_v42 = vpack.c.bf16 %v837_v33, %v829_v27  ;;  %v845_v45 = vld [vmem:[#allocation7 + $0x480] sm:$0xff]  ;;  %v752_v14 = vld [vmem:[#allocation7 + $0x198] sm:$0xff] }
  0x65   :  { %6327 = vmatprep.subr.bf16.mxu1 %v10083_v48  ;;  %481 = vmatprep.mubr.f32.mxu0 %v12281_v0  ;;  %12628 = vst [vmem:[#allocation37_spill] sm:$0xff] %v10167_v34  ;;  %v853_v46 = vld [vmem:[#allocation7 + $0x4c0] sm:$0xff]  ;;  %v10181_v47 = vpack.c.bf16 %v854_v38, %v846_v37  ;;  %v862_v54 = vld [vmem:[#allocation7 + $0x508] sm:$0xff]  ;;  %v760_v15 = vld [vmem:[#allocation7 + $0x1d8] sm:$0xff] }
  0x66   :  { %6113 = vmatmul.mubr.msk.f32.gmra.mrb[10].mxu1 %vm160_vm0, %v10024_v25  ;;  %6121 = vmatmul.mubr.msk.f32.gmra.mrb[10].mxu0 %vm160_vm0, %v10024_v25  ;;  %12629 = vst [vmem:[#allocation38_spill] sm:$0xff] %v10176_v42  ;;  %v870_v57 = vld [vmem:[#allocation7 + $0x548] sm:$0xff]  ;;  %v10190_v60 = vpack.c.bf16 %v853_v46, %v845_v45  ;;  %v861_v1 = vld [vmem:[#allocation7 + $0x500] sm:$0xff]  ;;  %v10213_v23 = vpack.c.bf16 %v760_v15, %v752_v14  ;;  %v751_v27 = vld [vmem:[#allocation7 + $0x190] sm:$0xff] }
  0x67   :  { %6269 = vmatpush1.bf16.msra.mxu0 %v10090_v49  ;;  %374 = vmatprep.mubr.f32.mxu1 %v12281_v0  ;;  %12631 = vst [vmem:[#allocation40_spill] sm:$0xff] %v10181_v47  ;;  %v869_v2 = vld [vmem:[#allocation7 + $0x540] sm:$0xff]  ;;  %v10196_v3 = vpack.c.bf16 %v870_v57, %v862_v54  ;;  %v878_v8 = vld [vmem:[#allocation7 + $0x588] sm:$0xff]  ;;  %v768_v36 = vld [vmem:[#allocation7 + $0x218] sm:$0xff] }
  0x68   :  { %6271 = vmatprep.subr.bf16.mxu0 %v10094_v50  ;;  %487 = vmatprep.mubr.f32.mxu0 %v12281_v0  ;;  %12633 = vst [vmem:[#allocation42_spill] sm:$0xff] %v10190_v60  ;;  %v886_v9 = vld [vmem:[#allocation7 + $0x5c8] sm:$0xff]  ;;  %v10205_v16 = vpack.c.bf16 %v869_v2, %v861_v1  ;;  %v877_v20 = vld [vmem:[#allocation7 + $0x580] sm:$0xff]  ;;  %12640 = vst [vmem:[#allocation49_spill] sm:$0xff] %v10213_v23 }
  0x69   :  { %12635 = vst [vmem:[#allocation44_spill] sm:$0xff] %v10196_v3  ;;  %v885_v21 = vld [vmem:[#allocation7 + $0x5c0] sm:$0xff]  ;;  %v10211_v22 = vpack.c.bf16 %v886_v9, %v878_v8  ;;  %v894_v33 = vld [vmem:[#allocation7 + $0x608] sm:$0xff]  ;;  %v776_v37 = vld [vmem:[#allocation7 + $0x258] sm:$0xff] }
  0x6a   :  { %6114 = vmatmul.mubr.msk.f32.gmra.mrb[12].mxu1 %vm160_vm0, %v10043_v29  ;;  %6122 = vmatmul.mubr.msk.f32.gmra.mrb[12].mxu0 %vm160_vm0, %v10043_v29  ;;  %12637 = vst [vmem:[#allocation46_spill] sm:$0xff] %v10205_v16  ;;  %v902_v35 = vld [vmem:[#allocation7 + $0x648] sm:$0xff]  ;;  %v10220_v38 = vpack.c.bf16 %v885_v21, %v877_v20  ;;  %v893_v40 = vld [vmem:[#allocation7 + $0x600] sm:$0xff]  ;;  %v10228_v52 = vpack.c.bf16 %v776_v37, %v768_v36  ;;  %v767_v53 = vld [vmem:[#allocation7 + $0x210] sm:$0xff] }
  0x6b   :  { %6273 = vmatpush1.bf16.msra.mxu0 %v10104_v55  ;;  %380 = vmatprep.mubr.f32.mxu1 %v12281_v0  ;;  %12639 = vst [vmem:[#allocation48_spill] sm:$0xff] %v10211_v22  ;;  %v901_v45 = vld [vmem:[#allocation7 + $0x640] sm:$0xff]  ;;  %v10226_v46 = vpack.c.bf16 %v902_v35, %v894_v33  ;;  %v910_v54 = vld [vmem:[#allocation7 + $0x688] sm:$0xff]  ;;  %v784_v58 = vld [vmem:[#allocation7 + $0x298] sm:$0xff] }
  0x6c   :  { %6275 = vmatprep.subr.bf16.mxu0 %v10107_v56  ;;  %493 = vmatprep.mubr.f32.mxu0 %v12281_v0  ;;  %12641 = vst [vmem:[#allocation50_spill] sm:$0xff] %v10220_v38  ;;  %12644 = vst [vmem:[#allocation53_spill] sm:$0xff] %v10228_v52  ;;  %v918_v57 = vld [vmem:[#allocation7 + $0x6c8] sm:$0xff]  ;;  %v792_v59 = vld [vmem:[#allocation7 + $0x2d8] sm:$0xff]  ;;  %v10235_v1 = vpack.c.bf16 %v901_v45, %v893_v40 }
  0x6d   :  { %12643 = vst [vmem:[#allocation52_spill] sm:$0xff] %v10226_v46  ;;  %v10241_v8 = vpack.c.bf16 %v918_v57, %v910_v54  ;;  %v10243_v9 = vpack.c.bf16 %v792_v59, %v784_v58  ;;  %v783_v14 = vld [vmem:[#allocation7 + $0x290] sm:$0xff]  ;;  %v926_v15 = vld [vmem:[#allocation7 + $0x708] sm:$0xff]  ;;  %v800_v21 = vld [vmem:[#allocation7 + $0x318] sm:$0xff] }
  0x6e   :  { %6115 = vmatmul.mubr.msk.f32.gmra.mrb[14].mxu1 %vm160_vm0, %v10060_v31  ;;  %6123 = vmatmul.mubr.msk.f32.gmra.mrb[14].mxu0 %vm160_vm0, %v10060_v31  ;;  %12645 = vst [vmem:[#allocation54_spill] sm:$0xff] %v10235_v1  ;;  %v934_v20 = vld [vmem:[#allocation7 + $0x748] sm:$0xff]  ;;  %v925_v35 = vld [vmem:[#allocation7 + $0x700] sm:$0xff]  ;;  %v799_v45 = vld [vmem:[#allocation7 + $0x310] sm:$0xff] }
  0x6f   :  { %6277 = vmatpush1.bf16.msra.mxu0 %v10116_v61  ;;  %386 = vmatprep.mubr.f32.mxu1 %v12281_v0  ;;  %12647 = vst [vmem:[#allocation56_spill] sm:$0xff] %v10241_v8  ;;  %12648 = vst [vmem:[#allocation57_spill] sm:$0xff] %v10243_v9  ;;  %v933_v36 = vld [vmem:[#allocation7 + $0x740] sm:$0xff]  ;;  %v10256_v37 = vpack.c.bf16 %v934_v20, %v926_v15  ;;  %v816_v54 = vld [vmem:[#allocation7 + $0x398] sm:$0xff] }
  0x70   :  { %6279 = vmatprep.subr.bf16.mxu0 %v10119_v62  ;;  %499 = vmatprep.mubr.f32.mxu0 %v12281_v0  ;;  %v824_v57 = vld [vmem:[#allocation7 + $0x3d8] sm:$0xff]  ;;  %v10265_v58 = vpack.c.bf16 %v933_v36, %v925_v35  ;;  %v815_v15 = vld [vmem:[#allocation7 + $0x390] sm:$0xff]  ;;  %v12657_v35 = vmov 0.0  }
  0x71   :  { %12651 = vst [vmem:[#allocation60_spill] sm:$0xff] %v10256_v37  ;;  %v832_v20 = vld [vmem:[#allocation7 + $0x418] sm:$0xff] }
  0x72   :  { %6116 = vmatmul.mubr.msk.f32.gmra.mrb[16].mxu1 %vm160_vm0, %v9996_v13  ;;  %6124 = vmatmul.mubr.msk.f32.gmra.mrb[16].mxu0 %vm160_vm0, %v9996_v13  ;;  %12653 = vst [vmem:[#allocation62_spill] sm:$0xff] %v10265_v58 }
  0x73   :  { %6281 = vmatpush1.bf16.msra.mxu0 %v10128_v4  ;;  %392 = vmatprep.mubr.f32.mxu1 %v12281_v0 }
  0x74   :  { %6283 = vmatprep.subr.bf16.mxu0 %v10131_v5  ;;  %505 = vmatprep.mubr.f32.mxu0 %v12281_v0 }
  0x76   :  { %6117 = vmatmul.mubr.msk.f32.gmra.mrb[18].mxu1 %vm160_vm0, %v10029_v26  ;;  %6125 = vmatmul.mubr.msk.f32.gmra.mrb[18].mxu0 %vm160_vm0, %v10029_v26 }
  0x77   :  { %6285 = vmatpush1.bf16.msra.mxu0 %v10140_v10  ;;  %398 = vmatprep.mubr.f32.mxu1 %v12281_v0 }
  0x78   :  { %6287 = vmatprep.subr.bf16.mxu0 %v10143_v11  ;;  %511 = vmatprep.mubr.f32.mxu0 %v12281_v0 }
  0x7a   :  { %6118 = vmatmul.mubr.msk.f32.gmra.mrb[20].mxu1 %vm160_vm0, %v10048_v30  ;;  %6126 = vmatmul.mubr.msk.f32.gmra.mrb[20].mxu0 %vm160_vm0, %v10048_v30 }
  0x7b   :  { %6289 = vmatpush1.bf16.msra.mxu0 %v10152_v18  ;;  %404 = vmatprep.mubr.f32.mxu1 %v12281_v0 }
  0x7c   :  { %6291 = vmatprep.subr.bf16.mxu0 %v10155_v19  ;;  %517 = vmatprep.mubr.f32.mxu0 %v12281_v0 }
  0x7e   :  { %6119 = vmatmul.mubr.msk.f32.gmra.mrb[22].mxu1 %vm160_vm0, %v10065_v32  ;;  %6127 = vmatmul.mubr.msk.f32.gmra.mrb[22].mxu0 %vm160_vm0, %v10065_v32 }
  0x7f   :  { %6293 = vmatpush1.bf16.msra.mxu0 %v10164_v24  ;;  %588 = vmatprep.mubr.f32.mxu1 %v12281_v0 }
  0x80   :  { %6295 = vmatprep.subr.bf16.mxu0 %v10167_v34  ;;  %1021 = vmatprep.mubr.f32.mxu0 %v12281_v0 }
  0x82   :  { %6128 = vmatmul.mubr.msk.f32.vlgmr.msra.gmra.mrb[24].mxu1 %vm160_vm0, %v9991_v12  ;;  %v743_v12 = vld [vmem:[#allocation7 + $0x150] sm:$0xff] }
  0x83   :  { %6297 = vmatpush1.bf16.msra.mxu0 %v10176_v42  ;;  %6329 = vmatpush1.bf16.msra.mxu1 %v10178_v44  ;;  %v10207_v17 = vpack.c.bf16 %v743_v12, %v735_v7  ;;  %v909_v7 = vld [vmem:[#allocation7 + $0x680] sm:$0xff] }
  0x84   :  { %6299 = vmatprep.subr.bf16.mxu0 %v10181_v47  ;;  %6331 = vmatprep.subr.bf16.mxu1 %v10183_v51  ;;  %v917_v12 = vld [vmem:[#allocation7 + $0x6c0] sm:$0xff] }
  0x85   :  { %594 = vmatprep.mubr.f32.mxu1 %v12281_v0  ;;  %12638 = vst [vmem:[#allocation47_spill] sm:$0xff] %v10207_v17 }
  0x86   :  { %6129 = vmatmul.mubr.msk.f32.gmra.mrb[26].mxu1 %vm160_vm0, %v10024_v25  ;;  %v759_v25 = vld [vmem:[#allocation7 + $0x1d0] sm:$0xff] }
  0x87   :  { %6301 = vmatpush1.bf16.msra.mxu0 %v10190_v60  ;;  %6333 = vmatpush1.bf16.msra.mxu1 %v10192_v63  ;;  %v10222_v39 = vpack.c.bf16 %v759_v25, %v751_v27  ;;  %v808_v27 = vld [vmem:[#allocation7 + $0x358] sm:$0xff]  ;;  %v10250_v25 = vpack.c.bf16 %v917_v12, %v909_v7  ;;  %v941_v7 = vld [vmem:[#allocation7 + $0x780] sm:$0xff] }
  0x88   :  { %6303 = vmatprep.subr.bf16.mxu0 %v10196_v3  ;;  %6335 = vmatprep.subr.bf16.mxu1 %v10198_v6  ;;  %v10258_v40 = vpack.c.bf16 %v808_v27, %v800_v21  ;;  %v949_v12 = vld [vmem:[#allocation7 + $0x7c0] sm:$0xff]  ;;  %v840_v21 = vld [vmem:[#allocation7 + $0x458] sm:$0xff]  ;;  %v706_v27 = vld [vmem:[#allocation7 + $0x28] sm:$0xff] }
  0x89   :  { %600 = vmatprep.mubr.f32.mxu1 %v12281_v0  ;;  %12642 = vst [vmem:[#allocation51_spill] sm:$0xff] %v10222_v39  ;;  %12649 = vst [vmem:[#allocation58_spill] sm:$0xff] %v10250_v25  ;;  %v10280_v36 = vpack.c.bf16 %v949_v12, %v941_v7 }
  0x8a   :  { %6130 = vmatmul.mubr.msk.f32.gmra.mrb[28].mxu1 %vm160_vm0, %v10043_v29  ;;  %v775_v29 = vld [vmem:[#allocation7 + $0x250] sm:$0xff]  ;;  %12652 = vst [vmem:[#allocation61_spill] sm:$0xff] %v10258_v40 }
  0x8b   :  { %6305 = vmatpush1.bf16.msra.mxu0 %v10205_v16  ;;  %6337 = vmatpush1.bf16.msra.mxu1 %v10207_v17  ;;  %v10237_v2 = vpack.c.bf16 %v775_v29, %v767_v53  ;;  %v942_v53 = vld [vmem:[#allocation7 + $0x788] sm:$0xff]  ;;  %12658 = vst [vmem:[#allocation66_spill] sm:$0xff] %v10280_v36 }
  0x8c   :  { %6307 = vmatprep.subr.bf16.mxu0 %v10211_v22  ;;  %6339 = vmatprep.subr.bf16.mxu1 %v10213_v23  ;;  %v950_v29 = vld [vmem:[#allocation7 + $0x7c8] sm:$0xff] }
  0x8d   :  { %606 = vmatprep.mubr.f32.mxu1 %v12281_v0  ;;  %12646 = vst [vmem:[#allocation55_spill] sm:$0xff] %v10237_v2 }
  0x8e   :  { %6131 = vmatmul.mubr.msk.f32.gmra.mrb[30].mxu1 %vm160_vm0, %v10060_v31  ;;  %v791_v31 = vld [vmem:[#allocation7 + $0x2d0] sm:$0xff] }
  0x8f   :  { %6309 = vmatpush1.bf16.msra.mxu0 %v10220_v38  ;;  %6341 = vmatpush1.bf16.msra.mxu1 %v10222_v39  ;;  %v10252_v33 = vpack.c.bf16 %v791_v31, %v783_v14  ;;  %v10271_v14 = vpack.c.bf16 %v950_v29, %v942_v53  ;;  %v10273_v31 = vpack.c.bf16 %v824_v57, %v816_v54  ;;  %v839_v53 = vld [vmem:[#allocation7 + $0x450] sm:$0xff]  ;;  %v705_v57 = vld [vmem:[#allocation7 + $0x20] sm:$0xff] }
  0x90   :  { %6311 = vmatprep.subr.bf16.mxu0 %v10226_v46  ;;  %6343 = vmatprep.subr.bf16.mxu1 %v10228_v52  ;;  %v10286_v29 = vpack.c.bf16 %v840_v21, %v832_v20  ;;  %v721_v21 = vld [vmem:[#allocation7 + $0xa0] sm:$0xff] }
  0x91   :  { %612 = vmatprep.mubr.f32.mxu1 %v12281_v0  ;;  %12650 = vst [vmem:[#allocation59_spill] sm:$0xff] %v10252_v33  ;;  %12655 = vst [vmem:[#allocation64_spill] sm:$0xff] %v10271_v14 }
  0x92   :  { %6132 = vmatmul.mubr.msk.f32.gmra.mrb[32].mxu1 %vm160_vm0, %v9996_v13  ;;  %v807_v13 = vld [vmem:[#allocation7 + $0x350] sm:$0xff]  ;;  %12656 = vst [vmem:[#allocation65_spill] sm:$0xff] %v10273_v31  ;;  %12660 = vst [vmem:[#allocation68_spill] sm:$0xff] %v10286_v29 }
  0x93   :  { %6313 = vmatpush1.bf16.msra.mxu0 %v10235_v1  ;;  %6345 = vmatpush1.bf16.msra.mxu1 %v10237_v2  ;;  %v10267_v59 = vpack.c.bf16 %v807_v13, %v799_v45  ;;  %v831_v13 = vld [vmem:[#allocation7 + $0x410] sm:$0xff] }
  0x94   :  { %6315 = vmatprep.subr.bf16.mxu0 %v10241_v8  ;;  %6347 = vmatprep.subr.bf16.mxu1 %v10243_v9  ;;  %v10295_v7 = vpack.c.bf16 %v839_v53, %v831_v13 }
  0x95   :  { %618 = vmatprep.mubr.f32.mxu1 %v12281_v0  ;;  %12654 = vst [vmem:[#allocation63_spill] sm:$0xff] %v10267_v59  ;;  %v714_v0 = vld [vmem:[#allocation7 + $0x68] sm:$0xff] }
  0x96   :  { %6133 = vmatmul.mubr.msk.f32.gmra.mrb[34].mxu1 %vm160_vm0, %v10029_v26  ;;  %v823_v26 = vld [vmem:[#allocation7 + $0x3d0] sm:$0xff]  ;;  %v10288_v54 = vpack.c.bf16 %v714_v0, %v706_v27  ;;  %12662 = vst [vmem:[#allocation70_spill] sm:$0xff] %v10295_v7  ;;  %v864_v27 = vld [vmem:[#allocation7 + $0x518] sm:$0xff] }
  0x97   :  { %6317 = vmatpush1.bf16.msra.mxu0 %v10250_v25  ;;  %6349 = vmatpush1.bf16.msra.mxu1 %v10252_v33  ;;  %v10282_v45 = vpack.c.bf16 %v823_v26, %v815_v15  ;;  %v847_v0 = vld [vmem:[#allocation7 + $0x490] sm:$0xff] }
  0x98   :  { %6319 = vmatprep.subr.bf16.mxu0 %v10256_v37  ;;  %6351 = vmatprep.subr.bf16.mxu1 %v10258_v40  ;;  %12661 = vst [vmem:[#allocation69_spill] sm:$0xff] %v10288_v54  ;;  %v848_v37 = vld [vmem:[#allocation7 + $0x498] sm:$0xff]  ;;  %v722_v40 = vld [vmem:[#allocation7 + $0xa8] sm:$0xff]  ;;  %v855_v15 = vld [vmem:[#allocation7 + $0x4d0] sm:$0xff] }
  0x99   :  { %624 = vmatprep.mubr.f32.mxu1 %v12657_v35  ;;  %12659 = vst [vmem:[#allocation67_spill] sm:$0xff] %v10282_v45  ;;  %v10309_v13 = vpack.c.bf16 %v855_v15, %v847_v0 }
  0x9a   :  { %6134 = vmatmul.mubr.msk.f32.gmra.mrb[36].mxu1 %vm160_vm0, %v10048_v30  ;;  %v713_v30 = vld [vmem:[#allocation7 + $0x60] sm:$0xff] }
  0x9b   :  { %6321 = vmatpush1.bf16.msra.mxu0 %v10265_v58  ;;  %6353 = vmatpush1.bf16.msra.mxu1 %v10267_v59  ;;  %v856_v58 = vld [vmem:[#allocation7 + $0x4d8] sm:$0xff]  ;;  %v730_v59 = vld [vmem:[#allocation7 + $0xe8] sm:$0xff]  ;;  %v10297_v12 = vpack.c.bf16 %v713_v30, %v705_v57  ;;  %12666 = vst [vmem:[#allocation74_spill] sm:$0xff] %v10309_v13  ;;  %v737_v57 = vld [vmem:[#allocation7 + $0x120] sm:$0xff] }
  0x9c   :  { %6323 = vmatprep.subr.bf16.mxu0 %v10271_v14  ;;  %6355 = vmatprep.subr.bf16.mxu1 %v10273_v31  ;;  %v10301_v26 = vpack.c.bf16 %v856_v58, %v848_v37  ;;  %v10303_v20 = vpack.c.bf16 %v730_v59, %v722_v40  ;;  %v738_v14 = vld [vmem:[#allocation7 + $0x128] sm:$0xff]  ;;  %v863_v40 = vld [vmem:[#allocation7 + $0x510] sm:$0xff]  ;;  %v745_v30 = vld [vmem:[#allocation7 + $0x160] sm:$0xff] }
  0x9d   :  { %630 = vmatprep.mubr.f32.mxu1 %v12657_v35  ;;  %12663 = vst [vmem:[#allocation71_spill] sm:$0xff] %v10297_v12  ;;  %v871_v58 = vld [vmem:[#allocation7 + $0x550] sm:$0xff]  ;;  %v10324_v15 = vpack.c.bf16 %v745_v30, %v737_v57 }
  0x9e   :  { %6135 = vmatmul.mubr.msk.f32.gmra.mrb[38].mxu1 %vm160_vm0, %v10065_v32  ;;  %12664 = vst [vmem:[#allocation72_spill] sm:$0xff] %v10301_v26  ;;  %12665 = vst [vmem:[#allocation73_spill] sm:$0xff] %v10303_v20  ;;  %v729_v32 = vld [vmem:[#allocation7 + $0xe0] sm:$0xff]  ;;  %v10322_v0 = vpack.c.bf16 %v871_v58, %v863_v40  ;;  %v895_v57 = vld [vmem:[#allocation7 + $0x610] sm:$0xff] }
  0x9f   :  { %6325 = vmatpush1.bf16.msra.mxu0 %v10280_v36  ;;  %6357 = vmatpush1.bf16.msra.mxu1 %v10282_v45  ;;  %v872_v36 = vld [vmem:[#allocation7 + $0x558] sm:$0xff]  ;;  %v746_v45 = vld [vmem:[#allocation7 + $0x168] sm:$0xff]  ;;  %v10311_v37 = vpack.c.bf16 %v729_v32, %v721_v21  ;;  %12671 = vst [vmem:[#allocation79_spill] sm:$0xff] %v10324_v15  ;;  %v887_v21 = vld [vmem:[#allocation7 + $0x5d0] sm:$0xff] }
  0xa0   :  { %6359 = vmatprep.subr.bf16.mxu1 %v10286_v29  ;;  %6391 = vmatprep.subr.bf16.mxu0 %v10288_v54  ;;  %v10315_v59 = vpack.c.bf16 %v872_v36, %v864_v27  ;;  %v10317_v53 = vpack.c.bf16 %v746_v45, %v738_v14  ;;  %v880_v54 = vld [vmem:[#allocation7 + $0x598] sm:$0xff]  ;;  %v754_v29 = vld [vmem:[#allocation7 + $0x1a8] sm:$0xff]  ;;  %12670 = vst [vmem:[#allocation78_spill] sm:$0xff] %v10322_v0  ;;  %v879_v36 = vld [vmem:[#allocation7 + $0x590] sm:$0xff] }
  0xa1   :  { %1092 = vmatprep.mubr.f32.mxu1 %v12657_v35  ;;  %12667 = vst [vmem:[#allocation75_spill] sm:$0xff] %v10311_v37  ;;  %v753_v32 = vld [vmem:[#allocation7 + $0x1a0] sm:$0xff]  ;;  %v10334_v40 = vpack.c.bf16 %v887_v21, %v879_v36  ;;  %v903_v30 = vld [vmem:[#allocation7 + $0x650] sm:$0xff] }
  0xa2   :  { %1022 = vmatmul.mubr.f32.vlgmr.msra.gmra.mrb[0].mxu0 %v12657_v35  ;;  %12668 = vst [vmem:[#allocation76_spill] sm:$0xff] %v10315_v59  ;;  %12669 = vst [vmem:[#allocation77_spill] sm:$0xff] %v10317_v53  ;;  %v761_v27 = vld [vmem:[#allocation7 + $0x1e0] sm:$0xff]  ;;  %v10346_v36 = vpack.c.bf16 %v903_v30, %v895_v57 }
  0xa3   :  { %6361 = vmatpush1.bf16.msra.mxu1 %v10295_v7  ;;  %6393 = vmatpush1.bf16.msra.mxu0 %v10297_v12  ;;  %v888_v7 = vld [vmem:[#allocation7 + $0x5d8] sm:$0xff]  ;;  %v762_v12 = vld [vmem:[#allocation7 + $0x1e8] sm:$0xff]  ;;  %12674 = vst [vmem:[#allocation82_spill] sm:$0xff] %v10334_v40  ;;  %v10336_v58 = vpack.c.bf16 %v761_v27, %v753_v32  ;;  %v911_v32 = vld [vmem:[#allocation7 + $0x690] sm:$0xff] }
  0xa4   :  { %6363 = vmatprep.subr.bf16.mxu1 %v10301_v26  ;;  %6395 = vmatprep.subr.bf16.mxu0 %v10303_v20  ;;  %v10328_v14 = vpack.c.bf16 %v888_v7, %v880_v54  ;;  %v10330_v45 = vpack.c.bf16 %v762_v12, %v754_v29  ;;  %v896_v20 = vld [vmem:[#allocation7 + $0x618] sm:$0xff]  ;;  %v770_v26 = vld [vmem:[#allocation7 + $0x228] sm:$0xff]  ;;  %v769_v7 = vld [vmem:[#allocation7 + $0x220] sm:$0xff]  ;;  %12678 = vst [vmem:[#allocation86_spill] sm:$0xff] %v10346_v36 }
  0xa5   :  { %1163 = vmatprep.mubr.f32.mxu0 %v12657_v35  ;;  %12675 = vst [vmem:[#allocation83_spill] sm:$0xff] %v10336_v58  ;;  %v777_v12 = vld [vmem:[#allocation7 + $0x260] sm:$0xff]  ;;  %v919_v27 = vld [vmem:[#allocation7 + $0x6d0] sm:$0xff] }
  0xa6   :  { %12672 = vst [vmem:[#allocation80_spill] sm:$0xff] %v10328_v14  ;;  %12673 = vst [vmem:[#allocation81_spill] sm:$0xff] %v10330_v45  ;;  %v10348_v21 = vpack.c.bf16 %v777_v12, %v769_v7  ;;  %v10358_v57 = vpack.c.bf16 %v919_v27, %v911_v32  ;;  %v927_v7 = vld [vmem:[#allocation7 + $0x710] sm:$0xff] }
  0xa7   :  { %6365 = vmatpush1.bf16.msra.mxu1 %v10309_v13  ;;  %6397 = vmatpush1.bf16.msra.mxu0 %v10311_v37  ;;  %v904_v13 = vld [vmem:[#allocation7 + $0x658] sm:$0xff]  ;;  %v778_v37 = vld [vmem:[#allocation7 + $0x268] sm:$0xff]  ;;  %v935_v12 = vld [vmem:[#allocation7 + $0x750] sm:$0xff] }
  0xa8   :  { %6367 = vmatprep.subr.bf16.mxu1 %v10315_v59  ;;  %6399 = vmatprep.subr.bf16.mxu0 %v10317_v53  ;;  %v10340_v29 = vpack.c.bf16 %v904_v13, %v896_v20  ;;  %v10342_v54 = vpack.c.bf16 %v778_v37, %v770_v26  ;;  %v912_v53 = vld [vmem:[#allocation7 + $0x698] sm:$0xff]  ;;  %v786_v59 = vld [vmem:[#allocation7 + $0x2a8] sm:$0xff]  ;;  %12679 = vst [vmem:[#allocation87_spill] sm:$0xff] %v10348_v21  ;;  %v785_v13 = vld [vmem:[#allocation7 + $0x2a0] sm:$0xff] }
  0xa9   :  { %v793_v37 = vld [vmem:[#allocation7 + $0x2e0] sm:$0xff]  ;;  %12682 = vst [vmem:[#allocation90_spill] sm:$0xff] %v10358_v57  ;;  %v10370_v32 = vpack.c.bf16 %v935_v12, %v927_v7 }
  0xaa   :  { %12676 = vst [vmem:[#allocation84_spill] sm:$0xff] %v10340_v29  ;;  %12677 = vst [vmem:[#allocation85_spill] sm:$0xff] %v10342_v54  ;;  %v10360_v30 = vpack.c.bf16 %v793_v37, %v785_v13  ;;  %v943_v13 = vld [vmem:[#allocation7 + $0x790] sm:$0xff] }
  0xab   :  { %6369 = vmatpush1.bf16.msra.mxu1 %v10322_v0  ;;  %6401 = vmatpush1.bf16.msra.mxu0 %v10324_v15  ;;  %v920_v0 = vld [vmem:[#allocation7 + $0x6d8] sm:$0xff]  ;;  %v794_v15 = vld [vmem:[#allocation7 + $0x2e8] sm:$0xff]  ;;  %12686 = vst [vmem:[#allocation94_spill] sm:$0xff] %v10370_v32  ;;  %v951_v37 = vld [vmem:[#allocation7 + $0x7d0] sm:$0xff] }
  0xac   :  { %6371 = vmatprep.subr.bf16.mxu1 %v10328_v14  ;;  %6403 = vmatprep.subr.bf16.mxu0 %v10330_v45  ;;  %v10352_v26 = vpack.c.bf16 %v920_v0, %v912_v53  ;;  %v10354_v20 = vpack.c.bf16 %v794_v15, %v786_v59  ;;  %v928_v45 = vld [vmem:[#allocation7 + $0x718] sm:$0xff]  ;;  %v802_v14 = vld [vmem:[#allocation7 + $0x328] sm:$0xff]  ;;  %12683 = vst [vmem:[#allocation91_spill] sm:$0xff] %v10360_v30  ;;  %v801_v0 = vld [vmem:[#allocation7 + $0x320] sm:$0xff] }
  0xad   :  { %v809_v15 = vld [vmem:[#allocation7 + $0x360] sm:$0xff]  ;;  %v10382_v7 = vpack.c.bf16 %v951_v37, %v943_v13 }
  0xae   :  { %12680 = vst [vmem:[#allocation88_spill] sm:$0xff] %v10352_v26  ;;  %12681 = vst [vmem:[#allocation89_spill] sm:$0xff] %v10354_v20  ;;  %v10372_v27 = vpack.c.bf16 %v809_v15, %v801_v0  ;;  %v833_v0 = vld [vmem:[#allocation7 + $0x420] sm:$0xff] }
  0xaf   :  { %6373 = vmatpush1.bf16.msra.mxu1 %v10334_v40  ;;  %6405 = vmatpush1.bf16.msra.mxu0 %v10336_v58  ;;  %v936_v40 = vld [vmem:[#allocation7 + $0x758] sm:$0xff]  ;;  %v810_v58 = vld [vmem:[#allocation7 + $0x368] sm:$0xff]  ;;  %12690 = vst [vmem:[#allocation98_spill] sm:$0xff] %v10382_v7  ;;  %v841_v15 = vld [vmem:[#allocation7 + $0x460] sm:$0xff] }
  0xb0   :  { %6375 = vmatprep.subr.bf16.mxu1 %v10340_v29  ;;  %6407 = vmatprep.subr.bf16.mxu0 %v10342_v54  ;;  %v10364_v59 = vpack.c.bf16 %v936_v40, %v928_v45  ;;  %v10366_v53 = vpack.c.bf16 %v810_v58, %v802_v14  ;;  %v944_v54 = vld [vmem:[#allocation7 + $0x798] sm:$0xff]  ;;  %v818_v29 = vld [vmem:[#allocation7 + $0x3a8] sm:$0xff]  ;;  %12687 = vst [vmem:[#allocation95_spill] sm:$0xff] %v10372_v27  ;;  %v817_v40 = vld [vmem:[#allocation7 + $0x3a0] sm:$0xff] }
  0xb1   :  { %v825_v58 = vld [vmem:[#allocation7 + $0x3e0] sm:$0xff]  ;;  %v10394_v13 = vpack.c.bf16 %v841_v15, %v833_v0 }
  0xb2   :  { %12684 = vst [vmem:[#allocation92_spill] sm:$0xff] %v10364_v59  ;;  %12685 = vst [vmem:[#allocation93_spill] sm:$0xff] %v10366_v53  ;;  %v10384_v12 = vpack.c.bf16 %v825_v58, %v817_v40  ;;  %v849_v40 = vld [vmem:[#allocation7 + $0x4a0] sm:$0xff] }
  0xb3   :  { %6377 = vmatpush1.bf16.msra.mxu1 %v10346_v36  ;;  %6409 = vmatpush1.bf16.msra.mxu0 %v10348_v21  ;;  %v952_v36 = vld [vmem:[#allocation7 + $0x7d8] sm:$0xff]  ;;  %v826_v21 = vld [vmem:[#allocation7 + $0x3e8] sm:$0xff]  ;;  %12694 = vst [vmem:[#allocation102_spill] sm:$0xff] %v10394_v13  ;;  %v857_v58 = vld [vmem:[#allocation7 + $0x4e0] sm:$0xff] }
  0xb4   :  { %6379 = vmatprep.subr.bf16.mxu1 %v10352_v26  ;;  %6411 = vmatprep.subr.bf16.mxu0 %v10354_v20  ;;  %v10376_v14 = vpack.c.bf16 %v952_v36, %v944_v54  ;;  %v10378_v45 = vpack.c.bf16 %v826_v21, %v818_v29  ;;  %v834_v20 = vld [vmem:[#allocation7 + $0x428] sm:$0xff]  ;;  %v708_v26 = vld [vmem:[#allocation7 + $0x38] sm:$0xff]  ;;  %12691 = vst [vmem:[#allocation99_spill] sm:$0xff] %v10384_v12  ;;  %v707_v36 = vld [vmem:[#allocation7 + $0x30] sm:$0xff] }
  0xb5   :  { %v715_v21 = vld [vmem:[#allocation7 + $0x70] sm:$0xff]  ;;  %v10407_v0 = vpack.c.bf16 %v857_v58, %v849_v40 }
  0xb6   :  { %12688 = vst [vmem:[#allocation96_spill] sm:$0xff] %v10376_v14  ;;  %12689 = vst [vmem:[#allocation97_spill] sm:$0xff] %v10378_v45  ;;  %v10396_v37 = vpack.c.bf16 %v715_v21, %v707_v36  ;;  %v739_v36 = vld [vmem:[#allocation7 + $0x130] sm:$0xff] }
  0xb7   :  { %6381 = vmatpush1.bf16.msra.mxu1 %v10358_v57  ;;  %6413 = vmatpush1.bf16.msra.mxu0 %v10360_v30  ;;  %v842_v57 = vld [vmem:[#allocation7 + $0x468] sm:$0xff]  ;;  %v716_v30 = vld [vmem:[#allocation7 + $0x78] sm:$0xff]  ;;  %12698 = vst [vmem:[#allocation106_spill] sm:$0xff] %v10407_v0  ;;  %v747_v21 = vld [vmem:[#allocation7 + $0x170] sm:$0xff] }
  0xb8   :  { %6383 = vmatprep.subr.bf16.mxu1 %v10364_v59  ;;  %6415 = vmatprep.subr.bf16.mxu0 %v10366_v53  ;;  %v10388_v29 = vpack.c.bf16 %v842_v57, %v834_v20  ;;  %v10390_v54 = vpack.c.bf16 %v716_v30, %v708_v26  ;;  %v850_v53 = vld [vmem:[#allocation7 + $0x4a8] sm:$0xff]  ;;  %v724_v59 = vld [vmem:[#allocation7 + $0xb8] sm:$0xff]  ;;  %12695 = vst [vmem:[#allocation103_spill] sm:$0xff] %v10396_v37  ;;  %v723_v57 = vld [vmem:[#allocation7 + $0xb0] sm:$0xff] }
  0xb9   :  { %v731_v30 = vld [vmem:[#allocation7 + $0xf0] sm:$0xff]  ;;  %v10422_v58 = vpack.c.bf16 %v747_v21, %v739_v36  ;;  %v897_v36 = vld [vmem:[#allocation7 + $0x620] sm:$0xff] }
  0xba   :  { %12692 = vst [vmem:[#allocation100_spill] sm:$0xff] %v10388_v29  ;;  %12693 = vst [vmem:[#allocation101_spill] sm:$0xff] %v10390_v54  ;;  %v10409_v15 = vpack.c.bf16 %v731_v30, %v723_v57  ;;  %v755_v57 = vld [vmem:[#allocation7 + $0x1b0] sm:$0xff]  ;;  %v905_v21 = vld [vmem:[#allocation7 + $0x660] sm:$0xff] }
  0xbb   :  { %6385 = vmatpush1.bf16.msra.mxu1 %v10370_v32  ;;  %6417 = vmatpush1.bf16.msra.mxu0 %v10372_v27  ;;  %v858_v32 = vld [vmem:[#allocation7 + $0x4e8] sm:$0xff]  ;;  %v732_v27 = vld [vmem:[#allocation7 + $0xf8] sm:$0xff]  ;;  %12703 = vst [vmem:[#allocation111_spill] sm:$0xff] %v10422_v58  ;;  %v763_v30 = vld [vmem:[#allocation7 + $0x1f0] sm:$0xff] }
  0xbc   :  { %6387 = vmatprep.subr.bf16.mxu1 %v10376_v14  ;;  %6419 = vmatprep.subr.bf16.mxu0 %v10378_v45  ;;  %v10400_v26 = vpack.c.bf16 %v858_v32, %v850_v53  ;;  %v10402_v20 = vpack.c.bf16 %v732_v27, %v724_v59  ;;  %v866_v45 = vld [vmem:[#allocation7 + $0x528] sm:$0xff]  ;;  %v740_v14 = vld [vmem:[#allocation7 + $0x138] sm:$0xff]  ;;  %12699 = vst [vmem:[#allocation107_spill] sm:$0xff] %v10409_v15  ;;  %v865_v53 = vld [vmem:[#allocation7 + $0x520] sm:$0xff] }
  0xbd   :  { %v873_v32 = vld [vmem:[#allocation7 + $0x560] sm:$0xff] }
  0xbe   :  { %12696 = vst [vmem:[#allocation104_spill] sm:$0xff] %v10400_v26  ;;  %12697 = vst [vmem:[#allocation105_spill] sm:$0xff] %v10402_v20  ;;  %v10420_v40 = vpack.c.bf16 %v873_v32, %v865_v53  ;;  %v10434_v32 = vpack.c.bf16 %v763_v30, %v755_v57  ;;  %v913_v57 = vld [vmem:[#allocation7 + $0x6a0] sm:$0xff] }
  0xbf   :  { %6389 = vmatpush1.bf16.msra.mxu1 %v10382_v7  ;;  %6421 = vmatpush1.bf16.msra.mxu0 %v10384_v12  ;;  %v874_v7 = vld [vmem:[#allocation7 + $0x568] sm:$0xff]  ;;  %v748_v12 = vld [vmem:[#allocation7 + $0x178] sm:$0xff]  ;;  %v921_v30 = vld [vmem:[#allocation7 + $0x6e0] sm:$0xff] }
  0xc0   :  { %6423 = vmatprep.subr.bf16.mxu0 %v10388_v29  ;;  %6455 = vmatprep.subr.bf16.mxu1 %v10390_v54  ;;  %v10413_v59 = vpack.c.bf16 %v874_v7, %v866_v45  ;;  %v10415_v27 = vpack.c.bf16 %v748_v12, %v740_v14  ;;  %v882_v29 = vld [vmem:[#allocation7 + $0x5a8] sm:$0xff]  ;;  %v756_v54 = vld [vmem:[#allocation7 + $0x1b8] sm:$0xff]  ;;  %12702 = vst [vmem:[#allocation110_spill] sm:$0xff] %v10420_v40  ;;  %v881_v45 = vld [vmem:[#allocation7 + $0x5a0] sm:$0xff] }
  0xc1   :  { %v889_v7 = vld [vmem:[#allocation7 + $0x5e0] sm:$0xff]  ;;  %12707 = vst [vmem:[#allocation115_spill] sm:$0xff] %v10434_v32 }
  0xc2   :  { %1093 = vmatmul.mubr.f32.vlgmr.msra.gmra.mrb[8].mxu1 %v12657_v35  ;;  %12700 = vst [vmem:[#allocation108_spill] sm:$0xff] %v10413_v59  ;;  %12701 = vst [vmem:[#allocation109_spill] sm:$0xff] %v10415_v27  ;;  %v10432_v53 = vpack.c.bf16 %v889_v7, %v881_v45  ;;  %v10444_v45 = vpack.c.bf16 %v905_v21, %v897_v36  ;;  %v10456_v36 = vpack.c.bf16 %v921_v30, %v913_v57 }
  0xc3   :  { %6425 = vmatpush1.bf16.msra.mxu0 %v10394_v13  ;;  %6457 = vmatpush1.bf16.msra.mxu1 %v10396_v37  ;;  %v890_v13 = vld [vmem:[#allocation7 + $0x5e8] sm:$0xff]  ;;  %v764_v37 = vld [vmem:[#allocation7 + $0x1f8] sm:$0xff] }
  0xc4   :  { %6427 = vmatprep.subr.bf16.mxu0 %v10400_v26  ;;  %6459 = vmatprep.subr.bf16.mxu1 %v10402_v20  ;;  %v10426_v14 = vpack.c.bf16 %v890_v13, %v882_v29  ;;  %v10428_v12 = vpack.c.bf16 %v764_v37, %v756_v54  ;;  %v898_v26 = vld [vmem:[#allocation7 + $0x628] sm:$0xff]  ;;  %v772_v20 = vld [vmem:[#allocation7 + $0x238] sm:$0xff]  ;;  %12706 = vst [vmem:[#allocation114_spill] sm:$0xff] %v10432_v53  ;;  %v771_v13 = vld [vmem:[#allocation7 + $0x230] sm:$0xff] }
  0xc5   :  { %1234 = vmatprep.mubr.f32.mxu1 %v12657_v35  ;;  %v779_v37 = vld [vmem:[#allocation7 + $0x270] sm:$0xff]  ;;  %12710 = vst [vmem:[#allocation118_spill] sm:$0xff] %v10444_v45  ;;  %12714 = vst [vmem:[#allocation122_spill] sm:$0xff] %v10456_v36 }
  0xc6   :  { %12704 = vst [vmem:[#allocation112_spill] sm:$0xff] %v10426_v14  ;;  %12705 = vst [vmem:[#allocation113_spill] sm:$0xff] %v10428_v12  ;;  %v10446_v7 = vpack.c.bf16 %v779_v37, %v771_v13  ;;  %v929_v13 = vld [vmem:[#allocation7 + $0x720] sm:$0xff] }
  0xc7   :  { %6429 = vmatpush1.bf16.msra.mxu0 %v10407_v0  ;;  %6461 = vmatpush1.bf16.msra.mxu1 %v10409_v15  ;;  %v906_v0 = vld [vmem:[#allocation7 + $0x668] sm:$0xff]  ;;  %v780_v15 = vld [vmem:[#allocation7 + $0x278] sm:$0xff]  ;;  %v937_v37 = vld [vmem:[#allocation7 + $0x760] sm:$0xff] }
  0xc8   :  { %6431 = vmatprep.subr.bf16.mxu0 %v10413_v59  ;;  %6463 = vmatprep.subr.bf16.mxu1 %v10415_v27  ;;  %v10438_v29 = vpack.c.bf16 %v906_v0, %v898_v26  ;;  %v10440_v54 = vpack.c.bf16 %v780_v15, %v772_v20  ;;  %v914_v59 = vld [vmem:[#allocation7 + $0x6a8] sm:$0xff]  ;;  %v788_v27 = vld [vmem:[#allocation7 + $0x2b8] sm:$0xff]  ;;  %12711 = vst [vmem:[#allocation119_spill] sm:$0xff] %v10446_v7  ;;  %v787_v0 = vld [vmem:[#allocation7 + $0x2b0] sm:$0xff] }
  0xc9   :  { %v795_v15 = vld [vmem:[#allocation7 + $0x2f0] sm:$0xff]  ;;  %v10468_v57 = vpack.c.bf16 %v937_v37, %v929_v13 }
  0xca   :  { %12708 = vst [vmem:[#allocation116_spill] sm:$0xff] %v10438_v29  ;;  %12709 = vst [vmem:[#allocation117_spill] sm:$0xff] %v10440_v54  ;;  %v10458_v21 = vpack.c.bf16 %v795_v15, %v787_v0  ;;  %v945_v0 = vld [vmem:[#allocation7 + $0x7a0] sm:$0xff]  ;;  %v827_v15 = vld [vmem:[#allocation7 + $0x3f0] sm:$0xff] }
  0xcb   :  { %6433 = vmatpush1.bf16.msra.mxu0 %v10420_v40  ;;  %6465 = vmatpush1.bf16.msra.mxu1 %v10422_v58  ;;  %v922_v40 = vld [vmem:[#allocation7 + $0x6e8] sm:$0xff]  ;;  %v796_v58 = vld [vmem:[#allocation7 + $0x2f8] sm:$0xff]  ;;  %12718 = vst [vmem:[#allocation126_spill] sm:$0xff] %v10468_v57 }
  0xcc   :  { %6435 = vmatprep.subr.bf16.mxu0 %v10426_v14  ;;  %6467 = vmatprep.subr.bf16.mxu1 %v10428_v12  ;;  %v10450_v26 = vpack.c.bf16 %v922_v40, %v914_v59  ;;  %v10452_v20 = vpack.c.bf16 %v796_v58, %v788_v27  ;;  %v930_v14 = vld [vmem:[#allocation7 + $0x728] sm:$0xff]  ;;  %v804_v12 = vld [vmem:[#allocation7 + $0x338] sm:$0xff]  ;;  %12715 = vst [vmem:[#allocation123_spill] sm:$0xff] %v10458_v21  ;;  %v803_v40 = vld [vmem:[#allocation7 + $0x330] sm:$0xff] }
  0xcd   :  { %v811_v58 = vld [vmem:[#allocation7 + $0x370] sm:$0xff] }
  0xce   :  { %12712 = vst [vmem:[#allocation120_spill] sm:$0xff] %v10450_v26  ;;  %12713 = vst [vmem:[#allocation121_spill] sm:$0xff] %v10452_v20  ;;  %v10470_v30 = vpack.c.bf16 %v811_v58, %v803_v40  ;;  %v860_v40 = vld [vmem:[#allocation7 + $0x4f8] sm:$0xff] }
  0xcf   :  { %6437 = vmatpush1.bf16.msra.mxu0 %v10432_v53  ;;  %6469 = vmatpush1.bf16.msra.mxu1 %v10434_v32  ;;  %v938_v53 = vld [vmem:[#allocation7 + $0x768] sm:$0xff]  ;;  %v812_v32 = vld [vmem:[#allocation7 + $0x378] sm:$0xff] }
  0xd0   :  { %6439 = vmatprep.subr.bf16.mxu0 %v10438_v29  ;;  %6471 = vmatprep.subr.bf16.mxu1 %v10440_v54  ;;  %v10462_v59 = vpack.c.bf16 %v938_v53, %v930_v14  ;;  %v10464_v27 = vpack.c.bf16 %v812_v32, %v804_v12  ;;  %v946_v29 = vld [vmem:[#allocation7 + $0x7a8] sm:$0xff]  ;;  %v820_v54 = vld [vmem:[#allocation7 + $0x3b8] sm:$0xff]  ;;  %12719 = vst [vmem:[#allocation127_spill] sm:$0xff] %v10470_v30  ;;  %v953_v53 = vld [vmem:[#allocation7 + $0x7e0] sm:$0xff] }
  0xd1   :  { %v819_v32 = vld [vmem:[#allocation7 + $0x3b0] sm:$0xff]  ;;  %v10480_v13 = vpack.c.bf16 %v953_v53, %v945_v0 }
  0xd2   :  { %12716 = vst [vmem:[#allocation124_spill] sm:$0xff] %v10462_v59  ;;  %12717 = vst [vmem:[#allocation125_spill] sm:$0xff] %v10464_v27  ;;  %v10482_v37 = vpack.c.bf16 %v827_v15, %v819_v32  ;;  %v851_v53 = vld [vmem:[#allocation7 + $0x4b0] sm:$0xff] }
  0xd3   :  { %6441 = vmatpush1.bf16.msra.mxu0 %v10444_v45  ;;  %6473 = vmatpush1.bf16.msra.mxu1 %v10446_v7  ;;  %v954_v45 = vld [vmem:[#allocation7 + $0x7e8] sm:$0xff]  ;;  %v828_v7 = vld [vmem:[#allocation7 + $0x3f8] sm:$0xff]  ;;  %12722 = vst [vmem:[#allocation130_spill] sm:$0xff] %v10480_v13  ;;  %v859_v32 = vld [vmem:[#allocation7 + $0x4f0] sm:$0xff] }
  0xd4   :  { %6443 = vmatprep.subr.bf16.mxu0 %v10450_v26  ;;  %6475 = vmatprep.subr.bf16.mxu1 %v10452_v20  ;;  %v10474_v14 = vpack.c.bf16 %v954_v45, %v946_v29  ;;  %v10476_v12 = vpack.c.bf16 %v828_v7, %v820_v54  ;;  %v836_v26 = vld [vmem:[#allocation7 + $0x438] sm:$0xff]  ;;  %12723 = vst [vmem:[#allocation131_spill] sm:$0xff] %v10482_v37  ;;  %v835_v54 = vld [vmem:[#allocation7 + $0x430] sm:$0xff] }
  0xd5   :  { %v843_v45 = vld [vmem:[#allocation7 + $0x470] sm:$0xff]  ;;  %v852_v7 = vld [vmem:[#allocation7 + $0x4b8] sm:$0xff]  ;;  %v10498_v15 = vpack.c.bf16 %v859_v32, %v851_v53 }
  0xd6   :  { %12720 = vst [vmem:[#allocation128_spill] sm:$0xff] %v10474_v14  ;;  %12721 = vst [vmem:[#allocation129_spill] sm:$0xff] %v10476_v12  ;;  %v10490_v58 = vpack.c.bf16 %v843_v45, %v835_v54  ;;  %v10493_v0 = vpack.c.bf16 %v860_v40, %v852_v7  ;;  %v867_v45 = vld [vmem:[#allocation7 + $0x530] sm:$0xff]  ;;  %v884_v40 = vld [vmem:[#allocation7 + $0x5b8] sm:$0xff] }
  0xd7   :  { %6445 = vmatpush1.bf16.msra.mxu0 %v10456_v36  ;;  %6477 = vmatpush1.bf16.msra.mxu1 %v10458_v21  ;;  %v844_v36 = vld [vmem:[#allocation7 + $0x478] sm:$0xff]  ;;  %12727 = vst [vmem:[#allocation135_spill] sm:$0xff] %v10498_v15  ;;  %v875_v7 = vld [vmem:[#allocation7 + $0x570] sm:$0xff] }
  0xd8   :  { %6447 = vmatprep.subr.bf16.mxu0 %v10462_v59  ;;  %6479 = vmatprep.subr.bf16.mxu1 %v10464_v27  ;;  %v10486_v29 = vpack.c.bf16 %v844_v36, %v836_v26  ;;  %12725 = vst [vmem:[#allocation133_spill] sm:$0xff] %v10490_v58  ;;  %12726 = vst [vmem:[#allocation134_spill] sm:$0xff] %v10493_v0  ;;  %v868_v26 = vld [vmem:[#allocation7 + $0x538] sm:$0xff]  ;;  %v883_v32 = vld [vmem:[#allocation7 + $0x5b0] sm:$0xff] }
  0xd9   :  { %v876_v36 = vld [vmem:[#allocation7 + $0x578] sm:$0xff] }
  0xda   :  { %12724 = vst [vmem:[#allocation132_spill] sm:$0xff] %v10486_v29  ;;  %v10502_v54 = vpack.c.bf16 %v876_v36, %v868_v26  ;;  %v900_v26 = vld [vmem:[#allocation7 + $0x638] sm:$0xff] }
  0xdb   :  { %6449 = vmatpush1.bf16.msra.mxu0 %v10468_v57  ;;  %6481 = vmatpush1.bf16.msra.mxu1 %v10470_v30  ;;  %v908_v36 = vld [vmem:[#allocation7 + $0x678] sm:$0xff] }
  0xdc   :  { %6451 = vmatprep.subr.bf16.mxu0 %v10474_v14  ;;  %6483 = vmatprep.subr.bf16.mxu1 %v10476_v12  ;;  %12728 = vst [vmem:[#allocation136_spill] sm:$0xff] %v10502_v54 }
  0xdf   :  { %6453 = vmatpush1.bf16.msra.mxu0 %v10480_v13  ;;  %6485 = vmatpush1.bf16.msra.mxu1 %v10482_v37  ;;  %v10506_v13 = vpack.c.bf16 %v875_v7, %v867_v45  ;;  %v10518_v45 = vpack.c.bf16 %v908_v36, %v900_v26  ;;  %v899_v7 = vld [vmem:[#allocation7 + $0x630] sm:$0xff]  ;;  %v932_v26 = vld [vmem:[#allocation7 + $0x738] sm:$0xff] }
  0xe0   :  { %6487 = vmatprep.subr.bf16.mxu1 %v10486_v29  ;;  %6519 = vmatprep.subr.bf16.mxu0 %v10032_v28  ;;  %v892_v28 = vld [vmem:[#allocation7 + $0x5f8] sm:$0xff] }
  0xe1   :  { %12729 = vst [vmem:[#allocation137_spill] sm:$0xff] %v10506_v13  ;;  %v10510_v53 = vpack.c.bf16 %v892_v28, %v884_v40  ;;  %12732 = vst [vmem:[#allocation140_spill] sm:$0xff] %v10518_v45  ;;  %v916_v28 = vld [vmem:[#allocation7 + $0x6b8] sm:$0xff] }
  0xe2   :  { %1164 = vmatmul.mubr.f32.vlgmr.msra.gmra.mrb[22].mxu0 %v12657_v35  ;;  %v924_v40 = vld [vmem:[#allocation7 + $0x6f8] sm:$0xff] }
  0xe3   :  { %6489 = vmatpush1.bf16.msra.mxu1 %v10490_v58  ;;  %6521 = vmatpush1.bf16.msra.mxu0 %v10079_v41  ;;  %12730 = vst [vmem:[#allocation138_spill] sm:$0xff] %v10510_v53  ;;  %v891_v41 = vld [vmem:[#allocation7 + $0x5f0] sm:$0xff]  ;;  %v940_v36 = vld [vmem:[#allocation7 + $0x778] sm:$0xff] }
  0xe4   :  { %6491 = vmatprep.subr.bf16.mxu1 %v10493_v0  ;;  %6523 = vmatprep.subr.bf16.mxu0 %v10081_v43  ;;  %v10514_v43 = vpack.c.bf16 %v891_v41, %v883_v32  ;;  %v10526_v41 = vpack.c.bf16 %v924_v40, %v916_v28  ;;  %v915_v32 = vld [vmem:[#allocation7 + $0x6b0] sm:$0xff]  ;;  %v948_v28 = vld [vmem:[#allocation7 + $0x7b8] sm:$0xff] }
  0xe5   :  { %v956_v40 = vld [vmem:[#allocation7 + $0x7f8] sm:$0xff] }
  0xe6   :  { %12731 = vst [vmem:[#allocation139_spill] sm:$0xff] %v10514_v43  ;;  %12734 = vst [vmem:[#allocation142_spill] sm:$0xff] %v10526_v41 }
  0xe7   :  { %6493 = vmatpush1.bf16.msra.mxu1 %v10498_v15  ;;  %6525 = vmatpush1.bf16.msra.mxu0 %v10090_v49  ;;  %v907_v49 = vld [vmem:[#allocation7 + $0x670] sm:$0xff] }
  0xe8   :  { %6495 = vmatprep.subr.bf16.mxu1 %v10502_v54  ;;  %6527 = vmatprep.subr.bf16.mxu0 %v10094_v50  ;;  %v10522_v50 = vpack.c.bf16 %v907_v49, %v899_v7  ;;  %v10534_v49 = vpack.c.bf16 %v940_v36, %v932_v26  ;;  %v931_v7 = vld [vmem:[#allocation7 + $0x730] sm:$0xff]  ;;  %v12742_v36 = vld [vmem:[#allocation63_spill] sm:$0xff] }
  0xea   :  { %12733 = vst [vmem:[#allocation141_spill] sm:$0xff] %v10522_v50  ;;  %12736 = vst [vmem:[#allocation144_spill] sm:$0xff] %v10534_v49 }
  0xeb   :  { %6497 = vmatpush1.bf16.msra.mxu1 %v10506_v13  ;;  %6529 = vmatpush1.bf16.msra.mxu0 %v10104_v55  ;;  %v923_v55 = vld [vmem:[#allocation7 + $0x6f0] sm:$0xff] }
  0xec   :  { %6499 = vmatprep.subr.bf16.mxu1 %v10510_v53  ;;  %6531 = vmatprep.subr.bf16.mxu0 %v10107_v56  ;;  %v10530_v56 = vpack.c.bf16 %v923_v55, %v915_v32  ;;  %v10542_v55 = vpack.c.bf16 %v956_v40, %v948_v28  ;;  %v947_v32 = vld [vmem:[#allocation7 + $0x7b0] sm:$0xff]  ;;  %v12744_v28 = vld [vmem:[#allocation64_spill] sm:$0xff]  ;;  %v12745_v40 = vld [vmem:[#allocation67_spill] sm:$0xff] }
  0xee   :  { %12735 = vst [vmem:[#allocation143_spill] sm:$0xff] %v10530_v56  ;;  %12738 = vst [vmem:[#allocation146_spill] sm:$0xff] %v10542_v55 }
  0xef   :  { %6501 = vmatpush1.bf16.msra.mxu1 %v10514_v43  ;;  %6533 = vmatpush1.bf16.msra.mxu0 %v10116_v61  ;;  %v939_v61 = vld [vmem:[#allocation7 + $0x770] sm:$0xff] }
  0xf0   :  { %6503 = vmatprep.subr.bf16.mxu1 %v10518_v45  ;;  %6535 = vmatprep.subr.bf16.mxu0 %v10119_v62  ;;  %v10538_v62 = vpack.c.bf16 %v939_v61, %v931_v7  ;;  %v12740_v61 = vld [vmem:[#allocation61_spill] sm:$0xff]  ;;  %v12743_v7 = vld [vmem:[#allocation62_spill] sm:$0xff] }
  0xf2   :  { %12737 = vst [vmem:[#allocation145_spill] sm:$0xff] %v10538_v62 }
  0xf3   :  { %6505 = vmatpush1.bf16.msra.mxu1 %v10522_v50  ;;  %6537 = vmatpush1.bf16.msra.mxu0 %v10128_v4  ;;  %v955_v4 = vld [vmem:[#allocation7 + $0x7f0] sm:$0xff] }
  0xf4   :  { %6507 = vmatprep.subr.bf16.mxu1 %v10526_v41  ;;  %6539 = vmatprep.subr.bf16.mxu0 %v10131_v5  ;;  %v10546_v26 = vpack.c.bf16 %v955_v4, %v947_v32  ;;  %v12741_v4 = vld [vmem:[#allocation60_spill] sm:$0xff]  ;;  %v12746_v32 = vld [vmem:[#allocation66_spill] sm:$0xff] }
  0xf6   :  { %12739 = vst [vmem:[#allocation147_spill] sm:$0xff] %v10546_v26 }
  0xf7   :  { %6509 = vmatpush1.bf16.msra.mxu1 %v10530_v56  ;;  %6541 = vmatpush1.bf16.msra.mxu0 %v10140_v10 }
  0xf8   :  { %6511 = vmatprep.subr.bf16.mxu1 %v10534_v49  ;;  %6543 = vmatprep.subr.bf16.mxu0 %v10143_v11 }
  0xfb   :  { %6513 = vmatpush1.bf16.msra.mxu1 %v10538_v62  ;;  %6545 = vmatpush1.bf16.msra.mxu0 %v10152_v18 }
  0xfc   :  { %6515 = vmatprep.subr.bf16.mxu1 %v10542_v55  ;;  %6547 = vmatprep.subr.bf16.mxu0 %v10155_v19 }
  0xff   :  { %6517 = vmatpush1.bf16.msra.mxu1 %v10546_v26  ;;  %6549 = vmatpush1.bf16.msra.mxu0 %v10164_v24 }
 0x100   :  { %6583 = vmatprep.subr.bf16.mxu1 %v10083_v48  ;;  %6551 = vmatprep.subr.bf16.mxu0 %v10167_v34 }
 0x102   :  { %1235 = vmatmul.mubr.f32.vlgmr.msra.gmra.mrb[38].mxu1 %v12657_v35  ;;  %v12747_v35 = vld [vmem:[#allocation68_spill] sm:$0xff] }
 0x103   :  { %6585 = vmatpush1.bf16.msra.mxu1 %v10178_v44  ;;  %6553 = vmatpush1.bf16.msra.mxu0 %v10176_v42 }
 0x104   :  { %6587 = vmatprep.subr.bf16.mxu1 %v10183_v51  ;;  %6555 = vmatprep.subr.bf16.mxu0 %v10181_v47 }
 0x107   :  { %6589 = vmatpush1.bf16.msra.mxu1 %v10192_v63  ;;  %6557 = vmatpush1.bf16.msra.mxu0 %v10190_v60  ;;  %v12761_v60 = vld [vmem:[#allocation82_spill] sm:$0xff] }
 0x108   :  { %6591 = vmatprep.subr.bf16.mxu1 %v10198_v6  ;;  %6559 = vmatprep.subr.bf16.mxu0 %v10196_v3 }
 0x10b   :  { %6593 = vmatpush1.bf16.msra.mxu1 %v10207_v17  ;;  %6561 = vmatpush1.bf16.msra.mxu0 %v10205_v16  ;;  %v12758_v16 = vld [vmem:[#allocation80_spill] sm:$0xff] }
 0x10c   :  { %6595 = vmatprep.subr.bf16.mxu1 %v10213_v23  ;;  %6563 = vmatprep.subr.bf16.mxu0 %v10211_v22 }
 0x10f   :  { %6597 = vmatpush1.bf16.msra.mxu1 %v10222_v39  ;;  %6565 = vmatpush1.bf16.msra.mxu0 %v10220_v38  ;;  %v12754_v38 = vld [vmem:[#allocation76_spill] sm:$0xff] }
 0x110   :  { %6599 = vmatprep.subr.bf16.mxu1 %v10228_v52  ;;  %6567 = vmatprep.subr.bf16.mxu0 %v10226_v46 }
 0x113   :  { %6601 = vmatpush1.bf16.msra.mxu1 %v10237_v2  ;;  %6569 = vmatpush1.bf16.msra.mxu0 %v10235_v1  ;;  %v12750_v1 = vld [vmem:[#allocation72_spill] sm:$0xff] }
 0x114   :  { %6603 = vmatprep.subr.bf16.mxu1 %v10243_v9  ;;  %6571 = vmatprep.subr.bf16.mxu0 %v10241_v8  ;;  %v12748_v8 = vld [vmem:[#allocation69_spill] sm:$0xff] }
 0x117   :  { %6605 = vmatpush1.bf16.msra.mxu1 %v10252_v33  ;;  %6573 = vmatpush1.bf16.msra.mxu0 %v10250_v25  ;;  %v12749_v25 = vld [vmem:[#allocation70_spill] sm:$0xff] }
 0x118   :  { %6607 = vmatprep.subr.bf16.mxu1 %v12740_v61  ;;  %6575 = vmatprep.subr.bf16.mxu0 %v12741_v4 }
 0x11b   :  { %6609 = vmatpush1.bf16.msra.mxu1 %v12742_v36  ;;  %6577 = vmatpush1.bf16.msra.mxu0 %v12743_v7  ;;  %v12753_v7 = vld [vmem:[#allocation74_spill] sm:$0xff] }
 0x11c   :  { %6611 = vmatprep.subr.bf16.mxu1 %v10273_v31  ;;  %6579 = vmatprep.subr.bf16.mxu0 %v12744_v28 }
 0x11f   :  { %6613 = vmatpush1.bf16.msra.mxu1 %v12745_v40  ;;  %6581 = vmatpush1.bf16.msra.mxu0 %v12746_v32  ;;  %v12757_v32 = vld [vmem:[#allocation78_spill] sm:$0xff] }
 0x120   :  { %6615 = vmatprep.subr.bf16.mxu1 %v12747_v35  ;;  %6647 = vmatprep.subr.bf16.mxu0 %v12748_v8 }
 0x123   :  { %6617 = vmatpush1.bf16.msra.mxu1 %v12749_v25 }
 0x124   :  { %6619 = vmatprep.subr.bf16.mxu1 %v12750_v1 }
 0x125   :  { %v10590_v4 = vpop.f32.mrb[0].mxu1 }
 0x126   :  { %12751 = vst [vmem:[#allocation148_spill] sm:$0xff] %v10590_v4  ;;  %v10592_v46 = vpop.f32.mrb[1].mxu1  ;;  %v12762_v4 = vld [vmem:[#allocation84_spill] sm:$0xff] }
 0x127   :  { %12752 = vst [vmem:[#allocation149_spill] sm:$0xff] %v10592_v46  ;;  %6621 = vmatpush1.bf16.msra.mxu1 %v12753_v7 }
 0x128   :  { %6623 = vmatprep.subr.bf16.mxu1 %v12754_v38  ;;  %v12765_v38 = vld [vmem:[#allocation86_spill] sm:$0xff] }
 0x129   :  { %v10596_v28 = vpop.f32.mrb[2].mxu1 }
 0x12a   :  { %12755 = vst [vmem:[#allocation150_spill] sm:$0xff] %v10596_v28  ;;  %v10598_v22 = vpop.f32.mrb[3].mxu1  ;;  %v12766_v28 = vld [vmem:[#allocation88_spill] sm:$0xff] }
 0x12b   :  { %12756 = vst [vmem:[#allocation151_spill] sm:$0xff] %v10598_v22  ;;  %6625 = vmatpush1.bf16.msra.mxu1 %v12757_v32  ;;  %v12767_v22 = vld [vmem:[#allocation90_spill] sm:$0xff]  ;;  %v12768_v32 = vld [vmem:[#allocation92_spill] sm:$0xff] }
 0x12c   :  { %6627 = vmatprep.subr.bf16.mxu1 %v12758_v16  ;;  %v12769_v16 = vld [vmem:[#allocation94_spill] sm:$0xff] }
 0x12d   :  { %v10602_v8 = vpop.f32.mrb[4].mxu1 }
 0x12e   :  { %12759 = vst [vmem:[#allocation152_spill] sm:$0xff] %v10602_v8  ;;  %v10604_v3 = vpop.f32.mrb[5].mxu1  ;;  %v12770_v8 = vld [vmem:[#allocation96_spill] sm:$0xff] }
 0x12f   :  { %12760 = vst [vmem:[#allocation153_spill] sm:$0xff] %v10604_v3  ;;  %6629 = vmatpush1.bf16.msra.mxu1 %v12761_v60  ;;  %v12771_v3 = vld [vmem:[#allocation98_spill] sm:$0xff]  ;;  %v12772_v60 = vld [vmem:[#allocation101_spill] sm:$0xff] }
 0x130   :  { %6631 = vmatprep.subr.bf16.mxu1 %v12762_v4  ;;  %v120_v4 = vlaneseq }
 0x131   :  { %v10608_v46 = vpop.f32.mrb[6].mxu1 }
 0x132   :  { %12763 = vst [vmem:[#allocation154_spill] sm:$0xff] %v10608_v46  ;;  %v10610_v7 = vpop.f32.mrb[7].mxu1  ;;  %v10620_v46 = vshrl.u32 %v120_v4, 7 }
 0x133   :  { %12764 = vst [vmem:[#allocation155_spill] sm:$0xff] %v10610_v7  ;;  %6633 = vmatpush1.bf16.msra.mxu1 %v12765_v38 }
 0x134   :  { %6635 = vmatprep.subr.bf16.mxu1 %v12766_v28  ;;  %12773 = vst [vmem:[#allocation156_spill] sm:$0xff] %v10620_v46  ;;  %v12450_v38 = vsub.s32 1, %v10620_v46  ;;  %v10639_v47 = vsub.s32 2, %v10620_v46 }
 0x136   :  { %12777 = vst [vmem:[#allocation160_spill] sm:$0xff] %v10639_v47 }
 0x137   :  { %6637 = vmatpush1.bf16.msra.mxu1 %v12767_v22  ;;  %v118_v22 = vld [vmem:[%s12272_s3] sm:$0xff] }
 0x138   :  { %6639 = vmatprep.subr.bf16.mxu1 %v12768_v32  ;;  %v10627_v32 = vsub.s32 0, %v10620_v46 }
 0x13a   :  { %12774 = vst [vmem:[#allocation157_spill] sm:$0xff] %v10627_v32 }
 0x13b   :  { %6641 = vmatpush1.bf16.msra.mxu1 %v12769_v16 }
 0x13c   :  { %6643 = vmatprep.subr.bf16.mxu1 %v12770_v8  ;;  %v10631_v8 = vrot.slane %v118_v22, %v12450_v38  ;;  %v10642_v38 = vrot.slane %v118_v22, %v10639_v47  ;;  %v138_v47 = vsub.s32 4, %v10620_v46 }
 0x13e   :  { %12775 = vst [vmem:[#allocation158_spill] sm:$0xff] %v10631_v8  ;;  %12778 = vst [vmem:[#allocation161_spill] sm:$0xff] %v10642_v38 }
 0x13f   :  { %6645 = vmatpush1.bf16.msra.mxu1 %v12771_v3 }
 0x140   :  { %6711 = vmatprep.subr.bf16.mxu1 %v12772_v60  ;;  %v10634_v60 = vrot.slane %v118_v22, %v10627_v32 }
 0x142   :  { %12776 = vst [vmem:[#allocation159_spill] sm:$0xff] %v10634_v60 }
 0x175   :  { %v1023_v7 = vpop.f32.mrb[0].mxu0 }
 0x176   :  { %v1025_v1 = vpop.f32.mrb[1].mxu0  ;;  %v9112_v3 = vadd.f32 %v1023_v7, %v10634_v60 }
 0x177   :  { %v9113_v4 = vadd.f32 %v1025_v1, %v10631_v8 }
 0x178   :  { %v6136_v28 = vmul.f32 -1.442695, %v9112_v3 }
 0x179   :  { %v6137_v16 = vmul.f32 -1.442695, %v9113_v4 }
 0x17b   :  { %9314 = vpow2.f32 %v6137_v16 }
 0x17c   :  { %9316 = vpow2.f32 %v6136_v28 }
 0x185   :  { %v9315_v25 = vpop.eup %9314 }
 0x186   :  { %v9317_v42 = vpop.eup %9316  ;;  %v1258_v35 = vadd.f32 1.0, %v9315_v25  ;;  %v142_v25 = vsub.s32 5, %v10620_v46 }
 0x187   :  { %v1252_v34 = vadd.f32 1.0, %v9317_v42 }
 0x188   :  { %9318 = vrcp.f32 %v1258_v35  ;;  %v10649_v24 = vrot.slane %v118_v22, %v142_v25  ;;  %v10651_v35 = vrot.slane %v118_v22, %v138_v47 }
 0x189   :  { %9320 = vrcp.f32 %v1252_v34 }
 0x18a   :  { %12779 = vst [vmem:[#allocation162_spill] sm:$0xff] %v10649_v24  ;;  %12780 = vst [vmem:[#allocation163_spill] sm:$0xff] %v10651_v35 }
 0x192   :  { %v9319_v3 = vpop.eup %9318 }
 0x193   :  { %v9321_v16 = vpop.eup %9320  ;;  %v1268_v28 = vmul.f32 0.0, %v9319_v3  ;;  %v10656_v3 = vsub.s32 3, %v10620_v46 }
 0x195   :  { %v1094_v32 = vpop.f32.mrb[8].mxu1  ;;  %12781 = vst [vmem:[#allocation164_spill] sm:$0xff] %v10656_v3 }
 0x196   :  { %v9136_v1 = vadd.f32 %v1094_v32, %v10642_v38  ;;  %v1096_v8 = vpop.f32.mrb[9].mxu1 }
 0x198   :  { %9322 = vtanh.f32 %v9136_v1 }
 0x1a2   :  { %v9323_v7 = vpop.eup %9322 }
 0x1a3   :  { %v1269_v4 = vmul.f32 %v9323_v7, %v9321_v16  ;;  %v10659_v16 = vrot.slane %v118_v22, %v10656_v3 }
 0x1a5   :  { %v10645_v60 = vadd.f32 %v1269_v4, %v1268_v28  ;;  %12782 = vst [vmem:[#allocation165_spill] sm:$0xff] %v10659_v16  ;;  %v9137_v7 = vadd.f32 %v1096_v8, %v10659_v16  ;;  %v146_v28 = vsub.s32 6, %v10620_v46  ;;  %v150_v4 = vsub.s32 7, %v10620_v46 }
 0x1b5   :  { %v1165_v40 = vpop.f32.mrb[22].mxu0 }
 0x1b6   :  { %v1167_v42 = vpop.f32.mrb[23].mxu0  ;;  %v9166_v32 = vadd.f32 %v1165_v40, %v10651_v35 }
 0x1b7   :  { %v9167_v34 = vadd.f32 %v1167_v42, %v10649_v24  ;;  %v6138_v42 = vmul.f32 -1.442695, %v9137_v7  ;;  %v10666_v24 = vrot.slane %v118_v22, %v150_v4 }
 0x1b8   :  { %v6139_v38 = vmul.f32 -1.442695, %v9166_v32 }
 0x1b9   :  { %v6140_v1 = vmul.f32 -1.442695, %v9167_v34  ;;  %v10664_v34 = vrot.slane %v118_v22, %v146_v28 }
 0x1bb   :  { %9324 = vpow2.f32 %v6140_v1 }
 0x1bc   :  { %9326 = vpow2.f32 %v6139_v38 }
 0x1bd   :  { %9328 = vpow2.f32 %v6138_v42 }
 0x1c5   :  { %v9325_v47 = vpop.eup %9324 }
 0x1c6   :  { %v9327_v25 = vpop.eup %9326  ;;  %v1291_v40 = vadd.f32 1.0, %v9325_v47 }
 0x1c7   :  { %v1285_v32 = vadd.f32 1.0, %v9327_v25  ;;  %v9329_v46 = vpop.eup %9328 }
 0x1c8   :  { %9330 = vrcp.f32 %v1291_v40  ;;  %v1265_v35 = vadd.f32 1.0, %v9329_v46  ;;  %v12785_v46 = vld [vmem:[#allocation71_spill] sm:$0xff] }
 0x1c9   :  { %9332 = vrcp.f32 %v1285_v32 }
 0x1d2   :  { %v9331_v7 = vpop.eup %9330 }
 0x1d3   :  { %v9333_v47 = vpop.eup %9332  ;;  %v1301_v25 = vmul.f32 0.0, %v9331_v7  ;;  %v12787_v7 = vld [vmem:[#allocation73_spill] sm:$0xff] }
 0x1d5   :  { %v1236_v38 = vpop.f32.mrb[38].mxu1 }
 0x1d6   :  { %v9182_v1 = vadd.f32 %v1236_v38, %v10664_v34  ;;  %v1238_v3 = vpop.f32.mrb[39].mxu1 }
 0x1d7   :  { %v9183_v8 = vadd.f32 %v1238_v3, %v10666_v24 }
 0x1d8   :  { %9334 = vtanh.f32 %v9182_v1 }
 0x1d9   :  { %v6141_v16 = vmul.f32 -1.442695, %v9183_v8 }
 0x1db   :  { %9336 = vpow2.f32 %v6141_v16 }
 0x1dc   :  { %9338 = vtanh.f32 %v10645_v60 }
 0x1dd   :  { %9340 = vrcp.f32 %v1265_v35  ;;  %v12786_v35 = vld [vmem:[#allocation103_spill] sm:$0xff] }
 0x1e2   :  { %v9335_v28 = vpop.eup %9334 }
 0x1e3   :  { %v1302_v22 = vmul.f32 %v9335_v28, %v9333_v47  ;;  %v12788_v47 = vld [vmem:[#allocation105_spill] sm:$0xff]  ;;  %v12789_v28 = vld [vmem:[#allocation75_spill] sm:$0xff] }
 0x1e5   :  { %v9337_v4 = vpop.eup %9336  ;;  %v10671_v42 = vadd.f32 %v1302_v22, %v1301_v25  ;;  %v12790_v25 = vld [vmem:[#allocation107_spill] sm:$0xff]  ;;  %v12791_v22 = vld [vmem:[#allocation77_spill] sm:$0xff] }
 0x1e6   :  { %v1298_v40 = vadd.f32 1.0, %v9337_v4  ;;  %v9339_v3 = vpop.eup %9338  ;;  %v12792_v4 = vld [vmem:[#allocation109_spill] sm:$0xff] }
 0x1e7   :  { %9342 = vtanh.f32 %v10671_v42  ;;  %v9341_v32 = vpop.eup %9340 }
 0x1e8   :  { %9344 = vrcp.f32 %v1298_v40  ;;  %v10676_v8 = vmul.f32 %v9341_v32, %v9339_v3  ;;  %v12793_v40 = vld [vmem:[#allocation79_spill] sm:$0xff]  ;;  %v12795_v32 = vld [vmem:[#allocation81_spill] sm:$0xff] }
 0x1e9   :  { %v12794_v3 = vld [vmem:[#allocation111_spill] sm:$0xff] }
 0x1ea   :  { %12784 = vst [vmem:[#allocation167_spill] sm:$0xff] %v10676_v8 }
 0x1f1   :  { %v9343_v16 = vpop.eup %9342 }
 0x1f2   :  { %v9345_v38 = vpop.eup %9344 }
 0x1f3   :  { %v10674_v1 = vmul.f32 %v9345_v38, %v9343_v16  ;;  %v12796_v16 = vld [vmem:[#allocation113_spill] sm:$0xff]  ;;  %v12797_v38 = vld [vmem:[#allocation83_spill] sm:$0xff] }
 0x1f5   :  { %12783 = vst [vmem:[#allocation166_spill] sm:$0xff] %v10674_v1  ;;  %1373 = vmatprep.mubr.f32.mxu0 %v10674_v1  ;;  %1444 = vmatprep.mubr.f32.mxu1 %v10674_v1 }
 0x1f6   :  { %1374 = vmatmul.mubr.f32.vlgmr.msra.gmra.mrb[2].mxu0 %v10676_v8  ;;  %1445 = vmatmul.mubr.f32.vlgmr.msra.gmra.mrb[10].mxu1 %v10676_v8 }
 0x1f7   :  { %6649 = vmatpush1.bf16.msra.mxu0 %v12785_v46  ;;  %6713 = vmatpush1.bf16.msra.mxu1 %v12786_v35 }
 0x1f8   :  { %1515 = vmatprep.mubr.f32.mxu0 %v10674_v1  ;;  %1586 = vmatprep.mubr.f32.mxu1 %v10674_v1  ;;  %v12798_v1 = vld [vmem:[#allocation115_spill] sm:$0xff] }
 0x1f9   :  { %6651 = vmatprep.subr.bf16.mxu0 %v12787_v7  ;;  %6715 = vmatprep.subr.bf16.mxu1 %v12788_v47  ;;  %v12799_v47 = vld [vmem:[#allocation85_spill] sm:$0xff] }
 0x1fb   :  { %6653 = vmatpush1.bf16.msra.mxu0 %v12789_v28  ;;  %6717 = vmatpush1.bf16.msra.mxu1 %v12790_v25  ;;  %v12800_v28 = vld [vmem:[#allocation117_spill] sm:$0xff]  ;;  %v12801_v25 = vld [vmem:[#allocation87_spill] sm:$0xff] }
 0x1fc   :  { %6655 = vmatprep.subr.bf16.mxu0 %v12791_v22  ;;  %6719 = vmatprep.subr.bf16.mxu1 %v12792_v4  ;;  %v12802_v22 = vld [vmem:[#allocation119_spill] sm:$0xff]  ;;  %v12803_v4 = vld [vmem:[#allocation89_spill] sm:$0xff] }
 0x1ff   :  { %6657 = vmatpush1.bf16.msra.mxu0 %v12793_v40  ;;  %6721 = vmatpush1.bf16.msra.mxu1 %v12794_v3  ;;  %v12804_v3 = vld [vmem:[#allocation91_spill] sm:$0xff] }
 0x200   :  { %6659 = vmatprep.subr.bf16.mxu0 %v12795_v32  ;;  %6723 = vmatprep.subr.bf16.mxu1 %v12796_v16  ;;  %v12805_v16 = vld [vmem:[#allocation93_spill] sm:$0xff] }
 0x203   :  { %6661 = vmatpush1.bf16.msra.mxu0 %v12797_v38  ;;  %6725 = vmatpush1.bf16.msra.mxu1 %v12798_v1  ;;  %v12806_v1 = vld [vmem:[#allocation95_spill] sm:$0xff] }
 0x204   :  { %6663 = vmatprep.subr.bf16.mxu0 %v12799_v47  ;;  %6727 = vmatprep.subr.bf16.mxu1 %v12800_v28  ;;  %v12807_v28 = vld [vmem:[#allocation97_spill] sm:$0xff] }
 0x207   :  { %6665 = vmatpush1.bf16.msra.mxu0 %v12801_v25  ;;  %6729 = vmatpush1.bf16.msra.mxu1 %v12802_v22  ;;  %v12808_v22 = vld [vmem:[#allocation99_spill] sm:$0xff] }
 0x208   :  { %6667 = vmatprep.subr.bf16.mxu0 %v12803_v4  ;;  %6731 = vmatprep.subr.bf16.mxu1 %v10452_v20  ;;  %v12809_v20 = vld [vmem:[#allocation100_spill] sm:$0xff] }
 0x20b   :  { %6669 = vmatpush1.bf16.msra.mxu0 %v12804_v3  ;;  %6733 = vmatpush1.bf16.msra.mxu1 %v10458_v21  ;;  %v12810_v21 = vld [vmem:[#allocation102_spill] sm:$0xff] }
 0x20c   :  { %6671 = vmatprep.subr.bf16.mxu0 %v12805_v16  ;;  %6735 = vmatprep.subr.bf16.mxu1 %v10464_v27  ;;  %v12811_v27 = vld [vmem:[#allocation104_spill] sm:$0xff] }
 0x20f   :  { %6673 = vmatpush1.bf16.msra.mxu0 %v12806_v1  ;;  %6737 = vmatpush1.bf16.msra.mxu1 %v10470_v30  ;;  %v12812_v30 = vld [vmem:[#allocation106_spill] sm:$0xff] }
 0x210   :  { %6675 = vmatprep.subr.bf16.mxu0 %v12807_v28  ;;  %6739 = vmatprep.subr.bf16.mxu1 %v10476_v12  ;;  %v12813_v12 = vld [vmem:[#allocation108_spill] sm:$0xff] }
 0x213   :  { %6677 = vmatpush1.bf16.msra.mxu0 %v12808_v22  ;;  %6741 = vmatpush1.bf16.msra.mxu1 %v10482_v37  ;;  %v12814_v37 = vld [vmem:[#allocation110_spill] sm:$0xff] }
 0x214   :  { %6679 = vmatprep.subr.bf16.mxu0 %v12809_v20  ;;  %6743 = vmatprep.subr.bf16.mxu1 %v10486_v29  ;;  %v12815_v29 = vld [vmem:[#allocation112_spill] sm:$0xff] }
 0x217   :  { %6681 = vmatpush1.bf16.msra.mxu0 %v12810_v21  ;;  %6745 = vmatpush1.bf16.msra.mxu1 %v10490_v58  ;;  %v12816_v58 = vld [vmem:[#allocation114_spill] sm:$0xff] }
 0x218   :  { %6683 = vmatprep.subr.bf16.mxu0 %v12811_v27  ;;  %6747 = vmatprep.subr.bf16.mxu1 %v10493_v0  ;;  %v12817_v0 = vld [vmem:[#allocation116_spill] sm:$0xff] }
 0x21b   :  { %6685 = vmatpush1.bf16.msra.mxu0 %v12812_v30  ;;  %6749 = vmatpush1.bf16.msra.mxu1 %v10498_v15  ;;  %v12818_v15 = vld [vmem:[#allocation118_spill] sm:$0xff] }
 0x21c   :  { %6687 = vmatprep.subr.bf16.mxu0 %v12813_v12  ;;  %6751 = vmatprep.subr.bf16.mxu1 %v10502_v54  ;;  %v12819_v54 = vld [vmem:[#allocation120_spill] sm:$0xff] }
 0x21f   :  { %6689 = vmatpush1.bf16.msra.mxu0 %v12814_v37  ;;  %6753 = vmatpush1.bf16.msra.mxu1 %v10506_v13  ;;  %v12820_v13 = vld [vmem:[#allocation122_spill] sm:$0xff] }
 0x220   :  { %6691 = vmatprep.subr.bf16.mxu0 %v12815_v29  ;;  %6755 = vmatprep.subr.bf16.mxu1 %v10510_v53 }
 0x223   :  { %6693 = vmatpush1.bf16.msra.mxu0 %v12816_v58  ;;  %6757 = vmatpush1.bf16.msra.mxu1 %v10514_v43 }
 0x224   :  { %6695 = vmatprep.subr.bf16.mxu0 %v12817_v0  ;;  %6759 = vmatprep.subr.bf16.mxu1 %v10518_v45 }
 0x227   :  { %6697 = vmatpush1.bf16.msra.mxu0 %v12818_v15  ;;  %6761 = vmatpush1.bf16.msra.mxu1 %v10522_v50  ;;  %v12821_v50 = vld [vmem:[#allocation130_spill] sm:$0xff] }
 0x228   :  { %6699 = vmatprep.subr.bf16.mxu0 %v12819_v54  ;;  %6763 = vmatprep.subr.bf16.mxu1 %v10526_v41  ;;  %v12822_v41 = vld [vmem:[#allocation20_spill] sm:$0xff] }
 0x22b   :  { %6701 = vmatpush1.bf16.msra.mxu0 %v12820_v13  ;;  %6765 = vmatpush1.bf16.msra.mxu1 %v10530_v56 }
 0x22c   :  { %6703 = vmatprep.subr.bf16.mxu0 %v10462_v59  ;;  %6767 = vmatprep.subr.bf16.mxu1 %v10534_v49  ;;  %v12823_v49 = vld [vmem:[#allocation21_spill] sm:$0xff] }
 0x22f   :  { %6705 = vmatpush1.bf16.msra.mxu0 %v10468_v57  ;;  %6769 = vmatpush1.bf16.msra.mxu1 %v10538_v62  ;;  %v12824_v62 = vld [vmem:[#allocation22_spill] sm:$0xff] }
 0x230   :  { %6707 = vmatprep.subr.bf16.mxu0 %v10474_v14  ;;  %6771 = vmatprep.subr.bf16.mxu1 %v10542_v55  ;;  %v12825_v55 = vld [vmem:[#allocation24_spill] sm:$0xff] }
 0x233   :  { %6709 = vmatpush1.bf16.msra.mxu0 %v12821_v50  ;;  %6773 = vmatpush1.bf16.msra.mxu1 %v10546_v26  ;;  %v12826_v26 = vld [vmem:[#allocation25_spill] sm:$0xff] }
 0x234   :  { %6775 = vmatprep.subr.bf16.mxu0 %v12822_v41  ;;  %6839 = vmatprep.subr.bf16.mxu1 %v10083_v48  ;;  %v12827_v48 = vld [vmem:[#allocation26_spill] sm:$0xff] }
 0x236   :  { %1516 = vmatmul.mubr.f32.vlgmr.msra.gmra.mrb[20].mxu0 %v10676_v8  ;;  %1587 = vmatmul.mubr.f32.vlgmr.msra.gmra.mrb[36].mxu1 %v10676_v8  ;;  %v12828_v8 = vld [vmem:[#allocation27_spill] sm:$0xff] }
 0x237   :  { %6777 = vmatpush1.bf16.msra.mxu0 %v12823_v49  ;;  %6841 = vmatpush1.bf16.msra.mxu1 %v10178_v44  ;;  %v12829_v44 = vld [vmem:[#allocation28_spill] sm:$0xff] }
 0x238   :  { %6779 = vmatprep.subr.bf16.mxu0 %v12824_v62  ;;  %6843 = vmatprep.subr.bf16.mxu1 %v10183_v51  ;;  %v12830_v51 = vld [vmem:[#allocation29_spill] sm:$0xff] }
 0x23b   :  { %6781 = vmatpush1.bf16.msra.mxu0 %v12825_v55  ;;  %6845 = vmatpush1.bf16.msra.mxu1 %v10192_v63  ;;  %v12831_v63 = vld [vmem:[#allocation30_spill] sm:$0xff] }
 0x23c   :  { %6783 = vmatprep.subr.bf16.mxu0 %v12826_v26  ;;  %6847 = vmatprep.subr.bf16.mxu1 %v10198_v6 }
 0x23f   :  { %6785 = vmatpush1.bf16.msra.mxu0 %v12827_v48  ;;  %6849 = vmatpush1.bf16.msra.mxu1 %v10207_v17 }
 0x240   :  { %6787 = vmatprep.subr.bf16.mxu0 %v12828_v8  ;;  %6851 = vmatprep.subr.bf16.mxu1 %v10213_v23 }
 0x243   :  { %6789 = vmatpush1.bf16.msra.mxu0 %v12829_v44  ;;  %6853 = vmatpush1.bf16.msra.mxu1 %v10222_v39 }
 0x244   :  { %6791 = vmatprep.subr.bf16.mxu0 %v12830_v51  ;;  %6855 = vmatprep.subr.bf16.mxu1 %v10228_v52  ;;  %v12869_v51 = vld [vmem:[#allocation158_spill] sm:$0xff] }
 0x247   :  { %6793 = vmatpush1.bf16.msra.mxu0 %v12831_v63  ;;  %6857 = vmatpush1.bf16.msra.mxu1 %v10237_v2  ;;  %v12832_v2 = vld [vmem:[#allocation36_spill] sm:$0xff]  ;;  %v12868_v63 = vld [vmem:[#allocation159_spill] sm:$0xff] }
 0x248   :  { %6795 = vmatprep.subr.bf16.mxu0 %v10131_v5  ;;  %6859 = vmatprep.subr.bf16.mxu1 %v10243_v9  ;;  %v12833_v5 = vld [vmem:[#allocation67_spill] sm:$0xff]  ;;  %v12834_v9 = vld [vmem:[#allocation37_spill] sm:$0xff] }
 0x24b   :  { %6797 = vmatpush1.bf16.msra.mxu0 %v10140_v10  ;;  %6861 = vmatpush1.bf16.msra.mxu1 %v10252_v33  ;;  %v12835_v10 = vld [vmem:[#allocation68_spill] sm:$0xff]  ;;  %v12836_v33 = vld [vmem:[#allocation38_spill] sm:$0xff] }
 0x24c   :  { %6799 = vmatprep.subr.bf16.mxu0 %v10143_v11  ;;  %6863 = vmatprep.subr.bf16.mxu1 %v12740_v61  ;;  %v12837_v11 = vld [vmem:[#allocation70_spill] sm:$0xff]  ;;  %v12838_v61 = vld [vmem:[#allocation40_spill] sm:$0xff] }
 0x24f   :  { %6801 = vmatpush1.bf16.msra.mxu0 %v10152_v18  ;;  %6865 = vmatpush1.bf16.msra.mxu1 %v12742_v36  ;;  %v12839_v18 = vld [vmem:[#allocation72_spill] sm:$0xff]  ;;  %v12840_v36 = vld [vmem:[#allocation42_spill] sm:$0xff] }
 0x250   :  { %6803 = vmatprep.subr.bf16.mxu0 %v10155_v19  ;;  %6867 = vmatprep.subr.bf16.mxu1 %v10273_v31  ;;  %v12841_v19 = vld [vmem:[#allocation74_spill] sm:$0xff]  ;;  %v12842_v31 = vld [vmem:[#allocation44_spill] sm:$0xff] }
 0x253   :  { %6805 = vmatpush1.bf16.msra.mxu0 %v12832_v2  ;;  %6869 = vmatpush1.bf16.msra.mxu1 %v12833_v5  ;;  %v12843_v2 = vld [vmem:[#allocation76_spill] sm:$0xff]  ;;  %v12844_v5 = vld [vmem:[#allocation46_spill] sm:$0xff] }
 0x254   :  { %6807 = vmatprep.subr.bf16.mxu0 %v12834_v9  ;;  %6871 = vmatprep.subr.bf16.mxu1 %v12835_v10  ;;  %v12845_v9 = vld [vmem:[#allocation78_spill] sm:$0xff]  ;;  %v12846_v10 = vld [vmem:[#allocation48_spill] sm:$0xff] }
 0x257   :  { %6809 = vmatpush1.bf16.msra.mxu0 %v12836_v33  ;;  %6873 = vmatpush1.bf16.msra.mxu1 %v12837_v11  ;;  %v12847_v33 = vld [vmem:[#allocation80_spill] sm:$0xff]  ;;  %v12848_v11 = vld [vmem:[#allocation50_spill] sm:$0xff] }
 0x258   :  { %6811 = vmatprep.subr.bf16.mxu0 %v12838_v61  ;;  %6875 = vmatprep.subr.bf16.mxu1 %v12839_v18  ;;  %v12849_v61 = vld [vmem:[#allocation82_spill] sm:$0xff]  ;;  %v12850_v18 = vld [vmem:[#allocation52_spill] sm:$0xff] }
 0x25b   :  { %6813 = vmatpush1.bf16.msra.mxu0 %v12840_v36  ;;  %6877 = vmatpush1.bf16.msra.mxu1 %v12841_v19  ;;  %v12851_v36 = vld [vmem:[#allocation84_spill] sm:$0xff]  ;;  %v12852_v19 = vld [vmem:[#allocation54_spill] sm:$0xff] }
 0x25c   :  { %6815 = vmatprep.subr.bf16.mxu0 %v12842_v31  ;;  %6879 = vmatprep.subr.bf16.mxu1 %v12843_v2  ;;  %v12853_v31 = vld [vmem:[#allocation86_spill] sm:$0xff]  ;;  %v12854_v2 = vld [vmem:[#allocation56_spill] sm:$0xff] }
 0x25f   :  { %6817 = vmatpush1.bf16.msra.mxu0 %v12844_v5  ;;  %6881 = vmatpush1.bf16.msra.mxu1 %v12845_v9  ;;  %v12855_v5 = vld [vmem:[#allocation88_spill] sm:$0xff]  ;;  %v12856_v9 = vld [vmem:[#allocation58_spill] sm:$0xff] }
 0x260   :  { %6819 = vmatprep.subr.bf16.mxu0 %v12846_v10  ;;  %6883 = vmatprep.subr.bf16.mxu1 %v12847_v33  ;;  %v12857_v10 = vld [vmem:[#allocation90_spill] sm:$0xff]  ;;  %v12858_v33 = vld [vmem:[#allocation60_spill] sm:$0xff] }
 0x263   :  { %6821 = vmatpush1.bf16.msra.mxu0 %v12848_v11  ;;  %6885 = vmatpush1.bf16.msra.mxu1 %v12849_v61  ;;  %v12859_v11 = vld [vmem:[#allocation92_spill] sm:$0xff]  ;;  %v12860_v61 = vld [vmem:[#allocation62_spill] sm:$0xff] }
 0x264   :  { %6823 = vmatprep.subr.bf16.mxu0 %v12850_v18  ;;  %6887 = vmatprep.subr.bf16.mxu1 %v12851_v36  ;;  %v12861_v18 = vld [vmem:[#allocation94_spill] sm:$0xff]  ;;  %v12862_v36 = vld [vmem:[#allocation64_spill] sm:$0xff] }
 0x267   :  { %6825 = vmatpush1.bf16.msra.mxu0 %v12852_v19  ;;  %6889 = vmatpush1.bf16.msra.mxu1 %v12853_v31  ;;  %v12863_v19 = vld [vmem:[#allocation96_spill] sm:$0xff]  ;;  %v12864_v31 = vld [vmem:[#allocation66_spill] sm:$0xff] }
 0x268   :  { %6827 = vmatprep.subr.bf16.mxu0 %v12854_v2  ;;  %6891 = vmatprep.subr.bf16.mxu1 %v12855_v5  ;;  %v12865_v2 = vld [vmem:[#allocation98_spill] sm:$0xff]  ;;  %v12866_v5 = vld [vmem:[#allocation69_spill] sm:$0xff] }
 0x26b   :  { %6829 = vmatpush1.bf16.msra.mxu0 %v12856_v9  ;;  %6893 = vmatpush1.bf16.msra.mxu1 %v12857_v10  ;;  %v12867_v9 = vld [vmem:[#allocation101_spill] sm:$0xff] }
 0x26c   :  { %6831 = vmatprep.subr.bf16.mxu0 %v12858_v33  ;;  %6895 = vmatprep.subr.bf16.mxu1 %v12859_v11 }
 0x26f   :  { %6833 = vmatpush1.bf16.msra.mxu0 %v12860_v61  ;;  %6897 = vmatpush1.bf16.msra.mxu1 %v12861_v18 }
 0x270   :  { %6835 = vmatprep.subr.bf16.mxu0 %v12862_v36  ;;  %6899 = vmatprep.subr.bf16.mxu1 %v12863_v19  ;;  %v12870_v19 = vld [vmem:[#allocation161_spill] sm:$0xff] }
 0x273   :  { %6837 = vmatpush1.bf16.msra.mxu0 %v12864_v31  ;;  %6901 = vmatpush1.bf16.msra.mxu1 %v12865_v2 }
 0x274   :  { %6903 = vmatprep.subr.bf16.mxu0 %v12866_v5  ;;  %6967 = vmatprep.subr.bf16.mxu1 %v12867_v9 }
 0x2c9   :  { %v1375_v10 = vpop.f32.mrb[2].mxu0  ;;  %v1446_v33 = vpop.f32.mrb[10].mxu1 }
 0x2ca   :  { %v9114_v11 = vadd.f32 %v1375_v10, %v12868_v63  ;;  %v1377_v52 = vpop.f32.mrb[3].mxu0  ;;  %v1448_v61 = vpop.f32.mrb[11].mxu1  ;;  %v9138_v31 = vadd.f32 %v1446_v33, %v12870_v19 }
 0x2cb   :  { %v9115_v18 = vadd.f32 %v1377_v52, %v12869_v51  ;;  %v12872_v51 = vld [vmem:[#allocation162_spill] sm:$0xff] }
 0x2cc   :  { %v6142_v39 = vmul.f32 -1.442695, %v9114_v11 }
 0x2cd   :  { %v6143_v36 = vmul.f32 -1.442695, %v9115_v18 }
 0x2ce   :  { %9346 = vpow2.f32 %v6142_v39  ;;  %v12871_v39 = vld [vmem:[#allocation163_spill] sm:$0xff] }
 0x2cf   :  { %9348 = vpow2.f32 %v6143_v36 }
 0x2d0   :  { %9350 = vtanh.f32 %v9138_v31 }
 0x2d8   :  { %v9347_v44 = vpop.eup %9346 }
 0x2d9   :  { %v9349_v2 = vpop.eup %9348  ;;  %v1605_v23 = vadd.f32 1.0, %v9347_v44 }
 0x2da   :  { %v1611_v5 = vadd.f32 1.0, %v9349_v2  ;;  %v9351_v9 = vpop.eup %9350 }
 0x2db   :  { %9352 = vrcp.f32 %v1605_v23 }
 0x2dc   :  { %9354 = vrcp.f32 %v1611_v5  ;;  %v12873_v5 = vld [vmem:[#allocation165_spill] sm:$0xff] }
 0x2dd   :  { %v9139_v23 = vadd.f32 %v1448_v61, %v12873_v5 }
 0x2e5   :  { %v9353_v8 = vpop.eup %9352 }
 0x2e6   :  { %v9355_v10 = vpop.eup %9354  ;;  %v1622_v63 = vmul.f32 %v9353_v8, %v9351_v9  ;;  %v6144_v8 = vmul.f32 -1.442695, %v9139_v23 }
 0x2e7   :  { %v1621_v17 = vmul.f32 %v9355_v10, %v10645_v60 }
 0x2e9   :  { %v10818_v52 = vadd.f32 %v1622_v63, %v1621_v17 }
 0x309   :  { %v1517_v11 = vpop.f32.mrb[20].mxu0  ;;  %v1588_v18 = vpop.f32.mrb[36].mxu1 }
 0x30a   :  { %v9164_v36 = vadd.f32 %v1517_v11, %v12871_v39  ;;  %v1519_v33 = vpop.f32.mrb[21].mxu0  ;;  %v1590_v19 = vpop.f32.mrb[37].mxu1  ;;  %v9180_v63 = vadd.f32 %v1588_v18, %v10664_v34 }
 0x30b   :  { %v9165_v44 = vadd.f32 %v1519_v33, %v12872_v51  ;;  %v9181_v9 = vadd.f32 %v1590_v19, %v10666_v24 }
 0x30c   :  { %v6145_v31 = vmul.f32 -1.442695, %v9164_v36 }
 0x30d   :  { %v6146_v2 = vmul.f32 -1.442695, %v9165_v44  ;;  %v6147_v60 = vmul.f32 -1.442695, %v9181_v9 }
 0x30e   :  { %9356 = vpow2.f32 %v6145_v31 }
 0x30f   :  { %9358 = vpow2.f32 %v6146_v2 }
 0x310   :  { %9360 = vpow2.f32 %v6144_v8 }
 0x311   :  { %9362 = vpow2.f32 %v6147_v60 }
 0x312   :  { %9364 = vtanh.f32 %v9180_v63 }
 0x318   :  { %v9357_v17 = vpop.eup %9356 }
 0x319   :  { %v9359_v10 = vpop.eup %9358  ;;  %v1638_v11 = vadd.f32 1.0, %v9357_v17 }
 0x31a   :  { %v1644_v39 = vadd.f32 1.0, %v9359_v10  ;;  %v9361_v36 = vpop.eup %9360 }
 0x31b   :  { %9366 = vrcp.f32 %v1638_v11  ;;  %v9363_v33 = vpop.eup %9362  ;;  %v1618_v9 = vadd.f32 1.0, %v9361_v36  ;;  %v12877_v11 = vld [vmem:[#allocation75_spill] sm:$0xff] }
 0x31c   :  { %9368 = vrcp.f32 %v1644_v39  ;;  %v9365_v44 = vpop.eup %9364  ;;  %v1651_v19 = vadd.f32 1.0, %v9363_v33  ;;  %v12878_v36 = vld [vmem:[#allocation107_spill] sm:$0xff]  ;;  %v12879_v33 = vld [vmem:[#allocation77_spill] sm:$0xff] }
 0x31d   :  { %9370 = vtanh.f32 %v10818_v52 }
 0x31e   :  { %9372 = vrcp.f32 %v1651_v19  ;;  %v12884_v19 = vld [vmem:[#allocation117_spill] sm:$0xff] }
 0x325   :  { %v9367_v31 = vpop.eup %9366 }
 0x326   :  { %v9369_v61 = vpop.eup %9368  ;;  %v1655_v2 = vmul.f32 %v9367_v31, %v9365_v44  ;;  %v12880_v44 = vld [vmem:[#allocation109_spill] sm:$0xff]  ;;  %v12881_v31 = vld [vmem:[#allocation111_spill] sm:$0xff] }
 0x327   :  { %v1654_v23 = vmul.f32 %v9369_v61, %v10671_v42  ;;  %v9371_v8 = vpop.eup %9370  ;;  %v12876_v42 = vld [vmem:[#allocation105_spill] sm:$0xff] }
 0x328   :  { %v9373_v39 = vpop.eup %9372  ;;  %v12882_v61 = vld [vmem:[#allocation113_spill] sm:$0xff] }
 0x329   :  { %v10827_v18 = vadd.f32 %v1655_v2, %v1654_v23  ;;  %v12883_v2 = vld [vmem:[#allocation115_spill] sm:$0xff] }
 0x32a   :  { %v12885_v23 = vld [vmem:[#allocation119_spill] sm:$0xff] }
 0x32b   :  { %9374 = vtanh.f32 %v10827_v18 }
 0x32c   :  { %9376 = vrcp.f32 %v1618_v9  ;;  %v12886_v9 = vld [vmem:[#allocation121_spill] sm:$0xff] }
 0x335   :  { %v9375_v60 = vpop.eup %9374 }
 0x336   :  { %v9377_v63 = vpop.eup %9376  ;;  %v10830_v17 = vmul.f32 %v9375_v60, %v9373_v39  ;;  %v12888_v39 = vld [vmem:[#allocation125_spill] sm:$0xff]  ;;  %v12889_v60 = vld [vmem:[#allocation127_spill] sm:$0xff] }
 0x337   :  { %v10832_v10 = vmul.f32 %v9377_v63, %v9371_v8  ;;  %v12887_v8 = vld [vmem:[#allocation123_spill] sm:$0xff]  ;;  %v12890_v63 = vld [vmem:[#allocation129_spill] sm:$0xff] }
 0x338   :  { %12874 = vst [vmem:[#allocation71_spill] sm:$0xff] %v10830_v17  ;;  %1727 = vmatprep.mubr.f32.mxu0 %v10830_v17  ;;  %1798 = vmatprep.mubr.f32.mxu1 %v10830_v17 }
 0x339   :  { %12875 = vst [vmem:[#allocation103_spill] sm:$0xff] %v10832_v10  ;;  %1728 = vmatmul.mubr.f32.vlgmr.msra.gmra.mrb[4].mxu0 %v10832_v10  ;;  %1799 = vmatmul.mubr.f32.vlgmr.msra.gmra.mrb[12].mxu1 %v10832_v10 }
 0x33a   :  { %6905 = vmatpush1.bf16.msra.mxu0 %v12785_v46  ;;  %6969 = vmatpush1.bf16.msra.mxu1 %v12786_v35 }
 0x33b   :  { %1869 = vmatprep.mubr.f32.mxu0 %v10830_v17  ;;  %1940 = vmatprep.mubr.f32.mxu1 %v10830_v17  ;;  %v12891_v17 = vld [vmem:[#allocation131_spill] sm:$0xff] }
 0x33c   :  { %6907 = vmatprep.subr.bf16.mxu0 %v12787_v7  ;;  %6971 = vmatprep.subr.bf16.mxu1 %v12876_v42 }
 0x33e   :  { %6909 = vmatpush1.bf16.msra.mxu0 %v12877_v11  ;;  %6973 = vmatpush1.bf16.msra.mxu1 %v12878_v36 }
 0x33f   :  { %6911 = vmatprep.subr.bf16.mxu0 %v12879_v33  ;;  %6975 = vmatprep.subr.bf16.mxu1 %v12880_v44 }
 0x342   :  { %6913 = vmatpush1.bf16.msra.mxu0 %v12793_v40  ;;  %6977 = vmatpush1.bf16.msra.mxu1 %v12881_v31 }
 0x343   :  { %6915 = vmatprep.subr.bf16.mxu0 %v12795_v32  ;;  %6979 = vmatprep.subr.bf16.mxu1 %v12882_v61 }
 0x346   :  { %6917 = vmatpush1.bf16.msra.mxu0 %v12797_v38  ;;  %6981 = vmatpush1.bf16.msra.mxu1 %v12883_v2 }
 0x347   :  { %6919 = vmatprep.subr.bf16.mxu0 %v12799_v47  ;;  %6983 = vmatprep.subr.bf16.mxu1 %v12884_v19 }
 0x34a   :  { %6921 = vmatpush1.bf16.msra.mxu0 %v12801_v25  ;;  %6985 = vmatpush1.bf16.msra.mxu1 %v12885_v23 }
 0x34b   :  { %6923 = vmatprep.subr.bf16.mxu0 %v12803_v4  ;;  %6987 = vmatprep.subr.bf16.mxu1 %v12886_v9 }
 0x34e   :  { %6925 = vmatpush1.bf16.msra.mxu0 %v12804_v3  ;;  %6989 = vmatpush1.bf16.msra.mxu1 %v12887_v8  ;;  %v12892_v3 = vld [vmem:[#allocation132_spill] sm:$0xff] }
 0x34f   :  { %6927 = vmatprep.subr.bf16.mxu0 %v12805_v16  ;;  %6991 = vmatprep.subr.bf16.mxu1 %v12888_v39  ;;  %v12893_v16 = vld [vmem:[#allocation133_spill] sm:$0xff] }
 0x352   :  { %6929 = vmatpush1.bf16.msra.mxu0 %v12806_v1  ;;  %6993 = vmatpush1.bf16.msra.mxu1 %v12889_v60  ;;  %v12894_v1 = vld [vmem:[#allocation134_spill] sm:$0xff] }
 0x353   :  { %6931 = vmatprep.subr.bf16.mxu0 %v12807_v28  ;;  %6995 = vmatprep.subr.bf16.mxu1 %v12890_v63  ;;  %v12895_v28 = vld [vmem:[#allocation135_spill] sm:$0xff] }
 0x356   :  { %6933 = vmatpush1.bf16.msra.mxu0 %v12808_v22  ;;  %6997 = vmatpush1.bf16.msra.mxu1 %v12891_v17  ;;  %v12896_v22 = vld [vmem:[#allocation136_spill] sm:$0xff] }
 0x357   :  { %6935 = vmatprep.subr.bf16.mxu0 %v12809_v20  ;;  %6999 = vmatprep.subr.bf16.mxu1 %v12892_v3  ;;  %v12897_v20 = vld [vmem:[#allocation137_spill] sm:$0xff] }
 0x35a   :  { %6937 = vmatpush1.bf16.msra.mxu0 %v12810_v21  ;;  %7001 = vmatpush1.bf16.msra.mxu1 %v12893_v16 }
 0x35b   :  { %6939 = vmatprep.subr.bf16.mxu0 %v12811_v27  ;;  %7003 = vmatprep.subr.bf16.mxu1 %v12894_v1 }
 0x35e   :  { %6941 = vmatpush1.bf16.msra.mxu0 %v12812_v30  ;;  %7005 = vmatpush1.bf16.msra.mxu1 %v12895_v28 }
 0x35f   :  { %6943 = vmatprep.subr.bf16.mxu0 %v12813_v12  ;;  %7007 = vmatprep.subr.bf16.mxu1 %v12896_v22  ;;  %v12898_v12 = vld [vmem:[#allocation141_spill] sm:$0xff] }
 0x362   :  { %6945 = vmatpush1.bf16.msra.mxu0 %v12814_v37  ;;  %7009 = vmatpush1.bf16.msra.mxu1 %v12897_v20  ;;  %v12899_v37 = vld [vmem:[#allocation142_spill] sm:$0xff] }
 0x363   :  { %6947 = vmatprep.subr.bf16.mxu0 %v12815_v29  ;;  %7011 = vmatprep.subr.bf16.mxu1 %v10510_v53 }
 0x366   :  { %6949 = vmatpush1.bf16.msra.mxu0 %v12816_v58  ;;  %7013 = vmatpush1.bf16.msra.mxu1 %v10514_v43  ;;  %v12900_v58 = vld [vmem:[#allocation144_spill] sm:$0xff] }
 0x367   :  { %6951 = vmatprep.subr.bf16.mxu0 %v12817_v0  ;;  %7015 = vmatprep.subr.bf16.mxu1 %v10518_v45  ;;  %v12901_v0 = vld [vmem:[#allocation145_spill] sm:$0xff] }
 0x36a   :  { %6953 = vmatpush1.bf16.msra.mxu0 %v12818_v15  ;;  %7017 = vmatpush1.bf16.msra.mxu1 %v12898_v12  ;;  %v12902_v15 = vld [vmem:[#allocation146_spill] sm:$0xff] }
 0x36b   :  { %6955 = vmatprep.subr.bf16.mxu0 %v12819_v54  ;;  %7019 = vmatprep.subr.bf16.mxu1 %v12899_v37  ;;  %v12903_v54 = vld [vmem:[#allocation147_spill] sm:$0xff] }
 0x36e   :  { %6957 = vmatpush1.bf16.msra.mxu0 %v12820_v13  ;;  %7021 = vmatpush1.bf16.msra.mxu1 %v10530_v56  ;;  %v12904_v13 = vld [vmem:[#allocation23_spill] sm:$0xff] }
 0x36f   :  { %6959 = vmatprep.subr.bf16.mxu0 %v10462_v59  ;;  %7023 = vmatprep.subr.bf16.mxu1 %v12900_v58 }
 0x372   :  { %6961 = vmatpush1.bf16.msra.mxu0 %v10468_v57  ;;  %7025 = vmatpush1.bf16.msra.mxu1 %v12901_v0  ;;  %v12905_v57 = vld [vmem:[#allocation39_spill] sm:$0xff] }
 0x373   :  { %6963 = vmatprep.subr.bf16.mxu0 %v10474_v14  ;;  %7027 = vmatprep.subr.bf16.mxu1 %v12902_v15  ;;  %v12906_v14 = vld [vmem:[#allocation41_spill] sm:$0xff]  ;;  %v12964_v15 = vld [vmem:[#allocation158_spill] sm:$0xff] }
 0x376   :  { %6965 = vmatpush1.bf16.msra.mxu0 %v12821_v50  ;;  %7029 = vmatpush1.bf16.msra.mxu1 %v12903_v54  ;;  %v12907_v50 = vld [vmem:[#allocation43_spill] sm:$0xff] }
 0x377   :  { %7031 = vmatprep.subr.bf16.mxu0 %v12822_v41  ;;  %7095 = vmatprep.subr.bf16.mxu1 %v12904_v13  ;;  %v12908_v13 = vld [vmem:[#allocation47_spill] sm:$0xff] }
 0x378   :  { %v12963_v41 = vld [vmem:[#allocation159_spill] sm:$0xff] }
 0x379   :  { %1870 = vmatmul.mubr.f32.vlgmr.msra.gmra.mrb[18].mxu0 %v10832_v10  ;;  %1941 = vmatmul.mubr.f32.vlgmr.msra.gmra.mrb[34].mxu1 %v10832_v10  ;;  %v12909_v10 = vld [vmem:[#allocation27_spill] sm:$0xff] }
 0x37a   :  { %7033 = vmatpush1.bf16.msra.mxu0 %v12823_v49  ;;  %7097 = vmatpush1.bf16.msra.mxu1 %v12905_v57  ;;  %v12910_v49 = vld [vmem:[#allocation49_spill] sm:$0xff]  ;;  %v12911_v57 = vld [vmem:[#allocation28_spill] sm:$0xff] }
 0x37b   :  { %7035 = vmatprep.subr.bf16.mxu0 %v12824_v62  ;;  %7099 = vmatprep.subr.bf16.mxu1 %v12906_v14  ;;  %v12912_v62 = vld [vmem:[#allocation51_spill] sm:$0xff]  ;;  %v12913_v14 = vld [vmem:[#allocation29_spill] sm:$0xff] }
 0x37e   :  { %7037 = vmatpush1.bf16.msra.mxu0 %v12825_v55  ;;  %7101 = vmatpush1.bf16.msra.mxu1 %v12907_v50  ;;  %v12914_v55 = vld [vmem:[#allocation53_spill] sm:$0xff]  ;;  %v12915_v50 = vld [vmem:[#allocation30_spill] sm:$0xff] }
 0x37f   :  { %7039 = vmatprep.subr.bf16.mxu0 %v12826_v26  ;;  %7103 = vmatprep.subr.bf16.mxu1 %v10198_v6  ;;  %v12916_v26 = vld [vmem:[#allocation55_spill] sm:$0xff] }
 0x380   :  { %v12917_v6 = vld [vmem:[#allocation31_spill] sm:$0xff] }
 0x382   :  { %7041 = vmatpush1.bf16.msra.mxu0 %v12827_v48  ;;  %7105 = vmatpush1.bf16.msra.mxu1 %v12908_v13  ;;  %v12918_v48 = vld [vmem:[#allocation57_spill] sm:$0xff]  ;;  %v12919_v13 = vld [vmem:[#allocation32_spill] sm:$0xff] }
 0x383   :  { %7043 = vmatprep.subr.bf16.mxu0 %v12909_v10  ;;  %7107 = vmatprep.subr.bf16.mxu1 %v12910_v49  ;;  %v12920_v10 = vld [vmem:[#allocation59_spill] sm:$0xff]  ;;  %v12921_v49 = vld [vmem:[#allocation33_spill] sm:$0xff] }
 0x386   :  { %7045 = vmatpush1.bf16.msra.mxu0 %v12911_v57  ;;  %7109 = vmatpush1.bf16.msra.mxu1 %v12912_v62  ;;  %v12922_v57 = vld [vmem:[#allocation61_spill] sm:$0xff]  ;;  %v12923_v62 = vld [vmem:[#allocation34_spill] sm:$0xff] }
 0x387   :  { %7047 = vmatprep.subr.bf16.mxu0 %v12913_v14  ;;  %7111 = vmatprep.subr.bf16.mxu1 %v12914_v55  ;;  %v12924_v14 = vld [vmem:[#allocation63_spill] sm:$0xff] }
 0x388   :  { %v12925_v55 = vld [vmem:[#allocation35_spill] sm:$0xff] }
 0x38a   :  { %7049 = vmatpush1.bf16.msra.mxu0 %v12915_v50  ;;  %7113 = vmatpush1.bf16.msra.mxu1 %v12916_v26  ;;  %v12926_v50 = vld [vmem:[#allocation65_spill] sm:$0xff]  ;;  %v12927_v26 = vld [vmem:[#allocation36_spill] sm:$0xff] }
 0x38b   :  { %7051 = vmatprep.subr.bf16.mxu0 %v12917_v6  ;;  %7115 = vmatprep.subr.bf16.mxu1 %v12918_v48  ;;  %v12928_v6 = vld [vmem:[#allocation67_spill] sm:$0xff]  ;;  %v12929_v48 = vld [vmem:[#allocation37_spill] sm:$0xff] }
 0x38e   :  { %7053 = vmatpush1.bf16.msra.mxu0 %v12919_v13  ;;  %7117 = vmatpush1.bf16.msra.mxu1 %v12920_v10  ;;  %v12930_v13 = vld [vmem:[#allocation68_spill] sm:$0xff]  ;;  %v12931_v10 = vld [vmem:[#allocation38_spill] sm:$0xff] }
 0x38f   :  { %7055 = vmatprep.subr.bf16.mxu0 %v12921_v49  ;;  %7119 = vmatprep.subr.bf16.mxu1 %v12922_v57  ;;  %v12932_v49 = vld [vmem:[#allocation70_spill] sm:$0xff]  ;;  %v12933_v57 = vld [vmem:[#allocation40_spill] sm:$0xff] }
 0x392   :  { %7057 = vmatpush1.bf16.msra.mxu0 %v12923_v62  ;;  %7121 = vmatpush1.bf16.msra.mxu1 %v12924_v14  ;;  %v12934_v62 = vld [vmem:[#allocation72_spill] sm:$0xff]  ;;  %v12935_v14 = vld [vmem:[#allocation42_spill] sm:$0xff] }
 0x393   :  { %7059 = vmatprep.subr.bf16.mxu0 %v12925_v55  ;;  %7123 = vmatprep.subr.bf16.mxu1 %v12926_v50  ;;  %v12936_v55 = vld [vmem:[#allocation74_spill] sm:$0xff]  ;;  %v12937_v50 = vld [vmem:[#allocation44_spill] sm:$0xff] }
 0x396   :  { %7061 = vmatpush1.bf16.msra.mxu0 %v12927_v26  ;;  %7125 = vmatpush1.bf16.msra.mxu1 %v12928_v6  ;;  %v12938_v26 = vld [vmem:[#allocation76_spill] sm:$0xff]  ;;  %v12939_v6 = vld [vmem:[#allocation46_spill] sm:$0xff] }
 0x397   :  { %7063 = vmatprep.subr.bf16.mxu0 %v12929_v48  ;;  %7127 = vmatprep.subr.bf16.mxu1 %v12930_v13  ;;  %v12940_v48 = vld [vmem:[#allocation78_spill] sm:$0xff]  ;;  %v12941_v13 = vld [vmem:[#allocation48_spill] sm:$0xff] }
 0x39a   :  { %7065 = vmatpush1.bf16.msra.mxu0 %v12931_v10  ;;  %7129 = vmatpush1.bf16.msra.mxu1 %v12932_v49  ;;  %v12942_v10 = vld [vmem:[#allocation80_spill] sm:$0xff]  ;;  %v12943_v49 = vld [vmem:[#allocation50_spill] sm:$0xff] }
 0x39b   :  { %7067 = vmatprep.subr.bf16.mxu0 %v12933_v57  ;;  %7131 = vmatprep.subr.bf16.mxu1 %v12934_v62  ;;  %v12944_v57 = vld [vmem:[#allocation82_spill] sm:$0xff]  ;;  %v12945_v62 = vld [vmem:[#allocation52_spill] sm:$0xff] }
 0x39e   :  { %7069 = vmatpush1.bf16.msra.mxu0 %v12935_v14  ;;  %7133 = vmatpush1.bf16.msra.mxu1 %v12936_v55  ;;  %v12946_v14 = vld [vmem:[#allocation84_spill] sm:$0xff]  ;;  %v12947_v55 = vld [vmem:[#allocation54_spill] sm:$0xff] }
 0x39f   :  { %7071 = vmatprep.subr.bf16.mxu0 %v12937_v50  ;;  %7135 = vmatprep.subr.bf16.mxu1 %v12938_v26  ;;  %v12948_v50 = vld [vmem:[#allocation86_spill] sm:$0xff]  ;;  %v12949_v26 = vld [vmem:[#allocation56_spill] sm:$0xff] }
 0x3a2   :  { %7073 = vmatpush1.bf16.msra.mxu0 %v12939_v6  ;;  %7137 = vmatpush1.bf16.msra.mxu1 %v12940_v48  ;;  %v12950_v6 = vld [vmem:[#allocation88_spill] sm:$0xff]  ;;  %v12951_v48 = vld [vmem:[#allocation58_spill] sm:$0xff] }
 0x3a3   :  { %7075 = vmatprep.subr.bf16.mxu0 %v12941_v13  ;;  %7139 = vmatprep.subr.bf16.mxu1 %v12942_v10  ;;  %v12952_v13 = vld [vmem:[#allocation90_spill] sm:$0xff]  ;;  %v12953_v10 = vld [vmem:[#allocation60_spill] sm:$0xff] }
 0x3a6   :  { %7077 = vmatpush1.bf16.msra.mxu0 %v12943_v49  ;;  %7141 = vmatpush1.bf16.msra.mxu1 %v12944_v57  ;;  %v12954_v49 = vld [vmem:[#allocation92_spill] sm:$0xff]  ;;  %v12955_v57 = vld [vmem:[#allocation62_spill] sm:$0xff] }
 0x3a7   :  { %7079 = vmatprep.subr.bf16.mxu0 %v12945_v62  ;;  %7143 = vmatprep.subr.bf16.mxu1 %v12946_v14  ;;  %v12956_v62 = vld [vmem:[#allocation94_spill] sm:$0xff]  ;;  %v12957_v14 = vld [vmem:[#allocation64_spill] sm:$0xff] }
 0x3aa   :  { %7081 = vmatpush1.bf16.msra.mxu0 %v12947_v55  ;;  %7145 = vmatpush1.bf16.msra.mxu1 %v12948_v50  ;;  %v12958_v55 = vld [vmem:[#allocation96_spill] sm:$0xff]  ;;  %v12959_v50 = vld [vmem:[#allocation66_spill] sm:$0xff] }
 0x3ab   :  { %7083 = vmatprep.subr.bf16.mxu0 %v12949_v26  ;;  %7147 = vmatprep.subr.bf16.mxu1 %v12950_v6  ;;  %v12960_v26 = vld [vmem:[#allocation98_spill] sm:$0xff]  ;;  %v12961_v6 = vld [vmem:[#allocation69_spill] sm:$0xff] }
 0x3ae   :  { %7085 = vmatpush1.bf16.msra.mxu0 %v12951_v48  ;;  %7149 = vmatpush1.bf16.msra.mxu1 %v12952_v13  ;;  %v12962_v48 = vld [vmem:[#allocation101_spill] sm:$0xff] }
 0x3af   :  { %7087 = vmatprep.subr.bf16.mxu0 %v12953_v10  ;;  %7151 = vmatprep.subr.bf16.mxu1 %v12954_v49 }
 0x3b2   :  { %7089 = vmatpush1.bf16.msra.mxu0 %v12955_v57  ;;  %7153 = vmatpush1.bf16.msra.mxu1 %v12956_v62 }
 0x3b3   :  { %7091 = vmatprep.subr.bf16.mxu0 %v12957_v14  ;;  %7155 = vmatprep.subr.bf16.mxu1 %v12958_v55  ;;  %v12965_v55 = vld [vmem:[#allocation161_spill] sm:$0xff] }
 0x3b6   :  { %7093 = vmatpush1.bf16.msra.mxu0 %v12959_v50  ;;  %7157 = vmatpush1.bf16.msra.mxu1 %v12960_v26 }
 0x3b7   :  { %7159 = vmatprep.subr.bf16.mxu0 %v12961_v6  ;;  %7223 = vmatprep.subr.bf16.mxu1 %v12962_v48 }
 0x40c   :  { %v1729_v13 = vpop.f32.mrb[4].mxu0  ;;  %v1800_v10 = vpop.f32.mrb[12].mxu1 }
 0x40d   :  { %v9116_v49 = vadd.f32 %v1729_v13, %v12963_v41  ;;  %v1731_v54 = vpop.f32.mrb[5].mxu0  ;;  %v1802_v57 = vpop.f32.mrb[13].mxu1  ;;  %v9140_v50 = vadd.f32 %v1800_v10, %v12965_v55 }
 0x40e   :  { %v9117_v62 = vadd.f32 %v1731_v54, %v12964_v15 }
 0x40f   :  { %v6148_v0 = vmul.f32 -1.442695, %v9116_v49 }
 0x410   :  { %v6149_v14 = vmul.f32 -1.442695, %v9117_v62 }
 0x411   :  { %9378 = vpow2.f32 %v6148_v0 }
 0x412   :  { %9380 = vpow2.f32 %v6149_v14  ;;  %v12966_v14 = vld [vmem:[#allocation163_spill] sm:$0xff] }
 0x413   :  { %9382 = vtanh.f32 %v9140_v50 }
 0x41b   :  { %v9379_v58 = vpop.eup %9378 }
 0x41c   :  { %v9381_v26 = vpop.eup %9380  ;;  %v1959_v59 = vadd.f32 1.0, %v9379_v58 }
 0x41d   :  { %v1965_v6 = vadd.f32 1.0, %v9381_v26  ;;  %v9383_v48 = vpop.eup %9382 }
 0x41e   :  { %9384 = vrcp.f32 %v1959_v59 }
 0x41f   :  { %9386 = vrcp.f32 %v1965_v6  ;;  %v9141_v6 = vadd.f32 %v1802_v57, %v12873_v5 }
 0x428   :  { %v9385_v56 = vpop.eup %9384 }
 0x429   :  { %v9387_v13 = vpop.eup %9386  ;;  %v1976_v41 = vmul.f32 %v9385_v56, %v9383_v48  ;;  %v6150_v56 = vmul.f32 -1.442695, %v9141_v6 }
 0x42a   :  { %v1975_v37 = vmul.f32 %v9387_v13, %v10818_v52 }
 0x42c   :  { %v10974_v54 = vadd.f32 %v1976_v41, %v1975_v37 }
 0x44c   :  { %v1871_v62 = vpop.f32.mrb[18].mxu0  ;;  %v1942_v0 = vpop.f32.mrb[34].mxu1 }
 0x44d   :  { %v9162_v49 = vadd.f32 %v1871_v62, %v12966_v14  ;;  %v1873_v10 = vpop.f32.mrb[19].mxu0  ;;  %v1944_v55 = vpop.f32.mrb[35].mxu1  ;;  %v9178_v37 = vadd.f32 %v1942_v0, %v10664_v34 }
 0x44e   :  { %v9163_v58 = vadd.f32 %v1873_v10, %v12872_v51  ;;  %v9179_v48 = vadd.f32 %v1944_v55, %v10666_v24 }
 0x44f   :  { %v6151_v50 = vmul.f32 -1.442695, %v9162_v49 }
 0x450   :  { %v6152_v26 = vmul.f32 -1.442695, %v9163_v58  ;;  %v6153_v59 = vmul.f32 -1.442695, %v9179_v48 }
 0x451   :  { %9388 = vpow2.f32 %v6151_v50 }
 0x452   :  { %9390 = vpow2.f32 %v6152_v26 }
 0x453   :  { %9392 = vpow2.f32 %v6150_v56 }
 0x454   :  { %9394 = vpow2.f32 %v6153_v59 }
 0x455   :  { %9396 = vtanh.f32 %v9178_v37 }
 0x45b   :  { %v9389_v41 = vpop.eup %9388 }
 0x45c   :  { %v9391_v52 = vpop.eup %9390  ;;  %v1992_v13 = vadd.f32 1.0, %v9389_v41 }
 0x45d   :  { %v1998_v62 = vadd.f32 1.0, %v9391_v52  ;;  %v9393_v49 = vpop.eup %9392 }
 0x45e   :  { %9398 = vrcp.f32 %v1992_v13  ;;  %v9395_v10 = vpop.eup %9394  ;;  %v1972_v48 = vadd.f32 1.0, %v9393_v49  ;;  %v12971_v49 = vld [vmem:[#allocation95_spill] sm:$0xff] }
 0x45f   :  { %9400 = vrcp.f32 %v1998_v62  ;;  %v9397_v58 = vpop.eup %9396  ;;  %v2005_v55 = vadd.f32 1.0, %v9395_v10  ;;  %v12970_v62 = vld [vmem:[#allocation93_spill] sm:$0xff] }
 0x460   :  { %9402 = vtanh.f32 %v10974_v54  ;;  %v12972_v10 = vld [vmem:[#allocation97_spill] sm:$0xff] }
 0x461   :  { %9404 = vrcp.f32 %v2005_v55  ;;  %v12977_v55 = vld [vmem:[#allocation114_spill] sm:$0xff] }
 0x468   :  { %v9399_v50 = vpop.eup %9398 }
 0x469   :  { %v9401_v57 = vpop.eup %9400  ;;  %v2009_v26 = vmul.f32 %v9399_v50, %v9397_v58  ;;  %v12973_v58 = vld [vmem:[#allocation99_spill] sm:$0xff]  ;;  %v12974_v50 = vld [vmem:[#allocation100_spill] sm:$0xff] }
 0x46a   :  { %v2008_v6 = vmul.f32 %v9401_v57, %v10827_v18  ;;  %v9403_v56 = vpop.eup %9402  ;;  %v12969_v18 = vld [vmem:[#allocation91_spill] sm:$0xff]  ;;  %v12975_v57 = vld [vmem:[#allocation108_spill] sm:$0xff] }
 0x46b   :  { %v9405_v59 = vpop.eup %9404 }
 0x46c   :  { %v10983_v0 = vadd.f32 %v2009_v26, %v2008_v6  ;;  %v12976_v26 = vld [vmem:[#allocation110_spill] sm:$0xff]  ;;  %v12978_v6 = vld [vmem:[#allocation116_spill] sm:$0xff] }
 0x46e   :  { %9406 = vtanh.f32 %v10983_v0 }
 0x46f   :  { %9408 = vrcp.f32 %v1972_v48  ;;  %v12979_v48 = vld [vmem:[#allocation118_spill] sm:$0xff] }
 0x478   :  { %v9407_v37 = vpop.eup %9406 }
 0x479   :  { %v9409_v41 = vpop.eup %9408  ;;  %v10986_v52 = vmul.f32 %v9407_v37, %v9405_v59  ;;  %v12981_v59 = vld [vmem:[#allocation142_spill] sm:$0xff] }
 0x47a   :  { %v10988_v13 = vmul.f32 %v9409_v41, %v9403_v56  ;;  %v12980_v56 = vld [vmem:[#allocation120_spill] sm:$0xff]  ;;  %v12982_v37 = vld [vmem:[#allocation122_spill] sm:$0xff]  ;;  %v12983_v41 = vld [vmem:[#allocation143_spill] sm:$0xff] }
 0x47b   :  { %12967 = vst [vmem:[#allocation73_spill] sm:$0xff] %v10986_v52  ;;  %2081 = vmatprep.mubr.f32.mxu0 %v10986_v52  ;;  %2152 = vmatprep.mubr.f32.mxu1 %v10986_v52 }
 0x47c   :  { %12968 = vst [vmem:[#allocation79_spill] sm:$0xff] %v10988_v13  ;;  %2082 = vmatmul.mubr.f32.vlgmr.msra.gmra.mrb[6].mxu0 %v10988_v13  ;;  %2153 = vmatmul.mubr.f32.vlgmr.msra.gmra.mrb[14].mxu1 %v10988_v13 }
 0x47d   :  { %7161 = vmatpush1.bf16.msra.mxu0 %v12785_v46  ;;  %7225 = vmatpush1.bf16.msra.mxu1 %v12786_v35 }
 0x47e   :  { %2223 = vmatprep.mubr.f32.mxu0 %v10986_v52  ;;  %2294 = vmatprep.mubr.f32.mxu1 %v10986_v52  ;;  %v12984_v52 = vld [vmem:[#allocation124_spill] sm:$0xff] }
 0x47f   :  { %7163 = vmatprep.subr.bf16.mxu0 %v12787_v7  ;;  %7227 = vmatprep.subr.bf16.mxu1 %v12876_v42 }
 0x481   :  { %7165 = vmatpush1.bf16.msra.mxu0 %v12877_v11  ;;  %7229 = vmatpush1.bf16.msra.mxu1 %v12878_v36 }
 0x482   :  { %7167 = vmatprep.subr.bf16.mxu0 %v12879_v33  ;;  %7231 = vmatprep.subr.bf16.mxu1 %v12880_v44 }
 0x485   :  { %7169 = vmatpush1.bf16.msra.mxu0 %v12793_v40  ;;  %7233 = vmatpush1.bf16.msra.mxu1 %v12881_v31 }
 0x486   :  { %7171 = vmatprep.subr.bf16.mxu0 %v12795_v32  ;;  %7235 = vmatprep.subr.bf16.mxu1 %v12882_v61 }
 0x489   :  { %7173 = vmatpush1.bf16.msra.mxu0 %v12797_v38  ;;  %7237 = vmatpush1.bf16.msra.mxu1 %v12883_v2 }
 0x48a   :  { %7175 = vmatprep.subr.bf16.mxu0 %v12799_v47  ;;  %7239 = vmatprep.subr.bf16.mxu1 %v12884_v19 }
 0x48d   :  { %7177 = vmatpush1.bf16.msra.mxu0 %v12801_v25  ;;  %7241 = vmatpush1.bf16.msra.mxu1 %v12885_v23 }
 0x48e   :  { %7179 = vmatprep.subr.bf16.mxu0 %v12803_v4  ;;  %7243 = vmatprep.subr.bf16.mxu1 %v12886_v9 }
 0x491   :  { %7181 = vmatpush1.bf16.msra.mxu0 %v12969_v18  ;;  %7245 = vmatpush1.bf16.msra.mxu1 %v12887_v8 }
 0x492   :  { %7183 = vmatprep.subr.bf16.mxu0 %v12970_v62  ;;  %7247 = vmatprep.subr.bf16.mxu1 %v12888_v39 }
 0x495   :  { %7185 = vmatpush1.bf16.msra.mxu0 %v12971_v49  ;;  %7249 = vmatpush1.bf16.msra.mxu1 %v12889_v60 }
 0x496   :  { %7187 = vmatprep.subr.bf16.mxu0 %v12972_v10  ;;  %7251 = vmatprep.subr.bf16.mxu1 %v12890_v63 }
 0x499   :  { %7189 = vmatpush1.bf16.msra.mxu0 %v12973_v58  ;;  %7253 = vmatpush1.bf16.msra.mxu1 %v12891_v17 }
 0x49a   :  { %7191 = vmatprep.subr.bf16.mxu0 %v12974_v50  ;;  %7255 = vmatprep.subr.bf16.mxu1 %v12892_v3 }
 0x49d   :  { %7193 = vmatpush1.bf16.msra.mxu0 %v12810_v21  ;;  %7257 = vmatpush1.bf16.msra.mxu1 %v12893_v16 }
 0x49e   :  { %7195 = vmatprep.subr.bf16.mxu0 %v12811_v27  ;;  %7259 = vmatprep.subr.bf16.mxu1 %v12894_v1 }
 0x4a1   :  { %7197 = vmatpush1.bf16.msra.mxu0 %v12812_v30  ;;  %7261 = vmatpush1.bf16.msra.mxu1 %v12895_v28 }
 0x4a2   :  { %7199 = vmatprep.subr.bf16.mxu0 %v12975_v57  ;;  %7263 = vmatprep.subr.bf16.mxu1 %v12896_v22 }
 0x4a5   :  { %7201 = vmatpush1.bf16.msra.mxu0 %v12976_v26  ;;  %7265 = vmatpush1.bf16.msra.mxu1 %v12897_v20 }
 0x4a6   :  { %7203 = vmatprep.subr.bf16.mxu0 %v12815_v29  ;;  %7267 = vmatprep.subr.bf16.mxu1 %v10510_v53 }
 0x4a9   :  { %7205 = vmatpush1.bf16.msra.mxu0 %v12977_v55  ;;  %7269 = vmatpush1.bf16.msra.mxu1 %v10514_v43  ;;  %v12985_v55 = vld [vmem:[#allocation144_spill] sm:$0xff]  ;;  %v12986_v43 = vld [vmem:[#allocation126_spill] sm:$0xff] }
 0x4aa   :  { %7207 = vmatprep.subr.bf16.mxu0 %v12978_v6  ;;  %7271 = vmatprep.subr.bf16.mxu1 %v10518_v45  ;;  %v12987_v6 = vld [vmem:[#allocation145_spill] sm:$0xff]  ;;  %v12988_v45 = vld [vmem:[#allocation128_spill] sm:$0xff] }
 0x4ad   :  { %7209 = vmatpush1.bf16.msra.mxu0 %v12979_v48  ;;  %7273 = vmatpush1.bf16.msra.mxu1 %v12898_v12  ;;  %v12989_v48 = vld [vmem:[#allocation146_spill] sm:$0xff] }
 0x4ae   :  { %7211 = vmatprep.subr.bf16.mxu0 %v12980_v56  ;;  %7275 = vmatprep.subr.bf16.mxu1 %v12981_v59  ;;  %v12990_v12 = vld [vmem:[#allocation130_spill] sm:$0xff]  ;;  %v12991_v56 = vld [vmem:[#allocation147_spill] sm:$0xff]  ;;  %v12992_v59 = vld [vmem:[#allocation20_spill] sm:$0xff] }
 0x4b1   :  { %7213 = vmatpush1.bf16.msra.mxu0 %v12982_v37  ;;  %7277 = vmatpush1.bf16.msra.mxu1 %v12983_v41  ;;  %v12993_v37 = vld [vmem:[#allocation23_spill] sm:$0xff] }
 0x4b2   :  { %7215 = vmatprep.subr.bf16.mxu0 %v12984_v52  ;;  %7279 = vmatprep.subr.bf16.mxu1 %v12985_v55  ;;  %v12994_v55 = vld [vmem:[#allocation21_spill] sm:$0xff]  ;;  %v13003_v52 = vld [vmem:[#allocation47_spill] sm:$0xff] }
 0x4b3   :  { %v13058_v41 = vld [vmem:[#allocation159_spill] sm:$0xff] }
 0x4b5   :  { %7217 = vmatpush1.bf16.msra.mxu0 %v12986_v43  ;;  %7281 = vmatpush1.bf16.msra.mxu1 %v12987_v6  ;;  %v12995_v43 = vld [vmem:[#allocation39_spill] sm:$0xff]  ;;  %v12996_v6 = vld [vmem:[#allocation22_spill] sm:$0xff] }
 0x4b6   :  { %7219 = vmatprep.subr.bf16.mxu0 %v12988_v45  ;;  %7283 = vmatprep.subr.bf16.mxu1 %v12989_v48  ;;  %v12997_v45 = vld [vmem:[#allocation41_spill] sm:$0xff]  ;;  %v12998_v48 = vld [vmem:[#allocation24_spill] sm:$0xff] }
 0x4b9   :  { %7221 = vmatpush1.bf16.msra.mxu0 %v12990_v12  ;;  %7285 = vmatpush1.bf16.msra.mxu1 %v12991_v56  ;;  %v12999_v12 = vld [vmem:[#allocation43_spill] sm:$0xff]  ;;  %v13000_v56 = vld [vmem:[#allocation25_spill] sm:$0xff] }
 0x4ba   :  { %7287 = vmatprep.subr.bf16.mxu0 %v12992_v59  ;;  %7351 = vmatprep.subr.bf16.mxu1 %v12993_v37  ;;  %v13001_v59 = vld [vmem:[#allocation45_spill] sm:$0xff]  ;;  %v13002_v37 = vld [vmem:[#allocation26_spill] sm:$0xff] }
 0x4bc   :  { %2224 = vmatmul.mubr.f32.vlgmr.msra.gmra.mrb[16].mxu0 %v10988_v13  ;;  %2295 = vmatmul.mubr.f32.vlgmr.msra.gmra.mrb[32].mxu1 %v10988_v13  ;;  %v13004_v13 = vld [vmem:[#allocation27_spill] sm:$0xff] }
 0x4bd   :  { %7289 = vmatpush1.bf16.msra.mxu0 %v12994_v55  ;;  %7353 = vmatpush1.bf16.msra.mxu1 %v12995_v43  ;;  %v13005_v55 = vld [vmem:[#allocation49_spill] sm:$0xff]  ;;  %v13006_v43 = vld [vmem:[#allocation28_spill] sm:$0xff] }
 0x4be   :  { %7291 = vmatprep.subr.bf16.mxu0 %v12996_v6  ;;  %7355 = vmatprep.subr.bf16.mxu1 %v12997_v45  ;;  %v13007_v6 = vld [vmem:[#allocation51_spill] sm:$0xff]  ;;  %v13008_v45 = vld [vmem:[#allocation29_spill] sm:$0xff] }
 0x4c1   :  { %7293 = vmatpush1.bf16.msra.mxu0 %v12998_v48  ;;  %7357 = vmatpush1.bf16.msra.mxu1 %v12999_v12  ;;  %v13009_v48 = vld [vmem:[#allocation53_spill] sm:$0xff]  ;;  %v13010_v12 = vld [vmem:[#allocation30_spill] sm:$0xff] }
 0x4c2   :  { %7295 = vmatprep.subr.bf16.mxu0 %v13000_v56  ;;  %7359 = vmatprep.subr.bf16.mxu1 %v13001_v59  ;;  %v13011_v56 = vld [vmem:[#allocation55_spill] sm:$0xff] }
 0x4c3   :  { %v13012_v59 = vld [vmem:[#allocation31_spill] sm:$0xff] }
 0x4c5   :  { %7297 = vmatpush1.bf16.msra.mxu0 %v13002_v37  ;;  %7361 = vmatpush1.bf16.msra.mxu1 %v13003_v52  ;;  %v13013_v37 = vld [vmem:[#allocation57_spill] sm:$0xff]  ;;  %v13014_v52 = vld [vmem:[#allocation32_spill] sm:$0xff] }
 0x4c6   :  { %7299 = vmatprep.subr.bf16.mxu0 %v13004_v13  ;;  %7363 = vmatprep.subr.bf16.mxu1 %v13005_v55  ;;  %v13015_v13 = vld [vmem:[#allocation59_spill] sm:$0xff]  ;;  %v13016_v55 = vld [vmem:[#allocation33_spill] sm:$0xff] }
 0x4c9   :  { %7301 = vmatpush1.bf16.msra.mxu0 %v13006_v43  ;;  %7365 = vmatpush1.bf16.msra.mxu1 %v13007_v6  ;;  %v13017_v43 = vld [vmem:[#allocation61_spill] sm:$0xff]  ;;  %v13018_v6 = vld [vmem:[#allocation34_spill] sm:$0xff] }
 0x4ca   :  { %7303 = vmatprep.subr.bf16.mxu0 %v13008_v45  ;;  %7367 = vmatprep.subr.bf16.mxu1 %v13009_v48  ;;  %v13019_v45 = vld [vmem:[#allocation63_spill] sm:$0xff] }
 0x4cb   :  { %v13020_v48 = vld [vmem:[#allocation35_spill] sm:$0xff] }
 0x4cd   :  { %7305 = vmatpush1.bf16.msra.mxu0 %v13010_v12  ;;  %7369 = vmatpush1.bf16.msra.mxu1 %v13011_v56  ;;  %v13021_v12 = vld [vmem:[#allocation65_spill] sm:$0xff]  ;;  %v13022_v56 = vld [vmem:[#allocation36_spill] sm:$0xff] }
 0x4ce   :  { %7307 = vmatprep.subr.bf16.mxu0 %v13012_v59  ;;  %7371 = vmatprep.subr.bf16.mxu1 %v13013_v37  ;;  %v13023_v59 = vld [vmem:[#allocation67_spill] sm:$0xff]  ;;  %v13024_v37 = vld [vmem:[#allocation37_spill] sm:$0xff] }
 0x4d1   :  { %7309 = vmatpush1.bf16.msra.mxu0 %v13014_v52  ;;  %7373 = vmatpush1.bf16.msra.mxu1 %v13015_v13  ;;  %v13025_v52 = vld [vmem:[#allocation68_spill] sm:$0xff]  ;;  %v13026_v13 = vld [vmem:[#allocation38_spill] sm:$0xff] }
 0x4d2   :  { %7311 = vmatprep.subr.bf16.mxu0 %v13016_v55  ;;  %7375 = vmatprep.subr.bf16.mxu1 %v13017_v43  ;;  %v13027_v55 = vld [vmem:[#allocation70_spill] sm:$0xff]  ;;  %v13028_v43 = vld [vmem:[#allocation40_spill] sm:$0xff] }
 0x4d5   :  { %7313 = vmatpush1.bf16.msra.mxu0 %v13018_v6  ;;  %7377 = vmatpush1.bf16.msra.mxu1 %v13019_v45  ;;  %v13029_v6 = vld [vmem:[#allocation72_spill] sm:$0xff]  ;;  %v13030_v45 = vld [vmem:[#allocation42_spill] sm:$0xff] }
 0x4d6   :  { %7315 = vmatprep.subr.bf16.mxu0 %v13020_v48  ;;  %7379 = vmatprep.subr.bf16.mxu1 %v13021_v12  ;;  %v13031_v48 = vld [vmem:[#allocation74_spill] sm:$0xff]  ;;  %v13032_v12 = vld [vmem:[#allocation44_spill] sm:$0xff] }
 0x4d9   :  { %7317 = vmatpush1.bf16.msra.mxu0 %v13022_v56  ;;  %7381 = vmatpush1.bf16.msra.mxu1 %v13023_v59  ;;  %v13033_v56 = vld [vmem:[#allocation76_spill] sm:$0xff]  ;;  %v13034_v59 = vld [vmem:[#allocation46_spill] sm:$0xff] }
 0x4da   :  { %7319 = vmatprep.subr.bf16.mxu0 %v13024_v37  ;;  %7383 = vmatprep.subr.bf16.mxu1 %v13025_v52  ;;  %v13035_v37 = vld [vmem:[#allocation78_spill] sm:$0xff]  ;;  %v13036_v52 = vld [vmem:[#allocation48_spill] sm:$0xff] }
 0x4dd   :  { %7321 = vmatpush1.bf16.msra.mxu0 %v13026_v13  ;;  %7385 = vmatpush1.bf16.msra.mxu1 %v13027_v55  ;;  %v13037_v13 = vld [vmem:[#allocation80_spill] sm:$0xff]  ;;  %v13038_v55 = vld [vmem:[#allocation50_spill] sm:$0xff] }
 0x4de   :  { %7323 = vmatprep.subr.bf16.mxu0 %v13028_v43  ;;  %7387 = vmatprep.subr.bf16.mxu1 %v13029_v6  ;;  %v13039_v43 = vld [vmem:[#allocation82_spill] sm:$0xff]  ;;  %v13040_v6 = vld [vmem:[#allocation52_spill] sm:$0xff] }
 0x4e1   :  { %7325 = vmatpush1.bf16.msra.mxu0 %v13030_v45  ;;  %7389 = vmatpush1.bf16.msra.mxu1 %v13031_v48  ;;  %v13041_v45 = vld [vmem:[#allocation84_spill] sm:$0xff]  ;;  %v13042_v48 = vld [vmem:[#allocation54_spill] sm:$0xff] }
 0x4e2   :  { %7327 = vmatprep.subr.bf16.mxu0 %v13032_v12  ;;  %7391 = vmatprep.subr.bf16.mxu1 %v13033_v56  ;;  %v13043_v12 = vld [vmem:[#allocation86_spill] sm:$0xff]  ;;  %v13044_v56 = vld [vmem:[#allocation56_spill] sm:$0xff] }
 0x4e5   :  { %7329 = vmatpush1.bf16.msra.mxu0 %v13034_v59  ;;  %7393 = vmatpush1.bf16.msra.mxu1 %v13035_v37  ;;  %v13045_v59 = vld [vmem:[#allocation88_spill] sm:$0xff]  ;;  %v13046_v37 = vld [vmem:[#allocation58_spill] sm:$0xff] }
 0x4e6   :  { %7331 = vmatprep.subr.bf16.mxu0 %v13036_v52  ;;  %7395 = vmatprep.subr.bf16.mxu1 %v13037_v13  ;;  %v13047_v52 = vld [vmem:[#allocation90_spill] sm:$0xff]  ;;  %v13048_v13 = vld [vmem:[#allocation60_spill] sm:$0xff] }
 0x4e9   :  { %7333 = vmatpush1.bf16.msra.mxu0 %v13038_v55  ;;  %7397 = vmatpush1.bf16.msra.mxu1 %v13039_v43  ;;  %v13049_v55 = vld [vmem:[#allocation92_spill] sm:$0xff]  ;;  %v13050_v43 = vld [vmem:[#allocation62_spill] sm:$0xff] }
 0x4ea   :  { %7335 = vmatprep.subr.bf16.mxu0 %v13040_v6  ;;  %7399 = vmatprep.subr.bf16.mxu1 %v13041_v45  ;;  %v13051_v6 = vld [vmem:[#allocation94_spill] sm:$0xff]  ;;  %v13052_v45 = vld [vmem:[#allocation64_spill] sm:$0xff] }
 0x4ed   :  { %7337 = vmatpush1.bf16.msra.mxu0 %v13042_v48  ;;  %7401 = vmatpush1.bf16.msra.mxu1 %v13043_v12  ;;  %v13053_v48 = vld [vmem:[#allocation96_spill] sm:$0xff]  ;;  %v13054_v12 = vld [vmem:[#allocation66_spill] sm:$0xff] }
 0x4ee   :  { %7339 = vmatprep.subr.bf16.mxu0 %v13044_v56  ;;  %7403 = vmatprep.subr.bf16.mxu1 %v13045_v59  ;;  %v13055_v56 = vld [vmem:[#allocation98_spill] sm:$0xff]  ;;  %v13056_v59 = vld [vmem:[#allocation69_spill] sm:$0xff] }
 0x4f1   :  { %7341 = vmatpush1.bf16.msra.mxu0 %v13046_v37  ;;  %7405 = vmatpush1.bf16.msra.mxu1 %v13047_v52  ;;  %v13057_v37 = vld [vmem:[#allocation101_spill] sm:$0xff] }
 0x4f2   :  { %7343 = vmatprep.subr.bf16.mxu0 %v13048_v13  ;;  %7407 = vmatprep.subr.bf16.mxu1 %v13049_v55 }
 0x4f5   :  { %7345 = vmatpush1.bf16.msra.mxu0 %v13050_v43  ;;  %7409 = vmatpush1.bf16.msra.mxu1 %v13051_v6 }
 0x4f6   :  { %7347 = vmatprep.subr.bf16.mxu0 %v13052_v45  ;;  %7411 = vmatprep.subr.bf16.mxu1 %v13053_v48  ;;  %v13059_v48 = vld [vmem:[#allocation161_spill] sm:$0xff] }
 0x4f9   :  { %7349 = vmatpush1.bf16.msra.mxu0 %v13054_v12  ;;  %7413 = vmatpush1.bf16.msra.mxu1 %v13055_v56 }
 0x4fa   :  { %7415 = vmatprep.subr.bf16.mxu0 %v13056_v59  ;;  %7479 = vmatprep.subr.bf16.mxu1 %v13057_v37 }
 0x54f   :  { %v2083_v52 = vpop.f32.mrb[6].mxu0  ;;  %v2154_v13 = vpop.f32.mrb[14].mxu1 }
 0x550   :  { %v9118_v55 = vadd.f32 %v2083_v52, %v13058_v41  ;;  %v2085_v53 = vpop.f32.mrb[7].mxu0  ;;  %v2156_v43 = vpop.f32.mrb[15].mxu1  ;;  %v9142_v12 = vadd.f32 %v2154_v13, %v13059_v48 }
 0x551   :  { %v9119_v6 = vadd.f32 %v2085_v53, %v12964_v15 }
 0x552   :  { %v6154_v29 = vmul.f32 -1.442695, %v9118_v55 }
 0x553   :  { %v6155_v45 = vmul.f32 -1.442695, %v9119_v6 }
 0x554   :  { %9410 = vpow2.f32 %v6154_v29 }
 0x555   :  { %9412 = vpow2.f32 %v6155_v45 }
 0x556   :  { %9414 = vtanh.f32 %v9142_v12 }
 0x55e   :  { %v9411_v20 = vpop.eup %9410 }
 0x55f   :  { %v9413_v56 = vpop.eup %9412  ;;  %v2313_v26 = vadd.f32 1.0, %v9411_v20 }
 0x560   :  { %v2319_v59 = vadd.f32 1.0, %v9413_v56  ;;  %v9415_v37 = vpop.eup %9414 }
 0x561   :  { %9416 = vrcp.f32 %v2313_v26  ;;  %v9143_v26 = vadd.f32 %v2156_v43, %v12873_v5 }
 0x562   :  { %9418 = vrcp.f32 %v2319_v59 }
 0x563   :  { %v6156_v59 = vmul.f32 -1.442695, %v9143_v26 }
 0x56b   :  { %v9417_v22 = vpop.eup %9416 }
 0x56c   :  { %v9419_v52 = vpop.eup %9418  ;;  %v2330_v41 = vmul.f32 %v9417_v22, %v9415_v37 }
 0x56d   :  { %v2329_v57 = vmul.f32 %v9419_v52, %v10974_v54 }
 0x56f   :  { %v11130_v53 = vadd.f32 %v2330_v41, %v2329_v57 }
 0x58f   :  { %v2225_v55 = vpop.f32.mrb[16].mxu0  ;;  %v2296_v29 = vpop.f32.mrb[32].mxu1 }
 0x590   :  { %v9160_v45 = vadd.f32 %v2225_v55, %v12966_v14  ;;  %v2227_v13 = vpop.f32.mrb[17].mxu0  ;;  %v2298_v6 = vpop.f32.mrb[33].mxu1  ;;  %v9176_v57 = vadd.f32 %v2296_v29, %v10664_v34 }
 0x591   :  { %v9161_v20 = vadd.f32 %v2227_v13, %v12872_v51  ;;  %v9177_v22 = vadd.f32 %v2298_v6, %v10666_v24 }
 0x592   :  { %v6157_v12 = vmul.f32 -1.442695, %v9160_v45 }
 0x593   :  { %v6158_v56 = vmul.f32 -1.442695, %v9161_v20  ;;  %v6159_v54 = vmul.f32 -1.442695, %v9177_v22 }
 0x594   :  { %9420 = vpow2.f32 %v6157_v12 }
 0x595   :  { %9422 = vpow2.f32 %v6158_v56 }
 0x596   :  { %9424 = vpow2.f32 %v6156_v59 }
 0x597   :  { %9426 = vpow2.f32 %v6159_v54 }
 0x598   :  { %9428 = vtanh.f32 %v9176_v57 }
 0x59e   :  { %v9421_v37 = vpop.eup %9420 }
 0x59f   :  { %v9423_v41 = vpop.eup %9422  ;;  %v2346_v52 = vadd.f32 1.0, %v9421_v37 }
 0x5a0   :  { %v2352_v55 = vadd.f32 1.0, %v9423_v41  ;;  %v9425_v45 = vpop.eup %9424 }
 0x5a1   :  { %9430 = vrcp.f32 %v2346_v52  ;;  %v9427_v13 = vpop.eup %9426  ;;  %v2326_v22 = vadd.f32 1.0, %v9425_v45  ;;  %v13064_v45 = vld [vmem:[#allocation110_spill] sm:$0xff] }
 0x5a2   :  { %9432 = vrcp.f32 %v2352_v55  ;;  %v9429_v20 = vpop.eup %9428  ;;  %v2359_v6 = vadd.f32 1.0, %v9427_v13  ;;  %v13063_v55 = vld [vmem:[#allocation136_spill] sm:$0xff]  ;;  %v13065_v13 = vld [vmem:[#allocation137_spill] sm:$0xff] }
 0x5a3   :  { %9434 = vtanh.f32 %v11130_v53 }
 0x5a4   :  { %9436 = vrcp.f32 %v2359_v6  ;;  %v13070_v6 = vld [vmem:[#allocation116_spill] sm:$0xff] }
 0x5ab   :  { %v9431_v12 = vpop.eup %9430 }
 0x5ac   :  { %v9433_v43 = vpop.eup %9432  ;;  %v2363_v56 = vmul.f32 %v9431_v12, %v9429_v20  ;;  %v13066_v20 = vld [vmem:[#allocation112_spill] sm:$0xff]  ;;  %v13067_v12 = vld [vmem:[#allocation138_spill] sm:$0xff] }
 0x5ad   :  { %v2362_v26 = vmul.f32 %v9433_v43, %v10983_v0  ;;  %v9435_v59 = vpop.eup %9434  ;;  %v13062_v0 = vld [vmem:[#allocation108_spill] sm:$0xff]  ;;  %v13068_v43 = vld [vmem:[#allocation114_spill] sm:$0xff] }
 0x5ae   :  { %v9437_v54 = vpop.eup %9436 }
 0x5af   :  { %v11139_v29 = vadd.f32 %v2363_v56, %v2362_v26  ;;  %v13069_v56 = vld [vmem:[#allocation139_spill] sm:$0xff]  ;;  %v13071_v26 = vld [vmem:[#allocation140_spill] sm:$0xff] }
 0x5b1   :  { %9438 = vtanh.f32 %v11139_v29 }
 0x5b2   :  { %9440 = vrcp.f32 %v2326_v22  ;;  %v13072_v22 = vld [vmem:[#allocation118_spill] sm:$0xff] }
 0x5bb   :  { %v9439_v57 = vpop.eup %9438 }
 0x5bc   :  { %v9441_v37 = vpop.eup %9440  ;;  %v11142_v41 = vmul.f32 %v9439_v57, %v9437_v54  ;;  %v13074_v54 = vld [vmem:[#allocation120_spill] sm:$0xff]  ;;  %v13075_v57 = vld [vmem:[#allocation142_spill] sm:$0xff] }
 0x5bd   :  { %v11144_v52 = vmul.f32 %v9441_v37, %v9435_v59  ;;  %v13073_v59 = vld [vmem:[#allocation141_spill] sm:$0xff]  ;;  %v13076_v37 = vld [vmem:[#allocation122_spill] sm:$0xff] }
 0x5be   :  { %13060 = vst [vmem:[#allocation81_spill] sm:$0xff] %v11142_v41  ;;  %2435 = vmatprep.mubr.f32.mxu0 %v11142_v41  ;;  %2506 = vmatprep.mubr.f32.mxu1 %v11142_v41 }
 0x5bf   :  { %13061 = vst [vmem:[#allocation83_spill] sm:$0xff] %v11144_v52  ;;  %2436 = vmatmul.mubr.f32.vlgmr.msra.gmra.mrb[24].mxu0 %v11144_v52  ;;  %2507 = vmatmul.mubr.f32.vlgmr.msra.gmra.mrb[16].mxu1 %v11144_v52 }
 0x5c0   :  { %7417 = vmatpush1.bf16.msra.mxu0 %v12785_v46  ;;  %7481 = vmatpush1.bf16.msra.mxu1 %v12786_v35 }
 0x5c1   :  { %2577 = vmatprep.mubr.f32.mxu0 %v11142_v41  ;;  %2648 = vmatprep.mubr.f32.mxu1 %v11142_v41  ;;  %v13077_v41 = vld [vmem:[#allocation143_spill] sm:$0xff] }
 0x5c2   :  { %7419 = vmatprep.subr.bf16.mxu0 %v12787_v7  ;;  %7483 = vmatprep.subr.bf16.mxu1 %v12876_v42 }
 0x5c4   :  { %7421 = vmatpush1.bf16.msra.mxu0 %v12877_v11  ;;  %7485 = vmatpush1.bf16.msra.mxu1 %v12878_v36 }
 0x5c5   :  { %7423 = vmatprep.subr.bf16.mxu0 %v12879_v33  ;;  %7487 = vmatprep.subr.bf16.mxu1 %v12880_v44 }
 0x5c8   :  { %7425 = vmatpush1.bf16.msra.mxu0 %v12793_v40  ;;  %7489 = vmatpush1.bf16.msra.mxu1 %v12881_v31 }
 0x5c9   :  { %7427 = vmatprep.subr.bf16.mxu0 %v12795_v32  ;;  %7491 = vmatprep.subr.bf16.mxu1 %v12882_v61 }
 0x5cc   :  { %7429 = vmatpush1.bf16.msra.mxu0 %v12797_v38  ;;  %7493 = vmatpush1.bf16.msra.mxu1 %v12883_v2 }
 0x5cd   :  { %7431 = vmatprep.subr.bf16.mxu0 %v12799_v47  ;;  %7495 = vmatprep.subr.bf16.mxu1 %v12884_v19 }
 0x5d0   :  { %7433 = vmatpush1.bf16.msra.mxu0 %v12801_v25  ;;  %7497 = vmatpush1.bf16.msra.mxu1 %v12885_v23 }
 0x5d1   :  { %7435 = vmatprep.subr.bf16.mxu0 %v12803_v4  ;;  %7499 = vmatprep.subr.bf16.mxu1 %v12886_v9 }
 0x5d4   :  { %7437 = vmatpush1.bf16.msra.mxu0 %v12969_v18  ;;  %7501 = vmatpush1.bf16.msra.mxu1 %v12887_v8 }
 0x5d5   :  { %7439 = vmatprep.subr.bf16.mxu0 %v12970_v62  ;;  %7503 = vmatprep.subr.bf16.mxu1 %v12888_v39 }
 0x5d8   :  { %7441 = vmatpush1.bf16.msra.mxu0 %v12971_v49  ;;  %7505 = vmatpush1.bf16.msra.mxu1 %v12889_v60 }
 0x5d9   :  { %7443 = vmatprep.subr.bf16.mxu0 %v12972_v10  ;;  %7507 = vmatprep.subr.bf16.mxu1 %v12890_v63 }
 0x5dc   :  { %7445 = vmatpush1.bf16.msra.mxu0 %v12973_v58  ;;  %7509 = vmatpush1.bf16.msra.mxu1 %v12891_v17 }
 0x5dd   :  { %7447 = vmatprep.subr.bf16.mxu0 %v12974_v50  ;;  %7511 = vmatprep.subr.bf16.mxu1 %v12892_v3 }
 0x5e0   :  { %7449 = vmatpush1.bf16.msra.mxu0 %v12810_v21  ;;  %7513 = vmatpush1.bf16.msra.mxu1 %v12893_v16 }
 0x5e1   :  { %7451 = vmatprep.subr.bf16.mxu0 %v12811_v27  ;;  %7515 = vmatprep.subr.bf16.mxu1 %v12894_v1 }
 0x5e4   :  { %7453 = vmatpush1.bf16.msra.mxu0 %v12812_v30  ;;  %7517 = vmatpush1.bf16.msra.mxu1 %v12895_v28 }
 0x5e5   :  { %7455 = vmatprep.subr.bf16.mxu0 %v13062_v0  ;;  %7519 = vmatprep.subr.bf16.mxu1 %v13063_v55 }
 0x5e8   :  { %7457 = vmatpush1.bf16.msra.mxu0 %v13064_v45  ;;  %7521 = vmatpush1.bf16.msra.mxu1 %v13065_v13 }
 0x5e9   :  { %7459 = vmatprep.subr.bf16.mxu0 %v13066_v20  ;;  %7523 = vmatprep.subr.bf16.mxu1 %v13067_v12  ;;  %v13078_v12 = vld [vmem:[#allocation124_spill] sm:$0xff] }
 0x5ec   :  { %7461 = vmatpush1.bf16.msra.mxu0 %v13068_v43  ;;  %7525 = vmatpush1.bf16.msra.mxu1 %v13069_v56  ;;  %v13079_v43 = vld [vmem:[#allocation144_spill] sm:$0xff]  ;;  %v13080_v56 = vld [vmem:[#allocation126_spill] sm:$0xff] }
 0x5ed   :  { %7463 = vmatprep.subr.bf16.mxu0 %v13070_v6  ;;  %7527 = vmatprep.subr.bf16.mxu1 %v13071_v26  ;;  %v13081_v6 = vld [vmem:[#allocation145_spill] sm:$0xff]  ;;  %v13082_v26 = vld [vmem:[#allocation128_spill] sm:$0xff] }
 0x5f0   :  { %7465 = vmatpush1.bf16.msra.mxu0 %v13072_v22  ;;  %7529 = vmatpush1.bf16.msra.mxu1 %v13073_v59  ;;  %v13083_v22 = vld [vmem:[#allocation146_spill] sm:$0xff] }
 0x5f1   :  { %7467 = vmatprep.subr.bf16.mxu0 %v13074_v54  ;;  %7531 = vmatprep.subr.bf16.mxu1 %v13075_v57  ;;  %v13084_v59 = vld [vmem:[#allocation130_spill] sm:$0xff]  ;;  %v13085_v54 = vld [vmem:[#allocation147_spill] sm:$0xff]  ;;  %v13086_v57 = vld [vmem:[#allocation20_spill] sm:$0xff] }
 0x5f4   :  { %7469 = vmatpush1.bf16.msra.mxu0 %v13076_v37  ;;  %7533 = vmatpush1.bf16.msra.mxu1 %v13077_v41  ;;  %v13087_v37 = vld [vmem:[#allocation23_spill] sm:$0xff] }
 0x5f5   :  { %7471 = vmatprep.subr.bf16.mxu0 %v13078_v12  ;;  %7535 = vmatprep.subr.bf16.mxu1 %v13079_v43  ;;  %v13088_v43 = vld [vmem:[#allocation21_spill] sm:$0xff]  ;;  %v13097_v12 = vld [vmem:[#allocation47_spill] sm:$0xff] }
 0x5f8   :  { %7473 = vmatpush1.bf16.msra.mxu0 %v13080_v56  ;;  %7537 = vmatpush1.bf16.msra.mxu1 %v13081_v6  ;;  %v13089_v56 = vld [vmem:[#allocation39_spill] sm:$0xff]  ;;  %v13090_v6 = vld [vmem:[#allocation22_spill] sm:$0xff] }
 0x5f9   :  { %7475 = vmatprep.subr.bf16.mxu0 %v13082_v26  ;;  %7539 = vmatprep.subr.bf16.mxu1 %v13083_v22  ;;  %v13091_v26 = vld [vmem:[#allocation41_spill] sm:$0xff]  ;;  %v13092_v22 = vld [vmem:[#allocation24_spill] sm:$0xff] }
 0x5fc   :  { %7477 = vmatpush1.bf16.msra.mxu0 %v13084_v59  ;;  %7541 = vmatpush1.bf16.msra.mxu1 %v13085_v54  ;;  %v13093_v59 = vld [vmem:[#allocation43_spill] sm:$0xff]  ;;  %v13094_v54 = vld [vmem:[#allocation25_spill] sm:$0xff] }
 0x5fd   :  { %7543 = vmatprep.subr.bf16.mxu0 %v13086_v57  ;;  %7607 = vmatprep.subr.bf16.mxu1 %v13087_v37  ;;  %v13095_v57 = vld [vmem:[#allocation45_spill] sm:$0xff]  ;;  %v13096_v37 = vld [vmem:[#allocation26_spill] sm:$0xff] }
 0x5ff   :  { %2578 = vmatmul.mubr.f32.vlgmr.msra.gmra.mrb[14].mxu0 %v11144_v52  ;;  %2649 = vmatmul.mubr.f32.vlgmr.msra.gmra.mrb[30].mxu1 %v11144_v52  ;;  %v13098_v52 = vld [vmem:[#allocation27_spill] sm:$0xff] }
 0x600   :  { %7545 = vmatpush1.bf16.msra.mxu0 %v13088_v43  ;;  %7609 = vmatpush1.bf16.msra.mxu1 %v13089_v56  ;;  %v13099_v43 = vld [vmem:[#allocation49_spill] sm:$0xff]  ;;  %v13100_v56 = vld [vmem:[#allocation28_spill] sm:$0xff] }
 0x601   :  { %7547 = vmatprep.subr.bf16.mxu0 %v13090_v6  ;;  %7611 = vmatprep.subr.bf16.mxu1 %v13091_v26  ;;  %v13101_v6 = vld [vmem:[#allocation51_spill] sm:$0xff]  ;;  %v13102_v26 = vld [vmem:[#allocation29_spill] sm:$0xff] }
 0x604   :  { %7549 = vmatpush1.bf16.msra.mxu0 %v13092_v22  ;;  %7613 = vmatpush1.bf16.msra.mxu1 %v13093_v59  ;;  %v13103_v22 = vld [vmem:[#allocation53_spill] sm:$0xff]  ;;  %v13104_v59 = vld [vmem:[#allocation30_spill] sm:$0xff] }
 0x605   :  { %7551 = vmatprep.subr.bf16.mxu0 %v13094_v54  ;;  %7615 = vmatprep.subr.bf16.mxu1 %v13095_v57  ;;  %v13105_v54 = vld [vmem:[#allocation55_spill] sm:$0xff] }
 0x606   :  { %v13106_v57 = vld [vmem:[#allocation31_spill] sm:$0xff] }
 0x608   :  { %7553 = vmatpush1.bf16.msra.mxu0 %v13096_v37  ;;  %7617 = vmatpush1.bf16.msra.mxu1 %v13097_v12  ;;  %v13107_v37 = vld [vmem:[#allocation57_spill] sm:$0xff]  ;;  %v13108_v12 = vld [vmem:[#allocation32_spill] sm:$0xff] }
 0x609   :  { %7555 = vmatprep.subr.bf16.mxu0 %v13098_v52  ;;  %7619 = vmatprep.subr.bf16.mxu1 %v13099_v43  ;;  %v13109_v52 = vld [vmem:[#allocation59_spill] sm:$0xff]  ;;  %v13110_v43 = vld [vmem:[#allocation33_spill] sm:$0xff] }
 0x60c   :  { %7557 = vmatpush1.bf16.msra.mxu0 %v13100_v56  ;;  %7621 = vmatpush1.bf16.msra.mxu1 %v13101_v6  ;;  %v13111_v56 = vld [vmem:[#allocation61_spill] sm:$0xff]  ;;  %v13112_v6 = vld [vmem:[#allocation34_spill] sm:$0xff] }
 0x60d   :  { %7559 = vmatprep.subr.bf16.mxu0 %v13102_v26  ;;  %7623 = vmatprep.subr.bf16.mxu1 %v13103_v22  ;;  %v13113_v26 = vld [vmem:[#allocation63_spill] sm:$0xff] }
 0x60e   :  { %v13114_v22 = vld [vmem:[#allocation35_spill] sm:$0xff] }
 0x610   :  { %7561 = vmatpush1.bf16.msra.mxu0 %v13104_v59  ;;  %7625 = vmatpush1.bf16.msra.mxu1 %v13105_v54  ;;  %v13115_v59 = vld [vmem:[#allocation65_spill] sm:$0xff]  ;;  %v13116_v54 = vld [vmem:[#allocation36_spill] sm:$0xff] }
 0x611   :  { %7563 = vmatprep.subr.bf16.mxu0 %v13106_v57  ;;  %7627 = vmatprep.subr.bf16.mxu1 %v13107_v37  ;;  %v13117_v57 = vld [vmem:[#allocation67_spill] sm:$0xff]  ;;  %v13118_v37 = vld [vmem:[#allocation37_spill] sm:$0xff] }
 0x614   :  { %7565 = vmatpush1.bf16.msra.mxu0 %v13108_v12  ;;  %7629 = vmatpush1.bf16.msra.mxu1 %v13109_v52  ;;  %v13119_v12 = vld [vmem:[#allocation68_spill] sm:$0xff]  ;;  %v13120_v52 = vld [vmem:[#allocation38_spill] sm:$0xff] }
 0x615   :  { %7567 = vmatprep.subr.bf16.mxu0 %v13110_v43  ;;  %7631 = vmatprep.subr.bf16.mxu1 %v13111_v56  ;;  %v13121_v43 = vld [vmem:[#allocation70_spill] sm:$0xff]  ;;  %v13122_v56 = vld [vmem:[#allocation40_spill] sm:$0xff] }
 0x618   :  { %7569 = vmatpush1.bf16.msra.mxu0 %v13112_v6  ;;  %7633 = vmatpush1.bf16.msra.mxu1 %v13113_v26  ;;  %v13123_v6 = vld [vmem:[#allocation72_spill] sm:$0xff]  ;;  %v13124_v26 = vld [vmem:[#allocation42_spill] sm:$0xff] }
 0x619   :  { %7571 = vmatprep.subr.bf16.mxu0 %v13114_v22  ;;  %7635 = vmatprep.subr.bf16.mxu1 %v13115_v59  ;;  %v13125_v22 = vld [vmem:[#allocation74_spill] sm:$0xff]  ;;  %v13126_v59 = vld [vmem:[#allocation44_spill] sm:$0xff] }
 0x61c   :  { %7573 = vmatpush1.bf16.msra.mxu0 %v13116_v54  ;;  %7637 = vmatpush1.bf16.msra.mxu1 %v13117_v57  ;;  %v13127_v54 = vld [vmem:[#allocation76_spill] sm:$0xff]  ;;  %v13128_v57 = vld [vmem:[#allocation46_spill] sm:$0xff] }
 0x61d   :  { %7575 = vmatprep.subr.bf16.mxu0 %v13118_v37  ;;  %7639 = vmatprep.subr.bf16.mxu1 %v13119_v12  ;;  %v13129_v37 = vld [vmem:[#allocation78_spill] sm:$0xff]  ;;  %v13130_v12 = vld [vmem:[#allocation48_spill] sm:$0xff] }
 0x620   :  { %7577 = vmatpush1.bf16.msra.mxu0 %v13120_v52  ;;  %7641 = vmatpush1.bf16.msra.mxu1 %v13121_v43  ;;  %v13131_v52 = vld [vmem:[#allocation80_spill] sm:$0xff]  ;;  %v13132_v43 = vld [vmem:[#allocation50_spill] sm:$0xff] }
 0x621   :  { %7579 = vmatprep.subr.bf16.mxu0 %v13122_v56  ;;  %7643 = vmatprep.subr.bf16.mxu1 %v13123_v6  ;;  %v13133_v56 = vld [vmem:[#allocation82_spill] sm:$0xff]  ;;  %v13134_v6 = vld [vmem:[#allocation52_spill] sm:$0xff] }
 0x624   :  { %7581 = vmatpush1.bf16.msra.mxu0 %v13124_v26  ;;  %7645 = vmatpush1.bf16.msra.mxu1 %v13125_v22  ;;  %v13135_v26 = vld [vmem:[#allocation84_spill] sm:$0xff]  ;;  %v13136_v22 = vld [vmem:[#allocation54_spill] sm:$0xff] }
 0x625   :  { %7583 = vmatprep.subr.bf16.mxu0 %v13126_v59  ;;  %7647 = vmatprep.subr.bf16.mxu1 %v13127_v54  ;;  %v13137_v59 = vld [vmem:[#allocation86_spill] sm:$0xff]  ;;  %v13138_v54 = vld [vmem:[#allocation56_spill] sm:$0xff] }
 0x628   :  { %7585 = vmatpush1.bf16.msra.mxu0 %v13128_v57  ;;  %7649 = vmatpush1.bf16.msra.mxu1 %v13129_v37  ;;  %v13139_v57 = vld [vmem:[#allocation88_spill] sm:$0xff]  ;;  %v13140_v37 = vld [vmem:[#allocation58_spill] sm:$0xff] }
 0x629   :  { %7587 = vmatprep.subr.bf16.mxu0 %v13130_v12  ;;  %7651 = vmatprep.subr.bf16.mxu1 %v13131_v52  ;;  %v13141_v12 = vld [vmem:[#allocation90_spill] sm:$0xff]  ;;  %v13142_v52 = vld [vmem:[#allocation60_spill] sm:$0xff] }
 0x62c   :  { %7589 = vmatpush1.bf16.msra.mxu0 %v13132_v43  ;;  %7653 = vmatpush1.bf16.msra.mxu1 %v13133_v56  ;;  %v13143_v43 = vld [vmem:[#allocation92_spill] sm:$0xff]  ;;  %v13144_v56 = vld [vmem:[#allocation62_spill] sm:$0xff] }
 0x62d   :  { %7591 = vmatprep.subr.bf16.mxu0 %v13134_v6  ;;  %7655 = vmatprep.subr.bf16.mxu1 %v13135_v26  ;;  %v13145_v6 = vld [vmem:[#allocation94_spill] sm:$0xff]  ;;  %v13146_v26 = vld [vmem:[#allocation64_spill] sm:$0xff] }
 0x630   :  { %7593 = vmatpush1.bf16.msra.mxu0 %v13136_v22  ;;  %7657 = vmatpush1.bf16.msra.mxu1 %v13137_v59  ;;  %v13147_v22 = vld [vmem:[#allocation96_spill] sm:$0xff]  ;;  %v13148_v59 = vld [vmem:[#allocation66_spill] sm:$0xff] }
 0x631   :  { %7595 = vmatprep.subr.bf16.mxu0 %v13138_v54  ;;  %7659 = vmatprep.subr.bf16.mxu1 %v13139_v57  ;;  %v13149_v54 = vld [vmem:[#allocation98_spill] sm:$0xff]  ;;  %v13150_v57 = vld [vmem:[#allocation69_spill] sm:$0xff] }
 0x634   :  { %7597 = vmatpush1.bf16.msra.mxu0 %v13140_v37  ;;  %7661 = vmatpush1.bf16.msra.mxu1 %v13141_v12  ;;  %v13151_v37 = vld [vmem:[#allocation101_spill] sm:$0xff]  ;;  %v13152_v12 = vld [vmem:[#allocation159_spill] sm:$0xff] }
 0x635   :  { %7599 = vmatprep.subr.bf16.mxu0 %v13142_v52  ;;  %7663 = vmatprep.subr.bf16.mxu1 %v13143_v43  ;;  %v13153_v52 = vld [vmem:[#allocation148_spill] sm:$0xff]  ;;  %v13154_v43 = vld [vmem:[#allocation149_spill] sm:$0xff] }
 0x636   :  { %v276_v41 = vadd.f32 %v13153_v52, %v13152_v12 }
 0x638   :  { %7601 = vmatpush1.bf16.msra.mxu0 %v13144_v56  ;;  %7665 = vmatpush1.bf16.msra.mxu1 %v13145_v6  ;;  %v278_v56 = vadd.f32 %v13154_v43, %v12964_v15 }
 0x639   :  { %7603 = vmatprep.subr.bf16.mxu0 %v13146_v26  ;;  %7667 = vmatprep.subr.bf16.mxu1 %v13147_v22 }
 0x63c   :  { %7605 = vmatpush1.bf16.msra.mxu0 %v13148_v59  ;;  %7669 = vmatpush1.bf16.msra.mxu1 %v13149_v54 }
 0x63d   :  { %7671 = vmatprep.subr.bf16.mxu0 %v13150_v57  ;;  %7735 = vmatprep.subr.bf16.mxu1 %v13151_v37 }
 0x692   :  { %v2437_v20 = vpop.f32.mrb[24].mxu0  ;;  %v2508_v6 = vpop.f32.mrb[16].mxu1 }
 0x693   :  { %v2660_v13 = vadd.f32 %v2437_v20, %v276_v41  ;;  %v2439_v26 = vpop.f32.mrb[25].mxu0  ;;  %v2510_v45 = vpop.f32.mrb[17].mxu1  ;;  %v9144_v57 = vadd.f32 %v2508_v6, %v13059_v48 }
 0x694   :  { %v2661_v22 = vadd.f32 %v2439_v26, %v278_v56 }
 0x695   :  { %v6160_v55 = vmul.f32 -1.442695, %v2660_v13 }
 0x696   :  { %v6161_v59 = vmul.f32 -1.442695, %v2661_v22 }
 0x697   :  { %9442 = vpow2.f32 %v6160_v55 }
 0x698   :  { %9444 = vpow2.f32 %v6161_v59 }
 0x699   :  { %9446 = vtanh.f32 %v9144_v57 }
 0x6a1   :  { %v9443_v54 = vpop.eup %9442 }
 0x6a2   :  { %v9445_v37 = vpop.eup %9444  ;;  %v2667_v0 = vadd.f32 1.0, %v9443_v54 }
 0x6a3   :  { %v2673_v52 = vadd.f32 1.0, %v9445_v37  ;;  %v9447_v43 = vpop.eup %9446 }
 0x6a4   :  { %9448 = vrcp.f32 %v2667_v0  ;;  %v9145_v0 = vadd.f32 %v2510_v45, %v12873_v5 }
 0x6a5   :  { %9450 = vrcp.f32 %v2673_v52 }
 0x6a6   :  { %v6162_v37 = vmul.f32 -1.442695, %v9145_v0 }
 0x6ae   :  { %v9449_v15 = vpop.eup %9448 }
 0x6af   :  { %v9451_v12 = vpop.eup %9450  ;;  %v2684_v41 = vmul.f32 %v9449_v15, %v9447_v43 }
 0x6b0   :  { %v2683_v20 = vmul.f32 %v9451_v12, %v11130_v53 }
 0x6b2   :  { %v11288_v56 = vadd.f32 %v2684_v41, %v2683_v20 }
 0x6d2   :  { %v2579_v13 = vpop.f32.mrb[14].mxu0  ;;  %v2650_v55 = vpop.f32.mrb[30].mxu1 }
 0x6d3   :  { %v9158_v26 = vadd.f32 %v2579_v13, %v12966_v14  ;;  %v2581_v6 = vpop.f32.mrb[15].mxu0  ;;  %v2652_v22 = vpop.f32.mrb[31].mxu1  ;;  %v9174_v12 = vadd.f32 %v2650_v55, %v10664_v34 }
 0x6d4   :  { %v9159_v59 = vadd.f32 %v2581_v6, %v12872_v51  ;;  %v9175_v15 = vadd.f32 %v2652_v22, %v10666_v24 }
 0x6d5   :  { %v6163_v54 = vmul.f32 -1.442695, %v9158_v26 }
 0x6d6   :  { %v6164_v57 = vmul.f32 -1.442695, %v9159_v59  ;;  %v6165_v53 = vmul.f32 -1.442695, %v9175_v15 }
 0x6d7   :  { %9452 = vpow2.f32 %v6163_v54 }
 0x6d8   :  { %9454 = vpow2.f32 %v6164_v57 }
 0x6d9   :  { %9456 = vpow2.f32 %v6162_v37 }
 0x6da   :  { %9458 = vpow2.f32 %v6165_v53 }
 0x6db   :  { %9460 = vtanh.f32 %v9174_v12 }
 0x6e1   :  { %v9453_v52 = vpop.eup %9452 }
 0x6e2   :  { %v9455_v43 = vpop.eup %9454  ;;  %v2700_v41 = vadd.f32 1.0, %v9453_v52 }
 0x6e3   :  { %v2706_v20 = vadd.f32 1.0, %v9455_v43  ;;  %v9457_v13 = vpop.eup %9456 }
 0x6e4   :  { %9462 = vrcp.f32 %v2700_v41  ;;  %v9459_v26 = vpop.eup %9458  ;;  %v2680_v0 = vadd.f32 1.0, %v9457_v13  ;;  %v13158_v41 = vld [vmem:[#allocation136_spill] sm:$0xff]  ;;  %v13160_v13 = vld [vmem:[#allocation137_spill] sm:$0xff] }
 0x6e5   :  { %9464 = vrcp.f32 %v2706_v20  ;;  %v9461_v6 = vpop.eup %9460  ;;  %v2713_v22 = vadd.f32 1.0, %v9459_v26  ;;  %v13159_v20 = vld [vmem:[#allocation110_spill] sm:$0xff]  ;;  %v13161_v26 = vld [vmem:[#allocation112_spill] sm:$0xff] }
 0x6e6   :  { %9466 = vtanh.f32 %v11288_v56 }
 0x6e7   :  { %9468 = vrcp.f32 %v2713_v22  ;;  %v13166_v22 = vld [vmem:[#allocation140_spill] sm:$0xff] }
 0x6ee   :  { %v9463_v59 = vpop.eup %9462 }
 0x6ef   :  { %v9465_v45 = vpop.eup %9464  ;;  %v2717_v54 = vmul.f32 %v9463_v59, %v9461_v6  ;;  %v13162_v6 = vld [vmem:[#allocation138_spill] sm:$0xff] }
 0x6f0   :  { %v2716_v57 = vmul.f32 %v9465_v45, %v11139_v29  ;;  %v9467_v15 = vpop.eup %9466  ;;  %v13157_v29 = vld [vmem:[#allocation108_spill] sm:$0xff]  ;;  %v13163_v59 = vld [vmem:[#allocation114_spill] sm:$0xff]  ;;  %v13164_v45 = vld [vmem:[#allocation139_spill] sm:$0xff] }
 0x6f1   :  { %v9469_v37 = vpop.eup %9468 }
 0x6f2   :  { %v11297_v55 = vadd.f32 %v2717_v54, %v2716_v57  ;;  %v13165_v54 = vld [vmem:[#allocation116_spill] sm:$0xff]  ;;  %v13167_v57 = vld [vmem:[#allocation118_spill] sm:$0xff] }
 0x6f4   :  { %9470 = vtanh.f32 %v11297_v55 }
 0x6f5   :  { %9472 = vrcp.f32 %v2680_v0  ;;  %v13168_v0 = vld [vmem:[#allocation141_spill] sm:$0xff] }
 0x6fe   :  { %v9471_v53 = vpop.eup %9470 }
 0x6ff   :  { %v9473_v12 = vpop.eup %9472  ;;  %v11300_v52 = vmul.f32 %v9471_v53, %v9469_v37  ;;  %v13170_v37 = vld [vmem:[#allocation142_spill] sm:$0xff] }
 0x700   :  { %v11302_v43 = vmul.f32 %v9473_v12, %v9467_v15  ;;  %v13169_v15 = vld [vmem:[#allocation120_spill] sm:$0xff]  ;;  %v13171_v53 = vld [vmem:[#allocation122_spill] sm:$0xff]  ;;  %v13172_v12 = vld [vmem:[#allocation143_spill] sm:$0xff] }
 0x701   :  { %13155 = vst [vmem:[#allocation85_spill] sm:$0xff] %v11300_v52  ;;  %2789 = vmatprep.mubr.f32.mxu0 %v11300_v52  ;;  %2860 = vmatprep.mubr.f32.mxu1 %v11300_v52 }
 0x702   :  { %13156 = vst [vmem:[#allocation87_spill] sm:$0xff] %v11302_v43  ;;  %2790 = vmatmul.mubr.f32.vlgmr.msra.gmra.mrb[26].mxu0 %v11302_v43  ;;  %2861 = vmatmul.mubr.f32.vlgmr.msra.gmra.mrb[18].mxu1 %v11302_v43 }
 0x703   :  { %7673 = vmatpush1.bf16.msra.mxu0 %v12785_v46  ;;  %7737 = vmatpush1.bf16.msra.mxu1 %v12786_v35 }
 0x704   :  { %2931 = vmatprep.mubr.f32.mxu0 %v11300_v52  ;;  %3002 = vmatprep.mubr.f32.mxu1 %v11300_v52  ;;  %v13173_v52 = vld [vmem:[#allocation124_spill] sm:$0xff] }
 0x705   :  { %7675 = vmatprep.subr.bf16.mxu0 %v12787_v7  ;;  %7739 = vmatprep.subr.bf16.mxu1 %v12876_v42 }
 0x707   :  { %7677 = vmatpush1.bf16.msra.mxu0 %v12877_v11  ;;  %7741 = vmatpush1.bf16.msra.mxu1 %v12878_v36 }
 0x708   :  { %7679 = vmatprep.subr.bf16.mxu0 %v12879_v33  ;;  %7743 = vmatprep.subr.bf16.mxu1 %v12880_v44 }
 0x70b   :  { %7681 = vmatpush1.bf16.msra.mxu0 %v12793_v40  ;;  %7745 = vmatpush1.bf16.msra.mxu1 %v12881_v31 }
 0x70c   :  { %7683 = vmatprep.subr.bf16.mxu0 %v12795_v32  ;;  %7747 = vmatprep.subr.bf16.mxu1 %v12882_v61 }
 0x70f   :  { %7685 = vmatpush1.bf16.msra.mxu0 %v12797_v38  ;;  %7749 = vmatpush1.bf16.msra.mxu1 %v12883_v2 }
 0x710   :  { %7687 = vmatprep.subr.bf16.mxu0 %v12799_v47  ;;  %7751 = vmatprep.subr.bf16.mxu1 %v12884_v19 }
 0x713   :  { %7689 = vmatpush1.bf16.msra.mxu0 %v12801_v25  ;;  %7753 = vmatpush1.bf16.msra.mxu1 %v12885_v23 }
 0x714   :  { %7691 = vmatprep.subr.bf16.mxu0 %v12803_v4  ;;  %7755 = vmatprep.subr.bf16.mxu1 %v12886_v9 }
 0x717   :  { %7693 = vmatpush1.bf16.msra.mxu0 %v12969_v18  ;;  %7757 = vmatpush1.bf16.msra.mxu1 %v12887_v8 }
 0x718   :  { %7695 = vmatprep.subr.bf16.mxu0 %v12970_v62  ;;  %7759 = vmatprep.subr.bf16.mxu1 %v12888_v39 }
 0x71b   :  { %7697 = vmatpush1.bf16.msra.mxu0 %v12971_v49  ;;  %7761 = vmatpush1.bf16.msra.mxu1 %v12889_v60 }
 0x71c   :  { %7699 = vmatprep.subr.bf16.mxu0 %v12972_v10  ;;  %7763 = vmatprep.subr.bf16.mxu1 %v12890_v63 }
 0x71f   :  { %7701 = vmatpush1.bf16.msra.mxu0 %v12973_v58  ;;  %7765 = vmatpush1.bf16.msra.mxu1 %v12891_v17 }
 0x720   :  { %7703 = vmatprep.subr.bf16.mxu0 %v12974_v50  ;;  %7767 = vmatprep.subr.bf16.mxu1 %v12892_v3 }
 0x723   :  { %7705 = vmatpush1.bf16.msra.mxu0 %v12810_v21  ;;  %7769 = vmatpush1.bf16.msra.mxu1 %v12893_v16 }
 0x724   :  { %7707 = vmatprep.subr.bf16.mxu0 %v12811_v27  ;;  %7771 = vmatprep.subr.bf16.mxu1 %v12894_v1 }
 0x727   :  { %7709 = vmatpush1.bf16.msra.mxu0 %v12812_v30  ;;  %7773 = vmatpush1.bf16.msra.mxu1 %v12895_v28 }
 0x728   :  { %7711 = vmatprep.subr.bf16.mxu0 %v13157_v29  ;;  %7775 = vmatprep.subr.bf16.mxu1 %v13158_v41 }
 0x72b   :  { %7713 = vmatpush1.bf16.msra.mxu0 %v13159_v20  ;;  %7777 = vmatpush1.bf16.msra.mxu1 %v13160_v13 }
 0x72c   :  { %7715 = vmatprep.subr.bf16.mxu0 %v13161_v26  ;;  %7779 = vmatprep.subr.bf16.mxu1 %v13162_v6  ;;  %v13250_v6 = vld [vmem:[#allocation151_spill] sm:$0xff] }
 0x72f   :  { %7717 = vmatpush1.bf16.msra.mxu0 %v13163_v59  ;;  %7781 = vmatpush1.bf16.msra.mxu1 %v13164_v45  ;;  %v13174_v59 = vld [vmem:[#allocation144_spill] sm:$0xff]  ;;  %v13175_v45 = vld [vmem:[#allocation126_spill] sm:$0xff] }
 0x730   :  { %7719 = vmatprep.subr.bf16.mxu0 %v13165_v54  ;;  %7783 = vmatprep.subr.bf16.mxu1 %v13166_v22  ;;  %v13176_v54 = vld [vmem:[#allocation145_spill] sm:$0xff]  ;;  %v13177_v22 = vld [vmem:[#allocation128_spill] sm:$0xff] }
 0x733   :  { %7721 = vmatpush1.bf16.msra.mxu0 %v13167_v57  ;;  %7785 = vmatpush1.bf16.msra.mxu1 %v13168_v0  ;;  %v13178_v57 = vld [vmem:[#allocation146_spill] sm:$0xff] }
 0x734   :  { %7723 = vmatprep.subr.bf16.mxu0 %v13169_v15  ;;  %7787 = vmatprep.subr.bf16.mxu1 %v13170_v37  ;;  %v13179_v0 = vld [vmem:[#allocation130_spill] sm:$0xff]  ;;  %v13180_v15 = vld [vmem:[#allocation147_spill] sm:$0xff]  ;;  %v13181_v37 = vld [vmem:[#allocation20_spill] sm:$0xff] }
 0x737   :  { %7725 = vmatpush1.bf16.msra.mxu0 %v13171_v53  ;;  %7789 = vmatpush1.bf16.msra.mxu1 %v13172_v12  ;;  %v13182_v53 = vld [vmem:[#allocation23_spill] sm:$0xff] }
 0x738   :  { %7727 = vmatprep.subr.bf16.mxu0 %v13173_v52  ;;  %7791 = vmatprep.subr.bf16.mxu1 %v13174_v59  ;;  %v13183_v59 = vld [vmem:[#allocation21_spill] sm:$0xff]  ;;  %v13192_v52 = vld [vmem:[#allocation47_spill] sm:$0xff] }
 0x73b   :  { %7729 = vmatpush1.bf16.msra.mxu0 %v13175_v45  ;;  %7793 = vmatpush1.bf16.msra.mxu1 %v13176_v54  ;;  %v13184_v45 = vld [vmem:[#allocation39_spill] sm:$0xff]  ;;  %v13185_v54 = vld [vmem:[#allocation22_spill] sm:$0xff] }
 0x73c   :  { %7731 = vmatprep.subr.bf16.mxu0 %v13177_v22  ;;  %7795 = vmatprep.subr.bf16.mxu1 %v13178_v57  ;;  %v13186_v22 = vld [vmem:[#allocation41_spill] sm:$0xff]  ;;  %v13187_v57 = vld [vmem:[#allocation24_spill] sm:$0xff] }
 0x73f   :  { %7733 = vmatpush1.bf16.msra.mxu0 %v13179_v0  ;;  %7797 = vmatpush1.bf16.msra.mxu1 %v13180_v15  ;;  %v13188_v0 = vld [vmem:[#allocation43_spill] sm:$0xff]  ;;  %v13189_v15 = vld [vmem:[#allocation25_spill] sm:$0xff] }
 0x740   :  { %7799 = vmatprep.subr.bf16.mxu0 %v13181_v37  ;;  %7863 = vmatprep.subr.bf16.mxu1 %v13182_v53  ;;  %v13190_v37 = vld [vmem:[#allocation45_spill] sm:$0xff]  ;;  %v13191_v53 = vld [vmem:[#allocation26_spill] sm:$0xff] }
 0x742   :  { %2932 = vmatmul.mubr.f32.vlgmr.msra.gmra.mrb[12].mxu0 %v11302_v43  ;;  %3003 = vmatmul.mubr.f32.vlgmr.msra.gmra.mrb[28].mxu1 %v11302_v43  ;;  %v13193_v43 = vld [vmem:[#allocation27_spill] sm:$0xff] }
 0x743   :  { %7801 = vmatpush1.bf16.msra.mxu0 %v13183_v59  ;;  %7865 = vmatpush1.bf16.msra.mxu1 %v13184_v45  ;;  %v13194_v59 = vld [vmem:[#allocation49_spill] sm:$0xff]  ;;  %v13195_v45 = vld [vmem:[#allocation28_spill] sm:$0xff] }
 0x744   :  { %7803 = vmatprep.subr.bf16.mxu0 %v13185_v54  ;;  %7867 = vmatprep.subr.bf16.mxu1 %v13186_v22  ;;  %v13196_v54 = vld [vmem:[#allocation51_spill] sm:$0xff]  ;;  %v13197_v22 = vld [vmem:[#allocation29_spill] sm:$0xff] }
 0x747   :  { %7805 = vmatpush1.bf16.msra.mxu0 %v13187_v57  ;;  %7869 = vmatpush1.bf16.msra.mxu1 %v13188_v0  ;;  %v13198_v57 = vld [vmem:[#allocation53_spill] sm:$0xff]  ;;  %v13199_v0 = vld [vmem:[#allocation30_spill] sm:$0xff] }
 0x748   :  { %7807 = vmatprep.subr.bf16.mxu0 %v13189_v15  ;;  %7871 = vmatprep.subr.bf16.mxu1 %v13190_v37  ;;  %v13200_v15 = vld [vmem:[#allocation55_spill] sm:$0xff] }
 0x749   :  { %v13201_v37 = vld [vmem:[#allocation31_spill] sm:$0xff] }
 0x74b   :  { %7809 = vmatpush1.bf16.msra.mxu0 %v13191_v53  ;;  %7873 = vmatpush1.bf16.msra.mxu1 %v13192_v52  ;;  %v13202_v53 = vld [vmem:[#allocation57_spill] sm:$0xff]  ;;  %v13203_v52 = vld [vmem:[#allocation32_spill] sm:$0xff] }
 0x74c   :  { %7811 = vmatprep.subr.bf16.mxu0 %v13193_v43  ;;  %7875 = vmatprep.subr.bf16.mxu1 %v13194_v59  ;;  %v13204_v43 = vld [vmem:[#allocation59_spill] sm:$0xff]  ;;  %v13205_v59 = vld [vmem:[#allocation33_spill] sm:$0xff] }
 0x74f   :  { %7813 = vmatpush1.bf16.msra.mxu0 %v13195_v45  ;;  %7877 = vmatpush1.bf16.msra.mxu1 %v13196_v54  ;;  %v13206_v45 = vld [vmem:[#allocation61_spill] sm:$0xff]  ;;  %v13207_v54 = vld [vmem:[#allocation34_spill] sm:$0xff] }
 0x750   :  { %7815 = vmatprep.subr.bf16.mxu0 %v13197_v22  ;;  %7879 = vmatprep.subr.bf16.mxu1 %v13198_v57  ;;  %v13208_v22 = vld [vmem:[#allocation63_spill] sm:$0xff] }
 0x751   :  { %v13209_v57 = vld [vmem:[#allocation35_spill] sm:$0xff] }
 0x753   :  { %7817 = vmatpush1.bf16.msra.mxu0 %v13199_v0  ;;  %7881 = vmatpush1.bf16.msra.mxu1 %v13200_v15  ;;  %v13210_v0 = vld [vmem:[#allocation65_spill] sm:$0xff]  ;;  %v13211_v15 = vld [vmem:[#allocation36_spill] sm:$0xff] }
 0x754   :  { %7819 = vmatprep.subr.bf16.mxu0 %v13201_v37  ;;  %7883 = vmatprep.subr.bf16.mxu1 %v13202_v53  ;;  %v13212_v37 = vld [vmem:[#allocation67_spill] sm:$0xff]  ;;  %v13213_v53 = vld [vmem:[#allocation37_spill] sm:$0xff] }
 0x757   :  { %7821 = vmatpush1.bf16.msra.mxu0 %v13203_v52  ;;  %7885 = vmatpush1.bf16.msra.mxu1 %v13204_v43  ;;  %v13214_v52 = vld [vmem:[#allocation68_spill] sm:$0xff]  ;;  %v13215_v43 = vld [vmem:[#allocation38_spill] sm:$0xff] }
 0x758   :  { %7823 = vmatprep.subr.bf16.mxu0 %v13205_v59  ;;  %7887 = vmatprep.subr.bf16.mxu1 %v13206_v45  ;;  %v13216_v59 = vld [vmem:[#allocation70_spill] sm:$0xff]  ;;  %v13217_v45 = vld [vmem:[#allocation40_spill] sm:$0xff] }
 0x75b   :  { %7825 = vmatpush1.bf16.msra.mxu0 %v13207_v54  ;;  %7889 = vmatpush1.bf16.msra.mxu1 %v13208_v22  ;;  %v13218_v54 = vld [vmem:[#allocation72_spill] sm:$0xff]  ;;  %v13219_v22 = vld [vmem:[#allocation42_spill] sm:$0xff] }
 0x75c   :  { %7827 = vmatprep.subr.bf16.mxu0 %v13209_v57  ;;  %7891 = vmatprep.subr.bf16.mxu1 %v13210_v0  ;;  %v13220_v57 = vld [vmem:[#allocation74_spill] sm:$0xff]  ;;  %v13221_v0 = vld [vmem:[#allocation44_spill] sm:$0xff] }
 0x75f   :  { %7829 = vmatpush1.bf16.msra.mxu0 %v13211_v15  ;;  %7893 = vmatpush1.bf16.msra.mxu1 %v13212_v37  ;;  %v13222_v15 = vld [vmem:[#allocation76_spill] sm:$0xff]  ;;  %v13223_v37 = vld [vmem:[#allocation46_spill] sm:$0xff] }
 0x760   :  { %7831 = vmatprep.subr.bf16.mxu0 %v13213_v53  ;;  %7895 = vmatprep.subr.bf16.mxu1 %v13214_v52  ;;  %v13224_v53 = vld [vmem:[#allocation78_spill] sm:$0xff]  ;;  %v13225_v52 = vld [vmem:[#allocation48_spill] sm:$0xff] }
 0x763   :  { %7833 = vmatpush1.bf16.msra.mxu0 %v13215_v43  ;;  %7897 = vmatpush1.bf16.msra.mxu1 %v13216_v59  ;;  %v13226_v43 = vld [vmem:[#allocation80_spill] sm:$0xff]  ;;  %v13227_v59 = vld [vmem:[#allocation50_spill] sm:$0xff] }
 0x764   :  { %7835 = vmatprep.subr.bf16.mxu0 %v13217_v45  ;;  %7899 = vmatprep.subr.bf16.mxu1 %v13218_v54  ;;  %v13228_v45 = vld [vmem:[#allocation82_spill] sm:$0xff]  ;;  %v13229_v54 = vld [vmem:[#allocation52_spill] sm:$0xff] }
 0x767   :  { %7837 = vmatpush1.bf16.msra.mxu0 %v13219_v22  ;;  %7901 = vmatpush1.bf16.msra.mxu1 %v13220_v57  ;;  %v13230_v22 = vld [vmem:[#allocation84_spill] sm:$0xff]  ;;  %v13231_v57 = vld [vmem:[#allocation54_spill] sm:$0xff] }
 0x768   :  { %7839 = vmatprep.subr.bf16.mxu0 %v13221_v0  ;;  %7903 = vmatprep.subr.bf16.mxu1 %v13222_v15  ;;  %v13232_v0 = vld [vmem:[#allocation86_spill] sm:$0xff]  ;;  %v13233_v15 = vld [vmem:[#allocation56_spill] sm:$0xff] }
 0x76b   :  { %7841 = vmatpush1.bf16.msra.mxu0 %v13223_v37  ;;  %7905 = vmatpush1.bf16.msra.mxu1 %v13224_v53  ;;  %v13234_v37 = vld [vmem:[#allocation88_spill] sm:$0xff]  ;;  %v13235_v53 = vld [vmem:[#allocation58_spill] sm:$0xff] }
 0x76c   :  { %7843 = vmatprep.subr.bf16.mxu0 %v13225_v52  ;;  %7907 = vmatprep.subr.bf16.mxu1 %v13226_v43  ;;  %v13236_v52 = vld [vmem:[#allocation90_spill] sm:$0xff]  ;;  %v13237_v43 = vld [vmem:[#allocation60_spill] sm:$0xff] }
 0x76f   :  { %7845 = vmatpush1.bf16.msra.mxu0 %v13227_v59  ;;  %7909 = vmatpush1.bf16.msra.mxu1 %v13228_v45  ;;  %v13238_v59 = vld [vmem:[#allocation92_spill] sm:$0xff]  ;;  %v13239_v45 = vld [vmem:[#allocation62_spill] sm:$0xff] }
 0x770   :  { %7847 = vmatprep.subr.bf16.mxu0 %v13229_v54  ;;  %7911 = vmatprep.subr.bf16.mxu1 %v13230_v22  ;;  %v13240_v54 = vld [vmem:[#allocation94_spill] sm:$0xff]  ;;  %v13241_v22 = vld [vmem:[#allocation64_spill] sm:$0xff] }
 0x773   :  { %7849 = vmatpush1.bf16.msra.mxu0 %v13231_v57  ;;  %7913 = vmatpush1.bf16.msra.mxu1 %v13232_v0  ;;  %v13242_v57 = vld [vmem:[#allocation96_spill] sm:$0xff]  ;;  %v13243_v0 = vld [vmem:[#allocation66_spill] sm:$0xff] }
 0x774   :  { %7851 = vmatprep.subr.bf16.mxu0 %v13233_v15  ;;  %7915 = vmatprep.subr.bf16.mxu1 %v13234_v37  ;;  %v13244_v15 = vld [vmem:[#allocation98_spill] sm:$0xff]  ;;  %v13245_v37 = vld [vmem:[#allocation69_spill] sm:$0xff] }
 0x777   :  { %7853 = vmatpush1.bf16.msra.mxu0 %v13235_v53  ;;  %7917 = vmatpush1.bf16.msra.mxu1 %v13236_v52  ;;  %v13246_v53 = vld [vmem:[#allocation101_spill] sm:$0xff]  ;;  %v13247_v52 = vld [vmem:[#allocation159_spill] sm:$0xff] }
 0x778   :  { %7855 = vmatprep.subr.bf16.mxu0 %v13237_v43  ;;  %7919 = vmatprep.subr.bf16.mxu1 %v13238_v59  ;;  %v13248_v43 = vld [vmem:[#allocation150_spill] sm:$0xff] }
 0x779   :  { %v282_v12 = vadd.f32 %v13248_v43, %v13247_v52  ;;  %v13249_v59 = vld [vmem:[#allocation158_spill] sm:$0xff] }
 0x77b   :  { %7857 = vmatpush1.bf16.msra.mxu0 %v13239_v45  ;;  %7921 = vmatpush1.bf16.msra.mxu1 %v13240_v54  ;;  %v284_v45 = vadd.f32 %v13250_v6, %v13249_v59 }
 0x77c   :  { %7859 = vmatprep.subr.bf16.mxu0 %v13241_v22  ;;  %7923 = vmatprep.subr.bf16.mxu1 %v13242_v57 }
 0x77f   :  { %7861 = vmatpush1.bf16.msra.mxu0 %v13243_v0  ;;  %7925 = vmatpush1.bf16.msra.mxu1 %v13244_v15 }
 0x780   :  { %7927 = vmatprep.subr.bf16.mxu0 %v13245_v37  ;;  %7991 = vmatprep.subr.bf16.mxu1 %v13246_v53 }
 0x7d5   :  { %v2791_v26 = vpop.f32.mrb[26].mxu0  ;;  %v2862_v54 = vpop.f32.mrb[18].mxu1 }
 0x7d6   :  { %v3014_v13 = vadd.f32 %v2791_v26, %v282_v12  ;;  %v2793_v22 = vpop.f32.mrb[27].mxu0  ;;  %v2864_v20 = vpop.f32.mrb[19].mxu1  ;;  %v9146_v37 = vadd.f32 %v2862_v54, %v13059_v48 }
 0x7d7   :  { %v3015_v57 = vadd.f32 %v2793_v22, %v284_v45 }
 0x7d8   :  { %v6166_v41 = vmul.f32 -1.442695, %v3014_v13 }
 0x7d9   :  { %v6167_v0 = vmul.f32 -1.442695, %v3015_v57 }
 0x7da   :  { %9474 = vpow2.f32 %v6166_v41 }
 0x7db   :  { %9476 = vpow2.f32 %v6167_v0 }
 0x7dc   :  { %9478 = vtanh.f32 %v9146_v37 }
 0x7e4   :  { %v9475_v15 = vpop.eup %9474 }
 0x7e5   :  { %v9477_v53 = vpop.eup %9476  ;;  %v3021_v29 = vadd.f32 1.0, %v9475_v15 }
 0x7e6   :  { %v3027_v43 = vadd.f32 1.0, %v9477_v53  ;;  %v9479_v6 = vpop.eup %9478 }
 0x7e7   :  { %9480 = vrcp.f32 %v3021_v29  ;;  %v9147_v29 = vadd.f32 %v2864_v20, %v12873_v5 }
 0x7e8   :  { %9482 = vrcp.f32 %v3027_v43 }
 0x7e9   :  { %v6168_v53 = vmul.f32 -1.442695, %v9147_v29 }
 0x7f1   :  { %v9481_v59 = vpop.eup %9480 }
 0x7f2   :  { %v9483_v52 = vpop.eup %9482  ;;  %v3038_v26 = vmul.f32 %v9481_v59, %v9479_v6 }
 0x7f3   :  { %v3037_v12 = vmul.f32 %v9483_v52, %v11288_v56 }
 0x7f5   :  { %v11446_v45 = vadd.f32 %v3038_v26, %v3037_v12 }
 0x815   :  { %v2933_v13 = vpop.f32.mrb[12].mxu0  ;;  %v3004_v41 = vpop.f32.mrb[28].mxu1 }
 0x816   :  { %v9156_v22 = vadd.f32 %v2933_v13, %v12966_v14  ;;  %v2935_v54 = vpop.f32.mrb[13].mxu0  ;;  %v3006_v57 = vpop.f32.mrb[29].mxu1  ;;  %v9172_v52 = vadd.f32 %v3004_v41, %v10664_v34 }
 0x817   :  { %v9157_v0 = vadd.f32 %v2935_v54, %v12872_v51  ;;  %v9173_v59 = vadd.f32 %v3006_v57, %v10666_v24 }
 0x818   :  { %v6169_v15 = vmul.f32 -1.442695, %v9156_v22 }
 0x819   :  { %v6170_v37 = vmul.f32 -1.442695, %v9157_v0  ;;  %v6171_v56 = vmul.f32 -1.442695, %v9173_v59 }
 0x81a   :  { %9484 = vpow2.f32 %v6169_v15 }
 0x81b   :  { %9486 = vpow2.f32 %v6170_v37 }
 0x81c   :  { %9488 = vpow2.f32 %v6168_v53 }
 0x81d   :  { %9490 = vpow2.f32 %v6171_v56 }
 0x81e   :  { %9492 = vtanh.f32 %v9172_v52 }
 0x824   :  { %v9485_v43 = vpop.eup %9484 }
 0x825   :  { %v9487_v6 = vpop.eup %9486  ;;  %v3054_v26 = vadd.f32 1.0, %v9485_v43 }
 0x826   :  { %v3060_v12 = vadd.f32 1.0, %v9487_v6  ;;  %v9489_v13 = vpop.eup %9488 }
 0x827   :  { %9494 = vrcp.f32 %v3054_v26  ;;  %v9491_v22 = vpop.eup %9490  ;;  %v3034_v29 = vadd.f32 1.0, %v9489_v13  ;;  %v13254_v26 = vld [vmem:[#allocation136_spill] sm:$0xff]  ;;  %v13256_v13 = vld [vmem:[#allocation137_spill] sm:$0xff] }
 0x828   :  { %9496 = vrcp.f32 %v3060_v12  ;;  %v9493_v54 = vpop.eup %9492  ;;  %v3067_v57 = vadd.f32 1.0, %v9491_v22  ;;  %v13255_v12 = vld [vmem:[#allocation110_spill] sm:$0xff]  ;;  %v13257_v22 = vld [vmem:[#allocation112_spill] sm:$0xff] }
 0x829   :  { %9498 = vtanh.f32 %v11446_v45 }
 0x82a   :  { %9500 = vrcp.f32 %v3067_v57  ;;  %v13262_v57 = vld [vmem:[#allocation140_spill] sm:$0xff] }
 0x831   :  { %v9495_v0 = vpop.eup %9494 }
 0x832   :  { %v9497_v20 = vpop.eup %9496  ;;  %v3071_v15 = vmul.f32 %v9495_v0, %v9493_v54  ;;  %v13258_v54 = vld [vmem:[#allocation138_spill] sm:$0xff] }
 0x833   :  { %v3070_v37 = vmul.f32 %v9497_v20, %v11297_v55  ;;  %v9499_v59 = vpop.eup %9498  ;;  %v13253_v55 = vld [vmem:[#allocation108_spill] sm:$0xff]  ;;  %v13259_v0 = vld [vmem:[#allocation114_spill] sm:$0xff]  ;;  %v13260_v20 = vld [vmem:[#allocation139_spill] sm:$0xff] }
 0x834   :  { %v9501_v53 = vpop.eup %9500 }
 0x835   :  { %v11455_v41 = vadd.f32 %v3071_v15, %v3070_v37  ;;  %v13261_v15 = vld [vmem:[#allocation116_spill] sm:$0xff]  ;;  %v13263_v37 = vld [vmem:[#allocation118_spill] sm:$0xff] }
 0x837   :  { %9502 = vtanh.f32 %v11455_v41 }
 0x838   :  { %9504 = vrcp.f32 %v3034_v29  ;;  %v13264_v29 = vld [vmem:[#allocation141_spill] sm:$0xff] }
 0x841   :  { %v9503_v56 = vpop.eup %9502 }
 0x842   :  { %v9505_v52 = vpop.eup %9504  ;;  %v11458_v43 = vmul.f32 %v9503_v56, %v9501_v53  ;;  %v13266_v53 = vld [vmem:[#allocation142_spill] sm:$0xff] }
 0x843   :  { %v11460_v6 = vmul.f32 %v9505_v52, %v9499_v59  ;;  %v13265_v59 = vld [vmem:[#allocation120_spill] sm:$0xff]  ;;  %v13267_v56 = vld [vmem:[#allocation122_spill] sm:$0xff]  ;;  %v13268_v52 = vld [vmem:[#allocation143_spill] sm:$0xff] }
 0x844   :  { %13251 = vst [vmem:[#allocation89_spill] sm:$0xff] %v11458_v43  ;;  %3143 = vmatprep.mubr.f32.mxu0 %v11458_v43  ;;  %3214 = vmatprep.mubr.f32.mxu1 %v11458_v43 }
 0x845   :  { %13252 = vst [vmem:[#allocation102_spill] sm:$0xff] %v11460_v6  ;;  %3144 = vmatmul.mubr.f32.vlgmr.msra.gmra.mrb[28].mxu0 %v11460_v6  ;;  %3215 = vmatmul.mubr.f32.vlgmr.msra.gmra.mrb[20].mxu1 %v11460_v6 }
 0x846   :  { %7929 = vmatpush1.bf16.msra.mxu0 %v12785_v46  ;;  %7993 = vmatpush1.bf16.msra.mxu1 %v12786_v35 }
 0x847   :  { %3285 = vmatprep.mubr.f32.mxu0 %v11458_v43  ;;  %3356 = vmatprep.mubr.f32.mxu1 %v11458_v43  ;;  %v13269_v43 = vld [vmem:[#allocation124_spill] sm:$0xff] }
 0x848   :  { %7931 = vmatprep.subr.bf16.mxu0 %v12787_v7  ;;  %7995 = vmatprep.subr.bf16.mxu1 %v12876_v42 }
 0x84a   :  { %7933 = vmatpush1.bf16.msra.mxu0 %v12877_v11  ;;  %7997 = vmatpush1.bf16.msra.mxu1 %v12878_v36 }
 0x84b   :  { %7935 = vmatprep.subr.bf16.mxu0 %v12879_v33  ;;  %7999 = vmatprep.subr.bf16.mxu1 %v12880_v44 }
 0x84e   :  { %7937 = vmatpush1.bf16.msra.mxu0 %v12793_v40  ;;  %8001 = vmatpush1.bf16.msra.mxu1 %v12881_v31 }
 0x84f   :  { %7939 = vmatprep.subr.bf16.mxu0 %v12795_v32  ;;  %8003 = vmatprep.subr.bf16.mxu1 %v12882_v61 }
 0x852   :  { %7941 = vmatpush1.bf16.msra.mxu0 %v12797_v38  ;;  %8005 = vmatpush1.bf16.msra.mxu1 %v12883_v2 }
 0x853   :  { %7943 = vmatprep.subr.bf16.mxu0 %v12799_v47  ;;  %8007 = vmatprep.subr.bf16.mxu1 %v12884_v19 }
 0x856   :  { %7945 = vmatpush1.bf16.msra.mxu0 %v12801_v25  ;;  %8009 = vmatpush1.bf16.msra.mxu1 %v12885_v23 }
 0x857   :  { %7947 = vmatprep.subr.bf16.mxu0 %v12803_v4  ;;  %8011 = vmatprep.subr.bf16.mxu1 %v12886_v9 }
 0x85a   :  { %7949 = vmatpush1.bf16.msra.mxu0 %v12969_v18  ;;  %8013 = vmatpush1.bf16.msra.mxu1 %v12887_v8 }
 0x85b   :  { %7951 = vmatprep.subr.bf16.mxu0 %v12970_v62  ;;  %8015 = vmatprep.subr.bf16.mxu1 %v12888_v39 }
 0x85e   :  { %7953 = vmatpush1.bf16.msra.mxu0 %v12971_v49  ;;  %8017 = vmatpush1.bf16.msra.mxu1 %v12889_v60 }
 0x85f   :  { %7955 = vmatprep.subr.bf16.mxu0 %v12972_v10  ;;  %8019 = vmatprep.subr.bf16.mxu1 %v12890_v63 }
 0x862   :  { %7957 = vmatpush1.bf16.msra.mxu0 %v12973_v58  ;;  %8021 = vmatpush1.bf16.msra.mxu1 %v12891_v17 }
 0x863   :  { %7959 = vmatprep.subr.bf16.mxu0 %v12974_v50  ;;  %8023 = vmatprep.subr.bf16.mxu1 %v12892_v3 }
 0x866   :  { %7961 = vmatpush1.bf16.msra.mxu0 %v12810_v21  ;;  %8025 = vmatpush1.bf16.msra.mxu1 %v12893_v16 }
 0x867   :  { %7963 = vmatprep.subr.bf16.mxu0 %v12811_v27  ;;  %8027 = vmatprep.subr.bf16.mxu1 %v12894_v1 }
 0x86a   :  { %7965 = vmatpush1.bf16.msra.mxu0 %v12812_v30  ;;  %8029 = vmatpush1.bf16.msra.mxu1 %v12895_v28 }
 0x86b   :  { %7967 = vmatprep.subr.bf16.mxu0 %v13253_v55  ;;  %8031 = vmatprep.subr.bf16.mxu1 %v13254_v26 }
 0x86e   :  { %7969 = vmatpush1.bf16.msra.mxu0 %v13255_v12  ;;  %8033 = vmatpush1.bf16.msra.mxu1 %v13256_v13 }
 0x86f   :  { %7971 = vmatprep.subr.bf16.mxu0 %v13257_v22  ;;  %8035 = vmatprep.subr.bf16.mxu1 %v13258_v54  ;;  %v13346_v54 = vld [vmem:[#allocation153_spill] sm:$0xff] }
 0x872   :  { %7973 = vmatpush1.bf16.msra.mxu0 %v13259_v0  ;;  %8037 = vmatpush1.bf16.msra.mxu1 %v13260_v20  ;;  %v13270_v0 = vld [vmem:[#allocation144_spill] sm:$0xff]  ;;  %v13271_v20 = vld [vmem:[#allocation126_spill] sm:$0xff] }
 0x873   :  { %7975 = vmatprep.subr.bf16.mxu0 %v13261_v15  ;;  %8039 = vmatprep.subr.bf16.mxu1 %v13262_v57  ;;  %v13272_v15 = vld [vmem:[#allocation145_spill] sm:$0xff]  ;;  %v13273_v57 = vld [vmem:[#allocation128_spill] sm:$0xff] }
 0x876   :  { %7977 = vmatpush1.bf16.msra.mxu0 %v13263_v37  ;;  %8041 = vmatpush1.bf16.msra.mxu1 %v13264_v29  ;;  %v13274_v37 = vld [vmem:[#allocation146_spill] sm:$0xff] }
 0x877   :  { %7979 = vmatprep.subr.bf16.mxu0 %v13265_v59  ;;  %8043 = vmatprep.subr.bf16.mxu1 %v13266_v53  ;;  %v13275_v29 = vld [vmem:[#allocation130_spill] sm:$0xff]  ;;  %v13276_v59 = vld [vmem:[#allocation147_spill] sm:$0xff]  ;;  %v13277_v53 = vld [vmem:[#allocation20_spill] sm:$0xff] }
 0x87a   :  { %7981 = vmatpush1.bf16.msra.mxu0 %v13267_v56  ;;  %8045 = vmatpush1.bf16.msra.mxu1 %v13268_v52  ;;  %v13278_v56 = vld [vmem:[#allocation23_spill] sm:$0xff] }
 0x87b   :  { %7983 = vmatprep.subr.bf16.mxu0 %v13269_v43  ;;  %8047 = vmatprep.subr.bf16.mxu1 %v13270_v0  ;;  %v13279_v0 = vld [vmem:[#allocation21_spill] sm:$0xff]  ;;  %v13288_v43 = vld [vmem:[#allocation47_spill] sm:$0xff] }
 0x87e   :  { %7985 = vmatpush1.bf16.msra.mxu0 %v13271_v20  ;;  %8049 = vmatpush1.bf16.msra.mxu1 %v13272_v15  ;;  %v13280_v20 = vld [vmem:[#allocation39_spill] sm:$0xff]  ;;  %v13281_v15 = vld [vmem:[#allocation22_spill] sm:$0xff] }
 0x87f   :  { %7987 = vmatprep.subr.bf16.mxu0 %v13273_v57  ;;  %8051 = vmatprep.subr.bf16.mxu1 %v13274_v37  ;;  %v13282_v57 = vld [vmem:[#allocation41_spill] sm:$0xff]  ;;  %v13283_v37 = vld [vmem:[#allocation24_spill] sm:$0xff] }
 0x882   :  { %7989 = vmatpush1.bf16.msra.mxu0 %v13275_v29  ;;  %8053 = vmatpush1.bf16.msra.mxu1 %v13276_v59  ;;  %v13284_v29 = vld [vmem:[#allocation43_spill] sm:$0xff]  ;;  %v13285_v59 = vld [vmem:[#allocation25_spill] sm:$0xff] }
 0x883   :  { %8055 = vmatprep.subr.bf16.mxu0 %v13277_v53  ;;  %8119 = vmatprep.subr.bf16.mxu1 %v13278_v56  ;;  %v13286_v53 = vld [vmem:[#allocation45_spill] sm:$0xff]  ;;  %v13287_v56 = vld [vmem:[#allocation26_spill] sm:$0xff] }
 0x885   :  { %3286 = vmatmul.mubr.f32.vlgmr.msra.gmra.mrb[10].mxu0 %v11460_v6  ;;  %3357 = vmatmul.mubr.f32.vlgmr.msra.gmra.mrb[26].mxu1 %v11460_v6  ;;  %v13289_v6 = vld [vmem:[#allocation27_spill] sm:$0xff] }
 0x886   :  { %8057 = vmatpush1.bf16.msra.mxu0 %v13279_v0  ;;  %8121 = vmatpush1.bf16.msra.mxu1 %v13280_v20  ;;  %v13290_v0 = vld [vmem:[#allocation49_spill] sm:$0xff]  ;;  %v13291_v20 = vld [vmem:[#allocation28_spill] sm:$0xff] }
 0x887   :  { %8059 = vmatprep.subr.bf16.mxu0 %v13281_v15  ;;  %8123 = vmatprep.subr.bf16.mxu1 %v13282_v57  ;;  %v13292_v15 = vld [vmem:[#allocation51_spill] sm:$0xff]  ;;  %v13293_v57 = vld [vmem:[#allocation29_spill] sm:$0xff] }
 0x88a   :  { %8061 = vmatpush1.bf16.msra.mxu0 %v13283_v37  ;;  %8125 = vmatpush1.bf16.msra.mxu1 %v13284_v29  ;;  %v13294_v37 = vld [vmem:[#allocation53_spill] sm:$0xff]  ;;  %v13295_v29 = vld [vmem:[#allocation30_spill] sm:$0xff] }
 0x88b   :  { %8063 = vmatprep.subr.bf16.mxu0 %v13285_v59  ;;  %8127 = vmatprep.subr.bf16.mxu1 %v13286_v53  ;;  %v13296_v59 = vld [vmem:[#allocation55_spill] sm:$0xff] }
 0x88c   :  { %v13297_v53 = vld [vmem:[#allocation31_spill] sm:$0xff] }
 0x88e   :  { %8065 = vmatpush1.bf16.msra.mxu0 %v13287_v56  ;;  %8129 = vmatpush1.bf16.msra.mxu1 %v13288_v43  ;;  %v13298_v56 = vld [vmem:[#allocation57_spill] sm:$0xff]  ;;  %v13299_v43 = vld [vmem:[#allocation32_spill] sm:$0xff] }
 0x88f   :  { %8067 = vmatprep.subr.bf16.mxu0 %v13289_v6  ;;  %8131 = vmatprep.subr.bf16.mxu1 %v13290_v0  ;;  %v13300_v6 = vld [vmem:[#allocation59_spill] sm:$0xff]  ;;  %v13301_v0 = vld [vmem:[#allocation33_spill] sm:$0xff] }
 0x892   :  { %8069 = vmatpush1.bf16.msra.mxu0 %v13291_v20  ;;  %8133 = vmatpush1.bf16.msra.mxu1 %v13292_v15  ;;  %v13302_v20 = vld [vmem:[#allocation61_spill] sm:$0xff]  ;;  %v13303_v15 = vld [vmem:[#allocation34_spill] sm:$0xff] }
 0x893   :  { %8071 = vmatprep.subr.bf16.mxu0 %v13293_v57  ;;  %8135 = vmatprep.subr.bf16.mxu1 %v13294_v37  ;;  %v13304_v57 = vld [vmem:[#allocation63_spill] sm:$0xff] }
 0x894   :  { %v13305_v37 = vld [vmem:[#allocation35_spill] sm:$0xff] }
 0x896   :  { %8073 = vmatpush1.bf16.msra.mxu0 %v13295_v29  ;;  %8137 = vmatpush1.bf16.msra.mxu1 %v13296_v59  ;;  %v13306_v29 = vld [vmem:[#allocation65_spill] sm:$0xff]  ;;  %v13307_v59 = vld [vmem:[#allocation36_spill] sm:$0xff] }
 0x897   :  { %8075 = vmatprep.subr.bf16.mxu0 %v13297_v53  ;;  %8139 = vmatprep.subr.bf16.mxu1 %v13298_v56  ;;  %v13308_v53 = vld [vmem:[#allocation67_spill] sm:$0xff]  ;;  %v13309_v56 = vld [vmem:[#allocation37_spill] sm:$0xff] }
 0x89a   :  { %8077 = vmatpush1.bf16.msra.mxu0 %v13299_v43  ;;  %8141 = vmatpush1.bf16.msra.mxu1 %v13300_v6  ;;  %v13310_v43 = vld [vmem:[#allocation68_spill] sm:$0xff]  ;;  %v13311_v6 = vld [vmem:[#allocation38_spill] sm:$0xff] }
 0x89b   :  { %8079 = vmatprep.subr.bf16.mxu0 %v13301_v0  ;;  %8143 = vmatprep.subr.bf16.mxu1 %v13302_v20  ;;  %v13312_v0 = vld [vmem:[#allocation70_spill] sm:$0xff]  ;;  %v13313_v20 = vld [vmem:[#allocation40_spill] sm:$0xff] }
 0x89e   :  { %8081 = vmatpush1.bf16.msra.mxu0 %v13303_v15  ;;  %8145 = vmatpush1.bf16.msra.mxu1 %v13304_v57  ;;  %v13314_v15 = vld [vmem:[#allocation72_spill] sm:$0xff]  ;;  %v13315_v57 = vld [vmem:[#allocation42_spill] sm:$0xff] }
 0x89f   :  { %8083 = vmatprep.subr.bf16.mxu0 %v13305_v37  ;;  %8147 = vmatprep.subr.bf16.mxu1 %v13306_v29  ;;  %v13316_v37 = vld [vmem:[#allocation74_spill] sm:$0xff]  ;;  %v13317_v29 = vld [vmem:[#allocation44_spill] sm:$0xff] }
 0x8a2   :  { %8085 = vmatpush1.bf16.msra.mxu0 %v13307_v59  ;;  %8149 = vmatpush1.bf16.msra.mxu1 %v13308_v53  ;;  %v13318_v59 = vld [vmem:[#allocation76_spill] sm:$0xff]  ;;  %v13319_v53 = vld [vmem:[#allocation46_spill] sm:$0xff] }
 0x8a3   :  { %8087 = vmatprep.subr.bf16.mxu0 %v13309_v56  ;;  %8151 = vmatprep.subr.bf16.mxu1 %v13310_v43  ;;  %v13320_v56 = vld [vmem:[#allocation78_spill] sm:$0xff]  ;;  %v13321_v43 = vld [vmem:[#allocation48_spill] sm:$0xff] }
 0x8a6   :  { %8089 = vmatpush1.bf16.msra.mxu0 %v13311_v6  ;;  %8153 = vmatpush1.bf16.msra.mxu1 %v13312_v0  ;;  %v13322_v6 = vld [vmem:[#allocation80_spill] sm:$0xff]  ;;  %v13323_v0 = vld [vmem:[#allocation50_spill] sm:$0xff] }
 0x8a7   :  { %8091 = vmatprep.subr.bf16.mxu0 %v13313_v20  ;;  %8155 = vmatprep.subr.bf16.mxu1 %v13314_v15  ;;  %v13324_v20 = vld [vmem:[#allocation82_spill] sm:$0xff]  ;;  %v13325_v15 = vld [vmem:[#allocation52_spill] sm:$0xff] }
 0x8aa   :  { %8093 = vmatpush1.bf16.msra.mxu0 %v13315_v57  ;;  %8157 = vmatpush1.bf16.msra.mxu1 %v13316_v37  ;;  %v13326_v57 = vld [vmem:[#allocation84_spill] sm:$0xff]  ;;  %v13327_v37 = vld [vmem:[#allocation54_spill] sm:$0xff] }
 0x8ab   :  { %8095 = vmatprep.subr.bf16.mxu0 %v13317_v29  ;;  %8159 = vmatprep.subr.bf16.mxu1 %v13318_v59  ;;  %v13328_v29 = vld [vmem:[#allocation86_spill] sm:$0xff]  ;;  %v13329_v59 = vld [vmem:[#allocation56_spill] sm:$0xff] }
 0x8ae   :  { %8097 = vmatpush1.bf16.msra.mxu0 %v13319_v53  ;;  %8161 = vmatpush1.bf16.msra.mxu1 %v13320_v56  ;;  %v13330_v53 = vld [vmem:[#allocation88_spill] sm:$0xff]  ;;  %v13331_v56 = vld [vmem:[#allocation58_spill] sm:$0xff] }
 0x8af   :  { %8099 = vmatprep.subr.bf16.mxu0 %v13321_v43  ;;  %8163 = vmatprep.subr.bf16.mxu1 %v13322_v6  ;;  %v13332_v43 = vld [vmem:[#allocation90_spill] sm:$0xff]  ;;  %v13333_v6 = vld [vmem:[#allocation60_spill] sm:$0xff] }
 0x8b2   :  { %8101 = vmatpush1.bf16.msra.mxu0 %v13323_v0  ;;  %8165 = vmatpush1.bf16.msra.mxu1 %v13324_v20  ;;  %v13334_v0 = vld [vmem:[#allocation92_spill] sm:$0xff]  ;;  %v13335_v20 = vld [vmem:[#allocation62_spill] sm:$0xff] }
 0x8b3   :  { %8103 = vmatprep.subr.bf16.mxu0 %v13325_v15  ;;  %8167 = vmatprep.subr.bf16.mxu1 %v13326_v57  ;;  %v13336_v15 = vld [vmem:[#allocation94_spill] sm:$0xff]  ;;  %v13337_v57 = vld [vmem:[#allocation64_spill] sm:$0xff] }
 0x8b6   :  { %8105 = vmatpush1.bf16.msra.mxu0 %v13327_v37  ;;  %8169 = vmatpush1.bf16.msra.mxu1 %v13328_v29  ;;  %v13338_v37 = vld [vmem:[#allocation96_spill] sm:$0xff]  ;;  %v13339_v29 = vld [vmem:[#allocation66_spill] sm:$0xff] }
 0x8b7   :  { %8107 = vmatprep.subr.bf16.mxu0 %v13329_v59  ;;  %8171 = vmatprep.subr.bf16.mxu1 %v13330_v53  ;;  %v13340_v59 = vld [vmem:[#allocation98_spill] sm:$0xff]  ;;  %v13341_v53 = vld [vmem:[#allocation69_spill] sm:$0xff] }
 0x8ba   :  { %8109 = vmatpush1.bf16.msra.mxu0 %v13331_v56  ;;  %8173 = vmatpush1.bf16.msra.mxu1 %v13332_v43  ;;  %v13342_v56 = vld [vmem:[#allocation101_spill] sm:$0xff]  ;;  %v13343_v43 = vld [vmem:[#allocation159_spill] sm:$0xff] }
 0x8bb   :  { %8111 = vmatprep.subr.bf16.mxu0 %v13333_v6  ;;  %8175 = vmatprep.subr.bf16.mxu1 %v13334_v0  ;;  %v13344_v6 = vld [vmem:[#allocation152_spill] sm:$0xff]  ;;  %v13345_v0 = vld [vmem:[#allocation158_spill] sm:$0xff] }
 0x8bc   :  { %v288_v52 = vadd.f32 %v13344_v6, %v13343_v43 }
 0x8be   :  { %8113 = vmatpush1.bf16.msra.mxu0 %v13335_v20  ;;  %8177 = vmatpush1.bf16.msra.mxu1 %v13336_v15  ;;  %v290_v20 = vadd.f32 %v13346_v54, %v13345_v0 }
 0x8bf   :  { %8115 = vmatprep.subr.bf16.mxu0 %v13337_v57  ;;  %8179 = vmatprep.subr.bf16.mxu1 %v13338_v37 }
 0x8c2   :  { %8117 = vmatpush1.bf16.msra.mxu0 %v13339_v29  ;;  %8181 = vmatpush1.bf16.msra.mxu1 %v13340_v59 }
 0x8c3   :  { %8183 = vmatprep.subr.bf16.mxu0 %v13341_v53  ;;  %8247 = vmatprep.subr.bf16.mxu1 %v13342_v56 }
 0x918   :  { %v3145_v22 = vpop.f32.mrb[28].mxu0  ;;  %v3216_v15 = vpop.f32.mrb[20].mxu1 }
 0x919   :  { %v3368_v13 = vadd.f32 %v3145_v22, %v288_v52  ;;  %v3147_v57 = vpop.f32.mrb[29].mxu0  ;;  %v3218_v12 = vpop.f32.mrb[21].mxu1  ;;  %v9148_v59 = vadd.f32 %v3216_v15, %v13059_v48 }
 0x91a   :  { %v3369_v37 = vadd.f32 %v3147_v57, %v290_v20 }
 0x91b   :  { %v6172_v26 = vmul.f32 -1.442695, %v3368_v13 }
 0x91c   :  { %v6173_v29 = vmul.f32 -1.442695, %v3369_v37 }
 0x91d   :  { %9506 = vpow2.f32 %v6172_v26 }
 0x91e   :  { %9508 = vpow2.f32 %v6173_v29 }
 0x91f   :  { %9510 = vtanh.f32 %v9148_v59 }
 0x927   :  { %v9507_v53 = vpop.eup %9506 }
 0x928   :  { %v9509_v56 = vpop.eup %9508  ;;  %v3375_v55 = vadd.f32 1.0, %v9507_v53 }
 0x929   :  { %v3381_v6 = vadd.f32 1.0, %v9509_v56  ;;  %v9511_v54 = vpop.eup %9510 }
 0x92a   :  { %9512 = vrcp.f32 %v3375_v55  ;;  %v9149_v55 = vadd.f32 %v3218_v12, %v12873_v5 }
 0x92b   :  { %9514 = vrcp.f32 %v3381_v6 }
 0x92c   :  { %v6174_v56 = vmul.f32 -1.442695, %v9149_v55 }
 0x934   :  { %v9513_v0 = vpop.eup %9512 }
 0x935   :  { %v9515_v43 = vpop.eup %9514  ;;  %v3392_v22 = vmul.f32 %v9513_v0, %v9511_v54 }
 0x936   :  { %v3391_v52 = vmul.f32 %v9515_v43, %v11446_v45 }
 0x938   :  { %v11604_v20 = vadd.f32 %v3392_v22, %v3391_v52 }
 0x958   :  { %v3287_v13 = vpop.f32.mrb[10].mxu0  ;;  %v3358_v26 = vpop.f32.mrb[26].mxu1 }
 0x959   :  { %v9154_v57 = vadd.f32 %v3287_v13, %v12966_v14  ;;  %v3289_v15 = vpop.f32.mrb[11].mxu0  ;;  %v3360_v37 = vpop.f32.mrb[27].mxu1  ;;  %v9170_v43 = vadd.f32 %v3358_v26, %v10664_v34 }
 0x95a   :  { %v9155_v29 = vadd.f32 %v3289_v15, %v12872_v51  ;;  %v9171_v0 = vadd.f32 %v3360_v37, %v10666_v24 }
 0x95b   :  { %v6175_v59 = vmul.f32 -1.442695, %v9154_v57 }
 0x95c   :  { %v6176_v53 = vmul.f32 -1.442695, %v9155_v29  ;;  %v6177_v45 = vmul.f32 -1.442695, %v9171_v0 }
 0x95d   :  { %9516 = vpow2.f32 %v6175_v59 }
 0x95e   :  { %9518 = vpow2.f32 %v6176_v53 }
 0x95f   :  { %9520 = vpow2.f32 %v6174_v56 }
 0x960   :  { %9522 = vpow2.f32 %v6177_v45 }
 0x961   :  { %9524 = vtanh.f32 %v9170_v43 }
 0x967   :  { %v9517_v6 = vpop.eup %9516 }
 0x968   :  { %v9519_v54 = vpop.eup %9518  ;;  %v3408_v22 = vadd.f32 1.0, %v9517_v6 }
 0x969   :  { %v3414_v52 = vadd.f32 1.0, %v9519_v54  ;;  %v9521_v13 = vpop.eup %9520 }
 0x96a   :  { %9526 = vrcp.f32 %v3408_v22  ;;  %v9523_v57 = vpop.eup %9522  ;;  %v3388_v55 = vadd.f32 1.0, %v9521_v13  ;;  %v3816_v22 = vld [vmem:[#allocation10 + $0x78] sm:$0xff] }
 0x96b   :  { %9528 = vrcp.f32 %v3414_v52  ;;  %v9525_v15 = vpop.eup %9524  ;;  %v3421_v37 = vadd.f32 1.0, %v9523_v57  ;;  %v3809_v57 = vld [vmem:[#allocation10 + $0x40] sm:$0xff] }
 0x96c   :  { %9530 = vtanh.f32 %v11604_v20 }
 0x96d   :  { %9532 = vrcp.f32 %v3421_v37  ;;  %v3818_v37 = vld [vmem:[#allocation10 + $0x88] sm:$0xff] }
 0x974   :  { %v9527_v29 = vpop.eup %9526 }
 0x975   :  { %v9529_v12 = vpop.eup %9528  ;;  %v3425_v59 = vmul.f32 %v9527_v29, %v9525_v15  ;;  %v3813_v15 = vld [vmem:[#allocation10 + $0x60] sm:$0xff]  ;;  %v3811_v29 = vld [vmem:[#allocation10 + $0x50] sm:$0xff] }
 0x976   :  { %v3424_v53 = vmul.f32 %v9529_v12, %v11455_v41  ;;  %v9531_v0 = vpop.eup %9530  ;;  %v3812_v41 = vld [vmem:[#allocation10 + $0x58] sm:$0xff]  ;;  %v8316_v12 = vpack.c.bf16 %v3813_v15, %v3809_v57  ;;  %v3850_v57 = vld [vmem:[#allocation10 + $0x188] sm:$0xff] }
 0x977   :  { %v9533_v56 = vpop.eup %9532  ;;  %v8378_v13 = vpack.c.bf16 %v3816_v22, %v3812_v41  ;;  %v3843_v22 = vld [vmem:[#allocation10 + $0x150] sm:$0xff]  ;;  %v3854_v15 = vld [vmem:[#allocation10 + $0x1a8] sm:$0xff] }
 0x978   :  { %v11613_v26 = vadd.f32 %v3425_v59, %v3424_v53  ;;  %v3815_v59 = vld [vmem:[#allocation10 + $0x70] sm:$0xff]  ;;  %v3822_v53 = vld [vmem:[#allocation10 + $0xa8] sm:$0xff] }
 0x97a   :  { %9534 = vtanh.f32 %v11613_v26 }
 0x97b   :  { %9536 = vrcp.f32 %v3388_v55  ;;  %v8380_v55 = vpack.c.bf16 %v3815_v59, %v3811_v29  ;;  %v3852_v29 = vld [vmem:[#allocation10 + $0x198] sm:$0xff] }
 0x97c   :  { %v3856_v59 = vld [vmem:[#allocation10 + $0x1b8] sm:$0xff] }
 0x984   :  { %v9535_v45 = vpop.eup %9534 }
 0x985   :  { %v9537_v43 = vpop.eup %9536  ;;  %v11616_v6 = vmul.f32 %v9535_v45, %v9533_v56  ;;  %v3820_v56 = vld [vmem:[#allocation10 + $0x98] sm:$0xff] }
 0x986   :  { %v11618_v54 = vmul.f32 %v9537_v43, %v9531_v0  ;;  %v8318_v0 = vpack.c.bf16 %v3822_v53, %v3818_v37  ;;  %v3824_v45 = vld [vmem:[#allocation10 + $0xb8] sm:$0xff]  ;;  %v3817_v43 = vld [vmem:[#allocation10 + $0x80] sm:$0xff] }
 0x987   :  { %3497 = vmatprep.mubr.f32.mxu0 %v11616_v6  ;;  %3568 = vmatprep.mubr.f32.mxu1 %v11616_v6  ;;  %v3849_v37 = vld [vmem:[#allocation10 + $0x180] sm:$0xff] }
 0x988   :  { %3498 = vmatmul.mubr.f32.vlgmr.msra.gmra.mrb[30].mxu0 %v11618_v54  ;;  %3569 = vmatmul.mubr.f32.vlgmr.msra.gmra.mrb[22].mxu1 %v11618_v54  ;;  %v3853_v53 = vld [vmem:[#allocation10 + $0x1a0] sm:$0xff] }
 0x989   :  { %8185 = vmatpush1.bf16.msra.mxu0 %v12785_v46  ;;  %8249 = vmatpush1.bf16.msra.mxu1 %v12786_v35  ;;  %v13347_v46 = vld [vmem:[#allocation108_spill] sm:$0xff] }
 0x98a   :  { %3639 = vmatprep.mubr.f32.mxu0 %v11616_v6  ;;  %3710 = vmatprep.mubr.f32.mxu1 %v11616_v6  ;;  %v13348_v35 = vld [vmem:[#allocation136_spill] sm:$0xff] }
 0x98b   :  { %8187 = vmatprep.subr.bf16.mxu0 %v12787_v7  ;;  %8251 = vmatprep.subr.bf16.mxu1 %v12876_v42  ;;  %v13349_v7 = vld [vmem:[#allocation110_spill] sm:$0xff]  ;;  %v13364_v42 = vld [vmem:[#allocation144_spill] sm:$0xff] }
 0x98d   :  { %8189 = vmatpush1.bf16.msra.mxu0 %v12877_v11  ;;  %8253 = vmatpush1.bf16.msra.mxu1 %v12878_v36  ;;  %v13365_v11 = vld [vmem:[#allocation126_spill] sm:$0xff]  ;;  %v13366_v36 = vld [vmem:[#allocation145_spill] sm:$0xff] }
 0x98e   :  { %8191 = vmatprep.subr.bf16.mxu0 %v12879_v33  ;;  %8255 = vmatprep.subr.bf16.mxu1 %v12880_v44  ;;  %v13367_v33 = vld [vmem:[#allocation128_spill] sm:$0xff]  ;;  %v13368_v44 = vld [vmem:[#allocation146_spill] sm:$0xff] }
 0x991   :  { %8193 = vmatpush1.bf16.msra.mxu0 %v12793_v40  ;;  %8257 = vmatpush1.bf16.msra.mxu1 %v12881_v31  ;;  %v13358_v40 = vld [vmem:[#allocation141_spill] sm:$0xff]  ;;  %v13369_v31 = vld [vmem:[#allocation130_spill] sm:$0xff] }
 0x992   :  { %8195 = vmatprep.subr.bf16.mxu0 %v12795_v32  ;;  %8259 = vmatprep.subr.bf16.mxu1 %v12882_v61  ;;  %v13360_v32 = vld [vmem:[#allocation142_spill] sm:$0xff]  ;;  %v13370_v61 = vld [vmem:[#allocation147_spill] sm:$0xff] }
 0x995   :  { %8197 = vmatpush1.bf16.msra.mxu0 %v12797_v38  ;;  %8261 = vmatpush1.bf16.msra.mxu1 %v12883_v2  ;;  %v13362_v38 = vld [vmem:[#allocation143_spill] sm:$0xff]  ;;  %v3802_v2 = vld [vmem:[#allocation10 + $0x8] sm:$0xff] }
 0x996   :  { %8199 = vmatprep.subr.bf16.mxu0 %v12799_v47  ;;  %8263 = vmatprep.subr.bf16.mxu1 %v12884_v19  ;;  %v13350_v47 = vld [vmem:[#allocation137_spill] sm:$0xff]  ;;  %v3806_v19 = vld [vmem:[#allocation10 + $0x28] sm:$0xff] }
 0x999   :  { %8201 = vmatpush1.bf16.msra.mxu0 %v12801_v25  ;;  %8265 = vmatpush1.bf16.msra.mxu1 %v12885_v23  ;;  %v13351_v25 = vld [vmem:[#allocation112_spill] sm:$0xff]  ;;  %v3804_v23 = vld [vmem:[#allocation10 + $0x18] sm:$0xff] }
 0x99a   :  { %8203 = vmatprep.subr.bf16.mxu0 %v12803_v4  ;;  %8267 = vmatprep.subr.bf16.mxu1 %v12886_v9  ;;  %v13353_v4 = vld [vmem:[#allocation114_spill] sm:$0xff]  ;;  %v8310_v9 = vpack.c.bf16 %v3806_v19, %v3802_v2  ;;  %v3833_v2 = vld [vmem:[#allocation10 + $0x100] sm:$0xff] }
 0x99b   :  { %v3837_v19 = vld [vmem:[#allocation10 + $0x120] sm:$0xff] }
 0x99d   :  { %8205 = vmatpush1.bf16.msra.mxu0 %v12969_v18  ;;  %8269 = vmatpush1.bf16.msra.mxu1 %v12887_v8  ;;  %v3808_v8 = vld [vmem:[#allocation10 + $0x38] sm:$0xff] }
 0x99e   :  { %8207 = vmatprep.subr.bf16.mxu0 %v12970_v62  ;;  %8271 = vmatprep.subr.bf16.mxu1 %v12888_v39  ;;  %v3801_v39 = vld [vmem:[#allocation10] sm:$0xff]  ;;  %v3803_v62 = vld [vmem:[#allocation10 + $0x10] sm:$0xff] }
 0x9a1   :  { %8209 = vmatpush1.bf16.msra.mxu0 %v12971_v49  ;;  %8273 = vmatpush1.bf16.msra.mxu1 %v12889_v60  ;;  %v3805_v60 = vld [vmem:[#allocation10 + $0x20] sm:$0xff]  ;;  %v3807_v49 = vld [vmem:[#allocation10 + $0x30] sm:$0xff] }
 0x9a2   :  { %8211 = vmatprep.subr.bf16.mxu0 %v12972_v10  ;;  %8275 = vmatprep.subr.bf16.mxu1 %v12890_v63  ;;  %v8374_v63 = vpack.c.bf16 %v3808_v8, %v3804_v23  ;;  %v8312_v18 = vpack.c.bf16 %v3805_v60, %v3801_v39  ;;  %v3810_v10 = vld [vmem:[#allocation10 + $0x48] sm:$0xff]  ;;  %v3835_v23 = vld [vmem:[#allocation10 + $0x110] sm:$0xff] }
 0x9a3   :  { %v3839_v8 = vld [vmem:[#allocation10 + $0x130] sm:$0xff]  ;;  %v3842_v60 = vld [vmem:[#allocation10 + $0x148] sm:$0xff] }
 0x9a4   :  { %v8392_v39 = vpack.c.bf16 %v3839_v8, %v3835_v23  ;;  %v3876_v23 = vld [vmem:[#allocation10 + $0x258] sm:$0xff] }
 0x9a5   :  { %8213 = vmatpush1.bf16.msra.mxu0 %v12973_v58  ;;  %8277 = vmatpush1.bf16.msra.mxu1 %v12891_v17  ;;  %v13363_v17 = vld [vmem:[#allocation124_spill] sm:$0xff]  ;;  %v8376_v58 = vpack.c.bf16 %v3807_v49, %v3803_v62  ;;  %v3848_v49 = vld [vmem:[#allocation10 + $0x178] sm:$0xff] }
 0x9a6   :  { %8215 = vmatprep.subr.bf16.mxu0 %v12974_v50  ;;  %8279 = vmatprep.subr.bf16.mxu1 %v12892_v3  ;;  %v13359_v3 = vld [vmem:[#allocation120_spill] sm:$0xff]  ;;  %v3880_v8 = vld [vmem:[#allocation10 + $0x278] sm:$0xff] }
 0x9a7   :  { %v3814_v50 = vld [vmem:[#allocation10 + $0x68] sm:$0xff] }
 0x9a8   :  { %v8314_v52 = vpack.c.bf16 %v3814_v50, %v3810_v10  ;;  %v3841_v10 = vld [vmem:[#allocation10 + $0x140] sm:$0xff] }
 0x9a9   :  { %8217 = vmatpush1.bf16.msra.mxu0 %v12810_v21  ;;  %8281 = vmatpush1.bf16.msra.mxu1 %v12893_v16  ;;  %v13352_v21 = vld [vmem:[#allocation138_spill] sm:$0xff] }
 0x9aa   :  { %8219 = vmatprep.subr.bf16.mxu0 %v12811_v27  ;;  %8283 = vmatprep.subr.bf16.mxu1 %v12894_v1  ;;  %v13354_v27 = vld [vmem:[#allocation139_spill] sm:$0xff]  ;;  %v13355_v1 = vld [vmem:[#allocation116_spill] sm:$0xff]  ;;  %v13361_v16 = vld [vmem:[#allocation122_spill] sm:$0xff] }
 0x9ad   :  { %8221 = vmatpush1.bf16.msra.mxu0 %v12812_v30  ;;  %8285 = vmatpush1.bf16.msra.mxu1 %v12895_v28  ;;  %v13356_v30 = vld [vmem:[#allocation140_spill] sm:$0xff]  ;;  %v13357_v28 = vld [vmem:[#allocation118_spill] sm:$0xff] }
 0x9ae   :  { %8223 = vmatprep.subr.bf16.mxu0 %v13347_v46  ;;  %8287 = vmatprep.subr.bf16.mxu1 %v13348_v35  ;;  %v8382_v46 = vpack.c.bf16 %v3824_v45, %v3820_v56  ;;  %v3821_v35 = vld [vmem:[#allocation10 + $0xa0] sm:$0xff]  ;;  %v3851_v56 = vld [vmem:[#allocation10 + $0x190] sm:$0xff] }
 0x9af   :  { %v3855_v45 = vld [vmem:[#allocation10 + $0x1b0] sm:$0xff] }
 0x9b1   :  { %8225 = vmatpush1.bf16.msra.mxu0 %v13349_v7  ;;  %8289 = vmatpush1.bf16.msra.mxu1 %v13350_v47  ;;  %v3819_v7 = vld [vmem:[#allocation10 + $0x90] sm:$0xff] }
 0x9b2   :  { %8227 = vmatprep.subr.bf16.mxu0 %v13351_v25  ;;  %8291 = vmatprep.subr.bf16.mxu1 %v13352_v21  ;;  %v3823_v47 = vld [vmem:[#allocation10 + $0xb0] sm:$0xff]  ;;  %v8320_v25 = vpack.c.bf16 %v3821_v35, %v3817_v43  ;;  %v3826_v21 = vld [vmem:[#allocation10 + $0xc8] sm:$0xff]  ;;  %v8400_v43 = vpack.c.bf16 %v3855_v45, %v3851_v56  ;;  %v3896_v45 = vld [vmem:[#allocation10 + $0x2f8] sm:$0xff] }
 0x9b3   :  { %v3862_v35 = vld [vmem:[#allocation10 + $0x1e8] sm:$0xff] }
 0x9b5   :  { %8229 = vmatpush1.bf16.msra.mxu0 %v13353_v4  ;;  %8293 = vmatpush1.bf16.msra.mxu1 %v13354_v27  ;;  %v3830_v4 = vld [vmem:[#allocation10 + $0xe8] sm:$0xff]  ;;  %v3828_v27 = vld [vmem:[#allocation10 + $0xd8] sm:$0xff] }
 0x9b6   :  { %8231 = vmatprep.subr.bf16.mxu0 %v13355_v1  ;;  %8295 = vmatprep.subr.bf16.mxu1 %v13356_v30  ;;  %v8384_v1 = vpack.c.bf16 %v3823_v47, %v3819_v7  ;;  %v8322_v30 = vpack.c.bf16 %v3830_v4, %v3826_v21  ;;  %v3860_v7 = vld [vmem:[#allocation10 + $0x1d8] sm:$0xff]  ;;  %v3857_v21 = vld [vmem:[#allocation10 + $0x1c0] sm:$0xff] }
 0x9b7   :  { %v3861_v4 = vld [vmem:[#allocation10 + $0x1e0] sm:$0xff] }
 0x9b9   :  { %8233 = vmatpush1.bf16.msra.mxu0 %v13357_v28  ;;  %8297 = vmatpush1.bf16.msra.mxu1 %v13358_v40  ;;  %v3832_v28 = vld [vmem:[#allocation10 + $0xf8] sm:$0xff]  ;;  %v3825_v40 = vld [vmem:[#allocation10 + $0xc0] sm:$0xff] }
 0x9ba   :  { %8235 = vmatprep.subr.bf16.mxu0 %v13359_v3  ;;  %8299 = vmatprep.subr.bf16.mxu1 %v13360_v32  ;;  %v3829_v3 = vld [vmem:[#allocation10 + $0xe0] sm:$0xff]  ;;  %v8386_v32 = vpack.c.bf16 %v3832_v28, %v3828_v27  ;;  %v3863_v28 = vld [vmem:[#allocation10 + $0x1f0] sm:$0xff] }
 0x9bd   :  { %8237 = vmatpush1.bf16.msra.mxu0 %v13361_v16  ;;  %8301 = vmatpush1.bf16.msra.mxu1 %v13362_v38  ;;  %v3827_v16 = vld [vmem:[#allocation10 + $0xd0] sm:$0xff] }
 0x9be   :  { %8239 = vmatprep.subr.bf16.mxu0 %v13363_v17  ;;  %8303 = vmatprep.subr.bf16.mxu1 %v13364_v42  ;;  %v3831_v38 = vld [vmem:[#allocation10 + $0xf0] sm:$0xff]  ;;  %v8324_v17 = vpack.c.bf16 %v3829_v3, %v3825_v40  ;;  %v3866_v3 = vld [vmem:[#allocation10 + $0x208] sm:$0xff] }
 0x9bf   :  { %v8388_v42 = vpack.c.bf16 %v3831_v38, %v3827_v16  ;;  %v3868_v16 = vld [vmem:[#allocation10 + $0x218] sm:$0xff] }
 0x9c1   :  { %8241 = vmatpush1.bf16.msra.mxu0 %v13365_v11  ;;  %8305 = vmatpush1.bf16.msra.mxu1 %v13366_v36  ;;  %v3834_v11 = vld [vmem:[#allocation10 + $0x108] sm:$0xff] }
 0x9c2   :  { %8243 = vmatprep.subr.bf16.mxu0 %v13367_v33  ;;  %8307 = vmatprep.subr.bf16.mxu1 %v13368_v44  ;;  %v3838_v36 = vld [vmem:[#allocation10 + $0x128] sm:$0xff]  ;;  %v3836_v33 = vld [vmem:[#allocation10 + $0x118] sm:$0xff] }
 0x9c3   :  { %v8326_v44 = vpack.c.bf16 %v3838_v36, %v3834_v11  ;;  %v3869_v11 = vld [vmem:[#allocation10 + $0x220] sm:$0xff] }
 0x9c5   :  { %8245 = vmatpush1.bf16.msra.mxu0 %v13369_v31  ;;  %8309 = vmatpush1.bf16.msra.mxu1 %v13370_v61  ;;  %v3840_v31 = vld [vmem:[#allocation10 + $0x138] sm:$0xff] }
 0x9c6   :  { %8311 = vmatprep.subr.bf16.mxu0 %v8310_v9  ;;  %8375 = vmatprep.subr.bf16.mxu1 %v8374_v63  ;;  %v8390_v61 = vpack.c.bf16 %v3840_v31, %v3836_v33  ;;  %v8328_v9 = vpack.c.bf16 %v3837_v19, %v3833_v2  ;;  %v3846_v63 = vld [vmem:[#allocation10 + $0x168] sm:$0xff]  ;;  %v3871_v31 = vld [vmem:[#allocation10 + $0x230] sm:$0xff] }
 0x9c7   :  { %v8330_v62 = vpack.c.bf16 %v3846_v63, %v3842_v60  ;;  %v3874_v2 = vld [vmem:[#allocation10 + $0x248] sm:$0xff]  ;;  %v3877_v60 = vld [vmem:[#allocation10 + $0x260] sm:$0xff]  ;;  %v8410_v63 = vpack.c.bf16 %v3880_v8, %v3876_v23  ;;  %v3907_v23 = vld [vmem:[#allocation10 + $0x350] sm:$0xff] }
 0x9c8   :  { %3640 = vmatmul.mubr.f32.vlgmr.msra.gmra.mrb[8].mxu0 %v11618_v54  ;;  %3711 = vmatmul.mubr.f32.vlgmr.msra.gmra.mrb[24].mxu1 %v11618_v54  ;;  %v3878_v19 = vld [vmem:[#allocation10 + $0x268] sm:$0xff]  ;;  %v3911_v8 = vld [vmem:[#allocation10 + $0x370] sm:$0xff] }
 0x9c9   :  { %8313 = vmatpush1.bf16.msra.mxu0 %v8312_v18  ;;  %8377 = vmatpush1.bf16.msra.mxu1 %v8376_v58  ;;  %v3844_v18 = vld [vmem:[#allocation10 + $0x158] sm:$0xff]  ;;  %v3845_v58 = vld [vmem:[#allocation10 + $0x160] sm:$0xff] }
 0x9ca   :  { %8315 = vmatprep.subr.bf16.mxu0 %v8314_v52  ;;  %8379 = vmatprep.subr.bf16.mxu1 %v8378_v13  ;;  %v8394_v50 = vpack.c.bf16 %v3848_v49, %v3844_v18  ;;  %v8332_v41 = vpack.c.bf16 %v3845_v58, %v3841_v10  ;;  %v3847_v52 = vld [vmem:[#allocation10 + $0x170] sm:$0xff]  ;;  %v3882_v58 = vld [vmem:[#allocation10 + $0x288] sm:$0xff] }
 0x9cb   :  { %v8396_v13 = vpack.c.bf16 %v3847_v52, %v3843_v22  ;;  %v3879_v49 = vld [vmem:[#allocation10 + $0x270] sm:$0xff]  ;;  %v3888_v52 = vld [vmem:[#allocation10 + $0x2b8] sm:$0xff] }
 0x9cd   :  { %8317 = vmatpush1.bf16.msra.mxu0 %v8316_v12  ;;  %8381 = vmatpush1.bf16.msra.mxu1 %v8380_v55  ;;  %v8334_v12 = vpack.c.bf16 %v3854_v15, %v3850_v57  ;;  %v8398_v55 = vpack.c.bf16 %v3856_v59, %v3852_v29  ;;  %v3885_v57 = vld [vmem:[#allocation10 + $0x2a0] sm:$0xff]  ;;  %v3887_v59 = vld [vmem:[#allocation10 + $0x2b0] sm:$0xff] }
 0x9ce   :  { %8319 = vmatprep.subr.bf16.mxu0 %v8318_v0  ;;  %8383 = vmatprep.subr.bf16.mxu1 %v8382_v46  ;;  %v8336_v0 = vpack.c.bf16 %v3853_v53, %v3849_v37  ;;  %v3858_v46 = vld [vmem:[#allocation10 + $0x1c8] sm:$0xff] }
 0x9cf   :  { %v8338_v47 = vpack.c.bf16 %v3862_v35, %v3858_v46  ;;  %v3890_v53 = vld [vmem:[#allocation10 + $0x2c8] sm:$0xff]  ;;  %v3893_v46 = vld [vmem:[#allocation10 + $0x2e0] sm:$0xff] }
 0x9d1   :  { %8321 = vmatpush1.bf16.msra.mxu0 %v8320_v25  ;;  %8385 = vmatpush1.bf16.msra.mxu1 %v8384_v1  ;;  %v3864_v25 = vld [vmem:[#allocation10 + $0x1f8] sm:$0xff]  ;;  %v8340_v1 = vpack.c.bf16 %v3861_v4, %v3857_v21  ;;  %v3898_v4 = vld [vmem:[#allocation10 + $0x308] sm:$0xff] }
 0x9d2   :  { %8323 = vmatprep.subr.bf16.mxu0 %v8322_v30  ;;  %8387 = vmatprep.subr.bf16.mxu1 %v8386_v32  ;;  %v8402_v27 = vpack.c.bf16 %v3864_v25, %v3860_v7  ;;  %v3859_v30 = vld [vmem:[#allocation10 + $0x1d0] sm:$0xff]  ;;  %v3870_v32 = vld [vmem:[#allocation10 + $0x228] sm:$0xff] }
 0x9d3   :  { %v8404_v40 = vpack.c.bf16 %v3863_v28, %v3859_v30  ;;  %v8342_v38 = vpack.c.bf16 %v3870_v32, %v3866_v3  ;;  %v3895_v25 = vld [vmem:[#allocation10 + $0x2f0] sm:$0xff]  ;;  %v3904_v28 = vld [vmem:[#allocation10 + $0x338] sm:$0xff]  ;;  %v3901_v3 = vld [vmem:[#allocation10 + $0x320] sm:$0xff] }
 0x9d5   :  { %8325 = vmatpush1.bf16.msra.mxu0 %v8324_v17  ;;  %8389 = vmatpush1.bf16.msra.mxu1 %v8388_v42  ;;  %v3872_v17 = vld [vmem:[#allocation10 + $0x238] sm:$0xff]  ;;  %v3865_v42 = vld [vmem:[#allocation10 + $0x200] sm:$0xff] }
 0x9d6   :  { %8327 = vmatprep.subr.bf16.mxu0 %v8326_v44  ;;  %8391 = vmatprep.subr.bf16.mxu1 %v8390_v61  ;;  %v8406_v36 = vpack.c.bf16 %v3872_v17, %v3868_v16  ;;  %v8344_v33 = vpack.c.bf16 %v3869_v11, %v3865_v42  ;;  %v3867_v44 = vld [vmem:[#allocation10 + $0x210] sm:$0xff]  ;;  %v3906_v42 = vld [vmem:[#allocation10 + $0x348] sm:$0xff] }
 0x9d7   :  { %v8408_v61 = vpack.c.bf16 %v3871_v31, %v3867_v44  ;;  %v3903_v17 = vld [vmem:[#allocation10 + $0x330] sm:$0xff]  ;;  %v3912_v44 = vld [vmem:[#allocation10 + $0x378] sm:$0xff] }
 0x9d9   :  { %8329 = vmatpush1.bf16.msra.mxu0 %v8328_v9  ;;  %8393 = vmatpush1.bf16.msra.mxu1 %v8392_v39  ;;  %v8346_v9 = vpack.c.bf16 %v3878_v19, %v3874_v2  ;;  %v3873_v39 = vld [vmem:[#allocation10 + $0x240] sm:$0xff] }
 0x9da   :  { %8331 = vmatprep.subr.bf16.mxu0 %v8330_v62  ;;  %8395 = vmatprep.subr.bf16.mxu1 %v8394_v50  ;;  %v8348_v18 = vpack.c.bf16 %v3877_v60, %v3873_v39  ;;  %v3875_v62 = vld [vmem:[#allocation10 + $0x250] sm:$0xff]  ;;  %v3886_v50 = vld [vmem:[#allocation10 + $0x2a8] sm:$0xff]  ;;  %v3905_v2 = vld [vmem:[#allocation10 + $0x340] sm:$0xff] }
 0x9db   :  { %v8412_v10 = vpack.c.bf16 %v3879_v49, %v3875_v62  ;;  %v8350_v22 = vpack.c.bf16 %v3886_v50, %v3882_v58  ;;  %v3909_v19 = vld [vmem:[#allocation10 + $0x360] sm:$0xff]  ;;  %v3914_v39 = vld [vmem:[#allocation10 + $0x388] sm:$0xff]  ;;  %v3916_v62 = vld [vmem:[#allocation10 + $0x398] sm:$0xff] }
 0x9dc   :  { %v3918_v60 = vld [vmem:[#allocation10 + $0x3a8] sm:$0xff]  ;;  %v3920_v49 = vld [vmem:[#allocation10 + $0x3b8] sm:$0xff]  ;;  %v3917_v50 = vld [vmem:[#allocation10 + $0x3a0] sm:$0xff] }
 0x9dd   :  { %8333 = vmatpush1.bf16.msra.mxu0 %v8332_v41  ;;  %8397 = vmatpush1.bf16.msra.mxu1 %v8396_v13  ;;  %v3884_v41 = vld [vmem:[#allocation10 + $0x298] sm:$0xff]  ;;  %v3881_v13 = vld [vmem:[#allocation10 + $0x280] sm:$0xff]  ;;  %v8430_v58 = vpack.c.bf16 %v3920_v49, %v3916_v62 }
 0x9de   :  { %8335 = vmatprep.subr.bf16.mxu0 %v8334_v12  ;;  %8399 = vmatprep.subr.bf16.mxu1 %v8398_v55  ;;  %v8414_v15 = vpack.c.bf16 %v3888_v52, %v3884_v41  ;;  %v8352_v29 = vpack.c.bf16 %v3885_v57, %v3881_v13  ;;  %v3883_v12 = vld [vmem:[#allocation10 + $0x290] sm:$0xff]  ;;  %v3894_v55 = vld [vmem:[#allocation10 + $0x2e8] sm:$0xff] }
 0x9df   :  { %v8416_v37 = vpack.c.bf16 %v3887_v59, %v3883_v12  ;;  %v8354_v56 = vpack.c.bf16 %v3894_v55, %v3890_v53  ;;  %v3915_v41 = vld [vmem:[#allocation10 + $0x390] sm:$0xff]  ;;  %v3922_v13 = vld [vmem:[#allocation10 + $0x3c8] sm:$0xff]  ;;  %v3928_v59 = vld [vmem:[#allocation10 + $0x3f8] sm:$0xff] }
 0x9e0   :  { %v3926_v57 = vld [vmem:[#allocation10 + $0x3e8] sm:$0xff]  ;;  %v3925_v53 = vld [vmem:[#allocation10 + $0x3e0] sm:$0xff] }
 0x9e1   :  { %8337 = vmatpush1.bf16.msra.mxu0 %v8336_v0  ;;  %8401 = vmatpush1.bf16.msra.mxu1 %v8400_v43  ;;  %v3892_v0 = vld [vmem:[#allocation10 + $0x2d8] sm:$0xff]  ;;  %v3889_v43 = vld [vmem:[#allocation10 + $0x2c0] sm:$0xff]  ;;  %v8370_v12 = vpack.c.bf16 %v3926_v57, %v3922_v13 }
 0x9e2   :  { %8339 = vmatprep.subr.bf16.mxu0 %v8338_v47  ;;  %8403 = vmatprep.subr.bf16.mxu1 %v8402_v27  ;;  %v8418_v35 = vpack.c.bf16 %v3896_v45, %v3892_v0  ;;  %v8356_v7 = vpack.c.bf16 %v3893_v46, %v3889_v43  ;;  %v3891_v47 = vld [vmem:[#allocation10 + $0x2d0] sm:$0xff]  ;;  %v3902_v27 = vld [vmem:[#allocation10 + $0x328] sm:$0xff] }
 0x9e3   :  { %v8420_v21 = vpack.c.bf16 %v3895_v25, %v3891_v47  ;;  %v8358_v30 = vpack.c.bf16 %v3902_v27, %v3898_v4  ;;  %v3923_v0 = vld [vmem:[#allocation10 + $0x3d0] sm:$0xff]  ;;  %v4210_v46 = vld [vmem:[#allocation13 + $0x8] sm:$0xff]  ;;  %v4216_v25 = vld [vmem:[#allocation13 + $0x38] sm:$0xff] }
 0x9e4   :  { %v13371_v4 = vld [vmem:[#allocation159_spill] sm:$0xff]  ;;  %v13372_v27 = vld [vmem:[#allocation154_spill] sm:$0xff] }
 0x9e5   :  { %8341 = vmatpush1.bf16.msra.mxu0 %v8340_v1  ;;  %8405 = vmatpush1.bf16.msra.mxu1 %v8404_v40  ;;  %v3900_v1 = vld [vmem:[#allocation10 + $0x318] sm:$0xff]  ;;  %v3897_v40 = vld [vmem:[#allocation10 + $0x300] sm:$0xff] }
 0x9e6   :  { %8343 = vmatprep.subr.bf16.mxu0 %v8342_v38  ;;  %8407 = vmatprep.subr.bf16.mxu1 %v8406_v36  ;;  %v8422_v32 = vpack.c.bf16 %v3904_v28, %v3900_v1  ;;  %v8360_v16 = vpack.c.bf16 %v3901_v3, %v3897_v40  ;;  %v3899_v38 = vld [vmem:[#allocation10 + $0x310] sm:$0xff]  ;;  %v3910_v36 = vld [vmem:[#allocation10 + $0x368] sm:$0xff]  ;;  %v294_v1 = vadd.f32 %v13372_v27, %v13371_v4  ;;  %v13374_v28 = vld [vmem:[#allocation155_spill] sm:$0xff] }
 0x9e7   :  { %v8424_v11 = vpack.c.bf16 %v3903_v17, %v3899_v38  ;;  %v8362_v31 = vpack.c.bf16 %v3910_v36, %v3906_v42  ;;  %v4215_v4 = vld [vmem:[#allocation13 + $0x30] sm:$0xff]  ;;  %v4218_v27 = vld [vmem:[#allocation13 + $0x48] sm:$0xff] }
 0x9e9   :  { %8345 = vmatpush1.bf16.msra.mxu0 %v8344_v33  ;;  %8409 = vmatpush1.bf16.msra.mxu1 %v8408_v61  ;;  %v3908_v33 = vld [vmem:[#allocation10 + $0x358] sm:$0xff] }
 0x9ea   :  { %8347 = vmatprep.subr.bf16.mxu0 %v8346_v9  ;;  %8411 = vmatprep.subr.bf16.mxu1 %v8410_v63  ;;  %v8426_v61 = vpack.c.bf16 %v3912_v44, %v3908_v33  ;;  %v8364_v9 = vpack.c.bf16 %v3909_v19, %v3905_v2  ;;  %v8428_v63 = vpack.c.bf16 %v3911_v8, %v3907_v23 }
 0x9ed   :  { %8349 = vmatpush1.bf16.msra.mxu0 %v8348_v18  ;;  %8413 = vmatpush1.bf16.msra.mxu1 %v8412_v10  ;;  %v8366_v18 = vpack.c.bf16 %v3918_v60, %v3914_v39  ;;  %v3913_v10 = vld [vmem:[#allocation10 + $0x380] sm:$0xff] }
 0x9ee   :  { %8351 = vmatprep.subr.bf16.mxu0 %v8350_v22  ;;  %8415 = vmatprep.subr.bf16.mxu1 %v8414_v15  ;;  %v3919_v22 = vld [vmem:[#allocation10 + $0x3b0] sm:$0xff]  ;;  %v8368_v52 = vpack.c.bf16 %v3917_v50, %v3913_v10  ;;  %v3924_v15 = vld [vmem:[#allocation10 + $0x3d8] sm:$0xff] }
 0x9ef   :  { %v8434_v55 = vpack.c.bf16 %v3928_v59, %v3924_v15 }
 0x9f1   :  { %8353 = vmatpush1.bf16.msra.mxu0 %v8352_v29  ;;  %8417 = vmatpush1.bf16.msra.mxu1 %v8416_v37  ;;  %v8432_v29 = vpack.c.bf16 %v3919_v22, %v3915_v41  ;;  %v3921_v37 = vld [vmem:[#allocation10 + $0x3c0] sm:$0xff] }
 0x9f2   :  { %8355 = vmatprep.subr.bf16.mxu0 %v8354_v56  ;;  %8419 = vmatprep.subr.bf16.mxu1 %v8418_v35  ;;  %v3927_v56 = vld [vmem:[#allocation10 + $0x3f0] sm:$0xff]  ;;  %v8372_v45 = vpack.c.bf16 %v3925_v53, %v3921_v37  ;;  %v4214_v35 = vld [vmem:[#allocation13 + $0x28] sm:$0xff] }
 0x9f3   :  { %v8436_v43 = vpack.c.bf16 %v3927_v56, %v3923_v0  ;;  %v11690_v47 = vpack.c.bf16 %v4214_v35, %v4210_v46  ;;  %v4213_v35 = vld [vmem:[#allocation13 + $0x20] sm:$0xff] }
 0x9f5   :  { %8357 = vmatpush1.bf16.msra.mxu0 %v8356_v7  ;;  %8421 = vmatpush1.bf16.msra.mxu1 %v8420_v21  ;;  %v4212_v7 = vld [vmem:[#allocation13 + $0x18] sm:$0xff] }
 0x9f6   :  { %8359 = vmatprep.subr.bf16.mxu0 %v8358_v30  ;;  %8423 = vmatprep.subr.bf16.mxu1 %v8422_v32  ;;  %v11692_v21 = vpack.c.bf16 %v4216_v25, %v4212_v7  ;;  %v13373_v30 = vld [vmem:[#allocation158_spill] sm:$0xff]  ;;  %v4211_v25 = vld [vmem:[#allocation13 + $0x10] sm:$0xff] }
 0x9f7   :  { %v296_v40 = vadd.f32 %v13374_v28, %v13373_v30  ;;  %v4222_v30 = vld [vmem:[#allocation13 + $0x68] sm:$0xff]  ;;  %v4220_v28 = vld [vmem:[#allocation13 + $0x58] sm:$0xff] }
 0x9f9   :  { %8361 = vmatpush1.bf16.msra.mxu0 %v8360_v16  ;;  %8425 = vmatpush1.bf16.msra.mxu1 %v8424_v11 }
 0x9fa   :  { %8363 = vmatprep.subr.bf16.mxu0 %v8362_v31  ;;  %8427 = vmatprep.subr.bf16.mxu1 %v8426_v61 }
 0x9fd   :  { %8365 = vmatpush1.bf16.msra.mxu0 %v8364_v9  ;;  %8429 = vmatpush1.bf16.msra.mxu1 %v8428_v63 }
 0x9fe   :  { %8367 = vmatprep.subr.bf16.mxu0 %v8366_v18  ;;  %8431 = vmatprep.subr.bf16.mxu1 %v8430_v58 }
 0xa01   :  { %8369 = vmatpush1.bf16.msra.mxu0 %v8368_v52  ;;  %8433 = vmatpush1.bf16.msra.mxu1 %v8432_v29 }
 0xa02   :  { %8371 = vmatprep.subr.bf16.mxu0 %v8370_v12  ;;  %8435 = vmatprep.subr.bf16.mxu1 %v8434_v55 }
 0xa05   :  { %8373 = vmatpush1.bf16.msra.mxu0 %v8372_v45  ;;  %8437 = vmatpush1.bf16.msra.mxu1 %v8436_v43 }
 0xa06   :  { %8439 = vmatprep.subr.bf16.mxu0 %v11690_v47  ;;  %8471 = vmatprep.subr.bf16.mxu1 %v11692_v21 }
 0xa5b   :  { %v3499_v3 = vpop.f32.mrb[30].mxu0  ;;  %v3570_v32 = vpop.f32.mrb[22].mxu1 }
 0xa5c   :  { %v3722_v16 = vadd.f32 %v3499_v3, %v294_v1  ;;  %v3501_v38 = vpop.f32.mrb[31].mxu0  ;;  %v3572_v17 = vpop.f32.mrb[23].mxu1  ;;  %v9150_v31 = vadd.f32 %v3570_v32, %v13059_v48 }
 0xa5d   :  { %v3723_v42 = vadd.f32 %v3501_v38, %v296_v40  ;;  %v9151_v33 = vadd.f32 %v3572_v17, %v12873_v5  ;;  %v4224_v40 = vld [vmem:[#allocation13 + $0x78] sm:$0xff]  ;;  %v4217_v38 = vld [vmem:[#allocation13 + $0x40] sm:$0xff]  ;;  %v11714_v17 = vpack.c.bf16 %v4222_v30, %v4218_v27  ;;  %v13381_v27 = vld [vmem:[#allocation81_spill] sm:$0xff] }
 0xa5e   :  { %v6178_v11 = vmul.f32 -1.442695, %v3722_v16  ;;  %v11712_v16 = vpack.c.bf16 %v4215_v4, %v4211_v25  ;;  %v4252_v25 = vld [vmem:[#allocation13 + $0x158] sm:$0xff] }
 0xa5f   :  { %v6179_v36 = vmul.f32 -1.442695, %v3723_v42  ;;  %v6180_v44 = vmul.f32 -1.442695, %v9151_v33  ;;  %v11716_v42 = vpack.c.bf16 %v4224_v40, %v4220_v28  ;;  %v4226_v33 = vld [vmem:[#allocation13 + $0x88] sm:$0xff]  ;;  %v4256_v4 = vld [vmem:[#allocation13 + $0x178] sm:$0xff] }
 0xa60   :  { %9538 = vpow2.f32 %v6178_v11  ;;  %v4219_v11 = vld [vmem:[#allocation13 + $0x50] sm:$0xff]  ;;  %v4249_v28 = vld [vmem:[#allocation13 + $0x140] sm:$0xff] }
 0xa61   :  { %9540 = vpow2.f32 %v6179_v36  ;;  %v4223_v36 = vld [vmem:[#allocation13 + $0x70] sm:$0xff]  ;;  %v4253_v40 = vld [vmem:[#allocation13 + $0x160] sm:$0xff] }
 0xa62   :  { %9542 = vpow2.f32 %v6180_v44  ;;  %v13375_v44 = vld [vmem:[#allocation167_spill] sm:$0xff] }
 0xa63   :  { %9544 = vtanh.f32 %v9150_v31  ;;  %v4230_v31 = vld [vmem:[#allocation13 + $0xa8] sm:$0xff] }
 0xa6a   :  { %v9539_v61 = vpop.eup %9538 }
 0xa6b   :  { %v9541_v2 = vpop.eup %9540  ;;  %v3729_v19 = vadd.f32 1.0, %v9539_v61  ;;  %v4228_v61 = vld [vmem:[#allocation13 + $0x98] sm:$0xff] }
 0xa6c   :  { %v3735_v23 = vadd.f32 1.0, %v9541_v2  ;;  %v9543_v9 = vpop.eup %9542  ;;  %v4232_v2 = vld [vmem:[#allocation13 + $0xb8] sm:$0xff] }
 0xa6d   :  { %9546 = vrcp.f32 %v3729_v19  ;;  %v9545_v8 = vpop.eup %9544  ;;  %v3742_v18 = vadd.f32 1.0, %v9543_v9  ;;  %v4225_v9 = vld [vmem:[#allocation13 + $0x80] sm:$0xff] }
 0xa6e   :  { %9548 = vrcp.f32 %v3735_v23  ;;  %v11726_v23 = vpack.c.bf16 %v4223_v36, %v4219_v11  ;;  %v4255_v11 = vld [vmem:[#allocation13 + $0x170] sm:$0xff]  ;;  %v4258_v36 = vld [vmem:[#allocation13 + $0x188] sm:$0xff] }
 0xa6f   :  { %9550 = vrcp.f32 %v3742_v18  ;;  %v4234_v18 = vld [vmem:[#allocation13 + $0xc8] sm:$0xff] }
 0xa77   :  { %v9547_v39 = vpop.eup %9546 }
 0xa78   :  { %v9549_v60 = vpop.eup %9548  ;;  %v3746_v63 = vmul.f32 %v9547_v39, %v9545_v8  ;;  %v4229_v8 = vld [vmem:[#allocation13 + $0xa0] sm:$0xff]  ;;  %v11730_v39 = vpack.c.bf16 %v4230_v31, %v4226_v33  ;;  %v4260_v31 = vld [vmem:[#allocation13 + $0x198] sm:$0xff] }
 0xa79   :  { %v3745_v62 = vmul.f32 %v9549_v60, %v11604_v20  ;;  %v9551_v48 = vpop.eup %9550  ;;  %v11732_v60 = vpack.c.bf16 %v4232_v2, %v4228_v61  ;;  %v13382_v33 = vld [vmem:[#allocation87_spill] sm:$0xff]  ;;  %v4264_v61 = vld [vmem:[#allocation13 + $0x1b8] sm:$0xff]  ;;  %v13383_v2 = vld [vmem:[#allocation73_spill] sm:$0xff] }
 0xa7b   :  { %v3747_v5 = vadd.f32 %v3746_v63, %v3745_v62  ;;  %v4227_v63 = vld [vmem:[#allocation13 + $0x90] sm:$0xff]  ;;  %v13376_v62 = vld [vmem:[#allocation103_spill] sm:$0xff] }
 0xa7d   :  { %9552 = vtanh.f32 %v3747_v5  ;;  %v4238_v5 = vld [vmem:[#allocation13 + $0xe8] sm:$0xff] }
 0xa87   :  { %v9553_v49 = vpop.eup %9552 }
 0xa88   :  { %v11703_v10 = vmul.f32 %v9553_v49, %v9551_v48  ;;  %v4236_v48 = vld [vmem:[#allocation13 + $0xd8] sm:$0xff] }
 0xa89   :  { %v4240_v49 = vld [vmem:[#allocation13 + $0xf8] sm:$0xff] }
 0xa9b   :  { %v3641_v58 = vpop.f32.mrb[8].mxu0  ;;  %v3712_v50 = vpop.f32.mrb[24].mxu1 }
 0xa9c   :  { %v9152_v41 = vadd.f32 %v3641_v58, %v12966_v14  ;;  %v3643_v22 = vpop.f32.mrb[9].mxu0  ;;  %v3714_v52 = vpop.f32.mrb[25].mxu1  ;;  %v9168_v12 = vadd.f32 %v3712_v50, %v10664_v34  ;;  %v4209_v34 = vld [vmem:[#allocation13] sm:$0xff]  ;;  %v13377_v58 = vld [vmem:[#allocation89_spill] sm:$0xff]  ;;  %v11740_v50 = vpack.c.bf16 %v4229_v8, %v4225_v9  ;;  %v11788_v9 = vpack.c.bf16 %v4253_v40, %v4249_v28 }
 0xa9d   :  { %v9153_v13 = vadd.f32 %v3643_v22, %v12872_v51  ;;  %v9169_v20 = vadd.f32 %v3714_v52, %v10666_v24  ;;  %v11710_v32 = vpack.c.bf16 %v4213_v35, %v4209_v34  ;;  %v4233_v22 = vld [vmem:[#allocation13 + $0xc0] sm:$0xff]  ;;  %v4250_v34 = vld [vmem:[#allocation13 + $0x148] sm:$0xff] }
 0xa9e   :  { %v6181_v57 = vmul.f32 -1.442695, %v9152_v41  ;;  %v4237_v52 = vld [vmem:[#allocation13 + $0xe0] sm:$0xff] }
 0xa9f   :  { %v6182_v15 = vmul.f32 -1.442695, %v9153_v13  ;;  %v6183_v29 = vmul.f32 -1.442695, %v9169_v20  ;;  %v11746_v13 = vpack.c.bf16 %v4238_v5, %v4234_v18  ;;  %v4239_v20 = vld [vmem:[#allocation13 + $0xf0] sm:$0xff]  ;;  %v13380_v35 = vld [vmem:[#allocation83_spill] sm:$0xff] }
 0xaa0   :  { %9554 = vpow2.f32 %v6181_v57  ;;  %v11748_v57 = vpack.c.bf16 %v4240_v49, %v4236_v48  ;;  %v4259_v5 = vld [vmem:[#allocation13 + $0x190] sm:$0xff]  ;;  %v4266_v49 = vld [vmem:[#allocation13 + $0x1c8] sm:$0xff] }
 0xaa1   :  { %9556 = vpow2.f32 %v6182_v15  ;;  %v4235_v15 = vld [vmem:[#allocation13 + $0xd0] sm:$0xff] }
 0xaa2   :  { %9558 = vpow2.f32 %v6183_v29  ;;  %v4242_v29 = vld [vmem:[#allocation13 + $0x108] sm:$0xff]  ;;  %v4263_v48 = vld [vmem:[#allocation13 + $0x1b0] sm:$0xff] }
 0xaa3   :  { %9560 = vtanh.f32 %v9168_v12  ;;  %v13378_v12 = vld [vmem:[#allocation79_spill] sm:$0xff] }
 0xaaa   :  { %v9555_v59 = vpop.eup %9554 }
 0xaab   :  { %v9557_v37 = vpop.eup %9556  ;;  %v3761_v53 = vadd.f32 1.0, %v9555_v59  ;;  %v4246_v59 = vld [vmem:[#allocation13 + $0x128] sm:$0xff] }
 0xaac   :  { %v3767_v55 = vadd.f32 1.0, %v9557_v37  ;;  %v9559_v14 = vpop.eup %9558  ;;  %v4244_v37 = vld [vmem:[#allocation13 + $0x118] sm:$0xff] }
 0xaad   :  { %9562 = vrcp.f32 %v3761_v53  ;;  %v9561_v0 = vpop.eup %9560  ;;  %v3774_v43 = vadd.f32 1.0, %v9559_v14  ;;  %v4248_v53 = vld [vmem:[#allocation13 + $0x138] sm:$0xff]  ;;  %v11756_v14 = vpack.c.bf16 %v4237_v52, %v4233_v22  ;;  %v4270_v22 = vld [vmem:[#allocation13 + $0x1e8] sm:$0xff] }
 0xaae   :  { %9564 = vrcp.f32 %v3767_v55  ;;  %v13379_v55 = vld [vmem:[#allocation85_spill] sm:$0xff]  ;;  %v4268_v52 = vld [vmem:[#allocation13 + $0x1d8] sm:$0xff] }
 0xaaf   :  { %9566 = vrcp.f32 %v3774_v43  ;;  %v11764_v43 = vpack.c.bf16 %v4248_v53, %v4244_v37  ;;  %v11810_v37 = vpack.c.bf16 %v4270_v22, %v4266_v49 }
 0xab7   :  { %v9563_v51 = vpop.eup %9562 }
 0xab8   :  { %v9565_v56 = vpop.eup %9564  ;;  %v3778_v45 = vmul.f32 %v9563_v51, %v9561_v0  ;;  %v11758_v0 = vpack.c.bf16 %v4239_v20, %v4235_v15  ;;  %v4241_v51 = vld [vmem:[#allocation13 + $0x100] sm:$0xff]  ;;  %v4272_v15 = vld [vmem:[#allocation13 + $0x1f8] sm:$0xff] }
 0xab9   :  { %v3777_v46 = vmul.f32 %v9565_v56, %v11613_v26  ;;  %v9567_v7 = vpop.eup %9566  ;;  %v4221_v26 = vld [vmem:[#allocation13 + $0x60] sm:$0xff]  ;;  %v11812_v53 = vpack.c.bf16 %v4272_v15, %v4268_v52 }
 0xaba   :  { %v11724_v19 = vpack.c.bf16 %v4221_v26, %v4217_v38  ;;  %v4245_v56 = vld [vmem:[#allocation13 + $0x120] sm:$0xff]  ;;  %v11780_v38 = vpack.c.bf16 %v4256_v4, %v4252_v25  ;;  %v4251_v26 = vld [vmem:[#allocation13 + $0x150] sm:$0xff]  ;;  %v13389_v4 = vld [vmem:[#allocation156_spill] sm:$0xff] }
 0xabb   :  { %v3779_v24 = vadd.f32 %v3778_v45, %v3777_v46  ;;  %v11762_v45 = vpack.c.bf16 %v4246_v59, %v4242_v29  ;;  %v4243_v46 = vld [vmem:[#allocation13 + $0x110] sm:$0xff]  ;;  %v11790_v8 = vpack.c.bf16 %v4255_v11, %v4251_v26  ;;  %v13385_v20 = vld [vmem:[#allocation71_spill] sm:$0xff] }
 0xabc   :  { %v4265_v59 = vld [vmem:[#allocation13 + $0x1c0] sm:$0xff] }
 0xabd   :  { %9568 = vtanh.f32 %v3779_v24  ;;  %v4247_v24 = vld [vmem:[#allocation13 + $0x130] sm:$0xff] }
 0xabe   :  { %v11774_v30 = vpack.c.bf16 %v4247_v24, %v4243_v46  ;;  %v13386_v46 = vld [vmem:[#allocation166_spill] sm:$0xff] }
 0xac7   :  { %v9569_v1 = vpop.eup %9568 }
 0xac8   :  { %v3781_v3 = vmul.f32 %v9569_v1, %v9567_v7  ;;  %v4254_v7 = vld [vmem:[#allocation13 + $0x168] sm:$0xff]  ;;  %v11772_v1 = vpack.c.bf16 %v4245_v56, %v4241_v51  ;;  %v4267_v51 = vld [vmem:[#allocation13 + $0x1d0] sm:$0xff] }
 0xac9   :  { %v4271_v56 = vld [vmem:[#allocation13 + $0x1f0] sm:$0xff] }
 0xaca   :  { %4015 = vmatprep.mubr.f32.mxu0 %v3781_v3  ;;  %4128 = vmatprep.mubr.f32.mxu1 %v3781_v3  ;;  %v11778_v3 = vpack.c.bf16 %v4254_v7, %v4250_v34  ;;  %v11822_v34 = vpack.c.bf16 %v4271_v56, %v4267_v51  ;;  %v13388_v7 = vld [vmem:[#allocation157_spill] sm:$0xff] }
 0xacb   :  { %4016 = vmatmul.mubr.f32.vlgmr.msra.gmra.mrb[32].mxu0 %v13375_v44  ;;  %4129 = vmatmul.mubr.f32.vlgmr.msra.gmra.mrb[40].mxu1 %v13375_v44  ;;  %v4262_v44 = vld [vmem:[#allocation13 + $0x1a8] sm:$0xff] }
 0xacc   :  { %4021 = vmatprep.mubr.f32.mxu0 %v11616_v6  ;;  %4134 = vmatprep.mubr.f32.mxu1 %v11616_v6  ;;  %v4231_v6 = vld [vmem:[#allocation13 + $0xb0] sm:$0xff]  ;;  %v11794_v18 = vpack.c.bf16 %v4262_v44, %v4258_v36 }
 0xacd   :  { %8441 = vmatpush1.bf16.msra.mxu0 %v11710_v32  ;;  %8473 = vmatpush1.bf16.msra.mxu1 %v11712_v16  ;;  %v11742_v41 = vpack.c.bf16 %v4231_v6, %v4227_v63  ;;  %v4257_v63 = vld [vmem:[#allocation13 + $0x180] sm:$0xff] }
 0xace   :  { %8443 = vmatprep.subr.bf16.mxu0 %v11714_v17  ;;  %8475 = vmatprep.subr.bf16.mxu1 %v11716_v42  ;;  %v4261_v6 = vld [vmem:[#allocation13 + $0x1a0] sm:$0xff] }
 0xacf   :  { %4022 = vmatmul.mubr.f32.gmra.mrb[34].mxu0 %v13376_v62  ;;  %4135 = vmatmul.mubr.f32.gmra.mrb[42].mxu1 %v13376_v62  ;;  %v11796_v62 = vpack.c.bf16 %v4264_v61, %v4260_v31  ;;  %v11804_v29 = vpack.c.bf16 %v4261_v6, %v4257_v63 }
 0xad0   :  { %4027 = vmatprep.mubr.f32.mxu0 %v13377_v58  ;;  %4140 = vmatprep.mubr.f32.mxu1 %v13377_v58  ;;  %v13384_v58 = vld [vmem:[#allocation102_spill] sm:$0xff] }
 0xad1   :  { %8445 = vmatpush1.bf16.msra.mxu0 %v11724_v19  ;;  %8477 = vmatpush1.bf16.msra.mxu1 %v11726_v23 }
 0xad2   :  { %8447 = vmatprep.subr.bf16.mxu0 %v11730_v39  ;;  %8479 = vmatprep.subr.bf16.mxu1 %v11732_v60 }
 0xad3   :  { %4028 = vmatmul.mubr.f32.gmra.mrb[36].mxu0 %v13378_v12  ;;  %4141 = vmatmul.mubr.f32.gmra.mrb[44].mxu1 %v13378_v12  ;;  %v11806_v12 = vpack.c.bf16 %v4263_v48, %v4259_v5  ;;  %v13392_v5 = vld [vmem:[#allocation160_spill] sm:$0xff] }
 0xad4   :  { %4033 = vmatprep.mubr.f32.mxu0 %v13379_v55  ;;  %4146 = vmatprep.mubr.f32.mxu1 %v13379_v55  ;;  %v4269_v55 = vld [vmem:[#allocation13 + $0x1e0] sm:$0xff] }
 0xad5   :  { %8449 = vmatpush1.bf16.msra.mxu0 %v11740_v50  ;;  %8481 = vmatpush1.bf16.msra.mxu1 %v11742_v41  ;;  %v11820_v24 = vpack.c.bf16 %v4269_v55, %v4265_v59 }
 0xad6   :  { %8451 = vmatprep.subr.bf16.mxu0 %v11746_v13  ;;  %8483 = vmatprep.subr.bf16.mxu1 %v11748_v57 }
 0xad7   :  { %4034 = vmatmul.mubr.f32.gmra.mrb[38].mxu0 %v13380_v35  ;;  %4147 = vmatmul.mubr.f32.gmra.mrb[46].mxu1 %v13380_v35  ;;  %v3929_v35 = vld [vmem:[%s12274_s5] sm:$0xf] }
 0xad8   :  { %4039 = vmatprep.mubr.f32.mxu0 %v13381_v27  ;;  %4152 = vmatprep.mubr.f32.mxu1 %v13381_v27  ;;  %v11874_v25 = vrot.slane %v3929_v35, %v13388_v7  ;;  %v13390_v27 = vsub.s32 1, %v13389_v4  ;;  %v11887_v48 = vrot.slane %v3929_v35, %v13392_v5 }
 0xad9   :  { %8453 = vmatpush1.bf16.msra.mxu0 %v11756_v14  ;;  %8485 = vmatpush1.bf16.msra.mxu1 %v11758_v0 }
 0xada   :  { %8455 = vmatprep.subr.bf16.mxu0 %v11762_v45  ;;  %8487 = vmatprep.subr.bf16.mxu1 %v11764_v43  ;;  %v11878_v28 = vrot.slane %v3929_v35, %v13390_v27 }
 0xadb   :  { %4040 = vmatmul.mubr.f32.gmra.mrb[40].mxu0 %v13382_v33  ;;  %4153 = vmatmul.mubr.f32.gmra.mrb[48].mxu1 %v13382_v33 }
 0xadc   :  { %4045 = vmatprep.mubr.f32.mxu0 %v13383_v2  ;;  %4158 = vmatprep.mubr.f32.mxu1 %v13383_v2  ;;  %v13391_v2 = vld [vmem:[#allocation164_spill] sm:$0xff] }
 0xadd   :  { %8457 = vmatpush1.bf16.msra.mxu0 %v11772_v1  ;;  %8489 = vmatpush1.bf16.msra.mxu1 %v11774_v30  ;;  %v11883_v63 = vrot.slane %v3929_v35, %v13391_v2 }
 0xade   :  { %8459 = vmatprep.subr.bf16.mxu0 %v11778_v3  ;;  %8491 = vmatprep.subr.bf16.mxu1 %v11780_v38 }
 0xadf   :  { %4046 = vmatmul.mubr.f32.gmra.mrb[42].mxu0 %v13384_v58  ;;  %4159 = vmatmul.mubr.f32.gmra.mrb[50].mxu1 %v13384_v58 }
 0xae0   :  { %4051 = vmatprep.mubr.f32.mxu0 %v13385_v20  ;;  %4164 = vmatprep.mubr.f32.mxu1 %v13385_v20 }
 0xae1   :  { %8461 = vmatpush1.bf16.msra.mxu0 %v11788_v9  ;;  %8493 = vmatpush1.bf16.msra.mxu1 %v11790_v8 }
 0xae2   :  { %8463 = vmatprep.subr.bf16.mxu0 %v11794_v18  ;;  %8495 = vmatprep.subr.bf16.mxu1 %v11796_v62 }
 0xae3   :  { %4052 = vmatmul.mubr.f32.gmra.mrb[44].mxu0 %v11618_v54  ;;  %4165 = vmatmul.mubr.f32.gmra.mrb[52].mxu1 %v11618_v54  ;;  %v13387_v54 = vmov 0.0  }
 0xae4   :  { %4057 = vmatprep.mubr.f32.mxu0 %v13386_v46  ;;  %4170 = vmatprep.mubr.f32.mxu1 %v13386_v46 }
 0xae5   :  { %8465 = vmatpush1.bf16.msra.mxu0 %v11804_v29  ;;  %8497 = vmatpush1.bf16.msra.mxu1 %v11806_v12 }
 0xae6   :  { %8467 = vmatprep.subr.bf16.mxu0 %v11810_v37  ;;  %8499 = vmatprep.subr.bf16.mxu1 %v11812_v53 }
 0xae7   :  { %4058 = vmatmul.mubr.f32.gmra.mrb[46].mxu0 %v11703_v10  ;;  %4171 = vmatmul.mubr.f32.gmra.mrb[54].mxu1 %v11703_v10 }
 0xae8   :  { %4337 = vmatprep.mubr.f32.mxu0 %v13387_v54  ;;  %4408 = vmatprep.mubr.f32.mxu1 %v13387_v54 }
 0xae9   :  { %8469 = vmatpush1.bf16.msra.mxu0 %v11820_v24  ;;  %8501 = vmatpush1.bf16.msra.mxu1 %v11822_v34 }
 0xaea   :  { %8503 = vmatprep.subr.bf16.mxu0 %v11690_v47  ;;  %8535 = vmatprep.subr.bf16.mxu1 %v11692_v21 }
 0xaec   :  { %4338 = vmatmul.mubr.f32.vlgmr.msra.gmra.mrb[32].mxu0 %v13387_v54  ;;  %4409 = vmatmul.mubr.f32.vlgmr.msra.gmra.mrb[40].mxu1 %v13387_v54 }
 0xaed   :  { %8505 = vmatpush1.bf16.msra.mxu0 %v11710_v32  ;;  %8537 = vmatpush1.bf16.msra.mxu1 %v11712_v16 }
 0xaee   :  { %8507 = vmatprep.subr.bf16.mxu0 %v11714_v17  ;;  %8539 = vmatprep.subr.bf16.mxu1 %v11716_v42 }
 0xaef   :  { %4511 = vmatprep.mubr.f32.mxu0 %v13387_v54  ;;  %4582 = vmatprep.mubr.f32.mxu1 %v13387_v54 }
 0xaf1   :  { %8509 = vmatpush1.bf16.msra.mxu0 %v11724_v19  ;;  %8541 = vmatpush1.bf16.msra.mxu1 %v11726_v23 }
 0xaf2   :  { %8511 = vmatprep.subr.bf16.mxu0 %v11730_v39  ;;  %8543 = vmatprep.subr.bf16.mxu1 %v11732_v60 }
 0xaf5   :  { %8513 = vmatpush1.bf16.msra.mxu0 %v11740_v50  ;;  %8545 = vmatpush1.bf16.msra.mxu1 %v11742_v41 }
 0xaf6   :  { %8515 = vmatprep.subr.bf16.mxu0 %v11746_v13  ;;  %8547 = vmatprep.subr.bf16.mxu1 %v11748_v57 }
 0xaf9   :  { %8517 = vmatpush1.bf16.msra.mxu0 %v11756_v14  ;;  %8549 = vmatpush1.bf16.msra.mxu1 %v11758_v0 }
 0xafa   :  { %8519 = vmatprep.subr.bf16.mxu0 %v11762_v45  ;;  %8551 = vmatprep.subr.bf16.mxu1 %v11764_v43 }
 0xafd   :  { %8521 = vmatpush1.bf16.msra.mxu0 %v11772_v1  ;;  %8553 = vmatpush1.bf16.msra.mxu1 %v11774_v30 }
 0xafe   :  { %8523 = vmatprep.subr.bf16.mxu0 %v11778_v3  ;;  %8555 = vmatprep.subr.bf16.mxu1 %v11780_v38 }
 0xb01   :  { %8525 = vmatpush1.bf16.msra.mxu0 %v11788_v9  ;;  %8557 = vmatpush1.bf16.msra.mxu1 %v11790_v8 }
 0xb02   :  { %8527 = vmatprep.subr.bf16.mxu0 %v11794_v18  ;;  %8559 = vmatprep.subr.bf16.mxu1 %v11796_v62 }
 0xb05   :  { %8529 = vmatpush1.bf16.msra.mxu0 %v11804_v29  ;;  %8561 = vmatpush1.bf16.msra.mxu1 %v11806_v12 }
 0xb06   :  { %8531 = vmatprep.subr.bf16.mxu0 %v11810_v37  ;;  %8563 = vmatprep.subr.bf16.mxu1 %v11812_v53 }
 0xb09   :  { %8533 = vmatpush1.bf16.msra.mxu0 %v11820_v24  ;;  %8565 = vmatpush1.bf16.msra.mxu1 %v11822_v34 }
 0xb0a   :  { %8567 = vmatprep.subr.bf16.mxu0 %v11690_v47  ;;  %8599 = vmatprep.subr.bf16.mxu1 %v11692_v21 }
 0xbbf   :  { %v4339_v40 = vpop.f32.mrb[32].mxu0  ;;  %v4410_v26 = vpop.f32.mrb[40].mxu1 }
 0xbc0   :  { %v9184_v11 = vadd.f32 %v4339_v40, %v11874_v25  ;;  %v4341_v36 = vpop.f32.mrb[33].mxu0  ;;  %v4412_v33 = vpop.f32.mrb[41].mxu1  ;;  %v9200_v58 = vadd.f32 %v4410_v26, %v11887_v48 }
 0xbc1   :  { %v9185_v44 = vadd.f32 %v4341_v36, %v11878_v28  ;;  %v9201_v6 = vadd.f32 %v4412_v33, %v11883_v63 }
 0xbc2   :  { %v6184_v31 = vmul.f32 -1.442695, %v9184_v11 }
 0xbc3   :  { %v6185_v61 = vmul.f32 -1.442695, %v9185_v44  ;;  %v6186_v49 = vmul.f32 -1.442695, %v9201_v6 }
 0xbc4   :  { %9570 = vpow2.f32 %v6184_v31 }
 0xbc5   :  { %9572 = vpow2.f32 %v6185_v61 }
 0xbc6   :  { %9574 = vpow2.f32 %v6186_v49 }
 0xbc7   :  { %9576 = vtanh.f32 %v9200_v58 }
 0xbce   :  { %v9571_v22 = vpop.eup %9570 }
 0xbcf   :  { %v9573_v52 = vpop.eup %9572  ;;  %v4426_v15 = vadd.f32 1.0, %v9571_v22 }
 0xbd0   :  { %v4432_v20 = vadd.f32 1.0, %v9573_v52  ;;  %v9575_v59 = vpop.eup %9574 }
 0xbd1   :  { %9578 = vrcp.f32 %v4426_v15  ;;  %v9577_v55 = vpop.eup %9576  ;;  %v4439_v27 = vadd.f32 1.0, %v9575_v59 }
 0xbd2   :  { %9580 = vrcp.f32 %v4432_v20 }
 0xbd3   :  { %9582 = vrcp.f32 %v4439_v27 }
 0xbdb   :  { %v9579_v51 = vpop.eup %9578 }
 0xbdc   :  { %v9581_v56 = vpop.eup %9580  ;;  %v4443_v4 = vmul.f32 %v9579_v51, %v9577_v55 }
 0xbdd   :  { %v4442_v40 = vmul.f32 0.0, %v9581_v56  ;;  %v9583_v26 = vpop.eup %9582 }
 0xbdf   :  { %v11890_v35 = vadd.f32 %v4443_v4, %v4442_v40 }
 0xbe1   :  { %9584 = vtanh.f32 %v11890_v35 }
 0xbeb   :  { %v9585_v11 = vpop.eup %9584 }
 0xbec   :  { %v4446_v36 = vmul.f32 %v9585_v11, %v9583_v26 }
 0xbee   :  { %4512 = vmatmul.mubr.f32.vlgmr.msra.gmra.mrb[34].mxu0 %v4446_v36  ;;  %4583 = vmatmul.mubr.f32.vlgmr.msra.gmra.mrb[42].mxu1 %v4446_v36 }
 0xbef   :  { %8569 = vmatpush1.bf16.msra.mxu0 %v11710_v32  ;;  %8601 = vmatpush1.bf16.msra.mxu1 %v11712_v16 }
 0xbf0   :  { %8571 = vmatprep.subr.bf16.mxu0 %v11714_v17  ;;  %8603 = vmatprep.subr.bf16.mxu1 %v11716_v42 }
 0xbf1   :  { %4686 = vmatprep.mubr.f32.mxu0 %v13387_v54  ;;  %4757 = vmatprep.mubr.f32.mxu1 %v13387_v54 }
 0xbf3   :  { %8573 = vmatpush1.bf16.msra.mxu0 %v11724_v19  ;;  %8605 = vmatpush1.bf16.msra.mxu1 %v11726_v23 }
 0xbf4   :  { %8575 = vmatprep.subr.bf16.mxu0 %v11730_v39  ;;  %8607 = vmatprep.subr.bf16.mxu1 %v11732_v60 }
 0xbf7   :  { %8577 = vmatpush1.bf16.msra.mxu0 %v11740_v50  ;;  %8609 = vmatpush1.bf16.msra.mxu1 %v11742_v41 }
 0xbf8   :  { %8579 = vmatprep.subr.bf16.mxu0 %v11746_v13  ;;  %8611 = vmatprep.subr.bf16.mxu1 %v11748_v57 }
 0xbfb   :  { %8581 = vmatpush1.bf16.msra.mxu0 %v11756_v14  ;;  %8613 = vmatpush1.bf16.msra.mxu1 %v11758_v0 }
 0xbfc   :  { %8583 = vmatprep.subr.bf16.mxu0 %v11762_v45  ;;  %8615 = vmatprep.subr.bf16.mxu1 %v11764_v43 }
 0xbff   :  { %8585 = vmatpush1.bf16.msra.mxu0 %v11772_v1  ;;  %8617 = vmatpush1.bf16.msra.mxu1 %v11774_v30 }
 0xc00   :  { %8587 = vmatprep.subr.bf16.mxu0 %v11778_v3  ;;  %8619 = vmatprep.subr.bf16.mxu1 %v11780_v38 }
 0xc03   :  { %8589 = vmatpush1.bf16.msra.mxu0 %v11788_v9  ;;  %8621 = vmatpush1.bf16.msra.mxu1 %v11790_v8 }
 0xc04   :  { %8591 = vmatprep.subr.bf16.mxu0 %v11794_v18  ;;  %8623 = vmatprep.subr.bf16.mxu1 %v11796_v62 }
 0xc07   :  { %8593 = vmatpush1.bf16.msra.mxu0 %v11804_v29  ;;  %8625 = vmatpush1.bf16.msra.mxu1 %v11806_v12 }
 0xc08   :  { %8595 = vmatprep.subr.bf16.mxu0 %v11810_v37  ;;  %8627 = vmatprep.subr.bf16.mxu1 %v11812_v53 }
 0xc0b   :  { %8597 = vmatpush1.bf16.msra.mxu0 %v11820_v24  ;;  %8629 = vmatpush1.bf16.msra.mxu1 %v11822_v34 }
 0xc0c   :  { %8631 = vmatprep.subr.bf16.mxu0 %v11690_v47  ;;  %8663 = vmatprep.subr.bf16.mxu1 %v11692_v21 }
 0xcc1   :  { %v4513_v33 = vpop.f32.mrb[34].mxu0  ;;  %v4584_v44 = vpop.f32.mrb[42].mxu1 }
 0xcc2   :  { %v9186_v31 = vadd.f32 %v4513_v33, %v11874_v25  ;;  %v4515_v61 = vpop.f32.mrb[35].mxu0  ;;  %v4586_v6 = vpop.f32.mrb[43].mxu1  ;;  %v9202_v20 = vadd.f32 %v4584_v44, %v11887_v48 }
 0xcc3   :  { %v9187_v49 = vadd.f32 %v4515_v61, %v11878_v28  ;;  %v9203_v52 = vadd.f32 %v4586_v6, %v11883_v63 }
 0xcc4   :  { %v6187_v58 = vmul.f32 -1.442695, %v9186_v31 }
 0xcc5   :  { %v6188_v22 = vmul.f32 -1.442695, %v9187_v49  ;;  %v6189_v15 = vmul.f32 -1.442695, %v9203_v52 }
 0xcc6   :  { %9586 = vpow2.f32 %v6187_v58 }
 0xcc7   :  { %9588 = vpow2.f32 %v6188_v22 }
 0xcc8   :  { %9590 = vpow2.f32 %v6189_v15 }
 0xcc9   :  { %9592 = vtanh.f32 %v9202_v20 }
 0xcd0   :  { %v9587_v59 = vpop.eup %9586 }
 0xcd1   :  { %v9589_v55 = vpop.eup %9588  ;;  %v4601_v51 = vadd.f32 1.0, %v9587_v59 }
 0xcd2   :  { %v4607_v56 = vadd.f32 1.0, %v9589_v55  ;;  %v9591_v4 = vpop.eup %9590 }
 0xcd3   :  { %9594 = vrcp.f32 %v4601_v51  ;;  %v9593_v27 = vpop.eup %9592  ;;  %v4614_v36 = vadd.f32 1.0, %v9591_v4 }
 0xcd4   :  { %9596 = vrcp.f32 %v4607_v56 }
 0xcd5   :  { %9598 = vrcp.f32 %v4614_v36 }
 0xcdd   :  { %v9595_v40 = vpop.eup %9594 }
 0xcde   :  { %v9597_v26 = vpop.eup %9596  ;;  %v4618_v11 = vmul.f32 %v9595_v40, %v9593_v27 }
 0xcdf   :  { %v4617_v33 = vmul.f32 %v9597_v26, %v11890_v35  ;;  %v9599_v44 = vpop.eup %9598 }
 0xce1   :  { %v11932_v31 = vadd.f32 %v4618_v11, %v4617_v33 }
 0xce3   :  { %9600 = vtanh.f32 %v11932_v31 }
 0xced   :  { %v9601_v61 = vpop.eup %9600 }
 0xcee   :  { %v4621_v6 = vmul.f32 %v9601_v61, %v9599_v44 }
 0xcf0   :  { %4687 = vmatmul.mubr.f32.vlgmr.msra.gmra.mrb[36].mxu0 %v4621_v6  ;;  %4758 = vmatmul.mubr.f32.vlgmr.msra.gmra.mrb[44].mxu1 %v4621_v6 }
 0xcf1   :  { %8633 = vmatpush1.bf16.msra.mxu0 %v11710_v32  ;;  %8665 = vmatpush1.bf16.msra.mxu1 %v11712_v16 }
 0xcf2   :  { %8635 = vmatprep.subr.bf16.mxu0 %v11714_v17  ;;  %8667 = vmatprep.subr.bf16.mxu1 %v11716_v42 }
 0xcf3   :  { %4861 = vmatprep.mubr.f32.mxu0 %v13387_v54  ;;  %4932 = vmatprep.mubr.f32.mxu1 %v13387_v54 }
 0xcf5   :  { %8637 = vmatpush1.bf16.msra.mxu0 %v11724_v19  ;;  %8669 = vmatpush1.bf16.msra.mxu1 %v11726_v23 }
 0xcf6   :  { %8639 = vmatprep.subr.bf16.mxu0 %v11730_v39  ;;  %8671 = vmatprep.subr.bf16.mxu1 %v11732_v60 }
 0xcf9   :  { %8641 = vmatpush1.bf16.msra.mxu0 %v11740_v50  ;;  %8673 = vmatpush1.bf16.msra.mxu1 %v11742_v41 }
 0xcfa   :  { %8643 = vmatprep.subr.bf16.mxu0 %v11746_v13  ;;  %8675 = vmatprep.subr.bf16.mxu1 %v11748_v57 }
 0xcfd   :  { %8645 = vmatpush1.bf16.msra.mxu0 %v11756_v14  ;;  %8677 = vmatpush1.bf16.msra.mxu1 %v11758_v0 }
 0xcfe   :  { %8647 = vmatprep.subr.bf16.mxu0 %v11762_v45  ;;  %8679 = vmatprep.subr.bf16.mxu1 %v11764_v43 }
 0xd01   :  { %8649 = vmatpush1.bf16.msra.mxu0 %v11772_v1  ;;  %8681 = vmatpush1.bf16.msra.mxu1 %v11774_v30 }
 0xd02   :  { %8651 = vmatprep.subr.bf16.mxu0 %v11778_v3  ;;  %8683 = vmatprep.subr.bf16.mxu1 %v11780_v38 }
 0xd05   :  { %8653 = vmatpush1.bf16.msra.mxu0 %v11788_v9  ;;  %8685 = vmatpush1.bf16.msra.mxu1 %v11790_v8 }
 0xd06   :  { %8655 = vmatprep.subr.bf16.mxu0 %v11794_v18  ;;  %8687 = vmatprep.subr.bf16.mxu1 %v11796_v62 }
 0xd09   :  { %8657 = vmatpush1.bf16.msra.mxu0 %v11804_v29  ;;  %8689 = vmatpush1.bf16.msra.mxu1 %v11806_v12 }
 0xd0a   :  { %8659 = vmatprep.subr.bf16.mxu0 %v11810_v37  ;;  %8691 = vmatprep.subr.bf16.mxu1 %v11812_v53 }
 0xd0d   :  { %8661 = vmatpush1.bf16.msra.mxu0 %v11820_v24  ;;  %8693 = vmatpush1.bf16.msra.mxu1 %v11822_v34 }
 0xd0e   :  { %8695 = vmatprep.subr.bf16.mxu0 %v11690_v47  ;;  %8727 = vmatprep.subr.bf16.mxu1 %v11692_v21 }
 0xdc3   :  { %v4688_v35 = vpop.f32.mrb[36].mxu0  ;;  %v4759_v49 = vpop.f32.mrb[44].mxu1 }
 0xdc4   :  { %v9188_v58 = vadd.f32 %v4688_v35, %v11874_v25  ;;  %v4690_v22 = vpop.f32.mrb[37].mxu0  ;;  %v4761_v52 = vpop.f32.mrb[45].mxu1  ;;  %v9204_v56 = vadd.f32 %v4759_v49, %v11887_v48 }
 0xdc5   :  { %v9189_v15 = vadd.f32 %v4690_v22, %v11878_v28  ;;  %v9205_v55 = vadd.f32 %v4761_v52, %v11883_v63 }
 0xdc6   :  { %v6190_v20 = vmul.f32 -1.442695, %v9188_v58 }
 0xdc7   :  { %v6191_v59 = vmul.f32 -1.442695, %v9189_v15  ;;  %v6192_v51 = vmul.f32 -1.442695, %v9205_v55 }
 0xdc8   :  { %9602 = vpow2.f32 %v6190_v20 }
 0xdc9   :  { %9604 = vpow2.f32 %v6191_v59 }
 0xdca   :  { %9606 = vpow2.f32 %v6192_v51 }
 0xdcb   :  { %9608 = vtanh.f32 %v9204_v56 }
 0xdd2   :  { %v9603_v4 = vpop.eup %9602 }
 0xdd3   :  { %v9605_v27 = vpop.eup %9604  ;;  %v4776_v40 = vadd.f32 1.0, %v9603_v4 }
 0xdd4   :  { %v4782_v26 = vadd.f32 1.0, %v9605_v27  ;;  %v9607_v11 = vpop.eup %9606 }
 0xdd5   :  { %9610 = vrcp.f32 %v4776_v40  ;;  %v9609_v36 = vpop.eup %9608  ;;  %v4789_v6 = vadd.f32 1.0, %v9607_v11 }
 0xdd6   :  { %9612 = vrcp.f32 %v4782_v26 }
 0xdd7   :  { %9614 = vrcp.f32 %v4789_v6 }
 0xddf   :  { %v9611_v33 = vpop.eup %9610 }
 0xde0   :  { %v9613_v44 = vpop.eup %9612  ;;  %v4793_v61 = vmul.f32 %v9611_v33, %v9609_v36 }
 0xde1   :  { %v4792_v35 = vmul.f32 %v9613_v44, %v11932_v31  ;;  %v9615_v49 = vpop.eup %9614 }
 0xde3   :  { %v11974_v58 = vadd.f32 %v4793_v61, %v4792_v35 }
 0xde5   :  { %9616 = vtanh.f32 %v11974_v58 }
 0xdef   :  { %v9617_v22 = vpop.eup %9616 }
 0xdf0   :  { %v4796_v52 = vmul.f32 %v9617_v22, %v9615_v49 }
 0xdf2   :  { %4862 = vmatmul.mubr.f32.vlgmr.msra.gmra.mrb[38].mxu0 %v4796_v52  ;;  %4933 = vmatmul.mubr.f32.vlgmr.msra.gmra.mrb[46].mxu1 %v4796_v52 }
 0xdf3   :  { %8697 = vmatpush1.bf16.msra.mxu0 %v11710_v32  ;;  %8729 = vmatpush1.bf16.msra.mxu1 %v11712_v16 }
 0xdf4   :  { %8699 = vmatprep.subr.bf16.mxu0 %v11714_v17  ;;  %8731 = vmatprep.subr.bf16.mxu1 %v11716_v42 }
 0xdf5   :  { %5036 = vmatprep.mubr.f32.mxu0 %v13387_v54  ;;  %5107 = vmatprep.mubr.f32.mxu1 %v13387_v54 }
 0xdf7   :  { %8701 = vmatpush1.bf16.msra.mxu0 %v11724_v19  ;;  %8733 = vmatpush1.bf16.msra.mxu1 %v11726_v23 }
 0xdf8   :  { %8703 = vmatprep.subr.bf16.mxu0 %v11730_v39  ;;  %8735 = vmatprep.subr.bf16.mxu1 %v11732_v60 }
 0xdfb   :  { %8705 = vmatpush1.bf16.msra.mxu0 %v11740_v50  ;;  %8737 = vmatpush1.bf16.msra.mxu1 %v11742_v41 }
 0xdfc   :  { %8707 = vmatprep.subr.bf16.mxu0 %v11746_v13  ;;  %8739 = vmatprep.subr.bf16.mxu1 %v11748_v57 }
 0xdff   :  { %8709 = vmatpush1.bf16.msra.mxu0 %v11756_v14  ;;  %8741 = vmatpush1.bf16.msra.mxu1 %v11758_v0 }
 0xe00   :  { %8711 = vmatprep.subr.bf16.mxu0 %v11762_v45  ;;  %8743 = vmatprep.subr.bf16.mxu1 %v11764_v43 }
 0xe03   :  { %8713 = vmatpush1.bf16.msra.mxu0 %v11772_v1  ;;  %8745 = vmatpush1.bf16.msra.mxu1 %v11774_v30 }
 0xe04   :  { %8715 = vmatprep.subr.bf16.mxu0 %v11778_v3  ;;  %8747 = vmatprep.subr.bf16.mxu1 %v11780_v38 }
 0xe07   :  { %8717 = vmatpush1.bf16.msra.mxu0 %v11788_v9  ;;  %8749 = vmatpush1.bf16.msra.mxu1 %v11790_v8 }
 0xe08   :  { %8719 = vmatprep.subr.bf16.mxu0 %v11794_v18  ;;  %8751 = vmatprep.subr.bf16.mxu1 %v11796_v62 }
 0xe0b   :  { %8721 = vmatpush1.bf16.msra.mxu0 %v11804_v29  ;;  %8753 = vmatpush1.bf16.msra.mxu1 %v11806_v12 }
 0xe0c   :  { %8723 = vmatprep.subr.bf16.mxu0 %v11810_v37  ;;  %8755 = vmatprep.subr.bf16.mxu1 %v11812_v53 }
 0xe0f   :  { %8725 = vmatpush1.bf16.msra.mxu0 %v11820_v24  ;;  %8757 = vmatpush1.bf16.msra.mxu1 %v11822_v34 }
 0xe10   :  { %8759 = vmatprep.subr.bf16.mxu0 %v11690_v47  ;;  %8791 = vmatprep.subr.bf16.mxu1 %v11692_v21 }
 0xec5   :  { %v4863_v31 = vpop.f32.mrb[38].mxu0  ;;  %v4934_v15 = vpop.f32.mrb[46].mxu1 }
 0xec6   :  { %v9190_v20 = vadd.f32 %v4863_v31, %v11874_v25  ;;  %v4865_v59 = vpop.f32.mrb[39].mxu0  ;;  %v4936_v55 = vpop.f32.mrb[47].mxu1  ;;  %v9206_v26 = vadd.f32 %v4934_v15, %v11887_v48 }
 0xec7   :  { %v9191_v51 = vadd.f32 %v4865_v59, %v11878_v28  ;;  %v9207_v27 = vadd.f32 %v4936_v55, %v11883_v63 }
 0xec8   :  { %v6193_v56 = vmul.f32 -1.442695, %v9190_v20 }
 0xec9   :  { %v6194_v4 = vmul.f32 -1.442695, %v9191_v51  ;;  %v6195_v40 = vmul.f32 -1.442695, %v9207_v27 }
 0xeca   :  { %9618 = vpow2.f32 %v6193_v56 }
 0xecb   :  { %9620 = vpow2.f32 %v6194_v4 }
 0xecc   :  { %9622 = vpow2.f32 %v6195_v40 }
 0xecd   :  { %9624 = vtanh.f32 %v9206_v26 }
 0xed4   :  { %v9619_v11 = vpop.eup %9618 }
 0xed5   :  { %v9621_v36 = vpop.eup %9620  ;;  %v4951_v33 = vadd.f32 1.0, %v9619_v11 }
 0xed6   :  { %v4957_v44 = vadd.f32 1.0, %v9621_v36  ;;  %v9623_v61 = vpop.eup %9622 }
 0xed7   :  { %9626 = vrcp.f32 %v4951_v33  ;;  %v9625_v6 = vpop.eup %9624  ;;  %v4964_v52 = vadd.f32 1.0, %v9623_v61 }
 0xed8   :  { %9628 = vrcp.f32 %v4957_v44 }
 0xed9   :  { %9630 = vrcp.f32 %v4964_v52 }
 0xee1   :  { %v9627_v35 = vpop.eup %9626 }
 0xee2   :  { %v9629_v49 = vpop.eup %9628  ;;  %v4968_v22 = vmul.f32 %v9627_v35, %v9625_v6 }
 0xee3   :  { %v4967_v31 = vmul.f32 %v9629_v49, %v11974_v58  ;;  %v9631_v15 = vpop.eup %9630 }
 0xee5   :  { %v12016_v20 = vadd.f32 %v4968_v22, %v4967_v31 }
 0xee7   :  { %9632 = vtanh.f32 %v12016_v20 }
 0xef1   :  { %v9633_v59 = vpop.eup %9632 }
 0xef2   :  { %v4971_v55 = vmul.f32 %v9633_v59, %v9631_v15 }
 0xef4   :  { %5037 = vmatmul.mubr.f32.vlgmr.msra.gmra.mrb[40].mxu0 %v4971_v55  ;;  %5108 = vmatmul.mubr.f32.vlgmr.msra.gmra.mrb[48].mxu1 %v4971_v55 }
 0xef5   :  { %8761 = vmatpush1.bf16.msra.mxu0 %v11710_v32  ;;  %8793 = vmatpush1.bf16.msra.mxu1 %v11712_v16 }
 0xef6   :  { %8763 = vmatprep.subr.bf16.mxu0 %v11714_v17  ;;  %8795 = vmatprep.subr.bf16.mxu1 %v11716_v42 }
 0xef7   :  { %5211 = vmatprep.mubr.f32.mxu0 %v13387_v54  ;;  %5282 = vmatprep.mubr.f32.mxu1 %v13387_v54 }
 0xef9   :  { %8765 = vmatpush1.bf16.msra.mxu0 %v11724_v19  ;;  %8797 = vmatpush1.bf16.msra.mxu1 %v11726_v23 }
 0xefa   :  { %8767 = vmatprep.subr.bf16.mxu0 %v11730_v39  ;;  %8799 = vmatprep.subr.bf16.mxu1 %v11732_v60 }
 0xefd   :  { %8769 = vmatpush1.bf16.msra.mxu0 %v11740_v50  ;;  %8801 = vmatpush1.bf16.msra.mxu1 %v11742_v41 }
 0xefe   :  { %8771 = vmatprep.subr.bf16.mxu0 %v11746_v13  ;;  %8803 = vmatprep.subr.bf16.mxu1 %v11748_v57 }
 0xf01   :  { %8773 = vmatpush1.bf16.msra.mxu0 %v11756_v14  ;;  %8805 = vmatpush1.bf16.msra.mxu1 %v11758_v0 }
 0xf02   :  { %8775 = vmatprep.subr.bf16.mxu0 %v11762_v45  ;;  %8807 = vmatprep.subr.bf16.mxu1 %v11764_v43 }
 0xf05   :  { %8777 = vmatpush1.bf16.msra.mxu0 %v11772_v1  ;;  %8809 = vmatpush1.bf16.msra.mxu1 %v11774_v30 }
 0xf06   :  { %8779 = vmatprep.subr.bf16.mxu0 %v11778_v3  ;;  %8811 = vmatprep.subr.bf16.mxu1 %v11780_v38 }
 0xf09   :  { %8781 = vmatpush1.bf16.msra.mxu0 %v11788_v9  ;;  %8813 = vmatpush1.bf16.msra.mxu1 %v11790_v8 }
 0xf0a   :  { %8783 = vmatprep.subr.bf16.mxu0 %v11794_v18  ;;  %8815 = vmatprep.subr.bf16.mxu1 %v11796_v62 }
 0xf0d   :  { %8785 = vmatpush1.bf16.msra.mxu0 %v11804_v29  ;;  %8817 = vmatpush1.bf16.msra.mxu1 %v11806_v12 }
 0xf0e   :  { %8787 = vmatprep.subr.bf16.mxu0 %v11810_v37  ;;  %8819 = vmatprep.subr.bf16.mxu1 %v11812_v53 }
 0xf11   :  { %8789 = vmatpush1.bf16.msra.mxu0 %v11820_v24  ;;  %8821 = vmatpush1.bf16.msra.mxu1 %v11822_v34 }
 0xf12   :  { %8823 = vmatprep.subr.bf16.mxu0 %v11690_v47  ;;  %8855 = vmatprep.subr.bf16.mxu1 %v11692_v21 }
 0xfc7   :  { %v5038_v58 = vpop.f32.mrb[40].mxu0  ;;  %v5109_v51 = vpop.f32.mrb[48].mxu1 }
 0xfc8   :  { %v9192_v56 = vadd.f32 %v5038_v58, %v11874_v25  ;;  %v5040_v4 = vpop.f32.mrb[41].mxu0  ;;  %v5111_v27 = vpop.f32.mrb[49].mxu1  ;;  %v9208_v44 = vadd.f32 %v5109_v51, %v11887_v48 }
 0xfc9   :  { %v9193_v40 = vadd.f32 %v5040_v4, %v11878_v28  ;;  %v9209_v36 = vadd.f32 %v5111_v27, %v11883_v63 }
 0xfca   :  { %v6196_v26 = vmul.f32 -1.442695, %v9192_v56 }
 0xfcb   :  { %v6197_v11 = vmul.f32 -1.442695, %v9193_v40  ;;  %v6198_v33 = vmul.f32 -1.442695, %v9209_v36 }
 0xfcc   :  { %9634 = vpow2.f32 %v6196_v26 }
 0xfcd   :  { %9636 = vpow2.f32 %v6197_v11 }
 0xfce   :  { %9638 = vpow2.f32 %v6198_v33 }
 0xfcf   :  { %9640 = vtanh.f32 %v9208_v44 }
 0xfd6   :  { %v9635_v61 = vpop.eup %9634 }
 0xfd7   :  { %v9637_v6 = vpop.eup %9636  ;;  %v5126_v35 = vadd.f32 1.0, %v9635_v61 }
 0xfd8   :  { %v5132_v49 = vadd.f32 1.0, %v9637_v6  ;;  %v9639_v22 = vpop.eup %9638 }
 0xfd9   :  { %9642 = vrcp.f32 %v5126_v35  ;;  %v9641_v52 = vpop.eup %9640  ;;  %v5139_v55 = vadd.f32 1.0, %v9639_v22 }
 0xfda   :  { %9644 = vrcp.f32 %v5132_v49 }
 0xfdb   :  { %9646 = vrcp.f32 %v5139_v55 }
 0xfe3   :  { %v9643_v31 = vpop.eup %9642 }
 0xfe4   :  { %v9645_v15 = vpop.eup %9644  ;;  %v5143_v59 = vmul.f32 %v9643_v31, %v9641_v52 }
 0xfe5   :  { %v5142_v58 = vmul.f32 %v9645_v15, %v12016_v20  ;;  %v9647_v51 = vpop.eup %9646 }
 0xfe7   :  { %v12058_v56 = vadd.f32 %v5143_v59, %v5142_v58 }
 0xfe9   :  { %9648 = vtanh.f32 %v12058_v56 }
 0xff3   :  { %v9649_v4 = vpop.eup %9648 }
 0xff4   :  { %v5146_v27 = vmul.f32 %v9649_v4, %v9647_v51 }
 0xff6   :  { %5212 = vmatmul.mubr.f32.vlgmr.msra.gmra.mrb[42].mxu0 %v5146_v27  ;;  %5283 = vmatmul.mubr.f32.vlgmr.msra.gmra.mrb[50].mxu1 %v5146_v27 }
 0xff7   :  { %8825 = vmatpush1.bf16.msra.mxu0 %v11710_v32  ;;  %8857 = vmatpush1.bf16.msra.mxu1 %v11712_v16 }
 0xff8   :  { %8827 = vmatprep.subr.bf16.mxu0 %v11714_v17  ;;  %8859 = vmatprep.subr.bf16.mxu1 %v11716_v42 }
 0xff9   :  { %5386 = vmatprep.mubr.f32.mxu0 %v13387_v54  ;;  %5457 = vmatprep.mubr.f32.mxu1 %v13387_v54 }
 0xffb   :  { %8829 = vmatpush1.bf16.msra.mxu0 %v11724_v19  ;;  %8861 = vmatpush1.bf16.msra.mxu1 %v11726_v23 }
 0xffc   :  { %8831 = vmatprep.subr.bf16.mxu0 %v11730_v39  ;;  %8863 = vmatprep.subr.bf16.mxu1 %v11732_v60 }
 0xfff   :  { %8833 = vmatpush1.bf16.msra.mxu0 %v11740_v50  ;;  %8865 = vmatpush1.bf16.msra.mxu1 %v11742_v41 }
0x1000   :  { %8835 = vmatprep.subr.bf16.mxu0 %v11746_v13  ;;  %8867 = vmatprep.subr.bf16.mxu1 %v11748_v57 }
0x1003   :  { %8837 = vmatpush1.bf16.msra.mxu0 %v11756_v14  ;;  %8869 = vmatpush1.bf16.msra.mxu1 %v11758_v0 }
0x1004   :  { %8839 = vmatprep.subr.bf16.mxu0 %v11762_v45  ;;  %8871 = vmatprep.subr.bf16.mxu1 %v11764_v43 }
0x1007   :  { %8841 = vmatpush1.bf16.msra.mxu0 %v11772_v1  ;;  %8873 = vmatpush1.bf16.msra.mxu1 %v11774_v30 }
0x1008   :  { %8843 = vmatprep.subr.bf16.mxu0 %v11778_v3  ;;  %8875 = vmatprep.subr.bf16.mxu1 %v11780_v38 }
0x100b   :  { %8845 = vmatpush1.bf16.msra.mxu0 %v11788_v9  ;;  %8877 = vmatpush1.bf16.msra.mxu1 %v11790_v8 }
0x100c   :  { %8847 = vmatprep.subr.bf16.mxu0 %v11794_v18  ;;  %8879 = vmatprep.subr.bf16.mxu1 %v11796_v62 }
0x100f   :  { %8849 = vmatpush1.bf16.msra.mxu0 %v11804_v29  ;;  %8881 = vmatpush1.bf16.msra.mxu1 %v11806_v12 }
0x1010   :  { %8851 = vmatprep.subr.bf16.mxu0 %v11810_v37  ;;  %8883 = vmatprep.subr.bf16.mxu1 %v11812_v53 }
0x1013   :  { %8853 = vmatpush1.bf16.msra.mxu0 %v11820_v24  ;;  %8885 = vmatpush1.bf16.msra.mxu1 %v11822_v34 }
0x1014   :  { %8887 = vmatprep.subr.bf16.mxu0 %v11690_v47  ;;  %8919 = vmatprep.subr.bf16.mxu1 %v11692_v21 }
0x10c9   :  { %v5213_v20 = vpop.f32.mrb[42].mxu0  ;;  %v5284_v40 = vpop.f32.mrb[50].mxu1 }
0x10ca   :  { %v9194_v26 = vadd.f32 %v5213_v20, %v11874_v25  ;;  %v5215_v11 = vpop.f32.mrb[43].mxu0  ;;  %v5286_v36 = vpop.f32.mrb[51].mxu1  ;;  %v9210_v49 = vadd.f32 %v5284_v40, %v11887_v48 }
0x10cb   :  { %v9195_v33 = vadd.f32 %v5215_v11, %v11878_v28  ;;  %v9211_v6 = vadd.f32 %v5286_v36, %v11883_v63  ;;  %v5680_v11 = vld [vmem:[#allocation12 + $0x30] sm:$0xff]  ;;  %v5683_v36 = vld [vmem:[#allocation12 + $0x48] sm:$0xff] }
0x10cc   :  { %v6199_v44 = vmul.f32 -1.442695, %v9194_v26 }
0x10cd   :  { %v6200_v61 = vmul.f32 -1.442695, %v9195_v33  ;;  %v6201_v35 = vmul.f32 -1.442695, %v9211_v6  ;;  %v5689_v6 = vld [vmem:[#allocation12 + $0x78] sm:$0xff] }
0x10ce   :  { %9650 = vpow2.f32 %v6199_v44  ;;  %v5687_v44 = vld [vmem:[#allocation12 + $0x68] sm:$0xff] }
0x10cf   :  { %9652 = vpow2.f32 %v6200_v61  ;;  %v5685_v61 = vld [vmem:[#allocation12 + $0x58] sm:$0xff] }
0x10d0   :  { %9654 = vpow2.f32 %v6201_v35 }
0x10d1   :  { %9656 = vtanh.f32 %v9210_v49 }
0x10d8   :  { %v9651_v47 = vpop.eup %9650 }
0x10d9   :  { %v9653_v22 = vpop.eup %9652  ;;  %v5301_v21 = vadd.f32 1.0, %v9651_v47 }
0x10da   :  { %v5307_v52 = vadd.f32 1.0, %v9653_v22  ;;  %v9655_v31 = vpop.eup %9654  ;;  %v5682_v22 = vld [vmem:[#allocation12 + $0x40] sm:$0xff] }
0x10db   :  { %9658 = vrcp.f32 %v5301_v21  ;;  %v9657_v15 = vpop.eup %9656  ;;  %v5314_v51 = vadd.f32 1.0, %v9655_v31  ;;  %v5686_v21 = vld [vmem:[#allocation12 + $0x60] sm:$0xff]  ;;  %v5684_v31 = vld [vmem:[#allocation12 + $0x50] sm:$0xff] }
0x10dc   :  { %9660 = vrcp.f32 %v5307_v52 }
0x10dd   :  { %9662 = vrcp.f32 %v5314_v51  ;;  %v5695_v51 = vld [vmem:[#allocation12 + $0xa8] sm:$0xff] }
0x10e5   :  { %v9659_v59 = vpop.eup %9658 }
0x10e6   :  { %v9661_v55 = vpop.eup %9660  ;;  %v5318_v58 = vmul.f32 %v9659_v59, %v9657_v15  ;;  %v5688_v15 = vld [vmem:[#allocation12 + $0x70] sm:$0xff]  ;;  %v5691_v59 = vld [vmem:[#allocation12 + $0x88] sm:$0xff] }
0x10e7   :  { %v5317_v4 = vmul.f32 %v9661_v55, %v12058_v56  ;;  %v9663_v20 = vpop.eup %9662  ;;  %v5676_v56 = vld [vmem:[#allocation12 + $0x10] sm:$0xff]  ;;  %v8954_v55 = vpack.c.bf16 %v5687_v44, %v5683_v36  ;;  %v5714_v44 = vld [vmem:[#allocation12 + $0x140] sm:$0xff] }
0x10e8   :  { %v9016_v47 = vpack.c.bf16 %v5680_v11, %v5676_v56  ;;  %v5717_v56 = vld [vmem:[#allocation12 + $0x158] sm:$0xff] }
0x10e9   :  { %v12100_v27 = vadd.f32 %v5318_v58, %v5317_v4  ;;  %v9018_v58 = vpack.c.bf16 %v5689_v6, %v5685_v61  ;;  %v5693_v4 = vld [vmem:[#allocation12 + $0x98] sm:$0xff]  ;;  %v5718_v61 = vld [vmem:[#allocation12 + $0x160] sm:$0xff] }
0x10ea   :  { %v5721_v11 = vld [vmem:[#allocation12 + $0x178] sm:$0xff] }
0x10eb   :  { %9664 = vtanh.f32 %v12100_v27 }
0x10f5   :  { %v9665_v40 = vpop.eup %9664 }
0x10f6   :  { %v5321_v26 = vmul.f32 %v9665_v40, %v9663_v20  ;;  %v8956_v20 = vpack.c.bf16 %v5686_v21, %v5682_v22  ;;  %v9020_v40 = vpack.c.bf16 %v5688_v15, %v5684_v31  ;;  %v5723_v22 = vld [vmem:[#allocation12 + $0x188] sm:$0xff]  ;;  %v5729_v31 = vld [vmem:[#allocation12 + $0x1b8] sm:$0xff]  ;;  %v8972_v15 = vpack.c.bf16 %v5718_v61, %v5714_v44 }
0x10f7   :  { %v5727_v21 = vld [vmem:[#allocation12 + $0x1a8] sm:$0xff]  ;;  %v5757_v61 = vld [vmem:[#allocation12 + $0x298] sm:$0xff] }
0x10f8   :  { %5387 = vmatmul.mubr.f32.vlgmr.msra.gmra.mrb[44].mxu0 %v5321_v26  ;;  %5458 = vmatmul.mubr.f32.vlgmr.msra.gmra.mrb[52].mxu1 %v5321_v26  ;;  %v5690_v26 = vld [vmem:[#allocation12 + $0x80] sm:$0xff]  ;;  %v5759_v44 = vld [vmem:[#allocation12 + $0x2a8] sm:$0xff] }
0x10f9   :  { %8889 = vmatpush1.bf16.msra.mxu0 %v11710_v32  ;;  %8921 = vmatpush1.bf16.msra.mxu1 %v11712_v16  ;;  %v5675_v32 = vld [vmem:[#allocation12 + $0x8] sm:$0xff] }
0x10fa   :  { %8891 = vmatprep.subr.bf16.mxu0 %v11714_v17  ;;  %8923 = vmatprep.subr.bf16.mxu1 %v11716_v42  ;;  %v5679_v16 = vld [vmem:[#allocation12 + $0x28] sm:$0xff]  ;;  %v5677_v17 = vld [vmem:[#allocation12 + $0x18] sm:$0xff] }
0x10fb   :  { %5561 = vmatprep.mubr.f32.mxu0 %v13387_v54  ;;  %5632 = vmatprep.mubr.f32.mxu1 %v13387_v54  ;;  %v8950_v42 = vpack.c.bf16 %v5679_v16, %v5675_v32  ;;  %v5678_v54 = vld [vmem:[#allocation12 + $0x20] sm:$0xff]  ;;  %v8958_v16 = vpack.c.bf16 %v5695_v51, %v5691_v59  ;;  %v8974_v51 = vpack.c.bf16 %v5727_v21, %v5723_v22 }
0x10fc   :  { %v5694_v32 = vld [vmem:[#allocation12 + $0xa0] sm:$0xff] }
0x10fd   :  { %8893 = vmatpush1.bf16.msra.mxu0 %v11724_v19  ;;  %8925 = vmatpush1.bf16.msra.mxu1 %v11726_v23  ;;  %v5681_v19 = vld [vmem:[#allocation12 + $0x38] sm:$0xff]  ;;  %v5758_v22 = vld [vmem:[#allocation12 + $0x2a0] sm:$0xff] }
0x10fe   :  { %8895 = vmatprep.subr.bf16.mxu0 %v11730_v39  ;;  %8927 = vmatprep.subr.bf16.mxu1 %v11732_v60  ;;  %v9014_v23 = vpack.c.bf16 %v5681_v19, %v5677_v17  ;;  %v5696_v19 = vld [vmem:[#allocation12 + $0xb0] sm:$0xff] }
0x1101   :  { %8897 = vmatpush1.bf16.msra.mxu0 %v11740_v50  ;;  %8929 = vmatpush1.bf16.msra.mxu1 %v11742_v41 }
0x1102   :  { %8899 = vmatprep.subr.bf16.mxu0 %v11746_v13  ;;  %8931 = vmatprep.subr.bf16.mxu1 %v11748_v57 }
0x1105   :  { %8901 = vmatpush1.bf16.msra.mxu0 %v11756_v14  ;;  %8933 = vmatpush1.bf16.msra.mxu1 %v11758_v0 }
0x1106   :  { %8903 = vmatprep.subr.bf16.mxu0 %v11762_v45  ;;  %8935 = vmatprep.subr.bf16.mxu1 %v11764_v43 }
0x1109   :  { %8905 = vmatpush1.bf16.msra.mxu0 %v11772_v1  ;;  %8937 = vmatpush1.bf16.msra.mxu1 %v11774_v30 }
0x110a   :  { %8907 = vmatprep.subr.bf16.mxu0 %v11778_v3  ;;  %8939 = vmatprep.subr.bf16.mxu1 %v11780_v38 }
0x110d   :  { %8909 = vmatpush1.bf16.msra.mxu0 %v11788_v9  ;;  %8941 = vmatpush1.bf16.msra.mxu1 %v11790_v8 }
0x110e   :  { %8911 = vmatprep.subr.bf16.mxu0 %v11794_v18  ;;  %8943 = vmatprep.subr.bf16.mxu1 %v11796_v62 }
0x1111   :  { %8913 = vmatpush1.bf16.msra.mxu0 %v11804_v29  ;;  %8945 = vmatpush1.bf16.msra.mxu1 %v11806_v12 }
0x1112   :  { %8915 = vmatprep.subr.bf16.mxu0 %v11810_v37  ;;  %8947 = vmatprep.subr.bf16.mxu1 %v11812_v53 }
0x1115   :  { %8917 = vmatpush1.bf16.msra.mxu0 %v11820_v24  ;;  %8949 = vmatpush1.bf16.msra.mxu1 %v11822_v34  ;;  %v5674_v34 = vld [vmem:[#allocation12] sm:$0xff] }
0x1116   :  { %8951 = vmatprep.subr.bf16.mxu0 %v8950_v42  ;;  %9015 = vmatprep.subr.bf16.mxu1 %v9014_v23  ;;  %v8952_v49 = vpack.c.bf16 %v5678_v54, %v5674_v34  ;;  %v5692_v42 = vld [vmem:[#allocation12 + $0x90] sm:$0xff]  ;;  %v5699_v23 = vld [vmem:[#allocation12 + $0xc8] sm:$0xff] }
0x1117   :  { %v5715_v34 = vld [vmem:[#allocation12 + $0x148] sm:$0xff] }
0x1118   :  { %v5719_v54 = vld [vmem:[#allocation12 + $0x168] sm:$0xff] }
0x1119   :  { %v8970_v6 = vpack.c.bf16 %v5719_v54, %v5715_v34  ;;  %v5750_v34 = vld [vmem:[#allocation12 + $0x260] sm:$0xff] }
0x11cb   :  { %v5388_v39 = vpop.f32.mrb[44].mxu0  ;;  %v5459_v60 = vpop.f32.mrb[52].mxu1 }
0x11cc   :  { %v9196_v50 = vadd.f32 %v5388_v39, %v11874_v25  ;;  %v5390_v41 = vpop.f32.mrb[45].mxu0  ;;  %v5461_v13 = vpop.f32.mrb[53].mxu1  ;;  %v9212_v1 = vadd.f32 %v5459_v60, %v11887_v48  ;;  %v5703_v39 = vld [vmem:[#allocation12 + $0xe8] sm:$0xff]  ;;  %v5701_v60 = vld [vmem:[#allocation12 + $0xd8] sm:$0xff] }
0x11cd   :  { %v9197_v57 = vadd.f32 %v5390_v41, %v11878_v28  ;;  %v9213_v45 = vadd.f32 %v5461_v13, %v11883_v63  ;;  %v8960_v41 = vpack.c.bf16 %v5694_v32, %v5690_v26  ;;  %v9024_v13 = vpack.c.bf16 %v5696_v19, %v5692_v42  ;;  %v5735_v26 = vld [vmem:[#allocation12 + $0x1e8] sm:$0xff]  ;;  %v5733_v32 = vld [vmem:[#allocation12 + $0x1d8] sm:$0xff]  ;;  %v5730_v19 = vld [vmem:[#allocation12 + $0x1c0] sm:$0xff] }
0x11ce   :  { %v6202_v14 = vmul.f32 -1.442695, %v9196_v50  ;;  %v5705_v50 = vld [vmem:[#allocation12 + $0xf8] sm:$0xff] }
0x11cf   :  { %v6203_v0 = vmul.f32 -1.442695, %v9197_v57  ;;  %v6204_v43 = vmul.f32 -1.442695, %v9213_v45  ;;  %v5698_v57 = vld [vmem:[#allocation12 + $0xc0] sm:$0xff]  ;;  %v5700_v45 = vld [vmem:[#allocation12 + $0xd0] sm:$0xff] }
0x11d0   :  { %9666 = vpow2.f32 %v6202_v14  ;;  %v5702_v14 = vld [vmem:[#allocation12 + $0xe0] sm:$0xff] }
0x11d1   :  { %9668 = vpow2.f32 %v6203_v0  ;;  %v8962_v0 = vpack.c.bf16 %v5703_v39, %v5699_v23  ;;  %v5734_v23 = vld [vmem:[#allocation12 + $0x1e0] sm:$0xff] }
0x11d2   :  { %9670 = vpow2.f32 %v6204_v43  ;;  %v5704_v43 = vld [vmem:[#allocation12 + $0xf0] sm:$0xff] }
0x11d3   :  { %9672 = vtanh.f32 %v9212_v1  ;;  %v5707_v1 = vld [vmem:[#allocation12 + $0x108] sm:$0xff] }
0x11da   :  { %v9667_v30 = vpop.eup %9666 }
0x11db   :  { %v9669_v3 = vpop.eup %9668  ;;  %v5476_v38 = vadd.f32 1.0, %v9667_v30  ;;  %v5711_v30 = vld [vmem:[#allocation12 + $0x128] sm:$0xff] }
0x11dc   :  { %v5482_v9 = vadd.f32 1.0, %v9669_v3  ;;  %v9671_v8 = vpop.eup %9670  ;;  %v5709_v3 = vld [vmem:[#allocation12 + $0x118] sm:$0xff] }
0x11dd   :  { %9674 = vrcp.f32 %v5476_v38  ;;  %v9673_v18 = vpop.eup %9672  ;;  %v5489_v37 = vadd.f32 1.0, %v9671_v8  ;;  %v5713_v38 = vld [vmem:[#allocation12 + $0x138] sm:$0xff]  ;;  %v9028_v8 = vpack.c.bf16 %v5704_v43, %v5700_v45  ;;  %v5738_v43 = vld [vmem:[#allocation12 + $0x200] sm:$0xff] }
0x11de   :  { %9676 = vrcp.f32 %v5482_v9  ;;  %v8964_v9 = vpack.c.bf16 %v5702_v14, %v5698_v57  ;;  %v5743_v57 = vld [vmem:[#allocation12 + $0x228] sm:$0xff]  ;;  %v5741_v14 = vld [vmem:[#allocation12 + $0x218] sm:$0xff] }
0x11df   :  { %9678 = vrcp.f32 %v5489_v37  ;;  %v5708_v37 = vld [vmem:[#allocation12 + $0x110] sm:$0xff] }
0x11e7   :  { %v9675_v62 = vpop.eup %9674 }
0x11e8   :  { %v9677_v29 = vpop.eup %9676  ;;  %v5493_v12 = vmul.f32 %v9675_v62, %v9673_v18  ;;  %v5706_v18 = vld [vmem:[#allocation12 + $0x100] sm:$0xff] }
0x11e9   :  { %v5492_v53 = vmul.f32 %v9677_v29, %v12100_v27  ;;  %v9679_v33 = vpop.eup %9678  ;;  %v5697_v27 = vld [vmem:[#allocation12 + $0xb8] sm:$0xff]  ;;  %v5710_v62 = vld [vmem:[#allocation12 + $0x120] sm:$0xff]  ;;  %v8966_v29 = vpack.c.bf16 %v5711_v30, %v5707_v1 }
0x11ea   :  { %v9022_v17 = vpack.c.bf16 %v5697_v27, %v5693_v4  ;;  %v8968_v36 = vpack.c.bf16 %v5710_v62, %v5706_v18  ;;  %v5724_v27 = vld [vmem:[#allocation12 + $0x190] sm:$0xff]  ;;  %v5742_v1 = vld [vmem:[#allocation12 + $0x220] sm:$0xff]  ;;  %v5751_v18 = vld [vmem:[#allocation12 + $0x268] sm:$0xff] }
0x11eb   :  { %v12140_v24 = vadd.f32 %v5493_v12, %v5492_v53  ;;  %v9030_v12 = vpack.c.bf16 %v5713_v38, %v5709_v3  ;;  %v5712_v53 = vld [vmem:[#allocation12 + $0x130] sm:$0xff]  ;;  %v5749_v62 = vld [vmem:[#allocation12 + $0x258] sm:$0xff] }
0x11ec   :  { %v5740_v38 = vld [vmem:[#allocation12 + $0x210] sm:$0xff] }
0x11ed   :  { %9680 = vtanh.f32 %v12140_v24 }
0x11f7   :  { %v9681_v35 = vpop.eup %9680 }
0x11f8   :  { %v5496_v52 = vmul.f32 %v9681_v35, %v9679_v33  ;;  %v9032_v33 = vpack.c.bf16 %v5712_v53, %v5708_v37  ;;  %v9034_v35 = vpack.c.bf16 %v5721_v11, %v5717_v56  ;;  %v5746_v53 = vld [vmem:[#allocation12 + $0x240] sm:$0xff]  ;;  %v5748_v11 = vld [vmem:[#allocation12 + $0x250] sm:$0xff] }
0x11fa   :  { %5562 = vmatmul.mubr.f32.vlgmr.msra.gmra.mrb[46].mxu0 %v5496_v52  ;;  %5633 = vmatmul.mubr.f32.vlgmr.msra.gmra.mrb[54].mxu1 %v5496_v52  ;;  %v5725_v52 = vld [vmem:[#allocation12 + $0x198] sm:$0xff] }
0x11fb   :  { %8953 = vmatpush1.bf16.msra.mxu0 %v8952_v49  ;;  %9017 = vmatpush1.bf16.msra.mxu1 %v9016_v47  ;;  %v5716_v49 = vld [vmem:[#allocation12 + $0x150] sm:$0xff]  ;;  %v9038_v4 = vpack.c.bf16 %v5729_v31, %v5725_v52 }
0x11fc   :  { %5883 = vmatprep.mubr.f32.mxu0 %v13386_v46  ;;  %5953 = vmatprep.mubr.f32.mxu1 %v13386_v46  ;;  %v9026_v46 = vpack.c.bf16 %v5705_v50, %v5701_v60  ;;  %v5720_v47 = vld [vmem:[#allocation12 + $0x170] sm:$0xff] }
0x11fd   :  { %8955 = vmatprep.subr.bf16.mxu0 %v8954_v55  ;;  %9019 = vmatprep.subr.bf16.mxu1 %v9018_v58  ;;  %v9036_v59 = vpack.c.bf16 %v5720_v47, %v5716_v49  ;;  %v5722_v55 = vld [vmem:[#allocation12 + $0x180] sm:$0xff]  ;;  %v5732_v50 = vld [vmem:[#allocation12 + $0x1d0] sm:$0xff] }
0x11fe   :  { %v5726_v58 = vld [vmem:[#allocation12 + $0x1a0] sm:$0xff]  ;;  %v5756_v31 = vld [vmem:[#allocation12 + $0x290] sm:$0xff] }
0x11ff   :  { %8957 = vmatpush1.bf16.msra.mxu0 %v8956_v20  ;;  %9021 = vmatpush1.bf16.msra.mxu1 %v9020_v40  ;;  %v5728_v20 = vld [vmem:[#allocation12 + $0x1b0] sm:$0xff]  ;;  %v5731_v40 = vld [vmem:[#allocation12 + $0x1c8] sm:$0xff]  ;;  %v5754_v47 = vld [vmem:[#allocation12 + $0x280] sm:$0xff] }
0x1200   :  { %8959 = vmatprep.subr.bf16.mxu0 %v8958_v16  ;;  %9023 = vmatprep.subr.bf16.mxu1 %v9022_v17  ;;  %v5737_v16 = vld [vmem:[#allocation12 + $0x1f8] sm:$0xff]  ;;  %v8976_v17 = vpack.c.bf16 %v5726_v58, %v5722_v55  ;;  %v9040_v42 = vpack.c.bf16 %v5728_v20, %v5724_v27  ;;  %v8978_v39 = vpack.c.bf16 %v5735_v26, %v5731_v40  ;;  %v5767_v55 = vld [vmem:[#allocation12 + $0x2e8] sm:$0xff]  ;;  %v5762_v20 = vld [vmem:[#allocation12 + $0x2c0] sm:$0xff] }
0x1201   :  { %v9042_v60 = vpack.c.bf16 %v5737_v16, %v5733_v32  ;;  %v5765_v58 = vld [vmem:[#allocation12 + $0x2d8] sm:$0xff]  ;;  %v5766_v40 = vld [vmem:[#allocation12 + $0x2e0] sm:$0xff]  ;;  %v5764_v16 = vld [vmem:[#allocation12 + $0x2d0] sm:$0xff] }
0x1203   :  { %8961 = vmatpush1.bf16.msra.mxu0 %v8960_v41  ;;  %9025 = vmatpush1.bf16.msra.mxu1 %v9024_v13  ;;  %v5736_v41 = vld [vmem:[#allocation12 + $0x1f0] sm:$0xff]  ;;  %v5739_v13 = vld [vmem:[#allocation12 + $0x208] sm:$0xff] }
0x1204   :  { %8963 = vmatprep.subr.bf16.mxu0 %v8962_v0  ;;  %9027 = vmatprep.subr.bf16.mxu1 %v9026_v46  ;;  %v5745_v0 = vld [vmem:[#allocation12 + $0x238] sm:$0xff]  ;;  %v8980_v46 = vpack.c.bf16 %v5734_v23, %v5730_v19  ;;  %v9044_v45 = vpack.c.bf16 %v5736_v41, %v5732_v50  ;;  %v8982_v30 = vpack.c.bf16 %v5743_v57, %v5739_v13  ;;  %v5775_v19 = vld [vmem:[#allocation12 + $0x328] sm:$0xff]  ;;  %v5770_v41 = vld [vmem:[#allocation12 + $0x300] sm:$0xff] }
0x1205   :  { %v9046_v3 = vpack.c.bf16 %v5745_v0, %v5741_v14  ;;  %v5773_v23 = vld [vmem:[#allocation12 + $0x318] sm:$0xff]  ;;  %v5774_v13 = vld [vmem:[#allocation12 + $0x320] sm:$0xff]  ;;  %v5772_v0 = vld [vmem:[#allocation12 + $0x310] sm:$0xff] }
0x1207   :  { %8965 = vmatpush1.bf16.msra.mxu0 %v8964_v9  ;;  %9029 = vmatpush1.bf16.msra.mxu1 %v9028_v8  ;;  %v5744_v9 = vld [vmem:[#allocation12 + $0x230] sm:$0xff]  ;;  %v5747_v8 = vld [vmem:[#allocation12 + $0x248] sm:$0xff] }
0x1208   :  { %8967 = vmatprep.subr.bf16.mxu0 %v8966_v29  ;;  %9031 = vmatprep.subr.bf16.mxu1 %v9030_v12  ;;  %v5753_v29 = vld [vmem:[#allocation12 + $0x278] sm:$0xff]  ;;  %v8984_v12 = vpack.c.bf16 %v5742_v1, %v5738_v43  ;;  %v9048_v37 = vpack.c.bf16 %v5744_v9, %v5740_v38  ;;  %v8986_v54 = vpack.c.bf16 %v5751_v18, %v5747_v8  ;;  %v5783_v43 = vld [vmem:[#allocation12 + $0x368] sm:$0xff]  ;;  %v5778_v9 = vld [vmem:[#allocation12 + $0x340] sm:$0xff] }
0x1209   :  { %v9050_v56 = vpack.c.bf16 %v5753_v29, %v5749_v62  ;;  %v5781_v1 = vld [vmem:[#allocation12 + $0x358] sm:$0xff]  ;;  %v5782_v8 = vld [vmem:[#allocation12 + $0x360] sm:$0xff]  ;;  %v5780_v29 = vld [vmem:[#allocation12 + $0x350] sm:$0xff] }
0x120b   :  { %8969 = vmatpush1.bf16.msra.mxu0 %v8968_v36  ;;  %9033 = vmatpush1.bf16.msra.mxu1 %v9032_v33  ;;  %v5752_v36 = vld [vmem:[#allocation12 + $0x270] sm:$0xff]  ;;  %v5755_v33 = vld [vmem:[#allocation12 + $0x288] sm:$0xff] }
0x120c   :  { %8971 = vmatprep.subr.bf16.mxu0 %v8970_v6  ;;  %9035 = vmatprep.subr.bf16.mxu1 %v9034_v35  ;;  %v5761_v6 = vld [vmem:[#allocation12 + $0x2b8] sm:$0xff]  ;;  %v8988_v35 = vpack.c.bf16 %v5750_v34, %v5746_v53  ;;  %v9052_v49 = vpack.c.bf16 %v5752_v36, %v5748_v11  ;;  %v8990_v21 = vpack.c.bf16 %v5759_v44, %v5755_v33  ;;  %v5791_v53 = vld [vmem:[#allocation12 + $0x3a8] sm:$0xff]  ;;  %v5786_v36 = vld [vmem:[#allocation12 + $0x380] sm:$0xff] }
0x120d   :  { %v9054_v52 = vpack.c.bf16 %v5761_v6, %v5757_v61  ;;  %v5789_v34 = vld [vmem:[#allocation12 + $0x398] sm:$0xff]  ;;  %v5790_v33 = vld [vmem:[#allocation12 + $0x3a0] sm:$0xff]  ;;  %v5788_v6 = vld [vmem:[#allocation12 + $0x390] sm:$0xff] }
0x120f   :  { %8973 = vmatpush1.bf16.msra.mxu0 %v8972_v15  ;;  %9037 = vmatpush1.bf16.msra.mxu1 %v9036_v59  ;;  %v5760_v15 = vld [vmem:[#allocation12 + $0x2b0] sm:$0xff]  ;;  %v5763_v59 = vld [vmem:[#allocation12 + $0x2c8] sm:$0xff] }
0x1210   :  { %8975 = vmatprep.subr.bf16.mxu0 %v8974_v51  ;;  %9039 = vmatprep.subr.bf16.mxu1 %v9038_v4  ;;  %v5769_v51 = vld [vmem:[#allocation12 + $0x2f8] sm:$0xff]  ;;  %v8992_v4 = vpack.c.bf16 %v5758_v22, %v5754_v47  ;;  %v9056_v27 = vpack.c.bf16 %v5760_v15, %v5756_v31  ;;  %v8994_v26 = vpack.c.bf16 %v5767_v55, %v5763_v59  ;;  %v5799_v47 = vld [vmem:[#allocation12 + $0x3e8] sm:$0xff]  ;;  %v5794_v15 = vld [vmem:[#allocation12 + $0x3c0] sm:$0xff] }
0x1211   :  { %v9058_v32 = vpack.c.bf16 %v5769_v51, %v5765_v58  ;;  %v5797_v22 = vld [vmem:[#allocation12 + $0x3d8] sm:$0xff]  ;;  %v5798_v58 = vld [vmem:[#allocation12 + $0x3e0] sm:$0xff]  ;;  %v5796_v51 = vld [vmem:[#allocation12 + $0x3d0] sm:$0xff] }
0x1213   :  { %8977 = vmatpush1.bf16.msra.mxu0 %v8976_v17  ;;  %9041 = vmatpush1.bf16.msra.mxu1 %v9040_v42  ;;  %v5768_v17 = vld [vmem:[#allocation12 + $0x2f0] sm:$0xff]  ;;  %v5771_v42 = vld [vmem:[#allocation12 + $0x308] sm:$0xff] }
0x1214   :  { %8979 = vmatprep.subr.bf16.mxu0 %v8978_v39  ;;  %9043 = vmatprep.subr.bf16.mxu1 %v9042_v60  ;;  %v5777_v39 = vld [vmem:[#allocation12 + $0x338] sm:$0xff]  ;;  %v8996_v60 = vpack.c.bf16 %v5766_v40, %v5762_v20  ;;  %v9060_v50 = vpack.c.bf16 %v5768_v17, %v5764_v16  ;;  %v8998_v57 = vpack.c.bf16 %v5775_v19, %v5771_v42  ;;  %v5992_v40 = vld [vmem:[%s12278_s9 + $0x80] sm:$0xff]  ;;  %v5977_v17 = vld [vmem:[%s12278_s9 + $0x8] sm:$0xff] }
0x1215   :  { %v9062_v14 = vpack.c.bf16 %v5777_v39, %v5773_v23  ;;  %v5976_v16 = vld [vmem:[%s12278_s9] sm:$0xff]  ;;  %v5995_v19 = vld [vmem:[%s12278_s9 + $0x98] sm:$0xff]  ;;  %v5978_v39 = vld [vmem:[%s12278_s9 + $0x10] sm:$0xff] }
0x1216   :  { %v9080_v42 = vpack.c.bf16 %v5977_v17, %v5976_v16 }
0x1217   :  { %8981 = vmatpush1.bf16.msra.mxu0 %v8980_v46  ;;  %9045 = vmatpush1.bf16.msra.mxu1 %v9044_v45  ;;  %v5776_v46 = vld [vmem:[#allocation12 + $0x330] sm:$0xff]  ;;  %v5779_v45 = vld [vmem:[#allocation12 + $0x348] sm:$0xff] }
0x1218   :  { %8983 = vmatprep.subr.bf16.mxu0 %v8982_v30  ;;  %9047 = vmatprep.subr.bf16.mxu1 %v9046_v3  ;;  %v5785_v30 = vld [vmem:[#allocation12 + $0x378] sm:$0xff]  ;;  %v9000_v3 = vpack.c.bf16 %v5774_v13, %v5770_v41  ;;  %v9064_v38 = vpack.c.bf16 %v5776_v46, %v5772_v0  ;;  %v9002_v18 = vpack.c.bf16 %v5783_v43, %v5779_v45  ;;  %v5996_v41 = vld [vmem:[%s12278_s9 + $0xa0] sm:$0xff]  ;;  %v5997_v13 = vld [vmem:[%s12278_s9 + $0xa8] sm:$0xff] }
0x1219   :  { %v9066_v62 = vpack.c.bf16 %v5785_v30, %v5781_v1  ;;  %v5981_v0 = vld [vmem:[%s12278_s9 + $0x28] sm:$0xff]  ;;  %v5998_v45 = vld [vmem:[%s12278_s9 + $0xb0] sm:$0xff]  ;;  %v5999_v43 = vld [vmem:[%s12278_s9 + $0xb8] sm:$0xff] }
0x121a   :  { %v9090_v1 = vpack.c.bf16 %v5999_v43, %v5998_v45  ;;  %v5982_v30 = vld [vmem:[%s12278_s9 + $0x30] sm:$0xff] }
0x121b   :  { %8985 = vmatpush1.bf16.msra.mxu0 %v8984_v12  ;;  %9049 = vmatpush1.bf16.msra.mxu1 %v9048_v37  ;;  %v5784_v12 = vld [vmem:[#allocation12 + $0x370] sm:$0xff]  ;;  %v5787_v37 = vld [vmem:[#allocation12 + $0x388] sm:$0xff] }
0x121c   :  { %8987 = vmatprep.subr.bf16.mxu0 %v8986_v54  ;;  %9051 = vmatprep.subr.bf16.mxu1 %v9050_v56  ;;  %v5793_v54 = vld [vmem:[#allocation12 + $0x3b8] sm:$0xff]  ;;  %v9004_v56 = vpack.c.bf16 %v5782_v8, %v5778_v9  ;;  %v9068_v11 = vpack.c.bf16 %v5784_v12, %v5780_v29  ;;  %v9006_v44 = vpack.c.bf16 %v5791_v53, %v5787_v37  ;;  %v6000_v9 = vld [vmem:[%s12278_s9 + $0xc0] sm:$0xff]  ;;  %v6001_v8 = vld [vmem:[%s12278_s9 + $0xc8] sm:$0xff] }
0x121d   :  { %v9070_v61 = vpack.c.bf16 %v5793_v54, %v5789_v34  ;;  %v5985_v29 = vld [vmem:[%s12278_s9 + $0x48] sm:$0xff]  ;;  %v6002_v37 = vld [vmem:[%s12278_s9 + $0xd0] sm:$0xff]  ;;  %v6003_v53 = vld [vmem:[%s12278_s9 + $0xd8] sm:$0xff] }
0x121e   :  { %v9098_v34 = vpack.c.bf16 %v6003_v53, %v6002_v37  ;;  %v5986_v54 = vld [vmem:[%s12278_s9 + $0x50] sm:$0xff] }
0x121f   :  { %8989 = vmatpush1.bf16.msra.mxu0 %v8988_v35  ;;  %9053 = vmatpush1.bf16.msra.mxu1 %v9052_v49  ;;  %v5792_v35 = vld [vmem:[#allocation12 + $0x3b0] sm:$0xff]  ;;  %v5795_v49 = vld [vmem:[#allocation12 + $0x3c8] sm:$0xff] }
0x1220   :  { %8991 = vmatprep.subr.bf16.mxu0 %v8990_v21  ;;  %9055 = vmatprep.subr.bf16.mxu1 %v9054_v52  ;;  %v5801_v21 = vld [vmem:[#allocation12 + $0x3f8] sm:$0xff]  ;;  %v9008_v52 = vpack.c.bf16 %v5790_v33, %v5786_v36  ;;  %v9072_v31 = vpack.c.bf16 %v5792_v35, %v5788_v6  ;;  %v9010_v59 = vpack.c.bf16 %v5799_v47, %v5795_v49  ;;  %v6005_v33 = vld [vmem:[%s12278_s9 + $0xe8] sm:$0xff]  ;;  %v6006_v35 = vld [vmem:[%s12278_s9 + $0xf0] sm:$0xff] }
0x1221   :  { %v9074_v55 = vpack.c.bf16 %v5801_v21, %v5797_v22  ;;  %v6007_v49 = vld [vmem:[%s12278_s9 + $0xf8] sm:$0xff]  ;;  %v5990_v21 = vld [vmem:[%s12278_s9 + $0x70] sm:$0xff] }
0x1222   :  { %v9106_v22 = vpack.c.bf16 %v6007_v49, %v6006_v35 }
0x1223   :  { %8993 = vmatpush1.bf16.msra.mxu0 %v8992_v4  ;;  %9057 = vmatpush1.bf16.msra.mxu1 %v9056_v27  ;;  %v5800_v4 = vld [vmem:[#allocation12 + $0x3f0] sm:$0xff]  ;;  %v9012_v27 = vpack.c.bf16 %v5798_v58, %v5794_v15 }
0x1224   :  { %8995 = vmatprep.subr.bf16.mxu0 %v8994_v26  ;;  %9059 = vmatprep.subr.bf16.mxu1 %v9058_v32  ;;  %v9076_v20 = vpack.c.bf16 %v5800_v4, %v5796_v51  ;;  %v5993_v26 = vld [vmem:[%s12278_s9 + $0x88] sm:$0xff] }
0x1225   :  { %v9078_v32 = vpack.c.bf16 %v5993_v26, %v5992_v40 }
0x1227   :  { %8997 = vmatpush1.bf16.msra.mxu0 %v8996_v60  ;;  %9061 = vmatpush1.bf16.msra.mxu1 %v9060_v50  ;;  %v5979_v60 = vld [vmem:[%s12278_s9 + $0x18] sm:$0xff] }
0x1228   :  { %8999 = vmatprep.subr.bf16.mxu0 %v8998_v57  ;;  %9063 = vmatprep.subr.bf16.mxu1 %v9062_v14  ;;  %v9084_v50 = vpack.c.bf16 %v5979_v60, %v5978_v39  ;;  %v9086_v57 = vpack.c.bf16 %v5997_v13, %v5996_v41  ;;  %v5980_v14 = vld [vmem:[%s12278_s9 + $0x20] sm:$0xff] }
0x1229   :  { %v9088_v46 = vpack.c.bf16 %v5981_v0, %v5980_v14 }
0x122b   :  { %9001 = vmatpush1.bf16.msra.mxu0 %v9000_v3  ;;  %9065 = vmatpush1.bf16.msra.mxu1 %v9064_v38  ;;  %v5983_v3 = vld [vmem:[%s12278_s9 + $0x38] sm:$0xff] }
0x122c   :  { %9003 = vmatprep.subr.bf16.mxu0 %v9002_v18  ;;  %9067 = vmatprep.subr.bf16.mxu1 %v9066_v62  ;;  %v9092_v38 = vpack.c.bf16 %v5983_v3, %v5982_v30  ;;  %v9094_v18 = vpack.c.bf16 %v6001_v8, %v6000_v9  ;;  %v5984_v62 = vld [vmem:[%s12278_s9 + $0x40] sm:$0xff] }
0x122d   :  { %v9096_v12 = vpack.c.bf16 %v5985_v29, %v5984_v62 }
0x122f   :  { %9005 = vmatpush1.bf16.msra.mxu0 %v9004_v56  ;;  %9069 = vmatpush1.bf16.msra.mxu1 %v9068_v11  ;;  %v5987_v56 = vld [vmem:[%s12278_s9 + $0x58] sm:$0xff]  ;;  %v6004_v11 = vld [vmem:[%s12278_s9 + $0xe0] sm:$0xff] }
0x1230   :  { %9007 = vmatprep.subr.bf16.mxu0 %v9006_v44  ;;  %9071 = vmatprep.subr.bf16.mxu1 %v9070_v61  ;;  %v9100_v36 = vpack.c.bf16 %v5987_v56, %v5986_v54  ;;  %v5988_v44 = vld [vmem:[%s12278_s9 + $0x60] sm:$0xff]  ;;  %v5989_v61 = vld [vmem:[%s12278_s9 + $0x68] sm:$0xff]  ;;  %v9102_v6 = vpack.c.bf16 %v6005_v33, %v6004_v11 }
0x1231   :  { %v9104_v47 = vpack.c.bf16 %v5989_v61, %v5988_v44  ;;  %v6210_v56 = vld [vmem:[%s12279_s10] ss:$0 sm:$0xff] }
0x1233   :  { %9009 = vmatpush1.bf16.msra.mxu0 %v9008_v52  ;;  %9073 = vmatpush1.bf16.msra.mxu1 %v9072_v31  ;;  %v5991_v52 = vld [vmem:[%s12278_s9 + $0x78] sm:$0xff] }
0x1234   :  { %9011 = vmatprep.subr.bf16.mxu0 %v9010_v59  ;;  %9075 = vmatprep.subr.bf16.mxu1 %v9074_v55  ;;  %v9108_v31 = vpack.c.bf16 %v5991_v52, %v5990_v21 }
0x1237   :  { %9013 = vmatpush1.bf16.msra.mxu0 %v9012_v27  ;;  %9077 = vmatpush1.bf16.msra.mxu1 %v9076_v20 }
0x1238   :  { %9079 = vmatprep.subr.bf16.mxu0 %v9078_v32 }
0x123a   :  { %5884 = vmatmul.mubr.f32.vlgmr.msra.gmra.mrb[48].mxu0 %v11703_v10  ;;  %5954 = vmatmul.mubr.f32.vlgmr.msra.gmra.mrb[56].mxu1 %v11703_v10  ;;  %v5994_v10 = vld [vmem:[%s12278_s9 + $0x90] sm:$0xff] }
0x123b   :  { %9081 = vmatpush3.bf16.msra.mxu0 %v9080_v42  ;;  %v9082_v23 = vpack.c.bf16 %v5995_v19, %v5994_v10 }
0x123d   :  { %9083 = vmatprep.subr.bf16.mxu0 %v9082_v23 }
0x123f   :  { %9085 = vmatpush3.bf16.msra.mxu0 %v9084_v50 }
0x1240   :  { %9087 = vmatprep.subr.bf16.mxu0 %v9086_v57  ;;  %v5802_v57 = vld [vmem:[%s12276_s7] sm:$0xf] }
0x1241   :  { %v5807_v14 = vrot.slane %v5802_v57, %v13388_v7 }
0x1243   :  { %9089 = vmatpush3.bf16.msra.mxu0 %v9088_v46 }
0x1244   :  { %9091 = vmatprep.subr.bf16.mxu0 %v9090_v1  ;;  %v5815_v1 = vrot.slane %v5802_v57, %v13391_v2 }
0x1247   :  { %9093 = vmatpush3.bf16.msra.mxu0 %v9092_v38  ;;  %v5811_v38 = vrot.slane %v5802_v57, %v13392_v5 }
0x1248   :  { %9095 = vmatprep.subr.bf16.mxu0 %v9094_v18 }
0x124b   :  { %9097 = vmatpush3.bf16.msra.mxu0 %v9096_v12 }
0x124c   :  { %9099 = vmatprep.subr.bf16.mxu0 %v9098_v34 }
0x124f   :  { %9101 = vmatpush3.bf16.msra.mxu0 %v9100_v36 }
0x1250   :  { %9103 = vmatprep.subr.bf16.mxu0 %v9102_v6 }
0x1253   :  { %9105 = vmatpush3.bf16.msra.mxu0 %v9104_v47 }
0x1254   :  { %9107 = vmatprep.subr.bf16.mxu0 %v9106_v22 }
0x1257   :  { %9109 = vmatpush3.bf16.msra.mxu0 %v9108_v31 }
0x12cd   :  { %v5563_v15 = vpop.f32.mrb[46].mxu0  ;;  %v5634_v59 = vpop.f32.mrb[54].mxu1 }
0x12ce   :  { %v9198_v55 = vadd.f32 %v5563_v15, %v11874_v25  ;;  %v5565_v58 = vpop.f32.mrb[47].mxu0  ;;  %v5636_v51 = vpop.f32.mrb[55].mxu1  ;;  %v9214_v32 = vadd.f32 %v5634_v59, %v11887_v48 }
0x12cf   :  { %v9199_v4 = vadd.f32 %v5565_v58, %v11878_v28  ;;  %v9215_v40 = vadd.f32 %v5636_v51, %v11883_v63 }
0x12d0   :  { %v6205_v27 = vmul.f32 -1.442695, %v9198_v55 }
0x12d1   :  { %v6206_v20 = vmul.f32 -1.442695, %v9199_v4  ;;  %v6207_v26 = vmul.f32 -1.442695, %v9215_v40 }
0x12d2   :  { %9682 = vpow2.f32 %v6205_v27 }
0x12d3   :  { %9684 = vpow2.f32 %v6206_v20 }
0x12d4   :  { %9686 = vpow2.f32 %v6207_v26 }
0x12d5   :  { %9688 = vtanh.f32 %v9214_v32 }
0x12dc   :  { %v9683_v16 = vpop.eup %9682 }
0x12dd   :  { %v9685_v17 = vpop.eup %9684  ;;  %v5651_v42 = vadd.f32 1.0, %v9683_v16 }
0x12de   :  { %v5657_v10 = vadd.f32 1.0, %v9685_v17  ;;  %v9687_v25 = vpop.eup %9686 }
0x12df   :  { %9690 = vrcp.f32 %v5651_v42  ;;  %v9689_v19 = vpop.eup %9688  ;;  %v5664_v60 = vadd.f32 1.0, %v9687_v25 }
0x12e0   :  { %9692 = vrcp.f32 %v5657_v10 }
0x12e1   :  { %9694 = vrcp.f32 %v5664_v60 }
0x12e9   :  { %v9691_v28 = vpop.eup %9690 }
0x12ea   :  { %v9693_v23 = vpop.eup %9692  ;;  %v5668_v39 = vmul.f32 %v9691_v28, %v9689_v19 }
0x12eb   :  { %v5667_v50 = vmul.f32 %v9693_v23, %v12140_v24  ;;  %v9695_v48 = vpop.eup %9694 }
0x12ed   :  { %v5669_v63 = vadd.f32 %v5668_v39, %v5667_v50 }
0x12ef   :  { %9696 = vtanh.f32 %v5669_v63 }
0x12f9   :  { %v9697_v41 = vpop.eup %9696 }
0x12fa   :  { %v5671_v13 = vmul.f32 %v9697_v41, %v9695_v48 }
0x130d   :  { %v5885_v0 = vpop.f32.mrb[48].mxu0  ;;  %v5955_v46 = vpop.f32.mrb[56].mxu1 }
0x130e   :  { %v5886_v45 = vadd.f32 %v5885_v0, %v5807_v14  ;;  %v5887_v43 = vpop.f32.mrb[49].mxu0  ;;  %v5957_v30 = vpop.f32.mrb[57].mxu1  ;;  %v5956_v8 = vadd.f32 %v5955_v46, %v5811_v38 }
0x130f   :  { %v5958_v3 = vadd.f32 %v5957_v30, %v5815_v1 }
0x1310   :  { %v6208_v24 = vmul.f32 -1.442695, %v5886_v45 }
0x1311   :  { %v6209_v9 = vmul.f32 -1.442695, %v5958_v3 }
0x1312   :  { %9698 = vpow2.f32 %v6208_v24 }
0x1313   :  { %9700 = vpow2.f32 %v6209_v9 }
0x1314   :  { %9702 = vtanh.f32 %v5956_v8 }
0x131c   :  { %v9699_v18 = vpop.eup %9698 }
0x131d   :  { %v5963_v62 = vadd.f32 1.0, %v9699_v18  ;;  %v9701_v7 = vpop.eup %9700 }
0x131e   :  { %v5970_v29 = vadd.f32 1.0, %v9701_v7  ;;  %v9703_v12 = vpop.eup %9702 }
0x131f   :  { %9704 = vrcp.f32 %v5963_v62 }
0x1320   :  { %9706 = vrcp.f32 %v5970_v29 }
0x1329   :  { %v9705_v37 = vpop.eup %9704 }
0x132a   :  { %v5973_v53 = vmul.f32 %v9705_v37, %v9703_v12  ;;  %v9707_v2 = vpop.eup %9706 }
0x132c   :  { %9708 = vtanh.f32 %v5973_v53 }
0x1336   :  { %v9709_v34 = vpop.eup %9708 }
0x1337   :  { %v5975_v54 = vmul.f32 %v9709_v34, %v9707_v2 }
0x1339   :  { %6079 = vmatprep.mubr.f32.mxu0 %v5975_v54 }
0x133a   :  { %6080 = vmatmul.mubr.f32.vlgmr.msra.gmra.mrb[50].mxu0 %v5671_v13 }
0x140d   :  { %v6243_v5 = vpop.f32.mrb[50].mxu0 }
0x140e   :  { %v6244_v11 = vpop.f32.mrb[51].mxu0 }
0x140f   :  { %v6245_v36 = vadd.f32 %v6244_v11, %v6243_v5 }
0x1411   :  { %v6082_v33 = vadd.f32 %v6245_v36, %v6210_v56 }
0x1413   :  { %6086 = vst.msk [vmem:[#allocation15] sm:$0xff] %vm6085_vm1, %v6082_v33 }
0x1414   :  { %9809 = shalt.err (!%p9806_p8)
}
0x1415   :  { %s9810_s29 = scalar_lea.hbm %s12280_s11, 128 }
0x1416   :  { %p9811_p9 = scmp.ne.s32.totalorder %s12280_s11, %s9810_s29  ;;  %p9814_p10 = scmp.lt.u32.totalorder %s9810_s29, %s12280_s11 }
0x1418   :  { %p9816_p11 = pnand %p9814_p10, %p9811_p9 }
0x141a   :  { %9819 = shalt.err (!%p9816_p11)
}
0x141b   :  { %6096 = dma.vmem_to_hbm [thread:$0]  %s6094_s18, 128, %s12280_s11, [#allocation9]  }
0x141c   :  { %9826 = dma.done.wait [#allocation9], 128  }
0x141d   :  { %9827 = vsyncadd [#allocation9], 4294967168 }
0x141e   :  { %6100 = vsyncpa [#allocation8], 1 }
0x141f   :  { %6101 = vsyncpa [#allocation11], 1 }
0x1420   :  { %6102 = vsyncpa [#allocation14], 1 }
0x1421   :  { %6103 = vsyncpa [#allocation9], 1 }

</bundles_post_ra>
